<compile_context>
chip_gen: v7x
topology: tpu7x:2x2x1
jax: 0.10.0
libtpu: 0.0.40
codegen_flags: <defaults>
</compile_context>

<pallas_src>
import functools

import jax
import jax.numpy as jnp
from jax.experimental import pallas as pl
from jax.experimental.pallas import tpu as pltpu

BASE_NUM = 100      # real number of knots per input dim (from the PyTorch spec)
K_PAD = 128         # per-dim lane-aligned padded basis size (padded coeff rows are zero)
NEURON = 8          # hidden width (and padded output width of the last layer)
NUM_LAYERS = 4
BN_EPS = 1e-5

# (din, dout_real, x_min, x_max, has_bn) per layer — kan1..kan4 of the PyTorch module.
LAYER_CFG = (
    (2,      NEURON, 0.0, 2.0, True),    # kan1: x_range = [0, 2] per input dim
    (NEURON, NEURON, -1.0, 1.0, True),   # kan2
    (NEURON, NEURON, -1.0, 1.0, True),   # kan3
    (NEURON, 1,      -1.0, 1.0, False),  # kan4: batch_norm=False, Dout padded 1 -> 8
)
KN_STRIDE = NEURON            # knot rows reserved per layer in the packed knot tables
W_STRIDE = NEURON * K_PAD     # coeff rows reserved per layer in the packed W table


def kan_forward_kernel(x_ref, kn_ref, ih_ref, w_ref, bn_ref, o_ref, phi_ref,
                       *, exp_bf16):
    """One batch tile of the full 4-layer KAN forward.

    x_ref   : (Bt, 2)     f32  input tile
    kn_ref  : (32, 128)   f32  knot positions; layer l occupies rows [l*8, l*8 + din)
    ih_ref  : (32, 128)   f32  1/bandwidth, same layout
    w_ref   : (4096, 8)   bf16 coefficients; layer l at rows [l*1024, l*1024 + din*128)
    bn_ref  : (8, 8)      f32  rows (2l, 2l+1) = eval-BN (scale, shift) of layer l
    o_ref   : (Bt, 8)     f32  output tile (column 0 is the real scalar output)
    phi_ref : (Bt, 1024)  bf16 VMEM scratch holding one layer's RBF basis
    """
    h = x_ref[...]                                         # (Bt, Din_l) f32 activations
    for l, (din, _, _, _, has_bn) in enumerate(LAYER_CFG):
        koff = l * KN_STRIDE
        # Per-input-dim Gaussian RBF basis: one VPU lane-broadcast + sub/mul and one
        # EUP exp per dim, stored at an aligned 128-lane offset of the bf16 scratch.
        for i in range(din):
            kn_i = kn_ref[koff + i:koff + i + 1, :]        # (1, 128)
            ih_i = ih_ref[koff + i:koff + i + 1, :]        # (1, 128)
            d = (h[:, i:i + 1] - kn_i) * ih_i              # (Bt, 128) f32
            arg = -(d * d)
            if exp_bf16:
                phi = jnp.exp(arg.astype(jnp.bfloat16))    # bf16 EUP path (v6e/v7x)
            else:
                phi = jnp.exp(arg).astype(jnp.bfloat16)    # f32 EUP path (v5e & older)
            phi_ref[:, i * K_PAD:(i + 1) * K_PAD] = phi
        # Single lane-aligned MXU contraction over din*128 basis values, f32 acc.
        w_l = w_ref[l * W_STRIDE:l * W_STRIDE + din * K_PAD, :]       # (din*128, 8) bf16
        y = jnp.dot(phi_ref[:, :din * K_PAD], w_l,
                    preferred_element_type=jnp.float32)               # (Bt, 8) f32
        if has_bn:
            # Eval-mode BatchNorm1d folded into a per-feature scale/shift.
            y = y * bn_ref[2 * l:2 * l + 1, :] + bn_ref[2 * l + 1:2 * l + 2, :]
        h = y
    o_ref[...] = h


def _bf16_eup_supported():
    """bf16 exp on the EUP: v6e / v7x only (v5e and older lack a bf16 EUP path)."""
    try:
        kind = jax.devices()[0].device_kind.lower()
    except Exception:
        return False
    if any(v in kind for v in ("v2", "v3", "v4", "v5")):
        return False
    return any(v in kind for v in ("v6", "v7", "7x"))


def kan_forward(x, knots, inv_h, w, bn, *, block_b=128, exp_bf16=None):
    B, din0 = x.shape
    assert din0 == LAYER_CFG[0][0]
    assert B % block_b == 0, "batch must be a multiple of the batch tile"
    if exp_bf16 is None:
        exp_bf16 = _bf16_eup_supported()
    kernel = functools.partial(kan_forward_kernel, exp_bf16=exp_bf16)
    const = lambda b: (0, 0)   # same parameter block every grid step -> stays VMEM-resident
    y = pl.pallas_call(
        kernel,
        out_shape=jax.ShapeDtypeStruct((B, NEURON), jnp.float32),
        grid=(B // block_b,),
        in_specs=[
            pl.BlockSpec((block_b, din0), lambda b: (b, 0)),   # x tile
            pl.BlockSpec(knots.shape, const),                  # packed knots
            pl.BlockSpec(inv_h.shape, const),                  # packed 1/bandwidth
            pl.BlockSpec(w.shape, const),                      # packed bf16 coefficients
            pl.BlockSpec(bn.shape, const),                     # packed BN scale/shift
        ],
        out_specs=pl.BlockSpec((block_b, NEURON), lambda b: (b, 0)),
        scratch_shapes=[pltpu.VMEM((block_b, NEURON * K_PAD), jnp.bfloat16)],
        compiler_params=pltpu.CompilerParams(
            dimension_semantics=("parallel",)),
    )(x, knots, inv_h, w, bn)
    # Real output is column 0 (layer-4 Dout is zero-padded 1 -> 8 for a lane-denser store).
    return y[:, :1]


def make_params(key, base_num=BASE_NUM, k_pad=K_PAD):
    """Deterministic synthetic KANLayer parameters packed into 4 arrays."""
    keys = jax.random.split(key, 3 * NUM_LAYERS)
    knots_all = jnp.zeros((NUM_LAYERS * KN_STRIDE, k_pad), jnp.float32)
    invh_all = jnp.ones((NUM_LAYERS * KN_STRIDE, k_pad), jnp.float32)
    w_all = jnp.zeros((NUM_LAYERS * W_STRIDE, NEURON), jnp.float32)
    bn_all = jnp.zeros((2 * NUM_LAYERS, NEURON), jnp.float32)   # rows 6,7 unused (no BN on kan4)

    k_idx = jnp.arange(k_pad, dtype=jnp.float32)
    for l, (din, dout, x_min, x_max, has_bn) in enumerate(LAYER_CFG):
        spacing = (x_max - x_min) / (base_num - 1)      # knot spacing = RBF bandwidth
        # First base_num knots = linspace(x_min, x_max, base_num); padded knots continue
        # the same grid beyond x_max (their coefficient rows below are exactly zero).
        knots = jnp.broadcast_to(x_min + spacing * k_idx, (din, k_pad))
        knots_all = knots_all.at[l * KN_STRIDE:l * KN_STRIDE + din].set(knots)
        invh_all = invh_all.at[l * KN_STRIDE:l * KN_STRIDE + din].set(1.0 / spacing)

        # Coefficients: real (din, 100, dout) rows random; knot dim padded 100 -> 128 and
        # Dout padded dout -> 8 with exact zeros.
        w = (jax.random.normal(keys[3 * l], (din, base_num, dout), jnp.float32)
             / jnp.sqrt(jnp.float32(base_num)))
        w_pad = jnp.zeros((din, k_pad, NEURON), jnp.float32)
        w_pad = w_pad.at[:, :base_num, :dout].set(w)
        w_all = w_all.at[l * W_STRIDE:l * W_STRIDE + din * k_pad].set(
            w_pad.reshape(din * k_pad, NEURON))

        if has_bn:
            # Eval-mode BatchNorm1d (gamma=1, beta=0) with synthetic running stats,
            # folded into per-feature scale/shift: y_norm = y * scale + shift.
            mean = 0.1 * jax.random.normal(keys[3 * l + 1], (NEURON,), jnp.float32)
            var = jax.random.uniform(keys[3 * l + 2], (NEURON,), jnp.float32,
                                     minval=0.5, maxval=1.5)
            scale = 1.0 / jnp.sqrt(var + BN_EPS)
            shift = -mean * scale
            bn_all = bn_all.at[2 * l].set(scale)
            bn_all = bn_all.at[2 * l + 1].set(shift)

    return knots_all, invh_all, w_all.astype(jnp.bfloat16), bn_all


if __name__ == "__main__":
    key = jax.random.PRNGKey(0)
    kx, kp = jax.random.split(key)

    B = 256                      # 2 batch tiles of 128 -> exercises the parallel batch grid
    # kan1 has x_range [0, 2] per input dim (2 inputs); synthesize x in that range.
    x = jax.random.uniform(kx, (B, 2), jnp.float32, minval=0.0, maxval=2.0)
    knots, inv_h, w, bn = make_params(kp)

    y = kan_forward(x, knots, inv_h, w, bn, block_b=128)
    jax.block_until_ready(y)
    assert y.shape == (B, 1) and y.dtype == jnp.float32
    assert bool(jnp.all(jnp.isfinite(y)))
    print("KERNEL_OK")
</pallas_src>

<mosaic_0001>
module attributes {stable_mosaic.version = 11 : i64} {
  func.func @kan_forward_kernel(%arg0: i32, %arg1: memref<128x2xf32, #tpu.memory_space<vmem>>, %arg2: memref<32x128xf32, #tpu.memory_space<vmem>>, %arg3: memref<32x128xf32, #tpu.memory_space<vmem>>, %arg4: memref<4096x8xbf16, #tpu.memory_space<vmem>>, %arg5: memref<8x8xf32, #tpu.memory_space<vmem>>, %arg6: memref<128x8xf32, #tpu.memory_space<vmem>>, %arg7: memref<128x1024xbf16, #tpu.memory_space<vmem>>) attributes {dimension_semantics = [#tpu.dimension_semantics<parallel>], iteration_bounds = array<i64: 2>, scalar_prefetch = 0 : i64, scratch_operands = 1 : i64, tpu.core_type = #tpu.core_type<tc>, window_params = [{transform_indices = @transform_0, window_bounds = array<i64: 128, 2>}, {pipeline_mode = #tpu.pipeline_mode<synchronous>, transform_indices = @transform_1, window_bounds = array<i64: 32, 128>}, {pipeline_mode = #tpu.pipeline_mode<synchronous>, transform_indices = @transform_2, window_bounds = array<i64: 32, 128>}, {pipeline_mode = #tpu.pipeline_mode<synchronous>, transform_indices = @transform_3, window_bounds = array<i64: 4096, 8>}, {pipeline_mode = #tpu.pipeline_mode<synchronous>, transform_indices = @transform_4, window_bounds = array<i64: 8, 8>}, {transform_indices = @transform_5, window_bounds = array<i64: 128, 8>}]} {
    %c0 = arith.constant 0 : index
    %c0_0 = arith.constant 0 : index
    %0 = vector.load %arg1[%c0, %c0_0] : memref<128x2xf32, #tpu.memory_space<vmem>>, vector<128x2xf32>
    %c0_1 = arith.constant 0 : index
    %c0_2 = arith.constant 0 : index
    %1 = vector.load %arg2[%c0_1, %c0_2] : memref<32x128xf32, #tpu.memory_space<vmem>>, vector<1x128xf32>
    %c0_3 = arith.constant 0 : index
    %c0_4 = arith.constant 0 : index
    %2 = vector.load %arg3[%c0_3, %c0_4] : memref<32x128xf32, #tpu.memory_space<vmem>>, vector<1x128xf32>
    %3 = vector.extract_strided_slice %0 {offsets = [0, 0], sizes = [128, 1], strides = [1, 1]} : vector<128x2xf32> to vector<128x1xf32>
    %4 = vector.broadcast %3 : vector<128x1xf32> to vector<128x128xf32>
    %5 = vector.broadcast %1 : vector<1x128xf32> to vector<128x128xf32>
    %6 = arith.subf %4, %5 : vector<128x128xf32>
    %7 = vector.broadcast %2 : vector<1x128xf32> to vector<128x128xf32>
    %8 = arith.mulf %6, %7 : vector<128x128xf32>
    %9 = arith.mulf %8, %8 : vector<128x128xf32>
    %cst = arith.constant 0.000000e+00 : f32
    %10 = vector.broadcast %cst : f32 to vector<128x128xf32>
    %11 = arith.subf %10, %9 : vector<128x128xf32>
    %12 = math.exp %11 : vector<128x128xf32>
    %13 = arith.truncf %12 : vector<128x128xf32> to vector<128x128xbf16>
    %c0_5 = arith.constant 0 : index
    %c0_6 = arith.constant 0 : index
    %14 = vector.load %arg7[%c0_5, %c0_6] : memref<128x1024xbf16, #tpu.memory_space<vmem>>, vector<128x128xbf16>
    tpu.vector_store %arg7[%c0_5, %c0_6], %13 {strides = array<i32>} : memref<128x1024xbf16, #tpu.memory_space<vmem>>, vector<128x128xbf16>,
    %c1 = arith.constant 1 : index
    %c0_7 = arith.constant 0 : index
    %15 = vector.load %arg2[%c1, %c0_7] : memref<32x128xf32, #tpu.memory_space<vmem>>, vector<1x128xf32>
    %c1_8 = arith.constant 1 : index
    %c0_9 = arith.constant 0 : index
    %16 = vector.load %arg3[%c1_8, %c0_9] : memref<32x128xf32, #tpu.memory_space<vmem>>, vector<1x128xf32>
    %17 = vector.extract_strided_slice %0 {offsets = [0, 1], sizes = [128, 1], strides = [1, 1]} : vector<128x2xf32> to vector<128x1xf32>
    %18 = vector.broadcast %17 : vector<128x1xf32> to vector<128x128xf32>
    %19 = vector.broadcast %15 : vector<1x128xf32> to vector<128x128xf32>
    %20 = arith.subf %18, %19 : vector<128x128xf32>
    %21 = vector.broadcast %16 : vector<1x128xf32> to vector<128x128xf32>
    %22 = arith.mulf %20, %21 : vector<128x128xf32>
    %23 = arith.mulf %22, %22 : vector<128x128xf32>
    %cst_10 = arith.constant 0.000000e+00 : f32
    %24 = vector.broadcast %cst_10 : f32 to vector<128x128xf32>
    %25 = arith.subf %24, %23 : vector<128x128xf32>
    %26 = math.exp %25 : vector<128x128xf32>
    %27 = arith.truncf %26 : vector<128x128xf32> to vector<128x128xbf16>
    %c0_11 = arith.constant 0 : index
    %c128 = arith.constant 128 : index
    %28 = vector.load %arg7[%c0_11, %c128] : memref<128x1024xbf16, #tpu.memory_space<vmem>>, vector<128x128xbf16>
    tpu.vector_store %arg7[%c0_11, %c128], %27 {strides = array<i32>} : memref<128x1024xbf16, #tpu.memory_space<vmem>>, vector<128x128xbf16>,
    %c0_12 = arith.constant 0 : index
    %c0_13 = arith.constant 0 : index
    %29 = vector.load %arg4[%c0_12, %c0_13] : memref<4096x8xbf16, #tpu.memory_space<vmem>>, vector<256x8xbf16>
    %c0_14 = arith.constant 0 : index
    %c0_15 = arith.constant 0 : index
    %30 = vector.load %arg7[%c0_14, %c0_15] : memref<128x1024xbf16, #tpu.memory_space<vmem>>, vector<128x256xbf16>
    %cst_16 = arith.constant dense<0.000000e+00> : vector<128x8xf32>
    %31 = tpu.matmul %30, %29, %cst_16 {dimension_numbers = #tpu.dot_dimension_numbers<[1], [0], [0], [1], [0, 0, 1, 1], [], []>} : vector<128x256xbf16>, vector<256x8xbf16>, vector<128x8xf32> -> vector<128x8xf32>
    %c0_17 = arith.constant 0 : index
    %c0_18 = arith.constant 0 : index
    %32 = vector.load %arg5[%c0_17, %c0_18] : memref<8x8xf32, #tpu.memory_space<vmem>>, vector<1x8xf32>
    %33 = vector.broadcast %32 : vector<1x8xf32> to vector<128x8xf32>
    %34 = arith.mulf %31, %33 : vector<128x8xf32>
    %c1_19 = arith.constant 1 : index
    %c0_20 = arith.constant 0 : index
    %35 = vector.load %arg5[%c1_19, %c0_20] : memref<8x8xf32, #tpu.memory_space<vmem>>, vector<1x8xf32>
    %36 = vector.broadcast %35 : vector<1x8xf32> to vector<128x8xf32>
    %37 = arith.addf %34, %36 : vector<128x8xf32>
    %c8 = arith.constant 8 : index
    %c0_21 = arith.constant 0 : index
    %38 = vector.load %arg2[%c8, %c0_21] : memref<32x128xf32, #tpu.memory_space<vmem>>, vector<1x128xf32>
    %c8_22 = arith.constant 8 : index
    %c0_23 = arith.constant 0 : index
    %39 = vector.load %arg3[%c8_22, %c0_23] : memref<32x128xf32, #tpu.memory_space<vmem>>, vector<1x128xf32>
    %40 = vector.extract_strided_slice %37 {offsets = [0, 0], sizes = [128, 1], strides = [1, 1]} : vector<128x8xf32> to vector<128x1xf32>
    %41 = vector.broadcast %40 : vector<128x1xf32> to vector<128x128xf32>
    %42 = vector.broadcast %38 : vector<1x128xf32> to vector<128x128xf32>
    %43 = arith.subf %41, %42 : vector<128x128xf32>
    %44 = vector.broadcast %39 : vector<1x128xf32> to vector<128x128xf32>
    %45 = arith.mulf %43, %44 : vector<128x128xf32>
    %46 = arith.mulf %45, %45 : vector<128x128xf32>
    %cst_24 = arith.constant 0.000000e+00 : f32
    %47 = vector.broadcast %cst_24 : f32 to vector<128x128xf32>
    %48 = arith.subf %47, %46 : vector<128x128xf32>
    %49 = math.exp %48 : vector<128x128xf32>
    %50 = arith.truncf %49 : vector<128x128xf32> to vector<128x128xbf16>
    %c0_25 = arith.constant 0 : index
    %c0_26 = arith.constant 0 : index
    %51 = vector.load %arg7[%c0_25, %c0_26] : memref<128x1024xbf16, #tpu.memory_space<vmem>>, vector<128x128xbf16>
    tpu.vector_store %arg7[%c0_25, %c0_26], %50 {strides = array<i32>} : memref<128x1024xbf16, #tpu.memory_space<vmem>>, vector<128x128xbf16>,
    %c9 = arith.constant 9 : index
    %c0_27 = arith.constant 0 : index
    %52 = vector.load %arg2[%c9, %c0_27] : memref<32x128xf32, #tpu.memory_space<vmem>>, vector<1x128xf32>
    %c9_28 = arith.constant 9 : index
    %c0_29 = arith.constant 0 : index
    %53 = vector.load %arg3[%c9_28, %c0_29] : memref<32x128xf32, #tpu.memory_space<vmem>>, vector<1x128xf32>
    %54 = vector.extract_strided_slice %37 {offsets = [0, 1], sizes = [128, 1], strides = [1, 1]} : vector<128x8xf32> to vector<128x1xf32>
    %55 = vector.broadcast %54 : vector<128x1xf32> to vector<128x128xf32>
    %56 = vector.broadcast %52 : vector<1x128xf32> to vector<128x128xf32>
    %57 = arith.subf %55, %56 : vector<128x128xf32>
    %58 = vector.broadcast %53 : vector<1x128xf32> to vector<128x128xf32>
    %59 = arith.mulf %57, %58 : vector<128x128xf32>
    %60 = arith.mulf %59, %59 : vector<128x128xf32>
    %cst_30 = arith.constant 0.000000e+00 : f32
    %61 = vector.broadcast %cst_30 : f32 to vector<128x128xf32>
    %62 = arith.subf %61, %60 : vector<128x128xf32>
    %63 = math.exp %62 : vector<128x128xf32>
    %64 = arith.truncf %63 : vector<128x128xf32> to vector<128x128xbf16>
    %c0_31 = arith.constant 0 : index
    %c128_32 = arith.constant 128 : index
    %65 = vector.load %arg7[%c0_31, %c128_32] : memref<128x1024xbf16, #tpu.memory_space<vmem>>, vector<128x128xbf16>
    tpu.vector_store %arg7[%c0_31, %c128_32], %64 {strides = array<i32>} : memref<128x1024xbf16, #tpu.memory_space<vmem>>, vector<128x128xbf16>,
    %c10 = arith.constant 10 : index
    %c0_33 = arith.constant 0 : index
    %66 = vector.load %arg2[%c10, %c0_33] : memref<32x128xf32, #tpu.memory_space<vmem>>, vector<1x128xf32>
    %c10_34 = arith.constant 10 : index
    %c0_35 = arith.constant 0 : index
    %67 = vector.load %arg3[%c10_34, %c0_35] : memref<32x128xf32, #tpu.memory_space<vmem>>, vector<1x128xf32>
    %68 = vector.extract_strided_slice %37 {offsets = [0, 2], sizes = [128, 1], strides = [1, 1]} : vector<128x8xf32> to vector<128x1xf32>
    %69 = vector.broadcast %68 : vector<128x1xf32> to vector<128x128xf32>
    %70 = vector.broadcast %66 : vector<1x128xf32> to vector<128x128xf32>
    %71 = arith.subf %69, %70 : vector<128x128xf32>
    %72 = vector.broadcast %67 : vector<1x128xf32> to vector<128x128xf32>
    %73 = arith.mulf %71, %72 : vector<128x128xf32>
    %74 = arith.mulf %73, %73 : vector<128x128xf32>
    %cst_36 = arith.constant 0.000000e+00 : f32
    %75 = vector.broadcast %cst_36 : f32 to vector<128x128xf32>
    %76 = arith.subf %75, %74 : vector<128x128xf32>
    %77 = math.exp %76 : vector<128x128xf32>
    %78 = arith.truncf %77 : vector<128x128xf32> to vector<128x128xbf16>
    %c0_37 = arith.constant 0 : index
    %c256 = arith.constant 256 : index
    %79 = vector.load %arg7[%c0_37, %c256] : memref<128x1024xbf16, #tpu.memory_space<vmem>>, vector<128x128xbf16>
    tpu.vector_store %arg7[%c0_37, %c256], %78 {strides = array<i32>} : memref<128x1024xbf16, #tpu.memory_space<vmem>>, vector<128x128xbf16>,
    %c11 = arith.constant 11 : index
    %c0_38 = arith.constant 0 : index
    %80 = vector.load %arg2[%c11, %c0_38] : memref<32x128xf32, #tpu.memory_space<vmem>>, vector<1x128xf32>
    %c11_39 = arith.constant 11 : index
    %c0_40 = arith.constant 0 : index
    %81 = vector.load %arg3[%c11_39, %c0_40] : memref<32x128xf32, #tpu.memory_space<vmem>>, vector<1x128xf32>
    %82 = vector.extract_strided_slice %37 {offsets = [0, 3], sizes = [128, 1], strides = [1, 1]} : vector<128x8xf32> to vector<128x1xf32>
    %83 = vector.broadcast %82 : vector<128x1xf32> to vector<128x128xf32>
    %84 = vector.broadcast %80 : vector<1x128xf32> to vector<128x128xf32>
    %85 = arith.subf %83, %84 : vector<128x128xf32>
    %86 = vector.broadcast %81 : vector<1x128xf32> to vector<128x128xf32>
    %87 = arith.mulf %85, %86 : vector<128x128xf32>
    %88 = arith.mulf %87, %87 : vector<128x128xf32>
    %cst_41 = arith.constant 0.000000e+00 : f32
    %89 = vector.broadcast %cst_41 : f32 to vector<128x128xf32>
    %90 = arith.subf %89, %88 : vector<128x128xf32>
    %91 = math.exp %90 : vector<128x128xf32>
    %92 = arith.truncf %91 : vector<128x128xf32> to vector<128x128xbf16>
    %c0_42 = arith.constant 0 : index
    %c384 = arith.constant 384 : index
    %93 = vector.load %arg7[%c0_42, %c384] : memref<128x1024xbf16, #tpu.memory_space<vmem>>, vector<128x128xbf16>
    tpu.vector_store %arg7[%c0_42, %c384], %92 {strides = array<i32>} : memref<128x1024xbf16, #tpu.memory_space<vmem>>, vector<128x128xbf16>,
    %c12 = arith.constant 12 : index
    %c0_43 = arith.constant 0 : index
    %94 = vector.load %arg2[%c12, %c0_43] : memref<32x128xf32, #tpu.memory_space<vmem>>, vector<1x128xf32>
    %c12_44 = arith.constant 12 : index
    %c0_45 = arith.constant 0 : index
    %95 = vector.load %arg3[%c12_44, %c0_45] : memref<32x128xf32, #tpu.memory_space<vmem>>, vector<1x128xf32>
    %96 = vector.extract_strided_slice %37 {offsets = [0, 4], sizes = [128, 1], strides = [1, 1]} : vector<128x8xf32> to vector<128x1xf32>
    %97 = vector.broadcast %96 : vector<128x1xf32> to vector<128x128xf32>
    %98 = vector.broadcast %94 : vector<1x128xf32> to vector<128x128xf32>
    %99 = arith.subf %97, %98 : vector<128x128xf32>
    %100 = vector.broadcast %95 : vector<1x128xf32> to vector<128x128xf32>
    %101 = arith.mulf %99, %100 : vector<128x128xf32>
    %102 = arith.mulf %101, %101 : vector<128x128xf32>
    %cst_46 = arith.constant 0.000000e+00 : f32
    %103 = vector.broadcast %cst_46 : f32 to vector<128x128xf32>
    %104 = arith.subf %103, %102 : vector<128x128xf32>
    %105 = math.exp %104 : vector<128x128xf32>
    %106 = arith.truncf %105 : vector<128x128xf32> to vector<128x128xbf16>
    %c0_47 = arith.constant 0 : index
    %c512 = arith.constant 512 : index
    %107 = vector.load %arg7[%c0_47, %c512] : memref<128x1024xbf16, #tpu.memory_space<vmem>>, vector<128x128xbf16>
    tpu.vector_store %arg7[%c0_47, %c512], %106 {strides = array<i32>} : memref<128x1024xbf16, #tpu.memory_space<vmem>>, vector<128x128xbf16>,
    %c13 = arith.constant 13 : index
    %c0_48 = arith.constant 0 : index
    %108 = vector.load %arg2[%c13, %c0_48] : memref<32x128xf32, #tpu.memory_space<vmem>>, vector<1x128xf32>
    %c13_49 = arith.constant 13 : index
    %c0_50 = arith.constant 0 : index
    %109 = vector.load %arg3[%c13_49, %c0_50] : memref<32x128xf32, #tpu.memory_space<vmem>>, vector<1x128xf32>
    %110 = vector.extract_strided_slice %37 {offsets = [0, 5], sizes = [128, 1], strides = [1, 1]} : vector<128x8xf32> to vector<128x1xf32>
    %111 = vector.broadcast %110 : vector<128x1xf32> to vector<128x128xf32>
    %112 = vector.broadcast %108 : vector<1x128xf32> to vector<128x128xf32>
    %113 = arith.subf %111, %112 : vector<128x128xf32>
    %114 = vector.broadcast %109 : vector<1x128xf32> to vector<128x128xf32>
    %115 = arith.mulf %113, %114 : vector<128x128xf32>
    %116 = arith.mulf %115, %115 : vector<128x128xf32>
    %cst_51 = arith.constant 0.000000e+00 : f32
    %117 = vector.broadcast %cst_51 : f32 to vector<128x128xf32>
    %118 = arith.subf %117, %116 : vector<128x128xf32>
    %119 = math.exp %118 : vector<128x128xf32>
    %120 = arith.truncf %119 : vector<128x128xf32> to vector<128x128xbf16>
    %c0_52 = arith.constant 0 : index
    %c640 = arith.constant 640 : index
    %121 = vector.load %arg7[%c0_52, %c640] : memref<128x1024xbf16, #tpu.memory_space<vmem>>, vector<128x128xbf16>
    tpu.vector_store %arg7[%c0_52, %c640], %120 {strides = array<i32>} : memref<128x1024xbf16, #tpu.memory_space<vmem>>, vector<128x128xbf16>,
    %c14 = arith.constant 14 : index
    %c0_53 = arith.constant 0 : index
    %122 = vector.load %arg2[%c14, %c0_53] : memref<32x128xf32, #tpu.memory_space<vmem>>, vector<1x128xf32>
    %c14_54 = arith.constant 14 : index
    %c0_55 = arith.constant 0 : index
    %123 = vector.load %arg3[%c14_54, %c0_55] : memref<32x128xf32, #tpu.memory_space<vmem>>, vector<1x128xf32>
    %124 = vector.extract_strided_slice %37 {offsets = [0, 6], sizes = [128, 1], strides = [1, 1]} : vector<128x8xf32> to vector<128x1xf32>
    %125 = vector.broadcast %124 : vector<128x1xf32> to vector<128x128xf32>
    %126 = vector.broadcast %122 : vector<1x128xf32> to vector<128x128xf32>
    %127 = arith.subf %125, %126 : vector<128x128xf32>
    %128 = vector.broadcast %123 : vector<1x128xf32> to vector<128x128xf32>
    %129 = arith.mulf %127, %128 : vector<128x128xf32>
    %130 = arith.mulf %129, %129 : vector<128x128xf32>
    %cst_56 = arith.constant 0.000000e+00 : f32
    %131 = vector.broadcast %cst_56 : f32 to vector<128x128xf32>
    %132 = arith.subf %131, %130 : vector<128x128xf32>
    %133 = math.exp %132 : vector<128x128xf32>
    %134 = arith.truncf %133 : vector<128x128xf32> to vector<128x128xbf16>
    %c0_57 = arith.constant 0 : index
    %c768 = arith.constant 768 : index
    %135 = vector.load %arg7[%c0_57, %c768] : memref<128x1024xbf16, #tpu.memory_space<vmem>>, vector<128x128xbf16>
    tpu.vector_store %arg7[%c0_57, %c768], %134 {strides = array<i32>} : memref<128x1024xbf16, #tpu.memory_space<vmem>>, vector<128x128xbf16>,
    %c15 = arith.constant 15 : index
    %c0_58 = arith.constant 0 : index
    %136 = vector.load %arg2[%c15, %c0_58] : memref<32x128xf32, #tpu.memory_space<vmem>>, vector<1x128xf32>
    %c15_59 = arith.constant 15 : index
    %c0_60 = arith.constant 0 : index
    %137 = vector.load %arg3[%c15_59, %c0_60] : memref<32x128xf32, #tpu.memory_space<vmem>>, vector<1x128xf32>
    %138 = vector.extract_strided_slice %37 {offsets = [0, 7], sizes = [128, 1], strides = [1, 1]} : vector<128x8xf32> to vector<128x1xf32>
    %139 = vector.broadcast %138 : vector<128x1xf32> to vector<128x128xf32>
    %140 = vector.broadcast %136 : vector<1x128xf32> to vector<128x128xf32>
    %141 = arith.subf %139, %140 : vector<128x128xf32>
    %142 = vector.broadcast %137 : vector<1x128xf32> to vector<128x128xf32>
    %143 = arith.mulf %141, %142 : vector<128x128xf32>
    %144 = arith.mulf %143, %143 : vector<128x128xf32>
    %cst_61 = arith.constant 0.000000e+00 : f32
    %145 = vector.broadcast %cst_61 : f32 to vector<128x128xf32>
    %146 = arith.subf %145, %144 : vector<128x128xf32>
    %147 = math.exp %146 : vector<128x128xf32>
    %148 = arith.truncf %147 : vector<128x128xf32> to vector<128x128xbf16>
    %c0_62 = arith.constant 0 : index
    %c896 = arith.constant 896 : index
    %149 = vector.load %arg7[%c0_62, %c896] : memref<128x1024xbf16, #tpu.memory_space<vmem>>, vector<128x128xbf16>
    tpu.vector_store %arg7[%c0_62, %c896], %148 {strides = array<i32>} : memref<128x1024xbf16, #tpu.memory_space<vmem>>, vector<128x128xbf16>,
    %c1024 = arith.constant 1024 : index
    %c0_63 = arith.constant 0 : index
    %150 = vector.load %arg4[%c1024, %c0_63] : memref<4096x8xbf16, #tpu.memory_space<vmem>>, vector<1024x8xbf16>
    %c0_64 = arith.constant 0 : index
    %c0_65 = arith.constant 0 : index
    %151 = vector.load %arg7[%c0_64, %c0_65] : memref<128x1024xbf16, #tpu.memory_space<vmem>>, vector<128x1024xbf16>
    %cst_66 = arith.constant dense<0.000000e+00> : vector<128x8xf32>
    %152 = tpu.matmul %151, %150, %cst_66 {dimension_numbers = #tpu.dot_dimension_numbers<[1], [0], [0], [1], [0, 0, 1, 1], [], []>} : vector<128x1024xbf16>, vector<1024x8xbf16>, vector<128x8xf32> -> vector<128x8xf32>
    %c2 = arith.constant 2 : index
    %c0_67 = arith.constant 0 : index
    %153 = vector.load %arg5[%c2, %c0_67] : memref<8x8xf32, #tpu.memory_space<vmem>>, vector<1x8xf32>
    %154 = vector.broadcast %153 : vector<1x8xf32> to vector<128x8xf32>
    %155 = arith.mulf %152, %154 : vector<128x8xf32>
    %c3 = arith.constant 3 : index
    %c0_68 = arith.constant 0 : index
    %156 = vector.load %arg5[%c3, %c0_68] : memref<8x8xf32, #tpu.memory_space<vmem>>, vector<1x8xf32>
    %157 = vector.broadcast %156 : vector<1x8xf32> to vector<128x8xf32>
    %158 = arith.addf %155, %157 : vector<128x8xf32>
    %c16 = arith.constant 16 : index
    %c0_69 = arith.constant 0 : index
    %159 = vector.load %arg2[%c16, %c0_69] : memref<32x128xf32, #tpu.memory_space<vmem>>, vector<1x128xf32>
    %c16_70 = arith.constant 16 : index
    %c0_71 = arith.constant 0 : index
    %160 = vector.load %arg3[%c16_70, %c0_71] : memref<32x128xf32, #tpu.memory_space<vmem>>, vector<1x128xf32>
    %161 = vector.extract_strided_slice %158 {offsets = [0, 0], sizes = [128, 1], strides = [1, 1]} : vector<128x8xf32> to vector<128x1xf32>
    %162 = vector.broadcast %161 : vector<128x1xf32> to vector<128x128xf32>
    %163 = vector.broadcast %159 : vector<1x128xf32> to vector<128x128xf32>
    %164 = arith.subf %162, %163 : vector<128x128xf32>
    %165 = vector.broadcast %160 : vector<1x128xf32> to vector<128x128xf32>
    %166 = arith.mulf %164, %165 : vector<128x128xf32>
    %167 = arith.mulf %166, %166 : vector<128x128xf32>
    %cst_72 = arith.constant 0.000000e+00 : f32
    %168 = vector.broadcast %cst_72 : f32 to vector<128x128xf32>
    %169 = arith.subf %168, %167 : vector<128x128xf32>
    %170 = math.exp %169 : vector<128x128xf32>
    %171 = arith.truncf %170 : vector<128x128xf32> to vector<128x128xbf16>
    %c0_73 = arith.constant 0 : index
    %c0_74 = arith.constant 0 : index
    %172 = vector.load %arg7[%c0_73, %c0_74] : memref<128x1024xbf16, #tpu.memory_space<vmem>>, vector<128x128xbf16>
    tpu.vector_store %arg7[%c0_73, %c0_74], %171 {strides = array<i32>} : memref<128x1024xbf16, #tpu.memory_space<vmem>>, vector<128x128xbf16>,
    %c17 = arith.constant 17 : index
    %c0_75 = arith.constant 0 : index
    %173 = vector.load %arg2[%c17, %c0_75] : memref<32x128xf32, #tpu.memory_space<vmem>>, vector<1x128xf32>
    %c17_76 = arith.constant 17 : index
    %c0_77 = arith.constant 0 : index
    %174 = vector.load %arg3[%c17_76, %c0_77] : memref<32x128xf32, #tpu.memory_space<vmem>>, vector<1x128xf32>
    %175 = vector.extract_strided_slice %158 {offsets = [0, 1], sizes = [128, 1], strides = [1, 1]} : vector<128x8xf32> to vector<128x1xf32>
    %176 = vector.broadcast %175 : vector<128x1xf32> to vector<128x128xf32>
    %177 = vector.broadcast %173 : vector<1x128xf32> to vector<128x128xf32>
    %178 = arith.subf %176, %177 : vector<128x128xf32>
    %179 = vector.broadcast %174 : vector<1x128xf32> to vector<128x128xf32>
    %180 = arith.mulf %178, %179 : vector<128x128xf32>
    %181 = arith.mulf %180, %180 : vector<128x128xf32>
    %cst_78 = arith.constant 0.000000e+00 : f32
    %182 = vector.broadcast %cst_78 : f32 to vector<128x128xf32>
    %183 = arith.subf %182, %181 : vector<128x128xf32>
    %184 = math.exp %183 : vector<128x128xf32>
    %185 = arith.truncf %184 : vector<128x128xf32> to vector<128x128xbf16>
    %c0_79 = arith.constant 0 : index
    %c128_80 = arith.constant 128 : index
    %186 = vector.load %arg7[%c0_79, %c128_80] : memref<128x1024xbf16, #tpu.memory_space<vmem>>, vector<128x128xbf16>
    tpu.vector_store %arg7[%c0_79, %c128_80], %185 {strides = array<i32>} : memref<128x1024xbf16, #tpu.memory_space<vmem>>, vector<128x128xbf16>,
    %c18 = arith.constant 18 : index
    %c0_81 = arith.constant 0 : index
    %187 = vector.load %arg2[%c18, %c0_81] : memref<32x128xf32, #tpu.memory_space<vmem>>, vector<1x128xf32>
    %c18_82 = arith.constant 18 : index
    %c0_83 = arith.constant 0 : index
    %188 = vector.load %arg3[%c18_82, %c0_83] : memref<32x128xf32, #tpu.memory_space<vmem>>, vector<1x128xf32>
    %189 = vector.extract_strided_slice %158 {offsets = [0, 2], sizes = [128, 1], strides = [1, 1]} : vector<128x8xf32> to vector<128x1xf32>
    %190 = vector.broadcast %189 : vector<128x1xf32> to vector<128x128xf32>
    %191 = vector.broadcast %187 : vector<1x128xf32> to vector<128x128xf32>
    %192 = arith.subf %190, %191 : vector<128x128xf32>
    %193 = vector.broadcast %188 : vector<1x128xf32> to vector<128x128xf32>
    %194 = arith.mulf %192, %193 : vector<128x128xf32>
    %195 = arith.mulf %194, %194 : vector<128x128xf32>
    %cst_84 = arith.constant 0.000000e+00 : f32
    %196 = vector.broadcast %cst_84 : f32 to vector<128x128xf32>
    %197 = arith.subf %196, %195 : vector<128x128xf32>
    %198 = math.exp %197 : vector<128x128xf32>
    %199 = arith.truncf %198 : vector<128x128xf32> to vector<128x128xbf16>
    %c0_85 = arith.constant 0 : index
    %c256_86 = arith.constant 256 : index
    %200 = vector.load %arg7[%c0_85, %c256_86] : memref<128x1024xbf16, #tpu.memory_space<vmem>>, vector<128x128xbf16>
    tpu.vector_store %arg7[%c0_85, %c256_86], %199 {strides = array<i32>} : memref<128x1024xbf16, #tpu.memory_space<vmem>>, vector<128x128xbf16>,
    %c19 = arith.constant 19 : index
    %c0_87 = arith.constant 0 : index
    %201 = vector.load %arg2[%c19, %c0_87] : memref<32x128xf32, #tpu.memory_space<vmem>>, vector<1x128xf32>
    %c19_88 = arith.constant 19 : index
    %c0_89 = arith.constant 0 : index
    %202 = vector.load %arg3[%c19_88, %c0_89] : memref<32x128xf32, #tpu.memory_space<vmem>>, vector<1x128xf32>
    %203 = vector.extract_strided_slice %158 {offsets = [0, 3], sizes = [128, 1], strides = [1, 1]} : vector<128x8xf32> to vector<128x1xf32>
    %204 = vector.broadcast %203 : vector<128x1xf32> to vector<128x128xf32>
    %205 = vector.broadcast %201 : vector<1x128xf32> to vector<128x128xf32>
    %206 = arith.subf %204, %205 : vector<128x128xf32>
    %207 = vector.broadcast %202 : vector<1x128xf32> to vector<128x128xf32>
    %208 = arith.mulf %206, %207 : vector<128x128xf32>
    %209 = arith.mulf %208, %208 : vector<128x128xf32>
    %cst_90 = arith.constant 0.000000e+00 : f32
    %210 = vector.broadcast %cst_90 : f32 to vector<128x128xf32>
    %211 = arith.subf %210, %209 : vector<128x128xf32>
    %212 = math.exp %211 : vector<128x128xf32>
    %213 = arith.truncf %212 : vector<128x128xf32> to vector<128x128xbf16>
    %c0_91 = arith.constant 0 : index
    %c384_92 = arith.constant 384 : index
    %214 = vector.load %arg7[%c0_91, %c384_92] : memref<128x1024xbf16, #tpu.memory_space<vmem>>, vector<128x128xbf16>
    tpu.vector_store %arg7[%c0_91, %c384_92], %213 {strides = array<i32>} : memref<128x1024xbf16, #tpu.memory_space<vmem>>, vector<128x128xbf16>,
    %c20 = arith.constant 20 : index
    %c0_93 = arith.constant 0 : index
    %215 = vector.load %arg2[%c20, %c0_93] : memref<32x128xf32, #tpu.memory_space<vmem>>, vector<1x128xf32>
    %c20_94 = arith.constant 20 : index
    %c0_95 = arith.constant 0 : index
    %216 = vector.load %arg3[%c20_94, %c0_95] : memref<32x128xf32, #tpu.memory_space<vmem>>, vector<1x128xf32>
    %217 = vector.extract_strided_slice %158 {offsets = [0, 4], sizes = [128, 1], strides = [1, 1]} : vector<128x8xf32> to vector<128x1xf32>
    %218 = vector.broadcast %217 : vector<128x1xf32> to vector<128x128xf32>
    %219 = vector.broadcast %215 : vector<1x128xf32> to vector<128x128xf32>
    %220 = arith.subf %218, %219 : vector<128x128xf32>
    %221 = vector.broadcast %216 : vector<1x128xf32> to vector<128x128xf32>
    %222 = arith.mulf %220, %221 : vector<128x128xf32>
    %223 = arith.mulf %222, %222 : vector<128x128xf32>
    %cst_96 = arith.constant 0.000000e+00 : f32
    %224 = vector.broadcast %cst_96 : f32 to vector<128x128xf32>
    %225 = arith.subf %224, %223 : vector<128x128xf32>
    %226 = math.exp %225 : vector<128x128xf32>
    %227 = arith.truncf %226 : vector<128x128xf32> to vector<128x128xbf16>
    %c0_97 = arith.constant 0 : index
    %c512_98 = arith.constant 512 : index
    %228 = vector.load %arg7[%c0_97, %c512_98] : memref<128x1024xbf16, #tpu.memory_space<vmem>>, vector<128x128xbf16>
    tpu.vector_store %arg7[%c0_97, %c512_98], %227 {strides = array<i32>} : memref<128x1024xbf16, #tpu.memory_space<vmem>>, vector<128x128xbf16>,
    %c21 = arith.constant 21 : index
    %c0_99 = arith.constant 0 : index
    %229 = vector.load %arg2[%c21, %c0_99] : memref<32x128xf32, #tpu.memory_space<vmem>>, vector<1x128xf32>
    %c21_100 = arith.constant 21 : index
    %c0_101 = arith.constant 0 : index
    %230 = vector.load %arg3[%c21_100, %c0_101] : memref<32x128xf32, #tpu.memory_space<vmem>>, vector<1x128xf32>
    %231 = vector.extract_strided_slice %158 {offsets = [0, 5], sizes = [128, 1], strides = [1, 1]} : vector<128x8xf32> to vector<128x1xf32>
    %232 = vector.broadcast %231 : vector<128x1xf32> to vector<128x128xf32>
    %233 = vector.broadcast %229 : vector<1x128xf32> to vector<128x128xf32>
    %234 = arith.subf %232, %233 : vector<128x128xf32>
    %235 = vector.broadcast %230 : vector<1x128xf32> to vector<128x128xf32>
    %236 = arith.mulf %234, %235 : vector<128x128xf32>
    %237 = arith.mulf %236, %236 : vector<128x128xf32>
    %cst_102 = arith.constant 0.000000e+00 : f32
    %238 = vector.broadcast %cst_102 : f32 to vector<128x128xf32>
    %239 = arith.subf %238, %237 : vector<128x128xf32>
    %240 = math.exp %239 : vector<128x128xf32>
    %241 = arith.truncf %240 : vector<128x128xf32> to vector<128x128xbf16>
    %c0_103 = arith.constant 0 : index
    %c640_104 = arith.constant 640 : index
    %242 = vector.load %arg7[%c0_103, %c640_104] : memref<128x1024xbf16, #tpu.memory_space<vmem>>, vector<128x128xbf16>
    tpu.vector_store %arg7[%c0_103, %c640_104], %241 {strides = array<i32>} : memref<128x1024xbf16, #tpu.memory_space<vmem>>, vector<128x128xbf16>,
    %c22 = arith.constant 22 : index
    %c0_105 = arith.constant 0 : index
    %243 = vector.load %arg2[%c22, %c0_105] : memref<32x128xf32, #tpu.memory_space<vmem>>, vector<1x128xf32>
    %c22_106 = arith.constant 22 : index
    %c0_107 = arith.constant 0 : index
    %244 = vector.load %arg3[%c22_106, %c0_107] : memref<32x128xf32, #tpu.memory_space<vmem>>, vector<1x128xf32>
    %245 = vector.extract_strided_slice %158 {offsets = [0, 6], sizes = [128, 1], strides = [1, 1]} : vector<128x8xf32> to vector<128x1xf32>
    %246 = vector.broadcast %245 : vector<128x1xf32> to vector<128x128xf32>
    %247 = vector.broadcast %243 : vector<1x128xf32> to vector<128x128xf32>
    %248 = arith.subf %246, %247 : vector<128x128xf32>
    %249 = vector.broadcast %244 : vector<1x128xf32> to vector<128x128xf32>
    %250 = arith.mulf %248, %249 : vector<128x128xf32>
    %251 = arith.mulf %250, %250 : vector<128x128xf32>
    %cst_108 = arith.constant 0.000000e+00 : f32
    %252 = vector.broadcast %cst_108 : f32 to vector<128x128xf32>
    %253 = arith.subf %252, %251 : vector<128x128xf32>
    %254 = math.exp %253 : vector<128x128xf32>
    %255 = arith.truncf %254 : vector<128x128xf32> to vector<128x128xbf16>
    %c0_109 = arith.constant 0 : index
    %c768_110 = arith.constant 768 : index
    %256 = vector.load %arg7[%c0_109, %c768_110] : memref<128x1024xbf16, #tpu.memory_space<vmem>>, vector<128x128xbf16>
    tpu.vector_store %arg7[%c0_109, %c768_110], %255 {strides = array<i32>} : memref<128x1024xbf16, #tpu.memory_space<vmem>>, vector<128x128xbf16>,
    %c23 = arith.constant 23 : index
    %c0_111 = arith.constant 0 : index
    %257 = vector.load %arg2[%c23, %c0_111] : memref<32x128xf32, #tpu.memory_space<vmem>>, vector<1x128xf32>
    %c23_112 = arith.constant 23 : index
    %c0_113 = arith.constant 0 : index
    %258 = vector.load %arg3[%c23_112, %c0_113] : memref<32x128xf32, #tpu.memory_space<vmem>>, vector<1x128xf32>
    %259 = vector.extract_strided_slice %158 {offsets = [0, 7], sizes = [128, 1], strides = [1, 1]} : vector<128x8xf32> to vector<128x1xf32>
    %260 = vector.broadcast %259 : vector<128x1xf32> to vector<128x128xf32>
    %261 = vector.broadcast %257 : vector<1x128xf32> to vector<128x128xf32>
    %262 = arith.subf %260, %261 : vector<128x128xf32>
    %263 = vector.broadcast %258 : vector<1x128xf32> to vector<128x128xf32>
    %264 = arith.mulf %262, %263 : vector<128x128xf32>
    %265 = arith.mulf %264, %264 : vector<128x128xf32>
    %cst_114 = arith.constant 0.000000e+00 : f32
    %266 = vector.broadcast %cst_114 : f32 to vector<128x128xf32>
    %267 = arith.subf %266, %265 : vector<128x128xf32>
    %268 = math.exp %267 : vector<128x128xf32>
    %269 = arith.truncf %268 : vector<128x128xf32> to vector<128x128xbf16>
    %c0_115 = arith.constant 0 : index
    %c896_116 = arith.constant 896 : index
    %270 = vector.load %arg7[%c0_115, %c896_116] : memref<128x1024xbf16, #tpu.memory_space<vmem>>, vector<128x128xbf16>
    tpu.vector_store %arg7[%c0_115, %c896_116], %269 {strides = array<i32>} : memref<128x1024xbf16, #tpu.memory_space<vmem>>, vector<128x128xbf16>,
    %c2048 = arith.constant 2048 : index
    %c0_117 = arith.constant 0 : index
    %271 = vector.load %arg4[%c2048, %c0_117] : memref<4096x8xbf16, #tpu.memory_space<vmem>>, vector<1024x8xbf16>
    %c0_118 = arith.constant 0 : index
    %c0_119 = arith.constant 0 : index
    %272 = vector.load %arg7[%c0_118, %c0_119] : memref<128x1024xbf16, #tpu.memory_space<vmem>>, vector<128x1024xbf16>
    %cst_120 = arith.constant dense<0.000000e+00> : vector<128x8xf32>
    %273 = tpu.matmul %272, %271, %cst_120 {dimension_numbers = #tpu.dot_dimension_numbers<[1], [0], [0], [1], [0, 0, 1, 1], [], []>} : vector<128x1024xbf16>, vector<1024x8xbf16>, vector<128x8xf32> -> vector<128x8xf32>
    %c4 = arith.constant 4 : index
    %c0_121 = arith.constant 0 : index
    %274 = vector.load %arg5[%c4, %c0_121] : memref<8x8xf32, #tpu.memory_space<vmem>>, vector<1x8xf32>
    %275 = vector.broadcast %274 : vector<1x8xf32> to vector<128x8xf32>
    %276 = arith.mulf %273, %275 : vector<128x8xf32>
    %c5 = arith.constant 5 : index
    %c0_122 = arith.constant 0 : index
    %277 = vector.load %arg5[%c5, %c0_122] : memref<8x8xf32, #tpu.memory_space<vmem>>, vector<1x8xf32>
    %278 = vector.broadcast %277 : vector<1x8xf32> to vector<128x8xf32>
    %279 = arith.addf %276, %278 : vector<128x8xf32>
    %c24 = arith.constant 24 : index
    %c0_123 = arith.constant 0 : index
    %280 = vector.load %arg2[%c24, %c0_123] : memref<32x128xf32, #tpu.memory_space<vmem>>, vector<1x128xf32>
    %c24_124 = arith.constant 24 : index
    %c0_125 = arith.constant 0 : index
    %281 = vector.load %arg3[%c24_124, %c0_125] : memref<32x128xf32, #tpu.memory_space<vmem>>, vector<1x128xf32>
    %282 = vector.extract_strided_slice %279 {offsets = [0, 0], sizes = [128, 1], strides = [1, 1]} : vector<128x8xf32> to vector<128x1xf32>
    %283 = vector.broadcast %282 : vector<128x1xf32> to vector<128x128xf32>
    %284 = vector.broadcast %280 : vector<1x128xf32> to vector<128x128xf32>
    %285 = arith.subf %283, %284 : vector<128x128xf32>
    %286 = vector.broadcast %281 : vector<1x128xf32> to vector<128x128xf32>
    %287 = arith.mulf %285, %286 : vector<128x128xf32>
    %288 = arith.mulf %287, %287 : vector<128x128xf32>
    %cst_126 = arith.constant 0.000000e+00 : f32
    %289 = vector.broadcast %cst_126 : f32 to vector<128x128xf32>
    %290 = arith.subf %289, %288 : vector<128x128xf32>
    %291 = math.exp %290 : vector<128x128xf32>
    %292 = arith.truncf %291 : vector<128x128xf32> to vector<128x128xbf16>
    %c0_127 = arith.constant 0 : index
    %c0_128 = arith.constant 0 : index
    %293 = vector.load %arg7[%c0_127, %c0_128] : memref<128x1024xbf16, #tpu.memory_space<vmem>>, vector<128x128xbf16>
    tpu.vector_store %arg7[%c0_127, %c0_128], %292 {strides = array<i32>} : memref<128x1024xbf16, #tpu.memory_space<vmem>>, vector<128x128xbf16>,
    %c25 = arith.constant 25 : index
    %c0_129 = arith.constant 0 : index
    %294 = vector.load %arg2[%c25, %c0_129] : memref<32x128xf32, #tpu.memory_space<vmem>>, vector<1x128xf32>
    %c25_130 = arith.constant 25 : index
    %c0_131 = arith.constant 0 : index
    %295 = vector.load %arg3[%c25_130, %c0_131] : memref<32x128xf32, #tpu.memory_space<vmem>>, vector<1x128xf32>
    %296 = vector.extract_strided_slice %279 {offsets = [0, 1], sizes = [128, 1], strides = [1, 1]} : vector<128x8xf32> to vector<128x1xf32>
    %297 = vector.broadcast %296 : vector<128x1xf32> to vector<128x128xf32>
    %298 = vector.broadcast %294 : vector<1x128xf32> to vector<128x128xf32>
    %299 = arith.subf %297, %298 : vector<128x128xf32>
    %300 = vector.broadcast %295 : vector<1x128xf32> to vector<128x128xf32>
    %301 = arith.mulf %299, %300 : vector<128x128xf32>
    %302 = arith.mulf %301, %301 : vector<128x128xf32>
    %cst_132 = arith.constant 0.000000e+00 : f32
    %303 = vector.broadcast %cst_132 : f32 to vector<128x128xf32>
    %304 = arith.subf %303, %302 : vector<128x128xf32>
    %305 = math.exp %304 : vector<128x128xf32>
    %306 = arith.truncf %305 : vector<128x128xf32> to vector<128x128xbf16>
    %c0_133 = arith.constant 0 : index
    %c128_134 = arith.constant 128 : index
    %307 = vector.load %arg7[%c0_133, %c128_134] : memref<128x1024xbf16, #tpu.memory_space<vmem>>, vector<128x128xbf16>
    tpu.vector_store %arg7[%c0_133, %c128_134], %306 {strides = array<i32>} : memref<128x1024xbf16, #tpu.memory_space<vmem>>, vector<128x128xbf16>,
    %c26 = arith.constant 26 : index
    %c0_135 = arith.constant 0 : index
    %308 = vector.load %arg2[%c26, %c0_135] : memref<32x128xf32, #tpu.memory_space<vmem>>, vector<1x128xf32>
    %c26_136 = arith.constant 26 : index
    %c0_137 = arith.constant 0 : index
    %309 = vector.load %arg3[%c26_136, %c0_137] : memref<32x128xf32, #tpu.memory_space<vmem>>, vector<1x128xf32>
    %310 = vector.extract_strided_slice %279 {offsets = [0, 2], sizes = [128, 1], strides = [1, 1]} : vector<128x8xf32> to vector<128x1xf32>
    %311 = vector.broadcast %310 : vector<128x1xf32> to vector<128x128xf32>
    %312 = vector.broadcast %308 : vector<1x128xf32> to vector<128x128xf32>
    %313 = arith.subf %311, %312 : vector<128x128xf32>
    %314 = vector.broadcast %309 : vector<1x128xf32> to vector<128x128xf32>
    %315 = arith.mulf %313, %314 : vector<128x128xf32>
    %316 = arith.mulf %315, %315 : vector<128x128xf32>
    %cst_138 = arith.constant 0.000000e+00 : f32
    %317 = vector.broadcast %cst_138 : f32 to vector<128x128xf32>
    %318 = arith.subf %317, %316 : vector<128x128xf32>
    %319 = math.exp %318 : vector<128x128xf32>
    %320 = arith.truncf %319 : vector<128x128xf32> to vector<128x128xbf16>
    %c0_139 = arith.constant 0 : index
    %c256_140 = arith.constant 256 : index
    %321 = vector.load %arg7[%c0_139, %c256_140] : memref<128x1024xbf16, #tpu.memory_space<vmem>>, vector<128x128xbf16>
    tpu.vector_store %arg7[%c0_139, %c256_140], %320 {strides = array<i32>} : memref<128x1024xbf16, #tpu.memory_space<vmem>>, vector<128x128xbf16>,
    %c27 = arith.constant 27 : index
    %c0_141 = arith.constant 0 : index
    %322 = vector.load %arg2[%c27, %c0_141] : memref<32x128xf32, #tpu.memory_space<vmem>>, vector<1x128xf32>
    %c27_142 = arith.constant 27 : index
    %c0_143 = arith.constant 0 : index
    %323 = vector.load %arg3[%c27_142, %c0_143] : memref<32x128xf32, #tpu.memory_space<vmem>>, vector<1x128xf32>
    %324 = vector.extract_strided_slice %279 {offsets = [0, 3], sizes = [128, 1], strides = [1, 1]} : vector<128x8xf32> to vector<128x1xf32>
    %325 = vector.broadcast %324 : vector<128x1xf32> to vector<128x128xf32>
    %326 = vector.broadcast %322 : vector<1x128xf32> to vector<128x128xf32>
    %327 = arith.subf %325, %326 : vector<128x128xf32>
    %328 = vector.broadcast %323 : vector<1x128xf32> to vector<128x128xf32>
    %329 = arith.mulf %327, %328 : vector<128x128xf32>
    %330 = arith.mulf %329, %329 : vector<128x128xf32>
    %cst_144 = arith.constant 0.000000e+00 : f32
    %331 = vector.broadcast %cst_144 : f32 to vector<128x128xf32>
    %332 = arith.subf %331, %330 : vector<128x128xf32>
    %333 = math.exp %332 : vector<128x128xf32>
    %334 = arith.truncf %333 : vector<128x128xf32> to vector<128x128xbf16>
    %c0_145 = arith.constant 0 : index
    %c384_146 = arith.constant 384 : index
    %335 = vector.load %arg7[%c0_145, %c384_146] : memref<128x1024xbf16, #tpu.memory_space<vmem>>, vector<128x128xbf16>
    tpu.vector_store %arg7[%c0_145, %c384_146], %334 {strides = array<i32>} : memref<128x1024xbf16, #tpu.memory_space<vmem>>, vector<128x128xbf16>,
    %c28 = arith.constant 28 : index
    %c0_147 = arith.constant 0 : index
    %336 = vector.load %arg2[%c28, %c0_147] : memref<32x128xf32, #tpu.memory_space<vmem>>, vector<1x128xf32>
    %c28_148 = arith.constant 28 : index
    %c0_149 = arith.constant 0 : index
    %337 = vector.load %arg3[%c28_148, %c0_149] : memref<32x128xf32, #tpu.memory_space<vmem>>, vector<1x128xf32>
    %338 = vector.extract_strided_slice %279 {offsets = [0, 4], sizes = [128, 1], strides = [1, 1]} : vector<128x8xf32> to vector<128x1xf32>
    %339 = vector.broadcast %338 : vector<128x1xf32> to vector<128x128xf32>
    %340 = vector.broadcast %336 : vector<1x128xf32> to vector<128x128xf32>
    %341 = arith.subf %339, %340 : vector<128x128xf32>
    %342 = vector.broadcast %337 : vector<1x128xf32> to vector<128x128xf32>
    %343 = arith.mulf %341, %342 : vector<128x128xf32>
    %344 = arith.mulf %343, %343 : vector<128x128xf32>
    %cst_150 = arith.constant 0.000000e+00 : f32
    %345 = vector.broadcast %cst_150 : f32 to vector<128x128xf32>
    %346 = arith.subf %345, %344 : vector<128x128xf32>
    %347 = math.exp %346 : vector<128x128xf32>
    %348 = arith.truncf %347 : vector<128x128xf32> to vector<128x128xbf16>
    %c0_151 = arith.constant 0 : index
    %c512_152 = arith.constant 512 : index
    %349 = vector.load %arg7[%c0_151, %c512_152] : memref<128x1024xbf16, #tpu.memory_space<vmem>>, vector<128x128xbf16>
    tpu.vector_store %arg7[%c0_151, %c512_152], %348 {strides = array<i32>} : memref<128x1024xbf16, #tpu.memory_space<vmem>>, vector<128x128xbf16>,
    %c29 = arith.constant 29 : index
    %c0_153 = arith.constant 0 : index
    %350 = vector.load %arg2[%c29, %c0_153] : memref<32x128xf32, #tpu.memory_space<vmem>>, vector<1x128xf32>
    %c29_154 = arith.constant 29 : index
    %c0_155 = arith.constant 0 : index
    %351 = vector.load %arg3[%c29_154, %c0_155] : memref<32x128xf32, #tpu.memory_space<vmem>>, vector<1x128xf32>
    %352 = vector.extract_strided_slice %279 {offsets = [0, 5], sizes = [128, 1], strides = [1, 1]} : vector<128x8xf32> to vector<128x1xf32>
    %353 = vector.broadcast %352 : vector<128x1xf32> to vector<128x128xf32>
    %354 = vector.broadcast %350 : vector<1x128xf32> to vector<128x128xf32>
    %355 = arith.subf %353, %354 : vector<128x128xf32>
    %356 = vector.broadcast %351 : vector<1x128xf32> to vector<128x128xf32>
    %357 = arith.mulf %355, %356 : vector<128x128xf32>
    %358 = arith.mulf %357, %357 : vector<128x128xf32>
    %cst_156 = arith.constant 0.000000e+00 : f32
    %359 = vector.broadcast %cst_156 : f32 to vector<128x128xf32>
    %360 = arith.subf %359, %358 : vector<128x128xf32>
    %361 = math.exp %360 : vector<128x128xf32>
    %362 = arith.truncf %361 : vector<128x128xf32> to vector<128x128xbf16>
    %c0_157 = arith.constant 0 : index
    %c640_158 = arith.constant 640 : index
    %363 = vector.load %arg7[%c0_157, %c640_158] : memref<128x1024xbf16, #tpu.memory_space<vmem>>, vector<128x128xbf16>
    tpu.vector_store %arg7[%c0_157, %c640_158], %362 {strides = array<i32>} : memref<128x1024xbf16, #tpu.memory_space<vmem>>, vector<128x128xbf16>,
    %c30 = arith.constant 30 : index
    %c0_159 = arith.constant 0 : index
    %364 = vector.load %arg2[%c30, %c0_159] : memref<32x128xf32, #tpu.memory_space<vmem>>, vector<1x128xf32>
    %c30_160 = arith.constant 30 : index
    %c0_161 = arith.constant 0 : index
    %365 = vector.load %arg3[%c30_160, %c0_161] : memref<32x128xf32, #tpu.memory_space<vmem>>, vector<1x128xf32>
    %366 = vector.extract_strided_slice %279 {offsets = [0, 6], sizes = [128, 1], strides = [1, 1]} : vector<128x8xf32> to vector<128x1xf32>
    %367 = vector.broadcast %366 : vector<128x1xf32> to vector<128x128xf32>
    %368 = vector.broadcast %364 : vector<1x128xf32> to vector<128x128xf32>
    %369 = arith.subf %367, %368 : vector<128x128xf32>
    %370 = vector.broadcast %365 : vector<1x128xf32> to vector<128x128xf32>
    %371 = arith.mulf %369, %370 : vector<128x128xf32>
    %372 = arith.mulf %371, %371 : vector<128x128xf32>
    %cst_162 = arith.constant 0.000000e+00 : f32
    %373 = vector.broadcast %cst_162 : f32 to vector<128x128xf32>
    %374 = arith.subf %373, %372 : vector<128x128xf32>
    %375 = math.exp %374 : vector<128x128xf32>
    %376 = arith.truncf %375 : vector<128x128xf32> to vector<128x128xbf16>
    %c0_163 = arith.constant 0 : index
    %c768_164 = arith.constant 768 : index
    %377 = vector.load %arg7[%c0_163, %c768_164] : memref<128x1024xbf16, #tpu.memory_space<vmem>>, vector<128x128xbf16>
    tpu.vector_store %arg7[%c0_163, %c768_164], %376 {strides = array<i32>} : memref<128x1024xbf16, #tpu.memory_space<vmem>>, vector<128x128xbf16>,
    %c31 = arith.constant 31 : index
    %c0_165 = arith.constant 0 : index
    %378 = vector.load %arg2[%c31, %c0_165] : memref<32x128xf32, #tpu.memory_space<vmem>>, vector<1x128xf32>
    %c31_166 = arith.constant 31 : index
    %c0_167 = arith.constant 0 : index
    %379 = vector.load %arg3[%c31_166, %c0_167] : memref<32x128xf32, #tpu.memory_space<vmem>>, vector<1x128xf32>
    %380 = vector.extract_strided_slice %279 {offsets = [0, 7], sizes = [128, 1], strides = [1, 1]} : vector<128x8xf32> to vector<128x1xf32>
    %381 = vector.broadcast %380 : vector<128x1xf32> to vector<128x128xf32>
    %382 = vector.broadcast %378 : vector<1x128xf32> to vector<128x128xf32>
    %383 = arith.subf %381, %382 : vector<128x128xf32>
    %384 = vector.broadcast %379 : vector<1x128xf32> to vector<128x128xf32>
    %385 = arith.mulf %383, %384 : vector<128x128xf32>
    %386 = arith.mulf %385, %385 : vector<128x128xf32>
    %cst_168 = arith.constant 0.000000e+00 : f32
    %387 = vector.broadcast %cst_168 : f32 to vector<128x128xf32>
    %388 = arith.subf %387, %386 : vector<128x128xf32>
    %389 = math.exp %388 : vector<128x128xf32>
    %390 = arith.truncf %389 : vector<128x128xf32> to vector<128x128xbf16>
    %c0_169 = arith.constant 0 : index
    %c896_170 = arith.constant 896 : index
    %391 = vector.load %arg7[%c0_169, %c896_170] : memref<128x1024xbf16, #tpu.memory_space<vmem>>, vector<128x128xbf16>
    tpu.vector_store %arg7[%c0_169, %c896_170], %390 {strides = array<i32>} : memref<128x1024xbf16, #tpu.memory_space<vmem>>, vector<128x128xbf16>,
    %c3072 = arith.constant 3072 : index
    %c0_171 = arith.constant 0 : index
    %392 = vector.load %arg4[%c3072, %c0_171] : memref<4096x8xbf16, #tpu.memory_space<vmem>>, vector<1024x8xbf16>
    %c0_172 = arith.constant 0 : index
    %c0_173 = arith.constant 0 : index
    %393 = vector.load %arg7[%c0_172, %c0_173] : memref<128x1024xbf16, #tpu.memory_space<vmem>>, vector<128x1024xbf16>
    %cst_174 = arith.constant dense<0.000000e+00> : vector<128x8xf32>
    %394 = tpu.matmul %393, %392, %cst_174 {dimension_numbers = #tpu.dot_dimension_numbers<[1], [0], [0], [1], [0, 0, 1, 1], [], []>} : vector<128x1024xbf16>, vector<1024x8xbf16>, vector<128x8xf32> -> vector<128x8xf32>
    %c0_175 = arith.constant 0 : index
    %c0_176 = arith.constant 0 : index
    %395 = vector.load %arg6[%c0_175, %c0_176] : memref<128x8xf32, #tpu.memory_space<vmem>>, vector<128x8xf32>
    tpu.vector_store %arg6[%c0_175, %c0_176], %394 {strides = array<i32>} : memref<128x8xf32, #tpu.memory_space<vmem>>, vector<128x8xf32>,
    return
  }
  func.func @transform_0(%arg0: i32) -> (i32, i32) {
    %c0_i32 = arith.constant 0 : i32
    %c0_i32_0 = arith.constant 0 : i32
    return %arg0, %c0_i32 : i32, i32
  }
  func.func @transform_1(%arg0: i32) -> (i32, i32) {
    %c0_i32 = arith.constant 0 : i32
    %c0_i32_0 = arith.constant 0 : i32
    %c0_i32_1 = arith.constant 0 : i32
    return %c0_i32, %c0_i32_0 : i32, i32
  }
  func.func @transform_2(%arg0: i32) -> (i32, i32) {
    %c0_i32 = arith.constant 0 : i32
    %c0_i32_0 = arith.constant 0 : i32
    %c0_i32_1 = arith.constant 0 : i32
    return %c0_i32, %c0_i32_0 : i32, i32
  }
  func.func @transform_3(%arg0: i32) -> (i32, i32) {
    %c0_i32 = arith.constant 0 : i32
    %c0_i32_0 = arith.constant 0 : i32
    %c0_i32_1 = arith.constant 0 : i32
    return %c0_i32, %c0_i32_0 : i32, i32
  }
  func.func @transform_4(%arg0: i32) -> (i32, i32) {
    %c0_i32 = arith.constant 0 : i32
    %c0_i32_0 = arith.constant 0 : i32
    %c0_i32_1 = arith.constant 0 : i32
    return %c0_i32, %c0_i32_0 : i32, i32
  }
  func.func @transform_5(%arg0: i32) -> (i32, i32) {
    %c0_i32 = arith.constant 0 : i32
    %c0_i32_0 = arith.constant 0 : i32
    return %arg0, %c0_i32 : i32, i32
  }
}

</mosaic_0001>

<bundles_post_ra>
// kernel: tpu_custom_call.1
= control target key start
LH: loop header
LB: loop body
LE: loop exit
PB: predicated region body
PF: predicated region fallthrough
CT: control target
= control target key end

     0   :  { %s11068_s18 = smov 0   ;;  %s15404_s0 = inlined_call_operand.vmem [shape: f32[256,2], index: 0, kind: input, shape index: {}]   ;;  %s15405_s1 = inlined_call_operand.vmem [shape: f32[32,128], index: 1, kind: input, shape index: {}]   ;;  %s15406_s2 = inlined_call_operand.vmem [shape: f32[32,128], index: 2, kind: input, shape index: {}]   ;;  %s15407_s3 = inlined_call_operand.vmem [shape: bf16[4096,8], index: 3, kind: input, shape index: {}]   ;;  %s15408_s4 = inlined_call_operand.vmem [shape: f32[8,8], index: 4, kind: input, shape index: {}]   ;;  %s15409_s5 = inlined_call_operand.vmem [shape: f32[256,8], index: 5, kind: output, shape index: {}]  }
   0x1 LB: > { %s8477_s19 = sadd.s32 4294967295, %s11028_s18   ;;  %p8481_p0 = scmp.ge.s32.totalorder %s11028_s18, 1  ;;  %s11028_s18 = sphi %s11068_s18, %s15_s18  }
   0x2   : > { %p188_p1 = scmp.lt.s32.totalorder %s11028_s18, 3 }
   0x4   : > { %p189_p2 = pnand %p8481_p0, %p188_p1 }
   0x6   : > { %192 = sbr.rel (%p189_p2) target bundleno = 2508 (0x9cc), region = 40 }
   0xd   : > { %s8482_s20 = sshll.u32 %s8477_s19, 4  ;;  %v15416_v0 = vmov 0   ;;  %v9938_v17 = vld [vmem:[%s15407_s3 + $0x40] sm:$0xff]   ;;  %v9940_v19 = vld [vmem:[%s15407_s3 + $0x48] sm:$0xff]   ;;  %v15410_v21 = vmov 1   ;;  %v9942_v22 = vld [vmem:[%s15407_s3 + $0x50] sm:$0xff]  }
   0xe   : > { %9619 = vset.pattern.permute.xlu1 %v15416_v0  ;;  %9618 = vset.pattern.permute.xlu0 %v15416_v0  ;;  %p217_p3 = scmp.lt.s32.totalorder %s8482_s20, 31  ;;  %v9939_v18 = vld [vmem:[%s15407_s3] sm:$0xff]   ;;  %v9941_v20 = vld [vmem:[%s15407_s3 + $0x8] sm:$0xff]   ;;  %v9943_v23 = vld [vmem:[%s15407_s3 + $0x10] sm:$0xff]   ;;  %vm8404_vm0 = vcmask 64512  }
   0xf   : > { %8754 = vmatprep.subr.bf16.mxu0 %v9938_v17  ;;  %9586 = vmatprep.subr.bf16.mxu1 %v9938_v17  ;;  %v9944_v24 = vld [vmem:[%s15407_s3 + $0x58] sm:$0xff]   ;;  %v9946_v26 = vld [vmem:[%s15407_s3 + $0x60] sm:$0xff]   ;;  %v9948_v28 = vld [vmem:[%s15407_s3 + $0x68] sm:$0xff]  }
  0x10   : > { %s15680_s20 = smov (!%p217_p3, %s8482_s20), 31  ;;  %8755 = vmatpush3.bf16.msra.mxu0 %v9939_v18  ;;  %9594 = vmatpush3.bf16.msra.mxu1 %v9939_v18  ;;  %v9945_v25 = vld [vmem:[%s15407_s3 + $0x18] sm:$0xff]   ;;  %v9947_v27 = vld [vmem:[%s15407_s3 + $0x20] sm:$0xff]   ;;  %v9949_v29 = vld [vmem:[%s15407_s3 + $0x28] sm:$0xff]  }
  0x11   : > { %s8483_s21 = sshll.u32 %s15680_s20, 3  ;;  %8756 = vmatprep.subr.bf16.mxu0 %v9940_v19  ;;  %9587 = vmatprep.subr.bf16.mxu1 %v9940_v19  ;;  %v9950_v30 = vld [vmem:[%s15407_s3 + $0x70] sm:$0xff]   ;;  %v9952_v32 = vld [vmem:[%s15407_s3 + $0x78] sm:$0xff]   ;;  %v11169_v40 = vld [vmem:[%s15405_s1] ss:$0 sm:$0xff] }
  0x12   : > { %s220_s24 = scalar_lea.vmem %s15404_s0, %s8483_s21  ;;  %v9951_v31 = vld [vmem:[%s15407_s3 + $0x30] sm:$0xff]   ;;  %v9953_v33 = vld [vmem:[%s15407_s3 + $0x38] sm:$0xff]   ;;  %v11174_v43 = vld [vmem:[%s15406_s2] ss:$0 sm:$0xff]  ;;  %s15353_s6 = scalar_lea.vmem %s15409_s5, %s8483_s21 }
  0x13   : > { %v231_v1 = vld [vmem:[%s220_s24 + $0x10] sm:$0xff]  ;;  %v229_v2 = vld [vmem:[%s220_s24] sm:$0xff]  ;;  %v232_v3 = vld [vmem:[%s220_s24 + $0x18] sm:$0xff] }
  0x14   : > { %259 = vperm.xlu1 %9619, %v231_v1   ;;  %249 = vperm.xlu0 %9618, %v229_v2   ;;  %v230_v4 = vld [vmem:[%s220_s24 + $0x8] sm:$0xff]  ;;  %v233_v6 = vld [vmem:[%s220_s24 + $0x20] sm:$0xff]  ;;  %v236_v7 = vld [vmem:[%s220_s24 + $0x38] sm:$0xff] }
  0x15   : > { %v234_v5 = vld [vmem:[%s220_s24 + $0x28] sm:$0xff]  ;;  %v235_v8 = vld [vmem:[%s220_s24 + $0x30] sm:$0xff]  ;;  %v237_v10 = vld [vmem:[%s220_s24 + $0x40] sm:$0xff]  ;;  %8757 = vmatpush3.bf16.msra.mxu0 %v9941_v20  ;;  %9595 = vmatpush3.bf16.msra.mxu1 %v9941_v20 }
  0x16   : > { %v11086_v9 = vld [vmem:[%s220_s24 + $0x48] sm:$0xff]  ;;  %v11088_v11 = vld [vmem:[%s220_s24 + $0x58] sm:$0xff]  ;;  %v11090_v12 = vld [vmem:[%s220_s24 + $0x50] sm:$0xff]  ;;  %8758 = vmatprep.subr.bf16.mxu0 %v9942_v22  ;;  %9588 = vmatprep.subr.bf16.mxu1 %v9942_v22 }
  0x17   : > { %v11093_v13 = vld [vmem:[%s220_s24 + $0x68] sm:$0xff]  ;;  %v11095_v14 = vld [vmem:[%s220_s24 + $0x60] sm:$0xff]  ;;  %v11099_v15 = vld [vmem:[%s220_s24 + $0x78] sm:$0xff] }
  0x18   : > { %264 = vperm.xlu1 %9619, %v232_v3   ;;  %254 = vperm.xlu0 %9618, %v230_v4   ;;  %v11101_v16 = vld [vmem:[%s220_s24 + $0x70] sm:$0xff] }
  0x19   : > { %8759 = vmatpush3.bf16.msra.mxu0 %v9943_v23  ;;  %9596 = vmatpush3.bf16.msra.mxu1 %v9943_v23 }
  0x1a   : > { %8760 = vmatprep.subr.bf16.mxu0 %v9944_v24  ;;  %9589 = vmatprep.subr.bf16.mxu1 %v9944_v24 }
  0x1c   : > { %274 = vperm.xlu1 %9619, %v234_v5   ;;  %269 = vperm.xlu0 %9618, %v233_v6  }
  0x1d   : > { %8761 = vmatpush3.bf16.msra.mxu0 %v9945_v25  ;;  %9597 = vmatpush3.bf16.msra.mxu1 %v9945_v25 }
  0x1e   : > { %8762 = vmatprep.subr.bf16.mxu0 %v9946_v26  ;;  %9590 = vmatprep.subr.bf16.mxu1 %v9946_v26 }
  0x20   : > { %284 = vperm.xlu1 %9619, %v236_v7   ;;  %279 = vperm.xlu0 %9618, %v235_v8  }
  0x21   : > { %8763 = vmatpush3.bf16.msra.mxu0 %v9947_v27  ;;  %9598 = vmatpush3.bf16.msra.mxu1 %v9947_v27  ;;  %v11210_v27 = vld [vmem:[%s15405_s1 + $0x1] ss:$0 sm:$0xff] }
  0x22   : > { %8764 = vmatprep.subr.bf16.mxu0 %v9948_v28  ;;  %9591 = vmatprep.subr.bf16.mxu1 %v9948_v28 }
  0x24   : > { %294 = vperm.xlu1 %9619, %v11086_v9   ;;  %289 = vperm.xlu0 %9618, %v237_v10  }
  0x25   : > { %8765 = vmatpush3.bf16.msra.mxu0 %v9949_v29  ;;  %9599 = vmatpush3.bf16.msra.mxu1 %v9949_v29 }
  0x26   : > { %8766 = vmatprep.subr.bf16.mxu0 %v9950_v30  ;;  %9592 = vmatprep.subr.bf16.mxu1 %v9950_v30 }
  0x28   : > { %304 = vperm.xlu1 %9619, %v11088_v11   ;;  %299 = vperm.xlu0 %9618, %v11090_v12  }
  0x29   : > { %8767 = vmatpush3.bf16.msra.mxu0 %v9951_v31  ;;  %9600 = vmatpush3.bf16.msra.mxu1 %v9951_v31 }
  0x2a   : > { %8768 = vmatprep.subr.bf16.mxu0 %v9952_v32  ;;  %9593 = vmatprep.subr.bf16.mxu1 %v9952_v32  ;;  %v11216_v32 = vld [vmem:[%s15406_s2 + $0x1] ss:$0 sm:$0xff] }
  0x2c   : > { %314 = vperm.xlu1 %9619, %v11093_v13   ;;  %309 = vperm.xlu0 %9618, %v11095_v14  }
  0x2d   : > { %8769 = vmatpush3.bf16.msra.mxu0 %v9953_v33  ;;  %9601 = vmatpush3.bf16.msra.mxu1 %v9953_v33 }
  0x30   : > { %324 = vperm.xlu1 %9619, %v11099_v15   ;;  %319 = vperm.xlu0 %9618, %v11101_v16  }
  0x34   : > { %9621 = vset.pattern.permute.xlu1 %v15410_v21  ;;  %9620 = vset.pattern.permute.xlu0 %v15410_v21 }
  0x35   : > { %454 = vperm.xlu1 %9621, %v230_v4   ;;  %450 = vperm.xlu0 %9620, %v229_v2  }
  0x39   : > { %458 = vperm.xlu1 %9621, %v231_v1   ;;  %462 = vperm.xlu0 %9620, %v232_v3  }
  0x3d   : > { %466 = vperm.xlu1 %9621, %v233_v6   ;;  %470 = vperm.xlu0 %9620, %v234_v5  }
  0x41   : > { %474 = vperm.xlu1 %9621, %v235_v8   ;;  %478 = vperm.xlu0 %9620, %v236_v7  }
  0x45   : > { %482 = vperm.xlu1 %9621, %v237_v10   ;;  %486 = vperm.xlu0 %9620, %v11086_v9  }
  0x49   : > { %490 = vperm.xlu1 %9621, %v11090_v12   ;;  %494 = vperm.xlu0 %9620, %v11088_v11  }
  0x4d   : > { %498 = vperm.xlu1 %9621, %v11095_v14   ;;  %502 = vperm.xlu0 %9620, %v11093_v13  }
  0x51   : > { %506 = vperm.xlu1 %9621, %v11101_v16   ;;  %510 = vperm.xlu0 %9620, %v11099_v15  }
  0x55   : > { %9622 = vset.pattern.permute.xlu1 %v15416_v0  ;;  %9623 = vset.pattern.permute.xlu0 %v15416_v0 }
  0x93   : > { %v260_v34 = vpop.permute.xlu1 %259  ;;  %v250_v35 = vpop.permute.xlu0 %249 }
  0x94   : > { %v333_v44 = vsub.f32 %v260_v34, %v11169_v40  ;;  %v331_v45 = vsub.f32 %v250_v35, %v11169_v40 }
  0x96   : > { %v353_v50 = vmul.f32 %v11174_v43, %v333_v44  ;;  %v351_v52 = vmul.f32 %v11174_v43, %v331_v45 }
  0x97   : > { %v265_v36 = vpop.permute.xlu1 %264  ;;  %v255_v37 = vpop.permute.xlu0 %254 }
  0x98   : > { %v334_v46 = vsub.f32 %v265_v36, %v11169_v40  ;;  %v332_v47 = vsub.f32 %v255_v37, %v11169_v40  ;;  %v369_v60 = vmul.f32 %v353_v50, %v353_v50  ;;  %v367_v62 = vmul.f32 %v351_v52, %v351_v52 }
  0x9a   : > { %v354_v54 = vmul.f32 %v11174_v43, %v334_v46  ;;  %v352_v56 = vmul.f32 %v11174_v43, %v332_v47  ;;  %v385_v7 = vsub.f32 0.0, %v369_v60  ;;  %v383_v9 = vsub.f32 0.0, %v367_v62 }
  0x9b   : > { %v275_v38 = vpop.permute.xlu1 %274  ;;  %v270_v39 = vpop.permute.xlu0 %269 }
  0x9c   : > { %v336_v51 = vsub.f32 %v275_v38, %v11169_v40  ;;  %v335_v53 = vsub.f32 %v270_v39, %v11169_v40  ;;  %v370_v1 = vmul.f32 %v354_v54, %v354_v54  ;;  %v368_v3 = vmul.f32 %v352_v56, %v352_v56 }
  0x9d   : > { %v403_v18 = vmul.f32 1.442695, %v385_v7  ;;  %v399_v22 = vmul.f32 1.442695, %v383_v9 }
  0x9e   : > { %v356_v61 = vmul.f32 %v11174_v43, %v336_v51  ;;  %v355_v63 = vmul.f32 %v11174_v43, %v335_v53  ;;  %v386_v11 = vsub.f32 0.0, %v370_v1  ;;  %v384_v14 = vsub.f32 0.0, %v368_v3 }
  0x9f   : > { %v285_v41 = vpop.permute.xlu1 %284  ;;  %v280_v42 = vpop.permute.xlu0 %279  ;;  %10146 = vpow2.f32 %v403_v18 }
  0xa0   : > { %v338_v55 = vsub.f32 %v285_v41, %v11169_v40  ;;  %v337_v57 = vsub.f32 %v280_v42, %v11169_v40  ;;  %v372_v8 = vmul.f32 %v356_v61, %v356_v61  ;;  %v371_v10 = vmul.f32 %v355_v63, %v355_v63 }
  0xa1   : > { %v405_v24 = vmul.f32 1.442695, %v386_v11  ;;  %v401_v28 = vmul.f32 1.442695, %v384_v14  ;;  %10148 = vpow2.f32 %v399_v22 }
  0xa2   : > { %v358_v2 = vmul.f32 %v11174_v43, %v338_v55  ;;  %v357_v4 = vmul.f32 %v11174_v43, %v337_v57  ;;  %v388_v19 = vsub.f32 0.0, %v372_v8  ;;  %v387_v23 = vsub.f32 0.0, %v371_v10 }
  0xa3   : > { %v295_v48 = vpop.permute.xlu1 %294  ;;  %v290_v49 = vpop.permute.xlu0 %289  ;;  %10150 = vpow2.f32 %v405_v24 }
  0xa4   : > { %v374_v12 = vmul.f32 %v358_v2, %v358_v2  ;;  %v340_v13 = vsub.f32 %v295_v48, %v11169_v40  ;;  %v373_v15 = vmul.f32 %v357_v4, %v357_v4  ;;  %v339_v20 = vsub.f32 %v290_v49, %v11169_v40 }
  0xa5   : > { %v409_v30 = vmul.f32 1.442695, %v388_v19  ;;  %v407_v35 = vmul.f32 1.442695, %v387_v23  ;;  %10152 = vpow2.f32 %v401_v28 }
  0xa6   : > { %v390_v25 = vsub.f32 0.0, %v374_v12  ;;  %v360_v26 = vmul.f32 %v11174_v43, %v340_v13  ;;  %v389_v29 = vsub.f32 0.0, %v373_v15  ;;  %v359_v31 = vmul.f32 %v11174_v43, %v339_v20 }
  0xa7   : > { %v11188_v58 = vpop.permute.xlu1 %304  ;;  %v11190_v59 = vpop.permute.xlu0 %299  ;;  %10154 = vpow2.f32 %v409_v30 }
  0xa8   : > { %v413_v38 = vmul.f32 1.442695, %v390_v25  ;;  %v376_v39 = vmul.f32 %v360_v26, %v360_v26  ;;  %v411_v41 = vmul.f32 1.442695, %v389_v29  ;;  %v375_v45 = vmul.f32 %v359_v31, %v359_v31 }
  0xa9   : > { %v342_v46 = vsub.f32 %v11188_v58, %v11169_v40  ;;  %v341_v47 = vsub.f32 %v11190_v59, %v11169_v40  ;;  %10156 = vpow2.f32 %v407_v35  ;;  %v11233_v7 = vpop.eup %10146 }
  0xaa   : > { %10158 = vpow2.f32 %v413_v38  ;;  %v392_v53 = vsub.f32 0.0, %v376_v39  ;;  %v391_v58 = vsub.f32 0.0, %v375_v45 }
  0xab   : > { %v11196_v5 = vpop.permute.xlu1 %314  ;;  %v11198_v6 = vpop.permute.xlu0 %309  ;;  %10160 = vpow2.f32 %v411_v41  ;;  %v362_v60 = vmul.f32 %v11174_v43, %v342_v46  ;;  %v361_v59 = vmul.f32 %v11174_v43, %v341_v47 }
  0xac   : > { %v417_v8 = vmul.f32 1.442695, %v392_v53  ;;  %v344_v9 = vsub.f32 %v11196_v5, %v11169_v40  ;;  %v11238_v12 = vpop.eup %10148  ;;  %v343_v13 = vsub.f32 %v11198_v6, %v11169_v40  ;;  %v415_v19 = vmul.f32 1.442695, %v391_v58 }
  0xad   : > { %v11243_v18 = vpop.eup %10150  ;;  %v378_v30 = vmul.f32 %v362_v60, %v362_v60  ;;  %v11258_v39 = vmul.f32 %v361_v59, %v361_v59 }
  0xae   : > { %v364_v41 = vmul.f32 %v11174_v43, %v344_v9 }
  0xaf   : > { %v11201_v16 = vpop.permute.xlu1 %324  ;;  %v11203_v17 = vpop.permute.xlu0 %319 }
  0xb0   : > { %v11246_v24 = vpop.eup %10152 }
  0xb1   : > { %v11250_v29 = vpop.eup %10154 }
  0xb4   : > { %v455_v33 = vpop.permute.xlu1 %454  ;;  %v451_v34 = vpop.permute.xlu0 %450 }
  0xb5   : > { %v518_v36 = vsub.f32 %v455_v33, %v11210_v27  ;;  %v517_v37 = vsub.f32 %v451_v34, %v11210_v27  ;;  %v11252_v34 = vpop.eup %10156 }
  0xb6   : > { %v11256_v38 = vpop.eup %10158 }
  0xb7   : > { %v538_v42 = vmul.f32 %v11216_v32, %v518_v36  ;;  %v537_v44 = vmul.f32 %v11216_v32, %v517_v37  ;;  %v11261_v46 = vpop.eup %10160 }
  0xb8   : > { %v459_v48 = vpop.permute.xlu1 %458  ;;  %v463_v49 = vpop.permute.xlu0 %462 }
  0xb9   : > { %v554_v50 = vmul.f32 %v538_v42, %v538_v42  ;;  %v553_v51 = vmul.f32 %v537_v44, %v537_v44  ;;  %v519_v52 = vsub.f32 %v459_v48, %v11210_v27  ;;  %v520_v54 = vsub.f32 %v463_v49, %v11210_v27 }
  0xbb   : > { %v570_v55 = vsub.f32 0.0, %v554_v50  ;;  %v569_v56 = vsub.f32 0.0, %v553_v51  ;;  %v539_v57 = vmul.f32 %v11216_v32, %v519_v52  ;;  %v540_v61 = vmul.f32 %v11216_v32, %v520_v54 }
  0xbc   : > { %v467_v62 = vpop.permute.xlu1 %466  ;;  %v471_v63 = vpop.permute.xlu0 %470  ;;  %v363_v51 = vmul.f32 %v11174_v43, %v343_v13 }
  0xbd   : > { %v587_v1 = vmul.f32 1.442695, %v570_v55  ;;  %v585_v2 = vmul.f32 1.442695, %v569_v56  ;;  %v555_v3 = vmul.f32 %v539_v57, %v539_v57  ;;  %v521_v4 = vsub.f32 %v467_v62, %v11210_v27 }
  0xbe   : > { %v556_v10 = vmul.f32 %v540_v61, %v540_v61  ;;  %v522_v11 = vsub.f32 %v471_v63, %v11210_v27  ;;  %v394_v57 = vsub.f32 0.0, %v378_v30  ;;  %v431_v61 = vpack.c.bf16 %v11246_v24, %v11238_v12 }
  0xbf   : > { %10162 = vpow2.f32 %v587_v1  ;;  %v571_v14 = vsub.f32 0.0, %v555_v3  ;;  %v541_v15 = vmul.f32 %v11216_v32, %v521_v4  ;;  %v393_v63 = vsub.f32 0.0, %v11258_v39 }
  0xc0   : > { %10164 = vpow2.f32 %v585_v2  ;;  %v572_v20 = vsub.f32 0.0, %v556_v10  ;;  %v542_v22 = vmul.f32 %v11216_v32, %v522_v11  ;;  %v475_v5 = vpop.permute.xlu1 %474  ;;  %v479_v23 = vpop.permute.xlu0 %478  ;;  %v11275_v13 = vmul.f32 %v363_v51, %v363_v51 }
  0xc1   : > { %v589_v25 = vmul.f32 1.442695, %v571_v14  ;;  %v557_v26 = vmul.f32 %v541_v15, %v541_v15  ;;  %v523_v28 = vsub.f32 %v475_v5, %v11210_v27  ;;  %v524_v6 = vsub.f32 %v479_v23, %v11210_v27 }
  0xc2   : > { %10166 = vpow2.f32 %v417_v8  ;;  %v591_v31 = vmul.f32 1.442695, %v572_v20  ;;  %v558_v33 = vmul.f32 %v542_v22, %v542_v22  ;;  %v11272_v8 = vmul.f32 %v364_v41, %v364_v41 }
  0xc3   : > { %10168 = vpow2.f32 %v589_v25  ;;  %v573_v35 = vsub.f32 0.0, %v557_v26  ;;  %v543_v36 = vmul.f32 %v11216_v32, %v523_v28  ;;  %v544_v37 = vmul.f32 %v11216_v32, %v524_v6 }
  0xc4   : > { %10170 = vpow2.f32 %v591_v31  ;;  %v574_v42 = vsub.f32 0.0, %v558_v33  ;;  %v483_v44 = vpop.permute.xlu1 %482  ;;  %v487_v45 = vpop.permute.xlu0 %486  ;;  %v346_v20 = vsub.f32 %v11201_v16, %v11169_v40  ;;  %v421_v33 = vmul.f32 1.442695, %v394_v57 }
  0xc5   : > { %v593_v47 = vmul.f32 1.442695, %v573_v35  ;;  %v559_v48 = vmul.f32 %v543_v36, %v543_v36  ;;  %v560_v49 = vmul.f32 %v544_v37, %v544_v37  ;;  %v525_v50 = vsub.f32 %v483_v44, %v11210_v27 }
  0xc6   : > { %10172 = vpow2.f32 %v415_v19  ;;  %v595_v52 = vmul.f32 1.442695, %v574_v42  ;;  %v526_v53 = vsub.f32 %v487_v45, %v11210_v27  ;;  %v345_v42 = vsub.f32 %v11203_v17, %v11169_v40 }
  0xc7   : > { %10174 = vpow2.f32 %v593_v47  ;;  %v575_v54 = vsub.f32 0.0, %v559_v48  ;;  %v576_v55 = vsub.f32 0.0, %v560_v49  ;;  %v545_v56 = vmul.f32 %v11216_v32, %v525_v50 }
  0xc8   : > { %10176 = vpow2.f32 %v595_v52  ;;  %v546_v58 = vmul.f32 %v11216_v32, %v526_v53  ;;  %v491_v60 = vpop.permute.xlu1 %490  ;;  %v495_v59 = vpop.permute.xlu0 %494 }
  0xc9   : > { %v10163_v62 = vpop.eup %10162  ;;  %v597_v1 = vmul.f32 1.442695, %v575_v54  ;;  %v561_v2 = vmul.f32 %v545_v56, %v545_v56  ;;  %v527_v3 = vsub.f32 %v491_v60, %v11210_v27  ;;  %v599_v9 = vmul.f32 1.442695, %v576_v55 }
  0xca   : > { %v10165_v4 = vpop.eup %10164  ;;  %v562_v10 = vmul.f32 %v546_v58, %v546_v58  ;;  %v528_v11 = vsub.f32 %v495_v59, %v11210_v27  ;;  %v419_v55 = vmul.f32 1.442695, %v393_v63  ;;  %v396_v60 = vsub.f32 0.0, %v11272_v8 }
  0xcb   : > { %v577_v14 = vsub.f32 0.0, %v561_v2  ;;  %v547_v15 = vmul.f32 %v11216_v32, %v527_v3  ;;  %v617_v12 = vpack.c.bf16 %v10163_v62, %v10165_v4  ;;  %10178 = vpow2.f32 %v597_v1 }
  0xcc   : > { %v11278_v19 = vpop.eup %10166  ;;  %v578_v22 = vsub.f32 0.0, %v562_v10  ;;  %v548_v5 = vmul.f32 %v11216_v32, %v528_v11  ;;  %v499_v23 = vpop.permute.xlu1 %498  ;;  %10180 = vpow2.f32 %v599_v9  ;;  %v366_v4 = vmul.f32 %v11174_v43, %v346_v20 }
  0xcd   : > { %v503_v24 = vpop.permute.xlu0 %502  ;;  %v10169_v25 = vpop.eup %10168  ;;  %v601_v26 = vmul.f32 1.442695, %v577_v14  ;;  %v563_v28 = vmul.f32 %v547_v15, %v547_v15  ;;  %v529_v6 = vsub.f32 %v499_v23, %v11210_v27  ;;  %809 = vmatprep.mubr.bf16.mxu0 %v617_v12  ;;  %v365_v8 = vmul.f32 %v11174_v43, %v345_v42 }
  0xce   : > { %v530_v30 = vsub.f32 %v503_v24, %v11210_v27  ;;  %v10171_v31 = vpop.eup %10170  ;;  %v603_v35 = vmul.f32 1.442695, %v578_v22  ;;  %v564_v36 = vmul.f32 %v548_v5, %v548_v5  ;;  %810 = vmatmul.mubr.bf16.vlgmr.msra.gmra.mrb[0].mxu0 %v431_v61  ;;  %v432_v61 = vpack.c.bf16 %v11243_v18, %v11233_v7 }
  0xcf   : > { %10182 = vpow2.f32 %v601_v26  ;;  %v579_v16 = vsub.f32 0.0, %v563_v28  ;;  %v549_v37 = vmul.f32 %v11216_v32, %v529_v6  ;;  %v618_v47 = vpack.c.bf16 %v10171_v31, %v10169_v25 }
  0xd0   : > { %v550_v39 = vmul.f32 %v11216_v32, %v530_v30  ;;  %v11287_v41 = vpop.eup %10172  ;;  %10184 = vpow2.f32 %v603_v35  ;;  %v580_v44 = vsub.f32 0.0, %v564_v36  ;;  %v507_v45 = vpop.permute.xlu1 %506  ;;  %v425_v11 = vmul.f32 1.442695, %v396_v60 }
  0xd1   : > { %v511_v48 = vpop.permute.xlu0 %510  ;;  %v10175_v49 = vpop.eup %10174  ;;  %v605_v50 = vmul.f32 1.442695, %v579_v16  ;;  %v565_v51 = vmul.f32 %v549_v37, %v549_v37  ;;  %v531_v53 = vsub.f32 %v507_v45, %v11210_v27  ;;  %10186 = vpow2.f32 %v421_v33  ;;  %817 = vmatprep.mubr.bf16.mxu0 %v618_v47 }
  0xd2   : > { %v566_v52 = vmul.f32 %v550_v39, %v550_v39  ;;  %v10177_v54 = vpop.eup %10176  ;;  %v607_v56 = vmul.f32 1.442695, %v580_v44  ;;  %v532_v57 = vsub.f32 %v511_v48, %v11210_v27  ;;  %v395_v27 = vsub.f32 0.0, %v11275_v13 }
  0xd3   : > { %10188 = vpow2.f32 %v605_v50  ;;  %v581_v40 = vsub.f32 0.0, %v565_v51  ;;  %v551_v58 = vmul.f32 %v11216_v32, %v531_v53  ;;  %v619_v2 = vpack.c.bf16 %v10177_v54, %v10175_v49  ;;  %v11310_v51 = vld [vmem:[%s15408_s4] ss:$0 sm:$0xff]  ;;  %v11315_v54 = vld [vmem:[%s15408_s4 + $0x1] ss:$0 sm:$0xff] }
  0xd4   : > { %v582_v17 = vsub.f32 0.0, %v566_v52  ;;  %10190 = vpow2.f32 %v607_v56  ;;  %v552_v59 = vmul.f32 %v11216_v32, %v532_v57  ;;  %v423_v15 = vmul.f32 1.442695, %v395_v27 }
  0xd5   : > { %v609_v62 = vmul.f32 1.442695, %v581_v40  ;;  %v567_v63 = vmul.f32 %v551_v58, %v551_v58  ;;  %v10179_v3 = vpop.eup %10178  ;;  %10192 = vpow2.f32 %v419_v55  ;;  %v382_v12 = vmul.f32 %v366_v4, %v366_v4 }
  0xd6   : > { %v611_v1 = vmul.f32 1.442695, %v582_v17  ;;  %v568_v9 = vmul.f32 %v552_v59, %v552_v59  ;;  %818 = vmatmul.mubr.bf16.gmra.mrb[4].mxu0 %v432_v61  ;;  %v10181_v32 = vpop.eup %10180  ;;  %v381_v22 = vmul.f32 %v365_v8, %v365_v8  ;;  %v433_v24 = vpack.c.bf16 %v11250_v29, %v11252_v34 }
  0xd7   : > { %10194 = vpow2.f32 %v609_v62  ;;  %v583_v10 = vsub.f32 0.0, %v567_v63  ;;  %825 = vmatprep.mubr.bf16.mxu0 %v619_v2  ;;  %v435_v43 = vpack.c.bf16 %v11278_v19, %v11287_v41  ;;  %v620_v26 = vpack.c.bf16 %v10181_v32, %v10179_v3 }
  0xd8   : > { %10196 = vpow2.f32 %v611_v1  ;;  %v584_v7 = vsub.f32 0.0, %v568_v9  ;;  %v398_v6 = vsub.f32 0.0, %v382_v12  ;;  %v397_v30 = vsub.f32 0.0, %v381_v22 }
  0xd9   : > { %v10183_v18 = vpop.eup %10182  ;;  %v613_v5 = vmul.f32 1.442695, %v583_v10  ;;  %10198 = vpow2.f32 %v425_v11  ;;  %v434_v36 = vpack.c.bf16 %v11256_v38, %v11261_v46 }
  0xda   : > { %v10185_v14 = vpop.eup %10184  ;;  %v615_v20 = vmul.f32 1.442695, %v584_v7  ;;  %10200 = vpow2.f32 %v423_v15  ;;  %v429_v34 = vmul.f32 1.442695, %v398_v6  ;;  %v427_v19 = vmul.f32 1.442695, %v397_v30 }
  0xdb   : > { %v621_v13 = vpack.c.bf16 %v10185_v14, %v10183_v18  ;;  %v10187_v23 = vpop.eup %10186  ;;  %10202 = vpow2.f32 %v613_v5 }
  0xdc   : > { %10204 = vpow2.f32 %v615_v20 }
  0xdd   : > { %v10189_v25 = vpop.eup %10188  ;;  %841 = vmatprep.mubr.bf16.mxu1 %v621_v13  ;;  %10206 = vpow2.f32 %v429_v34 }
  0xde   : > { %v10191_v28 = vpop.eup %10190  ;;  %826 = vmatmul.mubr.bf16.gmra.mrb[8].mxu0 %v433_v24  ;;  %842 = vmatmul.mubr.bf16.vlgmr.msra.gmra.mrb[0].mxu1 %v435_v43  ;;  %10208 = vpow2.f32 %v427_v19 }
  0xdf   : > { %833 = vmatprep.mubr.bf16.mxu0 %v620_v26  ;;  %v622_v31 = vpack.c.bf16 %v10191_v28, %v10189_v25  ;;  %v10193_v33 = vpop.eup %10192 }
  0xe0   : > { %v436_v16 = vpack.c.bf16 %v10187_v23, %v10193_v33 }
  0xe1   : > { %v10195_v35 = vpop.eup %10194  ;;  %849 = vmatprep.mubr.bf16.mxu1 %v622_v31 }
  0xe2   : > { %v10197_v29 = vpop.eup %10196 }
  0xe3   : > { %v623_v37 = vpack.c.bf16 %v10197_v29, %v10195_v35  ;;  %v10199_v39 = vpop.eup %10198 }
  0xe4   : > { %v10201_v41 = vpop.eup %10200 }
  0xe5   : > { %v10203_v42 = vpop.eup %10202  ;;  %v437_v45 = vpack.c.bf16 %v10199_v39, %v10201_v41 }
  0xe6   : > { %834 = vmatmul.mubr.bf16.gmra.mrb[12].mxu0 %v434_v36  ;;  %850 = vmatmul.mubr.bf16.gmra.mrb[4].mxu1 %v436_v16  ;;  %v10205_v44 = vpop.eup %10204  ;;  %v15418_v16 = vmov 2  }
  0xe7   : > { %857 = vmatprep.mubr.bf16.mxu1 %v623_v37  ;;  %v624_v47 = vpack.c.bf16 %v10205_v44, %v10203_v42  ;;  %v10207_v48 = vpop.eup %10206 }
  0xe8   : > { %v10209_v49 = vpop.eup %10208 }
  0xe9   : > { %v438_v50 = vpack.c.bf16 %v10207_v48, %v10209_v49 }
  0xee   : > { %858 = vmatmul.mubr.bf16.gmra.mrb[8].mxu1 %v437_v45 }
  0xef   : > { %865 = vmatprep.mubr.bf16.mxu1 %v624_v47  ;;  %v15412_v47 = vmov 3  }
  0xf6   : > { %866 = vmatmul.mubr.bf16.gmra.mrb[12].mxu1 %v438_v50 }
 0x1a1   : > { %v8770_v38 = vpop.f32.mrb[0].mxu0 }
 0x1a2   : > { %v8771_v46 = vpop.f32.mrb[1].mxu0 }
 0x1a3   : > { %v8772_v52 = vadd.f32 %v8771_v46, %v8770_v38  ;;  %v8773_v53 = vpop.f32.mrb[2].mxu0 }
 0x1a4   : > { %v8774_v55 = vpop.f32.mrb[3].mxu0 }
 0x1a5   : > { %v879_v56 = vmul.f32 %v8772_v52, %v11310_v51  ;;  %v11318_v57 = vadd.f32 %v8774_v55, %v8773_v53 }
 0x1a7   : > { %v11321_v40 = vadd.f32 %v11315_v54, %v879_v56  ;;  %v15414_v56 = vmov 4  }
 0x1a9   : > { %920 = vperm.xlu1 %9622, %v11321_v40   ;;  %v8776_v17 = vpop.f32.mrb[4].mxu0 }
 0x1aa   : > { %v8777_v58 = vpop.f32.mrb[5].mxu0 }
 0x1ab   : > { %v8778_v60 = vadd.f32 %v8777_v58, %v8776_v17  ;;  %v8779_v59 = vpop.f32.mrb[6].mxu0 }
 0x1ac   : > { %v8780_v61 = vpop.f32.mrb[7].mxu0 }
 0x1ad   : > { %v881_v62 = vmul.f32 %v8778_v60, %v11310_v51  ;;  %v8781_v1 = vadd.f32 %v8780_v61, %v8779_v59  ;;  %9625 = vset.pattern.permute.xlu1 %v15410_v21 }
 0x1af   : > { %v11327_v63 = vadd.f32 %v11315_v54, %v881_v62  ;;  %v882_v2 = vmul.f32 %v8781_v1, %v11310_v51  ;;  %v15422_v1 = vmov 5  }
 0x1b1   : > { %v11331_v3 = vadd.f32 %v11315_v54, %v882_v2  ;;  %v8782_v27 = vpop.f32.mrb[8].mxu0  ;;  %v8794_v4 = vpop.f32.mrb[0].mxu1 }
 0x1b2   : > { %v8783_v9 = vpop.f32.mrb[9].mxu0  ;;  %v8795_v8 = vpop.f32.mrb[1].mxu1 }
 0x1b3   : > { %v8784_v10 = vadd.f32 %v8783_v9, %v8782_v27  ;;  %v8796_v32 = vadd.f32 %v8795_v8, %v8794_v4  ;;  %v8785_v7 = vpop.f32.mrb[10].mxu0  ;;  %v8797_v18 = vpop.f32.mrb[2].mxu1  ;;  %v880_v27 = vmul.f32 %v11318_v57, %v11310_v51  ;;  %v9954_v8 = vld [vmem:[%s15407_s3 + $0x240] sm:$0xff]  }
 0x1b4   : > { %v8786_v11 = vpop.f32.mrb[11].mxu0  ;;  %v8798_v14 = vpop.f32.mrb[3].mxu1  ;;  %v9955_v57 = vld [vmem:[%s15407_s3 + $0x200] sm:$0xff]   ;;  %8818 = vmatprep.subr.bf16.mxu1 %v9954_v8 }
 0x1b5   : > { %v883_v15 = vmul.f32 %v8784_v10, %v11310_v51  ;;  %v887_v12 = vmul.f32 %v8796_v32, %v11310_v51  ;;  %v8787_v22 = vadd.f32 %v8786_v11, %v8785_v7  ;;  %v8799_v5 = vadd.f32 %v8798_v14, %v8797_v18  ;;  %8819 = vmatpush3.bf16.msra.mxu1 %v9955_v57  ;;  %v9956_v14 = vld [vmem:[%s15407_s3 + $0x248] sm:$0xff]   ;;  %v9970_v8 = vld [vmem:[%s15407_s3 + $0x2c0] sm:$0xff]  }
 0x1b6   : > { %v11403_v18 = vadd.f32 %v11315_v54, %v880_v27  ;;  %8820 = vmatprep.subr.bf16.mxu1 %v9956_v14  ;;  %v9971_v57 = vld [vmem:[%s15407_s3 + $0x280] sm:$0xff]   ;;  %8882 = vmatprep.subr.bf16.mxu0 %v9970_v8  ;;  %v9977_v8 = vld [vmem:[%s15407_s3 + $0x298] sm:$0xff]  }
 0x1b7   : > { %v11336_v13 = vadd.f32 %v11315_v54, %v883_v15  ;;  %v11339_v23 = vadd.f32 %v11315_v54, %v887_v12  ;;  %v884_v20 = vmul.f32 %v8787_v22, %v11310_v51  ;;  %v888_v62 = vmul.f32 %v8799_v5, %v11310_v51  ;;  %v9957_v15 = vld [vmem:[%s15407_s3 + $0x208] sm:$0xff]   ;;  %v9958_v12 = vld [vmem:[%s15407_s3 + $0x250] sm:$0xff]   ;;  %v9960_v5 = vld [vmem:[%s15407_s3 + $0x258] sm:$0xff]   ;;  %8883 = vmatpush3.bf16.msra.mxu0 %v9971_v57 }
 0x1b8   : > { %v9959_v22 = vld [vmem:[%s15407_s3 + $0x210] sm:$0xff]   ;;  %v9978_v57 = vld [vmem:[%s15407_s3 + $0x2e0] sm:$0xff]  }
 0x1b9   : > { %v11343_v24 = vadd.f32 %v11315_v54, %v884_v20  ;;  %v8788_v43 = vpop.f32.mrb[12].mxu0  ;;  %1153 = vperm.xlu1 %9625, %v11339_v23   ;;  %960 = vperm.xlu0 %9623, %v11339_v23   ;;  %v8800_v25 = vpop.f32.mrb[4].mxu1  ;;  %v11400_v7 = vadd.f32 %v11315_v54, %v888_v62  ;;  %v9961_v20 = vld [vmem:[%s15407_s3 + $0x218] sm:$0xff]  }
 0x1ba   : > { %v8789_v26 = vpop.f32.mrb[13].mxu0  ;;  %v8801_v28 = vpop.f32.mrb[5].mxu1  ;;  %8821 = vmatpush3.bf16.msra.mxu1 %v9957_v15 }
 0x1bb   : > { %v8790_v6 = vadd.f32 %v8789_v26, %v8788_v43  ;;  %v11347_v30 = vadd.f32 %v8801_v28, %v8800_v25  ;;  %v8791_v31 = vpop.f32.mrb[14].mxu0  ;;  %v8803_v33 = vpop.f32.mrb[6].mxu1  ;;  %8822 = vmatprep.subr.bf16.mxu1 %v9958_v12  ;;  %v9962_v43 = vld [vmem:[%s15407_s3 + $0x260] sm:$0xff]   ;;  %v9964_v28 = vld [vmem:[%s15407_s3 + $0x268] sm:$0xff]  }
 0x1bc   : > { %v8792_v35 = vpop.f32.mrb[15].mxu0  ;;  %v8804_v29 = vpop.f32.mrb[7].mxu1  ;;  %v9963_v25 = vld [vmem:[%s15407_s3 + $0x220] sm:$0xff]  }
 0x1bd   : > { %v885_v34 = vmul.f32 %v8790_v6, %v11310_v51  ;;  %v8793_v19 = vadd.f32 %v8792_v35, %v8791_v31  ;;  %v8805_v36 = vadd.f32 %v8804_v29, %v8803_v33  ;;  %9626 = vset.pattern.permute.xlu1 %v15418_v16  ;;  %9624 = vset.pattern.permute.xlu0 %v15410_v21  ;;  %v9965_v6 = vld [vmem:[%s15407_s3 + $0x228] sm:$0xff]   ;;  %v9969_v33 = vld [vmem:[%s15407_s3 + $0x238] sm:$0xff]  }
 0x1be   : > { %1307 = vperm.xlu1 %9626, %v11321_v40   ;;  %1121 = vperm.xlu0 %9624, %v11321_v40   ;;  %v889_v26 = vmul.f32 %v11347_v30, %v11310_v51  ;;  %v9967_v30 = vld [vmem:[%s15407_s3 + $0x230] sm:$0xff]  }
 0x1bf   : > { %v11354_v37 = vadd.f32 %v11315_v54, %v885_v34  ;;  %v886_v39 = vmul.f32 %v8793_v19, %v11310_v51  ;;  %v890_v41 = vmul.f32 %v8805_v36, %v11310_v51  ;;  %8823 = vmatpush3.bf16.msra.mxu1 %v9959_v22 }
 0x1c0   : > { %8824 = vmatprep.subr.bf16.mxu1 %v9960_v5  ;;  %v11457_v31 = vadd.f32 %v11315_v54, %v889_v26 }
 0x1c1   : > { %v11360_v42 = vadd.f32 %v11315_v54, %v886_v39  ;;  %v11363_v44 = vadd.f32 %v11315_v54, %v890_v41  ;;  %v8806_v45 = vpop.f32.mrb[8].mxu1 }
 0x1c2   : > { %9628 = vset.pattern.permute.xlu1 %v15412_v47  ;;  %v8807_v48 = vpop.f32.mrb[9].mxu1  ;;  %9627 = vset.pattern.permute.xlu0 %v15418_v16 }
 0x1c3   : > { %15465 = vst [vmem:[#allocation3_spill] sm:$0xff] %v11363_v44  ;;  %v8808_v49 = vadd.f32 %v8807_v48, %v8806_v45  ;;  %1525 = vperm.xlu1 %9628, %v11339_v23   ;;  %v8809_v50 = vpop.f32.mrb[10].mxu1  ;;  %1339 = vperm.xlu0 %9627, %v11339_v23  }
 0x1c4   : > { %v8810_v38 = vpop.f32.mrb[11].mxu1  ;;  %8825 = vmatpush3.bf16.msra.mxu1 %v9961_v20 }
 0x1c5   : > { %v891_v46 = vmul.f32 %v8808_v49, %v11310_v51  ;;  %v8811_v52 = vadd.f32 %v8810_v38, %v8809_v50  ;;  %8826 = vmatprep.subr.bf16.mxu1 %v9962_v43  ;;  %v11560_v49 = vld [vmem:[%s15405_s1 + $0x9] ss:$0 sm:$0xff]  ;;  %v11565_v50 = vld [vmem:[%s15405_s1 + $0x8] ss:$0 sm:$0xff] }
 0x1c6   : > { %v9972_v43 = vld [vmem:[%s15407_s3 + $0x2c8] sm:$0xff]  }
 0x1c7   : > { %v11371_v53 = vadd.f32 %v11315_v54, %v891_v46  ;;  %v892_v55 = vmul.f32 %v8811_v52, %v11310_v51  ;;  %9629 = vset.pattern.permute.xlu1 %v15414_v56  ;;  %9630 = vset.pattern.permute.xlu0 %v15414_v56 }
 0x1c8   : > { %1679 = vperm.xlu1 %9629, %v11321_v40   ;;  %1711 = vperm.xlu0 %9630, %v11339_v23  }
 0x1c9   : > { %v11378_v17 = vadd.f32 %v11315_v54, %v892_v55  ;;  %v8812_v58 = vpop.f32.mrb[12].mxu1  ;;  %8827 = vmatpush3.bf16.msra.mxu1 %v9963_v25  ;;  %8884 = vmatprep.subr.bf16.mxu0 %v9972_v43 }
 0x1ca   : > { %v8813_v60 = vpop.f32.mrb[13].mxu1  ;;  %8828 = vmatprep.subr.bf16.mxu1 %v9964_v28  ;;  %v9973_v28 = vld [vmem:[%s15407_s3 + $0x288] sm:$0xff]  }
 0x1cb   : > { %v8814_v59 = vadd.f32 %v8813_v60, %v8812_v58  ;;  %v8815_v61 = vpop.f32.mrb[14].mxu1  ;;  %v11579_v58 = vld [vmem:[%s15406_s2 + $0x9] ss:$0 sm:$0xff]  ;;  %v11584_v60 = vld [vmem:[%s15406_s2 + $0x8] ss:$0 sm:$0xff]  ;;  %8885 = vmatpush3.bf16.msra.mxu0 %v9973_v28 }
 0x1cc   : > { %9632 = vset.pattern.permute.xlu1 %v15422_v1  ;;  %v8816_v2 = vpop.f32.mrb[15].mxu1  ;;  %9631 = vset.pattern.permute.xlu0 %v15422_v1 }
 0x1cd   : > { %v893_v4 = vmul.f32 %v8814_v59, %v11310_v51  ;;  %v8817_v9 = vadd.f32 %v8816_v2, %v8815_v61  ;;  %1897 = vperm.xlu1 %9632, %v11339_v23   ;;  %1865 = vperm.xlu0 %9631, %v11321_v40   ;;  %v15420_v61 = vmov 7  }
 0x1ce   : > { %8829 = vmatpush3.bf16.msra.mxu1 %v9965_v6 }
 0x1cf   : > { %v11393_v10 = vadd.f32 %v11315_v54, %v893_v4  ;;  %v894_v32 = vmul.f32 %v8817_v9, %v11310_v51  ;;  %v9966_v51 = vld [vmem:[%s15407_s3 + $0x270] sm:$0xff]  }
 0x1d0   : > { %8830 = vmatprep.subr.bf16.mxu1 %v9966_v51 }
 0x1d1   : > { %v11406_v11 = vadd.f32 %v11315_v54, %v894_v32  ;;  %9634 = vset.pattern.permute.xlu1 %v15416_v0  ;;  %9633 = vset.pattern.permute.xlu0 %v15416_v0  ;;  %v9968_v54 = vld [vmem:[%s15407_s3 + $0x278] sm:$0xff]  }
 0x1d2   : > { %965 = vperm.xlu1 %9634, %v11400_v7   ;;  %925 = vperm.xlu0 %9633, %v11403_v18  }
 0x1d3   : > { %8831 = vmatpush3.bf16.msra.mxu1 %v9967_v30 }
 0x1d4   : > { %8832 = vmatprep.subr.bf16.mxu1 %v9968_v54 }
 0x1d6   : > { %9635 = vset.pattern.permute.xlu1 %v15410_v21  ;;  %9636 = vset.pattern.permute.xlu0 %v15410_v21 }
 0x1d7   : > { %1125 = vperm.xlu1 %9635, %v11403_v18   ;;  %1157 = vperm.xlu0 %9636, %v11400_v7  }
 0x1d8   : > { %8833 = vmatpush3.bf16.msra.mxu1 %v9969_v33 }
 0x1db   : > { %9638 = vset.pattern.permute.xlu1 %v15418_v16  ;;  %9637 = vset.pattern.permute.xlu0 %v15418_v16 }
 0x1dc   : > { %1343 = vperm.xlu1 %9638, %v11400_v7   ;;  %1311 = vperm.xlu0 %9637, %v11403_v18  }
 0x1e0   : > { %9639 = vset.pattern.permute.xlu1 %v15412_v47  ;;  %9640 = vset.pattern.permute.xlu0 %v15414_v56 }
 0x1e1   : > { %1497 = vperm.xlu1 %9639, %v11403_v18   ;;  %1683 = vperm.xlu0 %9640, %v11403_v18  }
 0x1e5   : > { %9641 = vset.pattern.permute.xlu1 %v15414_v56  ;;  %9644 = vset.pattern.permute.xlu0 %v15416_v0 }
 0x1e6   : > { %1715 = vperm.xlu1 %9641, %v11400_v7   ;;  %970 = vperm.xlu0 %9644, %v11457_v31  }
 0x1ea   : > { %9642 = vset.pattern.permute.xlu1 %v15422_v1  ;;  %9647 = vset.pattern.permute.xlu0 %v15418_v16 }
 0x1eb   : > { %1869 = vperm.xlu1 %9642, %v11403_v18   ;;  %1347 = vperm.xlu0 %9647, %v11457_v31  }
 0x1ef   : > { %9643 = vset.pattern.permute.xlu1 %v15416_v0  ;;  %9650 = vset.pattern.permute.xlu0 %v15414_v56 }
 0x1f0   : > { %930 = vperm.xlu1 %9643, %v11327_v63   ;;  %1719 = vperm.xlu0 %9650, %v11457_v31  }
 0x1f4   : > { %9645 = vset.pattern.permute.xlu1 %v15410_v21  ;;  %9653 = vset.pattern.permute.xlu0 %v15410_v21 }
 0x1f5   : > { %1129 = vperm.xlu1 %9645, %v11327_v63   ;;  %1133 = vperm.xlu0 %9653, %v11331_v3  }
 0x1f9   : > { %1161 = vperm.xlu1 %9645, %v11457_v31   ;;  %1165 = vperm.xlu0 %9653, %v11363_v44  }
 0x1fd   : > { %9646 = vset.pattern.permute.xlu1 %v15418_v16  ;;  %9656 = vset.pattern.permute.xlu0 %v15422_v1 }
 0x1fe   : > { %1315 = vperm.xlu1 %9646, %v11327_v63   ;;  %1877 = vperm.xlu0 %9656, %v11331_v3  }
 0x202   : > { %9648 = vset.pattern.permute.xlu1 %v15412_v47  ;;  %9657 = vset.pattern.permute.xlu0 %v15416_v0 }
 0x203   : > { %1501 = vperm.xlu1 %9648, %v11327_v63   ;;  %940 = vperm.xlu0 %9657, %v11336_v13  }
 0x207   : > { %1533 = vperm.xlu1 %9648, %v11457_v31   ;;  %980 = vperm.xlu0 %9657, %v11371_v53  }
 0x20b   : > { %9649 = vset.pattern.permute.xlu1 %v15414_v56  ;;  %9659 = vset.pattern.permute.xlu0 %v15418_v16 }
 0x20c   : > { %1687 = vperm.xlu1 %9649, %v11327_v63   ;;  %1323 = vperm.xlu0 %9659, %v11336_v13  }
 0x210   : > { %9651 = vset.pattern.permute.xlu1 %v15422_v1  ;;  %1355 = vperm.xlu0 %9659, %v11371_v53  }
 0x211   : > { %1873 = vperm.xlu1 %9651, %v11327_v63  }
 0x214   : > { %9661 = vset.pattern.permute.xlu0 %v15414_v56 }
 0x215   : > { %1905 = vperm.xlu1 %9651, %v11457_v31   ;;  %1695 = vperm.xlu0 %9661, %v11336_v13  }
 0x219   : > { %9652 = vset.pattern.permute.xlu1 %v15416_v0  ;;  %1727 = vperm.xlu0 %9661, %v11371_v53  }
 0x21a   : > { %935 = vperm.xlu1 %9652, %v11331_v3  }
 0x21d   : > { %9664 = vset.pattern.permute.xlu0 %v15410_v21 }
 0x21e   : > { %975 = vperm.xlu1 %9652, %v11363_v44   ;;  %1141 = vperm.xlu0 %9664, %v11343_v24  }
 0x222   : > { %9654 = vset.pattern.permute.xlu1 %v15418_v16  ;;  %1173 = vperm.xlu0 %9664, %v11378_v17  }
 0x223   : > { %1319 = vperm.xlu1 %9654, %v11331_v3  }
 0x226   : > { %9667 = vset.pattern.permute.xlu0 %v15422_v1 }
 0x227   : > { %1351 = vperm.xlu1 %9654, %v11363_v44   ;;  %1885 = vperm.xlu0 %9667, %v11343_v24  }
 0x228   : > { %v921_v35 = vpop.permute.xlu1 %920 }
 0x229   : > { %v1002_v55 = vsub.f32 %v921_v35, %v11565_v50 }
 0x22b   : > { %9655 = vset.pattern.permute.xlu1 %v15414_v56  ;;  %9668 = vset.pattern.permute.xlu0 %v15416_v0  ;;  %v1022_v2 = vmul.f32 %v11584_v60, %v1002_v55  ;;  %v9975_v55 = vld [vmem:[%s15407_s3 + $0x290] sm:$0xff]  }
 0x22c   : > { %1691 = vperm.xlu1 %9655, %v11331_v3   ;;  %950 = vperm.xlu0 %9668, %v11354_v37  }
 0x22d   : > { %v1038_v14 = vmul.f32 %v1022_v2, %v1022_v2 }
 0x22f   : > { %v1054_v6 = vsub.f32 0.0, %v1038_v14 }
 0x230   : > { %1723 = vperm.xlu1 %9655, %v11363_v44   ;;  %990 = vperm.xlu0 %9668, %v11393_v10  }
 0x234   : > { %9658 = vset.pattern.permute.xlu1 %v15410_v21  ;;  %9670 = vset.pattern.permute.xlu0 %v15418_v16 }
 0x235   : > { %1137 = vperm.xlu1 %9658, %v11336_v13   ;;  %1331 = vperm.xlu0 %9670, %v11354_v37  }
 0x238   : > { %v11531_v29 = vpop.permute.xlu1 %1153  ;;  %v11533_v34 = vpop.permute.xlu0 %960 }
 0x239   : > { %1169 = vperm.xlu1 %9658, %v11371_v53   ;;  %1363 = vperm.xlu0 %9670, %v11393_v10  }
 0x23d   : > { %v11537_v19 = vpop.permute.xlu1 %1307  ;;  %9660 = vset.pattern.permute.xlu1 %v15412_v47  ;;  %9672 = vset.pattern.permute.xlu0 %v15414_v56  ;;  %v1122_v36 = vpop.permute.xlu0 %1121 }
 0x23e   : > { %1509 = vperm.xlu1 %9660, %v11336_v13   ;;  %1703 = vperm.xlu0 %9672, %v11354_v37   ;;  %v1188_v38 = vsub.f32 %v1122_v36, %v11560_v49  ;;  %v9974_v36 = vld [vmem:[%s15407_s3 + $0x2d0] sm:$0xff]  }
 0x23f   : > { %8886 = vmatprep.subr.bf16.mxu0 %v9974_v36  ;;  %v9983_v36 = vld [vmem:[%s15407_s3 + $0x2b0] sm:$0xff]  }
 0x240   : > { %v1208_v59 = vmul.f32 %v11579_v58, %v1188_v38  ;;  %8887 = vmatpush3.bf16.msra.mxu0 %v9975_v55 }
 0x242   : > { %v11543_v39 = vpop.permute.xlu1 %1525  ;;  %1541 = vperm.xlu1 %9660, %v11371_v53   ;;  %1735 = vperm.xlu0 %9672, %v11393_v10   ;;  %v11547_v41 = vpop.permute.xlu0 %1339  ;;  %v1224_v4 = vmul.f32 %v1208_v59, %v1208_v59  ;;  %v1070_v59 = vmul.f32 1.442695, %v1054_v6 }
 0x244   : > { %v1240_v12 = vsub.f32 0.0, %v1224_v4  ;;  %v9976_v4 = vld [vmem:[%s15407_s3 + $0x2d8] sm:$0xff]  }
 0x245   : > { %8888 = vmatprep.subr.bf16.mxu0 %v9976_v4 }
 0x246   : > { %9662 = vset.pattern.permute.xlu1 %v15422_v1  ;;  %9675 = vset.pattern.permute.xlu0 %v15410_v21  ;;  %v1256_v51 = vmul.f32 1.442695, %v1240_v12 }
 0x247   : > { %v11551_v45 = vpop.permute.xlu1 %1679  ;;  %1881 = vperm.xlu1 %9662, %v11336_v13   ;;  %1149 = vperm.xlu0 %9675, %v11360_v42   ;;  %v11555_v48 = vpop.permute.xlu0 %1711 }
 0x248   : > { %10210 = vpow2.f32 %v1256_v51  ;;  %8889 = vmatpush3.bf16.msra.mxu0 %v9977_v8 }
 0x249   : > { %8890 = vmatprep.subr.bf16.mxu0 %v9978_v57 }
 0x24b   : > { %9663 = vset.pattern.permute.xlu1 %v15416_v0  ;;  %1181 = vperm.xlu0 %9675, %v11406_v11  }
 0x24c   : > { %v11570_v46 = vpop.permute.xlu1 %1897  ;;  %945 = vperm.xlu1 %9663, %v11343_v24   ;;  %v11573_v52 = vpop.permute.xlu0 %1865 }
 0x24f   : > { %9679 = vset.pattern.permute.xlu0 %v15420_v61 }
 0x250   : > { %985 = vperm.xlu1 %9663, %v11378_v17   ;;  %2237 = vperm.xlu0 %9679, %v11321_v40  }
 0x251   : > { %v11590_v62 = vpop.permute.xlu1 %965  ;;  %v926_v27 = vpop.permute.xlu0 %925 }
 0x252   : > { %v1003_v9 = vsub.f32 %v926_v27, %v11565_v50  ;;  %v10211_v12 = vpop.eup %10210 }
 0x254   : > { %9665 = vset.pattern.permute.xlu1 %v15418_v16  ;;  %v1023_v32 = vmul.f32 %v11584_v60, %v1003_v9  ;;  %2249 = vperm.xlu0 %9679, %v11331_v3  }
 0x255   : > { %1327 = vperm.xlu1 %9665, %v11343_v24  }
 0x256   : > { %v1126_v15 = vpop.permute.xlu1 %1125  ;;  %v1039_v22 = vmul.f32 %v1023_v32, %v1023_v32  ;;  %v11605_v20 = vpop.permute.xlu0 %1157 }
 0x257   : > { %v1189_v5 = vsub.f32 %v1126_v15, %v11560_v49  ;;  %v9979_v15 = vld [vmem:[%s15407_s3 + $0x2a0] sm:$0xff]  }
 0x258   : > { %v1055_v25 = vsub.f32 0.0, %v1039_v22  ;;  %2257 = vperm.xlu0 %9679, %v11343_v24   ;;  %8891 = vmatpush3.bf16.msra.mxu0 %v9979_v15  ;;  %v9980_v22 = vld [vmem:[%s15407_s3 + $0x2e8] sm:$0xff]  }
 0x259   : > { %v1209_v26 = vmul.f32 %v11579_v58, %v1189_v5  ;;  %1359 = vperm.xlu1 %9665, %v11378_v17   ;;  %8892 = vmatprep.subr.bf16.mxu0 %v9980_v22 }
 0x25a   : > { %v1072_v33 = vmul.f32 1.442695, %v1055_v25  ;;  %v9981_v25 = vld [vmem:[%s15407_s3 + $0x2a8] sm:$0xff]  }
 0x25b   : > { %v1225_v30 = vmul.f32 %v1209_v26, %v1209_v26  ;;  %v11616_v54 = vpop.permute.xlu1 %1343  ;;  %v11618_v35 = vpop.permute.xlu0 %1311 }
 0x25c   : > { %9683 = vset.pattern.permute.xlu0 %v15412_v47  ;;  %10212 = vpow2.f32 %v1072_v33  ;;  %8893 = vmatpush3.bf16.msra.mxu0 %v9981_v25  ;;  %v9982_v33 = vld [vmem:[%s15407_s3 + $0x2f0] sm:$0xff]  }
 0x25d   : > { %v1241_v38 = vsub.f32 0.0, %v1225_v30  ;;  %9666 = vset.pattern.permute.xlu1 %v15414_v56  ;;  %1493 = vperm.xlu0 %9683, %v11321_v40  }
 0x25e   : > { %1699 = vperm.xlu1 %9666, %v11343_v24   ;;  %8894 = vmatprep.subr.bf16.mxu0 %v9982_v33 }
 0x25f   : > { %v1258_v2 = vmul.f32 1.442695, %v1241_v38 }
 0x260   : > { %v11630_v27 = vpop.permute.xlu1 %1497  ;;  %v11635_v9 = vpop.permute.xlu0 %1683  ;;  %8895 = vmatpush3.bf16.msra.mxu0 %v9983_v36 }
 0x261   : > { %10214 = vpow2.f32 %v1258_v2  ;;  %1505 = vperm.xlu0 %9683, %v11331_v3   ;;  %v9985_v2 = vld [vmem:[%s15407_s3 + $0x2b8] sm:$0xff]  }
 0x262   : > { %10216 = vpow2.f32 %v1070_v59  ;;  %1731 = vperm.xlu1 %9666, %v11378_v17   ;;  %v9984_v59 = vld [vmem:[%s15407_s3 + $0x2f8] sm:$0xff]  }
 0x263   : > { %8896 = vmatprep.subr.bf16.mxu0 %v9984_v59 }
 0x264   : > { %8897 = vmatpush3.bf16.msra.mxu0 %v9985_v2 }
 0x265   : > { %v11642_v32 = vpop.permute.xlu1 %1715  ;;  %1513 = vperm.xlu0 %9683, %v11343_v24   ;;  %v11648_v14 = vpop.permute.xlu0 %970 }
 0x266   : > { %9669 = vset.pattern.permute.xlu1 %v15410_v21  ;;  %v10213_v5 = vpop.eup %10212 }
 0x267   : > { %1145 = vperm.xlu1 %9669, %v11354_v37  }
 0x269   : > { %1529 = vperm.xlu0 %9683, %v11400_v7  }
 0x26a   : > { %v11659_v43 = vpop.permute.xlu1 %1869  ;;  %v11664_v28 = vpop.permute.xlu0 %1347 }
 0x26b   : > { %v10215_v26 = vpop.eup %10214  ;;  %1177 = vperm.xlu1 %9669, %v11393_v10  }
 0x26c   : > { %v10217_v6 = vpop.eup %10216  ;;  %v1288_v51 = vpack.c.bf16 %v10215_v26, %v10211_v12 }
 0x26d   : > { %v1102_v30 = vpack.c.bf16 %v10213_v5, %v10217_v6  ;;  %1537 = vperm.xlu0 %9683, %v11363_v44  }
 0x26e   : > { %3028 = vmatprep.mubr.bf16.mxu1 %v1288_v51 }
 0x26f   : > { %v11674_v38 = vpop.permute.xlu1 %930  ;;  %9671 = vset.pattern.permute.xlu1 %v15412_v47  ;;  %3029 = vmatmul.mubr.bf16.vlgmr.msra.gmra.mrb[16].mxu1 %v1102_v30  ;;  %v11677_v55 = vpop.permute.xlu0 %1719 }
 0x270   : > { %1517 = vperm.xlu1 %9671, %v11354_v37  }
 0x271   : > { %1545 = vperm.xlu0 %9683, %v11378_v17  }
 0x274   : > { %v1130_v4 = vpop.permute.xlu1 %1129  ;;  %1549 = vperm.xlu1 %9671, %v11393_v10   ;;  %v1134_v57 = vpop.permute.xlu0 %1133 }
 0x275   : > { %v1190_v8 = vsub.f32 %v1130_v4, %v11560_v49  ;;  %v1191_v15 = vsub.f32 %v1134_v57, %v11560_v49  ;;  %1521 = vperm.xlu0 %9683, %v11360_v42   ;;  %v15424_v4 = vmov 6  }
 0x277   : > { %v1210_v12 = vmul.f32 %v11579_v58, %v1190_v8  ;;  %v1211_v22 = vmul.f32 %v11579_v58, %v1191_v15 }
 0x278   : > { %v11693_v5 = vpop.permute.xlu1 %1161  ;;  %9673 = vset.pattern.permute.xlu1 %v15422_v1  ;;  %v11696_v26 = vpop.permute.xlu0 %1165 }
 0x279   : > { %v1226_v25 = vmul.f32 %v1210_v12, %v1210_v12  ;;  %1889 = vperm.xlu1 %9673, %v11354_v37   ;;  %v1227_v6 = vmul.f32 %v1211_v22, %v1211_v22  ;;  %9684 = vset.pattern.permute.xlu0 %v15420_v61 }
 0x27a   : > { %2273 = vperm.xlu0 %9684, %v11400_v7  }
 0x27b   : > { %v1242_v51 = vsub.f32 0.0, %v1226_v25  ;;  %v1243_v30 = vsub.f32 0.0, %v1227_v6 }
 0x27d   : > { %v1260_v33 = vmul.f32 1.442695, %v1242_v51  ;;  %v11701_v36 = vpop.permute.xlu1 %1315  ;;  %9674 = vset.pattern.permute.xlu1 %v15416_v0  ;;  %v1262_v59 = vmul.f32 1.442695, %v1243_v30  ;;  %v11704_v2 = vpop.permute.xlu0 %1877 }
 0x27e   : > { %955 = vperm.xlu1 %9674, %v11360_v42   ;;  %9685 = vset.pattern.permute.xlu0 %v15424_v4 }
 0x27f   : > { %10218 = vpow2.f32 %v1260_v33  ;;  %2055 = vperm.xlu0 %9685, %v11403_v18   ;;  %v1004_v33 = vsub.f32 %v11674_v38, %v11565_v50  ;;  %v9988_v38 = vld [vmem:[%s15407_s3 + $0x3c0] sm:$0xff]  }
 0x280   : > { %10220 = vpow2.f32 %v1262_v59  ;;  %9010 = vmatprep.subr.bf16.mxu0 %v9988_v38 }
 0x282   : > { %v11709_v8 = vpop.permute.xlu1 %1501  ;;  %995 = vperm.xlu1 %9674, %v11406_v11   ;;  %v11712_v57 = vpop.permute.xlu0 %940 }
 0x283   : > { %2067 = vperm.xlu0 %9685, %v11336_v13  }
 0x286   : > { %v11715_v15 = vpop.permute.xlu1 %1533  ;;  %9676 = vset.pattern.permute.xlu1 %v15418_v16  ;;  %v11718_v12 = vpop.permute.xlu0 %980 }
 0x287   : > { %1335 = vperm.xlu1 %9676, %v11360_v42   ;;  %2075 = vperm.xlu0 %9685, %v11354_v37  }
 0x289   : > { %v10219_v22 = vpop.eup %10218 }
 0x28a   : > { %v10221_v25 = vpop.eup %10220 }
 0x28b   : > { %v11722_v6 = vpop.permute.xlu1 %1687  ;;  %9677 = vset.pattern.permute.xlu1 %v15422_v1  ;;  %v1289_v51 = vpack.c.bf16 %v10221_v25, %v10219_v22  ;;  %2087 = vperm.xlu0 %9685, %v11400_v7   ;;  %v11726_v30 = vpop.permute.xlu0 %1323  ;;  %v9986_v22 = vld [vmem:[%s15407_s3 + $0x340] sm:$0xff]  }
 0x28c   : > { %15466 = vst [vmem:[#allocation4_spill] sm:$0xff] %v11722_v6  ;;  %15467 = vst [vmem:[#allocation5_spill] sm:$0xff] %v11726_v30  ;;  %1913 = vperm.xlu1 %9677, %v11371_v53   ;;  %v9987_v25 = vld [vmem:[%s15407_s3 + $0x300] sm:$0xff]   ;;  %8946 = vmatprep.subr.bf16.mxu1 %v9986_v22 }
 0x28d   : > { %3036 = vmatprep.mubr.bf16.mxu1 %v1289_v51  ;;  %v1024_v51 = vmul.f32 %v11584_v60, %v1004_v33  ;;  %8947 = vmatpush3.bf16.msra.mxu1 %v9987_v25 }
 0x28f   : > { %9687 = vset.pattern.permute.xlu0 %v15412_v47  ;;  %v11732_v59 = vpop.permute.xlu0 %1355  ;;  %v1040_v0 = vmul.f32 %v1024_v51, %v1024_v51 }
 0x290   : > { %15468 = vst [vmem:[#allocation6_spill] sm:$0xff] %v11732_v59  ;;  %v11734_v21 = vpop.permute.xlu1 %1873  ;;  %1921 = vperm.xlu1 %9677, %v11393_v10   ;;  %1553 = vperm.xlu0 %9687, %v11406_v11   ;;  %v15482_v59 = vmov 6  }
 0x291   : > { %15469 = vst [vmem:[#allocation7_spill] sm:$0xff] %v11734_v21 }
 0x294   : > { %v11748_v47 = vpop.permute.xlu1 %1905  ;;  %9678 = vset.pattern.permute.xlu1 %v15424_v4  ;;  %9688 = vset.pattern.permute.xlu0 %v15422_v1  ;;  %v11752_v56 = vpop.permute.xlu0 %1695  ;;  %v9990_v1 = vld [vmem:[%s15407_s3 + $0x348] sm:$0xff]  }
 0x295   : > { %15470 = vst [vmem:[#allocation8_spill] sm:$0xff] %v11748_v47  ;;  %15471 = vst [vmem:[#allocation9_spill] sm:$0xff] %v11752_v56  ;;  %2051 = vperm.xlu1 %9678, %v11321_v40   ;;  %1901 = vperm.xlu0 %9688, %v11400_v7   ;;  %v9991_v40 = vld [vmem:[%s15407_s3 + $0x308] sm:$0xff]   ;;  %v1056_v7 = vsub.f32 0.0, %v1040_v0 }
 0x296   : > { %8948 = vmatprep.subr.bf16.mxu1 %v9990_v1 }
 0x297   : > { %8949 = vmatpush3.bf16.msra.mxu1 %v9991_v40  ;;  %v1074_v51 = vmul.f32 1.442695, %v1056_v7  ;;  %v11786_v40 = vld [vmem:[%s15405_s1 + $0xa] ss:$0 sm:$0xff] }
 0x298   : > { %v11756_v16 = vpop.permute.xlu0 %1727  ;;  %v1374_v7 = vsub.f32 %v11537_v19, %v11786_v40  ;;  %v9998_v19 = vld [vmem:[%s15407_s3 + $0x358] sm:$0xff]   ;;  %v1382_v56 = vsub.f32 %v11547_v41, %v11786_v40  ;;  %v10002_v41 = vld [vmem:[%s15407_s3 + $0x360] sm:$0xff]  }
 0x299   : > { %15472 = vst [vmem:[#allocation10_spill] sm:$0xff] %v11756_v16  ;;  %v936_v61 = vpop.permute.xlu1 %935  ;;  %2059 = vperm.xlu1 %9678, %v11327_v63   ;;  %1909 = vperm.xlu0 %9688, %v11363_v44   ;;  %v9994_v16 = vld [vmem:[%s15407_s3 + $0x350] sm:$0xff]   ;;  %10222 = vpow2.f32 %v1074_v51 }
 0x29a   : > { %v1005_v33 = vsub.f32 %v936_v61, %v11565_v50  ;;  %8950 = vmatprep.subr.bf16.mxu1 %v9994_v16  ;;  %v11796_v16 = vld [vmem:[%s15405_s1 + $0xb] ss:$0 sm:$0xff] }
 0x29c   : > { %v1025_v22 = vmul.f32 %v11584_v60, %v1005_v33 }
 0x29d   : > { %v11768_v25 = vpop.permute.xlu1 %975  ;;  %2063 = vperm.xlu1 %9678, %v11331_v3   ;;  %1917 = vperm.xlu0 %9688, %v11378_v17   ;;  %v1142_v38 = vpop.permute.xlu0 %1141  ;;  %v1196_v3 = vsub.f32 %v11531_v29, %v11560_v49  ;;  %v15476_v29 = vmov 7  }
 0x29e   : > { %15473 = vst [vmem:[#allocation11_spill] sm:$0xff] %v11768_v25  ;;  %v1041_v61 = vmul.f32 %v1025_v22, %v1025_v22 }
 0x2a0   : > { %v1057_v4 = vsub.f32 0.0, %v1041_v61  ;;  %v11809_v61 = vld [vmem:[%s15406_s2 + $0xa] ss:$0 sm:$0xff] }
 0x2a1   : > { %2071 = vperm.xlu1 %9678, %v11343_v24   ;;  %1893 = vperm.xlu0 %9688, %v11360_v42   ;;  %v11777_v1 = vpop.permute.xlu0 %1173  ;;  %v9995_v24 = vld [vmem:[%s15407_s3 + $0x310] sm:$0xff]  }
 0x2a2   : > { %v1076_v0 = vmul.f32 1.442695, %v1057_v4  ;;  %15474 = vst [vmem:[#allocation12_spill] sm:$0xff] %v11777_v1  ;;  %v11779_v33 = vpop.permute.xlu1 %1319  ;;  %v1010_v4 = vsub.f32 %v11533_v34, %v11565_v50  ;;  %8951 = vmatpush3.bf16.msra.mxu1 %v9995_v24  ;;  %v1216_v34 = vmul.f32 %v11579_v58, %v1196_v3  ;;  %v1394_v3 = vmul.f32 %v11809_v61, %v1374_v7 }
 0x2a3   : > { %15475 = vst [vmem:[#allocation13_spill] sm:$0xff] %v11779_v33  ;;  %8952 = vmatprep.subr.bf16.mxu1 %v9998_v19  ;;  %v11881_v33 = vld [vmem:[%s15406_s2 + $0xd] ss:$0 sm:$0xff] }
 0x2a4   : > { %10224 = vpow2.f32 %v1076_v0  ;;  %v1568_v0 = vsub.f32 %v11543_v39, %v11796_v16  ;;  %v1030_v24 = vmul.f32 %v11584_v60, %v1010_v4  ;;  %v1193_v39 = vsub.f32 %v1142_v38, %v11560_v49  ;;  %v9999_v4 = vld [vmem:[%s15407_s3 + $0x318] sm:$0xff]  }
 0x2a5   : > { %9680 = vset.pattern.permute.xlu1 %v15476_v29  ;;  %1925 = vperm.xlu0 %9688, %v11406_v11   ;;  %v1232_v1 = vmul.f32 %v1216_v34, %v1216_v34  ;;  %v11850_v34 = vld [vmem:[%s15405_s1 + $0xd] ss:$0 sm:$0xff]  ;;  %v1410_v21 = vmul.f32 %v1394_v3, %v1394_v3  ;;  %v10003_v3 = vld [vmem:[%s15407_s3 + $0x320] sm:$0xff]  }
 0x2a6   : > { %v11802_v22 = vpop.permute.xlu1 %1351  ;;  %2241 = vperm.xlu1 %9680, %v11403_v18   ;;  %v11811_v51 = vpop.permute.xlu0 %1885  ;;  %v11822_v18 = vld [vmem:[%s15406_s2 + $0xb] ss:$0 sm:$0xff]  ;;  %8953 = vmatpush3.bf16.msra.mxu1 %v9999_v4  ;;  %v1213_v19 = vmul.f32 %v11579_v58, %v1193_v39  ;;  %v1402_v4 = vmul.f32 %v11809_v61, %v1382_v56 }
 0x2a7   : > { %15477 = vst [vmem:[#allocation14_spill] sm:$0xff] %v11802_v22  ;;  %15478 = vst [vmem:[#allocation15_spill] sm:$0xff] %v11811_v51  ;;  %v11828_v51 = vld [vmem:[%s15405_s1 + $0xc] ss:$0 sm:$0xff]  ;;  %v15479_v22 = vmov 2   ;;  %v1588_v38 = vmul.f32 %v11822_v18, %v1568_v0  ;;  %8954 = vmatprep.subr.bf16.mxu1 %v10002_v41 }
 0x2a8   : > { %v1746_v25 = vsub.f32 %v11551_v45, %v11828_v51  ;;  %v11858_v0 = vld [vmem:[%s15406_s2 + $0xc] ss:$0 sm:$0xff]  ;;  %v1754_v45 = vsub.f32 %v11555_v48, %v11828_v51  ;;  %v1940_v48 = vsub.f32 %v11570_v46, %v11850_v34 }
 0x2a9   : > { %9692 = vset.pattern.permute.xlu0 %v15476_v29  ;;  %v1604_v6 = vmul.f32 %v1588_v38, %v1588_v38  ;;  %v10006_v46 = vld [vmem:[%s15407_s3 + $0x368] sm:$0xff]   ;;  %v1426_v38 = vsub.f32 0.0, %v1410_v21 }
 0x2aa   : > { %9681 = vset.pattern.permute.xlu1 %v15479_v22  ;;  %2265 = vperm.xlu0 %9692, %v11360_v42   ;;  %v1046_v22 = vmul.f32 %v1030_v24, %v1030_v24  ;;  %v1774_v44 = vmul.f32 %v11858_v0, %v1754_v45  ;;  %v10007_v41 = vld [vmem:[%s15407_s3 + $0x328] sm:$0xff]   ;;  %v1960_v21 = vmul.f32 %v11881_v33, %v1940_v48 }
 0x2ab   : > { %v11839_v7 = vpop.permute.xlu1 %1691  ;;  %1367 = vperm.xlu1 %9681, %v11406_v11   ;;  %v11843_v47 = vpop.permute.xlu0 %950  ;;  %8955 = vmatpush3.bf16.msra.mxu1 %v10003_v3  ;;  %v1197_v45 = vsub.f32 %v11605_v20, %v11560_v49  ;;  %v10010_v20 = vld [vmem:[%s15407_s3 + $0x370] sm:$0xff]  }
 0x2ac   : > { %15480 = vst [vmem:[#allocation16_spill] sm:$0xff] %v11839_v7  ;;  %15481 = vst [vmem:[#allocation17_spill] sm:$0xff] %v11843_v47  ;;  %v10223_v7 = vpop.eup %10222  ;;  %v1248_v47 = vsub.f32 0.0, %v1232_v1  ;;  %v1062_v1 = vsub.f32 0.0, %v1046_v22  ;;  %8956 = vmatprep.subr.bf16.mxu1 %v10006_v46  ;;  %v1790_v48 = vmul.f32 %v1774_v44, %v1774_v44  ;;  %v10011_v46 = vld [vmem:[%s15407_s3 + $0x330] sm:$0xff]  }
 0x2ad   : > { %v1217_v44 = vmul.f32 %v11579_v58, %v1197_v45 }
 0x2ae   : > { %v10225_v24 = vpop.eup %10224  ;;  %9693 = vset.pattern.permute.xlu0 %v15482_v59  ;;  %v1272_v22 = vmul.f32 1.442695, %v1248_v47  ;;  %v1086_v47 = vmul.f32 1.442695, %v1062_v1 }
 0x2af   : > { %v11865_v30 = vpop.permute.xlu1 %1723  ;;  %9682 = vset.pattern.permute.xlu1 %v15476_v29  ;;  %2091 = vperm.xlu0 %9693, %v11457_v31   ;;  %v11874_v39 = vpop.permute.xlu0 %990  ;;  %v1103_v56 = vpack.c.bf16 %v10225_v24, %v10223_v7  ;;  %v1229_v7 = vmul.f32 %v1213_v19, %v1213_v19  ;;  %v1620_v24 = vsub.f32 0.0, %v1604_v6 }
 0x2b0   : > { %15483 = vst [vmem:[#allocation18_spill] sm:$0xff] %v11865_v30  ;;  %15484 = vst [vmem:[#allocation19_spill] sm:$0xff] %v11874_v39  ;;  %2245 = vperm.xlu1 %9682, %v11327_v63   ;;  %v1766_v30 = vmul.f32 %v11858_v0, %v1746_v25  ;;  %v1932_v63 = vsub.f32 %v11573_v52, %v11850_v34  ;;  %v1011_v25 = vsub.f32 %v11590_v62, %v11565_v50 }
 0x2b1   : > { %3037 = vmatmul.mubr.bf16.gmra.mrb[20].mxu1 %v1103_v56  ;;  %v1418_v39 = vmul.f32 %v1402_v4, %v1402_v4  ;;  %v1383_v62 = vsub.f32 %v11616_v54, %v11786_v40  ;;  %v1442_v4 = vmul.f32 1.442695, %v1426_v38  ;;  %v1245_v56 = vsub.f32 0.0, %v1229_v7 }
 0x2b2   : > { %v1782_v19 = vmul.f32 %v1766_v30, %v1766_v30  ;;  %10226 = vpow2.f32 %v1272_v22  ;;  %v1031_v30 = vmul.f32 %v11584_v60, %v1011_v25  ;;  %v1375_v54 = vsub.f32 %v11618_v35, %v11786_v40  ;;  %8957 = vmatpush3.bf16.msra.mxu1 %v10007_v41 }
 0x2b3   : > { %9695 = vset.pattern.permute.xlu0 %v15476_v29  ;;  %v1976_v38 = vmul.f32 %v1960_v21, %v1960_v21  ;;  %8958 = vmatprep.subr.bf16.mxu1 %v10010_v20  ;;  %10228 = vpow2.f32 %v1086_v47  ;;  %v1403_v35 = vmul.f32 %v11809_v61, %v1383_v62  ;;  %v1806_v41 = vsub.f32 0.0, %v1790_v48  ;;  %v10014_v62 = vld [vmem:[%s15407_s3 + $0x338] sm:$0xff]  }
 0x2b4   : > { %v1138_v52 = vpop.permute.xlu1 %1137  ;;  %2253 = vperm.xlu1 %9682, %v11336_v13   ;;  %2285 = vperm.xlu0 %9695, %v11371_v53   ;;  %v11903_v6 = vpop.permute.xlu0 %1331  ;;  %v1952_v13 = vmul.f32 %v11881_v33, %v1932_v63  ;;  %v1798_v7 = vsub.f32 0.0, %v1782_v19  ;;  %10230 = vpow2.f32 %v1442_v4  ;;  %v1266_v21 = vmul.f32 1.442695, %v1245_v56 }
 0x2b5   : > { %v1192_v3 = vsub.f32 %v1138_v52, %v11560_v49  ;;  %15485 = vst [vmem:[#allocation20_spill] sm:$0xff] %v11903_v6  ;;  %v1644_v52 = vmul.f32 1.442695, %v1620_v24  ;;  %v1434_v6 = vsub.f32 0.0, %v1418_v39  ;;  %v10012_v39 = vld [vmem:[%s15407_s3 + $0x378] sm:$0xff]   ;;  %v1395_v45 = vmul.f32 %v11809_v61, %v1375_v54 }
 0x2b6   : > { %v1968_v24 = vmul.f32 %v1952_v13, %v1952_v13  ;;  %v1561_v47 = vsub.f32 %v11630_v27, %v11796_v16  ;;  %8959 = vmatpush3.bf16.msra.mxu1 %v10011_v46  ;;  %v1992_v20 = vsub.f32 0.0, %v1976_v38  ;;  %v1233_v4 = vmul.f32 %v1217_v44, %v1217_v44 }
 0x2b7   : > { %v1212_v1 = vmul.f32 %v11579_v58, %v1192_v3  ;;  %10232 = vpow2.f32 %v1644_v52  ;;  %v1458_v3 = vmul.f32 1.442695, %v1434_v6  ;;  %8960 = vmatprep.subr.bf16.mxu1 %v10012_v39  ;;  %v1814_v48 = vmul.f32 1.442695, %v1798_v7 }
 0x2b8   : > { %v11917_v63 = vpop.permute.xlu1 %1169  ;;  %2261 = vperm.xlu1 %9682, %v11354_v37   ;;  %9698 = vset.pattern.permute.xlu0 %v15482_v59  ;;  %v11922_v25 = vpop.permute.xlu0 %1363  ;;  %v1047_v37 = vmul.f32 %v1031_v30, %v1031_v30  ;;  %v1419_v13 = vmul.f32 %v1403_v35, %v1403_v35  ;;  %v1747_v56 = vsub.f32 %v11635_v9, %v11828_v51  ;;  %v1830_v54 = vmul.f32 1.442695, %v1806_v41 }
 0x2b9   : > { %v1228_v22 = vmul.f32 %v1212_v1, %v1212_v1  ;;  %2103 = vperm.xlu0 %9698, %v11378_v17   ;;  %v1984_v1 = vsub.f32 0.0, %v1968_v24  ;;  %10234 = vpow2.f32 %v1266_v21  ;;  %v1411_v52 = vmul.f32 %v1395_v45, %v1395_v45 }
 0x2ba   : > { %v1063_v6 = vsub.f32 0.0, %v1047_v37  ;;  %v1581_v38 = vmul.f32 %v11822_v18, %v1561_v47  ;;  %8961 = vmatpush3.bf16.msra.mxu1 %v10014_v62  ;;  %v2016_v44 = vmul.f32 1.442695, %v1992_v20  ;;  %v1249_v7 = vsub.f32 0.0, %v1233_v4 }
 0x2bb   : > { %v1244_v19 = vsub.f32 0.0, %v1228_v22  ;;  %v1435_v35 = vsub.f32 0.0, %v1419_v13  ;;  %v1767_v22 = vmul.f32 %v11858_v0, %v1747_v56  ;;  %v1755_v39 = vsub.f32 %v11642_v32, %v11828_v51 }
 0x2bc   : > { %2269 = vperm.xlu1 %9682, %v11339_v23   ;;  %v11944_v9 = vpop.eup %10226  ;;  %v2000_v24 = vmul.f32 1.442695, %v1984_v1  ;;  %v1012_v21 = vsub.f32 %v11648_v14, %v11565_v50  ;;  %v15487_v45 = vmov 0   ;;  %v1427_v62 = vsub.f32 0.0, %v1411_v52 }
 0x2bd   : > { %v1264_v30 = vmul.f32 1.442695, %v1244_v19  ;;  %v11937_v27 = vpop.permute.xlu1 %1509  ;;  %2107 = vperm.xlu0 %9698, %v11393_v10   ;;  %v11940_v46 = vpop.permute.xlu0 %1703  ;;  %15486 = vst [vmem:[#allocation21_spill] sm:$0xff] %v11944_v9  ;;  %v1088_v19 = vmul.f32 1.442695, %v1063_v6  ;;  %v1783_v13 = vmul.f32 %v1767_v22, %v1767_v22  ;;  %v1775_v14 = vmul.f32 %v11858_v0, %v1755_v39 }
 0x2be   : > { %v11955_v47 = vpop.eup %10228  ;;  %v1274_v4 = vmul.f32 1.442695, %v1249_v7  ;;  %v1032_v1 = vmul.f32 %v11584_v60, %v1012_v21  ;;  %v1933_v6 = vsub.f32 %v11659_v43, %v11850_v34  ;;  %v1756_v22 = vsub.f32 %v11677_v55, %v11828_v51 }
 0x2bf   : > { %10236 = vpow2.f32 %v1264_v30  ;;  %15488 = vst [vmem:[#allocation22_spill] sm:$0xff] %v11955_v47  ;;  %v11958_v32 = vpop.eup %10230  ;;  %v15490_v30 = vmov 4   ;;  %v1791_v21 = vmul.f32 %v1775_v14, %v1775_v14  ;;  %v15515_v47 = vld [vmem:[#allocation9_spill] sm:$0xff] }
 0x2c0   : > { %10238 = vpow2.f32 %v1458_v3  ;;  %9686 = vset.pattern.permute.xlu1 %v15482_v59  ;;  %v1597_v3 = vmul.f32 %v1581_v38, %v1581_v38 }
 0x2c1   : > { %10240 = vpow2.f32 %v1814_v48  ;;  %v11949_v41 = vpop.permute.xlu1 %1541  ;;  %2083 = vperm.xlu1 %9686, %v11339_v23   ;;  %v1736_v37 = vpop.permute.xlu0 %1735  ;;  %9701 = vset.pattern.permute.xlu0 %v15487_v45  ;;  %v1006_v23 = vsub.f32 %v11712_v57, %v11565_v50  ;;  %v1460_v48 = vmul.f32 1.442695, %v1435_v35  ;;  %v1444_v57 = vmul.f32 1.442695, %v1427_v62 }
 0x2c2   : > { %10242 = vpow2.f32 %v1830_v54  ;;  %v1760_v20 = vsub.f32 %v1736_v37, %v11828_v51  ;;  %v11967_v54 = vpop.eup %10232  ;;  %v1613_v38 = vsub.f32 0.0, %v1597_v3  ;;  %v1198_v37 = vsub.f32 %v11693_v5, %v11560_v49 }
 0x2c3   : > { %10244 = vpow2.f32 %v2016_v44  ;;  %15491 = vst [vmem:[#allocation24_spill] sm:$0xff] %v11967_v54  ;;  %v1384_v44 = vsub.f32 %v11664_v28, %v11786_v40  ;;  %v10235_v35 = vpop.eup %10234  ;;  %v1026_v39 = vmul.f32 %v11584_v60, %v1006_v23  ;;  %v1048_v62 = vmul.f32 %v1032_v1, %v1032_v1 }
 0x2c4   : > { %v11964_v56 = vmul.f32 %v11858_v0, %v1760_v20  ;;  %10246 = vpow2.f32 %v2000_v24  ;;  %v1799_v24 = vsub.f32 0.0, %v1783_v13  ;;  %v1953_v28 = vmul.f32 %v11881_v33, %v1933_v6 }
 0x2c5   : > { %9689 = vset.pattern.permute.xlu1 %v15490_v30  ;;  %10248 = vpow2.f32 %v1088_v19  ;;  %v1199_v3 = vsub.f32 %v11696_v26, %v11560_v49  ;;  %v1404_v23 = vmul.f32 %v11809_v61, %v1384_v44  ;;  %v1376_v5 = vsub.f32 %v11701_v36, %v11786_v40 }
 0x2c6   : > { %15489 = vst [vmem:[#allocation23_spill] sm:$0xff] %v11964_v56  ;;  %v11972_v52 = vpop.permute.xlu1 %1881  ;;  %1707 = vperm.xlu1 %9689, %v11360_v42   ;;  %v11977_v7 = vpop.permute.xlu0 %1149  ;;  %10250 = vpow2.f32 %v1274_v4  ;;  %v1630_v4 = vmul.f32 1.442695, %v1613_v38  ;;  %v1776_v1 = vmul.f32 %v11858_v0, %v1756_v22  ;;  %v1935_v26 = vsub.f32 %v11704_v2, %v11850_v34 }
 0x2c7   : > { %10252 = vpow2.f32 %v1460_v48  ;;  %v1042_v6 = vmul.f32 %v1026_v39, %v1026_v39  ;;  %v1807_v38 = vsub.f32 0.0, %v1791_v21  ;;  %v1218_v44 = vmul.f32 %v11579_v58, %v1198_v37 }
 0x2c8   : > { %10254 = vpow2.f32 %v1444_v57  ;;  %v1816_v57 = vmul.f32 1.442695, %v1799_v24  ;;  %v1562_v36 = vsub.f32 %v11709_v8, %v11796_v16  ;;  %v1064_v45 = vsub.f32 0.0, %v1048_v62 }
 0x2c9   : > { %v10237_v43 = vpop.eup %10236  ;;  %v1969_v30 = vmul.f32 %v1953_v28, %v1953_v28  ;;  %v1219_v22 = vmul.f32 %v11579_v58, %v1199_v3  ;;  %10256 = vpow2.f32 %v1630_v4  ;;  %v1420_v2 = vmul.f32 %v1404_v23, %v1404_v23 }
 0x2ca   : > { %v11984_v19 = vpop.eup %10238  ;;  %1739 = vperm.xlu1 %9689, %v11406_v11   ;;  %v1290_v55 = vpack.c.bf16 %v10235_v35, %v10237_v43  ;;  %v11995_v48 = vpop.permute.xlu0 %1181  ;;  %v1396_v39 = vmul.f32 %v11809_v61, %v1376_v5  ;;  %v1570_v24 = vsub.f32 %v11715_v15, %v11796_v16  ;;  %v1792_v37 = vmul.f32 %v1776_v1, %v1776_v1 }
 0x2cb   : > { %15492 = vst [vmem:[#allocation25_spill] sm:$0xff] %v11984_v19  ;;  %v11990_v20 = vpop.eup %10240  ;;  %v946_v13 = vpop.permute.xlu1 %945  ;;  %v1955_v62 = vmul.f32 %v11881_v33, %v1935_v26  ;;  %v1058_v28 = vsub.f32 0.0, %v1042_v6  ;;  %v1832_v23 = vmul.f32 1.442695, %v1807_v38  ;;  %v1234_v5 = vmul.f32 %v1218_v44, %v1218_v44 }
 0x2cc   : > { %15493 = vst [vmem:[#allocation26_spill] sm:$0xff] %v11990_v20  ;;  %v11997_v14 = vpop.eup %10242  ;;  %v1007_v35 = vsub.f32 %v946_v13, %v11565_v50  ;;  %3044 = vmatprep.mubr.bf16.mxu1 %v1290_v55  ;;  %v1582_v13 = vmul.f32 %v11822_v18, %v1562_v36  ;;  %v1014_v15 = vsub.f32 %v11718_v12, %v11565_v50  ;;  %10258 = vpow2.f32 %v1816_v57 }
 0x2cd   : > { %15494 = vst [vmem:[#allocation27_spill] sm:$0xff] %v11997_v14  ;;  %v12006_v43 = vpop.eup %10244  ;;  %v1235_v1 = vmul.f32 %v1219_v22, %v1219_v22  ;;  %v1412_v6 = vmul.f32 %v1396_v39, %v1396_v39  ;;  %v1590_v54 = vmul.f32 %v11822_v18, %v1570_v24  ;;  %v1808_v38 = vsub.f32 0.0, %v1792_v37 }
 0x2ce   : > { %15495 = vst [vmem:[#allocation28_spill] sm:$0xff] %v12006_v43  ;;  %v1027_v14 = vmul.f32 %v11584_v60, %v1007_v35  ;;  %9690 = vset.pattern.permute.xlu1 %v15482_v59  ;;  %v12017_v8 = vpop.eup %10246  ;;  %v1985_v43 = vsub.f32 0.0, %v1969_v30  ;;  %v1971_v44 = vmul.f32 %v1955_v62, %v1955_v62  ;;  %v1078_v36 = vmul.f32 1.442695, %v1058_v28 }
 0x2cf   : > { %v12014_v21 = vpop.permute.xlu1 %985  ;;  %2079 = vperm.xlu1 %9690, %v11360_v42   ;;  %v12020_v55 = vpop.permute.xlu0 %2237  ;;  %v1090_v42 = vmul.f32 1.442695, %v1064_v45  ;;  %10260 = vpow2.f32 %v1832_v23  ;;  %v1250_v30 = vsub.f32 0.0, %v1234_v5  ;;  %v1598_v57 = vmul.f32 %v1582_v13, %v1582_v13 }
 0x2d0   : > { %v1043_v3 = vmul.f32 %v1027_v14, %v1027_v14  ;;  %15496 = vst [vmem:[#allocation29_spill] sm:$0xff] %v12020_v55  ;;  %v12022_v4 = vpop.eup %10248  ;;  %v1436_v14 = vsub.f32 0.0, %v1420_v2  ;;  %v1034_v22 = vmul.f32 %v11584_v60, %v1014_v15  ;;  %v2002_v2 = vmul.f32 1.442695, %v1985_v43 }
 0x2d1   : > { %15497 = vst [vmem:[#allocation30_spill] sm:$0xff] %v12022_v4  ;;  %v12027_v35 = vpop.eup %10250  ;;  %10262 = vpow2.f32 %v1090_v42  ;;  %v1251_v39 = vsub.f32 0.0, %v1235_v1  ;;  %v1428_v37 = vsub.f32 0.0, %v1412_v6  ;;  %v1606_v62 = vmul.f32 %v1590_v54, %v1590_v54  ;;  %v15502_v54 = vld [vmem:[#allocation13_spill] sm:$0xff]  ;;  %v15503_v42 = vld [vmem:[#allocation4_spill] sm:$0xff] }
 0x2d2   : > { %v1059_v56 = vsub.f32 0.0, %v1043_v3  ;;  %v12029_v26 = vpop.eup %10252  ;;  %v1462_v24 = vmul.f32 1.442695, %v1436_v14  ;;  %v1987_v28 = vsub.f32 0.0, %v1971_v44  ;;  %v1276_v43 = vmul.f32 1.442695, %v1250_v30 }
 0x2d3   : > { %15498 = vst [vmem:[#allocation31_spill] sm:$0xff] %v12029_v26  ;;  %9691 = vset.pattern.permute.xlu1 %v15476_v29  ;;  %v12033_v50 = vpop.permute.xlu0 %2249  ;;  %v12038_v45 = vpop.eup %10254  ;;  %v1614_v5 = vsub.f32 0.0, %v1598_v57  ;;  %v1050_v13 = vmul.f32 %v1034_v22, %v1034_v22  ;;  %v1278_v15 = vmul.f32 1.442695, %v1251_v39  ;;  %v1748_v1 = vsub.f32 %v15503_v42, %v11828_v51  ;;  %v15504_v30 = vld [vmem:[#allocation5_spill] sm:$0xff] }
 0x2d4   : > { %v1080_v55 = vmul.f32 1.442695, %v1059_v56  ;;  %15499 = vst [vmem:[#allocation32_spill] sm:$0xff] %v12033_v50  ;;  %v12035_v12 = vpop.permute.xlu1 %1327  ;;  %2277 = vperm.xlu1 %9691, %v11457_v31   ;;  %v1834_v56 = vmul.f32 1.442695, %v1808_v38  ;;  %v15501_v50 = vld [vmem:[#allocation3_spill] sm:$0xff]  ;;  %v12048_v60 = vpop.eup %10256  ;;  %v1195_v44 = vsub.f32 %v11977_v7, %v11560_v49  ;;  %v1378_v57 = vsub.f32 %v15504_v30, %v11786_v40 }
 0x2d5   : > { %v1446_v6 = vmul.f32 1.442695, %v1428_v37  ;;  %v1622_v38 = vsub.f32 0.0, %v1606_v62  ;;  %v1632_v39 = vmul.f32 1.442695, %v1614_v5  ;;  %v1768_v49 = vmul.f32 %v11858_v0, %v1748_v1 }
 0x2d6   : > { %10264 = vpow2.f32 %v1080_v55  ;;  %v1377_v55 = vsub.f32 %v15502_v54, %v11786_v40  ;;  %v1564_v7 = vsub.f32 %v11937_v27, %v11796_v16  ;;  %v1215_v5 = vmul.f32 %v11579_v58, %v1195_v44 }
 0x2d7   : > { %10266 = vpow2.f32 %v1078_v36  ;;  %v12041_v3 = vpop.permute.xlu0 %2257  ;;  %v2006_v36 = vmul.f32 1.442695, %v1987_v28  ;;  %v1750_v4 = vsub.f32 %v15515_v47, %v11828_v51 }
 0x2d8   : > { %15500 = vst [vmem:[#allocation33_spill] sm:$0xff] %v12041_v3  ;;  %v12043_v31 = vpop.permute.xlu1 %1359  ;;  %2281 = vperm.xlu1 %9691, %v15501_v50   ;;  %10268 = vpow2.f32 %v2002_v2  ;;  %v12063_v2 = vpop.eup %10258  ;;  %v1397_v37 = vmul.f32 %v11809_v61, %v1377_v55 }
 0x2d9   : > { %10270 = vpow2.f32 %v1462_v24  ;;  %15505 = vst [vmem:[#allocation3_spill] sm:$0xff] %v12063_v2  ;;  %v1066_v24 = vsub.f32 0.0, %v1050_v13  ;;  %v12073_v28 = vpop.eup %10260 }
 0x2da   : > { %10272 = vpow2.f32 %v1834_v56  ;;  %15507 = vst [vmem:[#allocation4_spill] sm:$0xff] %v12073_v28  ;;  %v1413_v58 = vmul.f32 %v1397_v37, %v1397_v37 }
 0x2db   : > { %10274 = vpow2.f32 %v1276_v43  ;;  %v1648_v43 = vmul.f32 1.442695, %v1622_v38  ;;  %v12078_v55 = vpop.eup %10262  ;;  %v1094_v1 = vmul.f32 1.442695, %v1066_v24  ;;  %v1379_v24 = vsub.f32 %v12035_v12, %v11786_v40  ;;  %v12109_v12 = vld [vmem:[%s15405_s1 + $0x8] ss:$0 sm:$0xff] }
 0x2dc   : > { %9694 = vset.pattern.permute.xlu1 %v15482_v59  ;;  %v1494_v62 = vpop.permute.xlu0 %1493  ;;  %10276 = vpow2.f32 %v1278_v15 }
 0x2dd   : > { %v12066_v54 = vpop.permute.xlu1 %1699  ;;  %2095 = vperm.xlu1 %9694, %v15501_v50   ;;  %v1560_v56 = vsub.f32 %v1494_v62, %v11796_v16  ;;  %10278 = vpow2.f32 %v1446_v6  ;;  %v1398_v50 = vmul.f32 %v11809_v61, %v1378_v57  ;;  %v15508_v6 = vld [vmem:[#allocation6_spill] sm:$0xff]  ;;  %v12089_v62 = vmul.f32 %v1768_v49, %v1768_v49  ;;  %v15510_v49 = vld [vmem:[#allocation7_spill] sm:$0xff] }
 0x2de   : > { %15506 = vst [vmem:[#allocation13_spill] sm:$0xff] %v12066_v54  ;;  %10280 = vpow2.f32 %v2006_v36  ;;  %v1386_v38 = vsub.f32 %v15508_v6, %v11786_v40  ;;  %v1584_v57 = vmul.f32 %v11822_v18, %v1564_v7  ;;  %v1934_v23 = vsub.f32 %v15510_v49, %v11850_v34 }
 0x2df   : > { %v1580_v15 = vmul.f32 %v11822_v18, %v1560_v56  ;;  %10282 = vpow2.f32 %v1632_v39  ;;  %v1231_v39 = vmul.f32 %v1215_v5, %v1215_v5  ;;  %v12098_v22 = vmul.f32 %v1398_v50, %v1398_v50 }
 0x2e0   : > { %v10265_v42 = vpop.eup %10264  ;;  %v1506_v44 = vpop.permute.xlu0 %1505  ;;  %10284 = vpow2.f32 %v1648_v43  ;;  %v15512_v43 = vld [vmem:[#allocation11_spill] sm:$0xff]  ;;  %v1429_v50 = vsub.f32 0.0, %v1413_v58  ;;  %v1800_v13 = vsub.f32 0.0, %v12089_v62  ;;  %v12124_v58 = vld [vmem:[%s15405_s1 + $0x9] ss:$0 sm:$0xff] }
 0x2e1   : > { %v12086_v30 = vpop.permute.xlu1 %1731  ;;  %9696 = vset.pattern.permute.xlu1 %v15476_v29  ;;  %v10267_v36 = vpop.eup %10266  ;;  %v1596_v56 = vmul.f32 %v1580_v15, %v1580_v15  ;;  %v1563_v27 = vsub.f32 %v1506_v44, %v11796_v16  ;;  %10286 = vpow2.f32 %v1094_v1  ;;  %v1013_v5 = vsub.f32 %v15512_v43, %v12109_v12 }
 0x2e2   : > { %15509 = vst [vmem:[#allocation5_spill] sm:$0xff] %v12086_v30  ;;  %2289 = vperm.xlu1 %9696, %v11378_v17   ;;  %v1104_v37 = vpack.c.bf16 %v10265_v42, %v10267_v36  ;;  %v12096_v6 = vpop.eup %10268  ;;  %v1406_v17 = vmul.f32 %v11809_v61, %v1386_v38  ;;  %v1600_v36 = vmul.f32 %v1584_v57, %v1584_v57  ;;  %v1247_v28 = vsub.f32 0.0, %v1231_v39 }
 0x2e3   : > { %v1612_v14 = vsub.f32 0.0, %v1596_v56  ;;  %v1583_v7 = vmul.f32 %v11822_v18, %v1563_v27  ;;  %v12103_v15 = vpop.eup %10270  ;;  %v1399_v43 = vmul.f32 %v11809_v61, %v1379_v24 }
 0x2e4   : > { %15511 = vst [vmem:[#allocation6_spill] sm:$0xff] %v12103_v15  ;;  %3045 = vmatmul.mubr.bf16.gmra.mrb[24].mxu1 %v1104_v37  ;;  %v1514_v42 = vpop.permute.xlu0 %1513  ;;  %v12113_v44 = vpop.eup %10272  ;;  %v1954_v37 = vmul.f32 %v11881_v33, %v1934_v23  ;;  %v1422_v24 = vmul.f32 %v1406_v17, %v1406_v17  ;;  %v12145_v23 = vld [vmem:[%s15406_s2 + $0x9] ss:$0 sm:$0xff]  ;;  %v1270_v26 = vmul.f32 1.442695, %v1247_v28 }
 0x2e5   : > { %15513 = vst [vmem:[#allocation7_spill] sm:$0xff] %v12113_v44  ;;  %v1628_v27 = vmul.f32 1.442695, %v1612_v14  ;;  %v1599_v56 = vmul.f32 %v1583_v7, %v1583_v7  ;;  %v1565_v1 = vsub.f32 %v1514_v42, %v11796_v16  ;;  %v12117_v38 = vpop.eup %10274  ;;  %v15514_v42 = vld [vmem:[#allocation8_spill] sm:$0xff]  ;;  %v1415_v15 = vmul.f32 %v1399_v43, %v1399_v43 }
 0x2e6   : > { %v1146_v49 = vpop.permute.xlu1 %1145  ;;  %9697 = vset.pattern.permute.xlu1 %v15482_v59  ;;  %v12128_v57 = vpop.eup %10276  ;;  %v1942_v44 = vsub.f32 %v15514_v42, %v11850_v34  ;;  %v1616_v42 = vsub.f32 0.0, %v1600_v36 }
 0x2e7   : > { %v1194_v14 = vsub.f32 %v1146_v49, %v12124_v58  ;;  %2099 = vperm.xlu1 %9697, %v11371_v53   ;;  %10288 = vpow2.f32 %v1628_v27  ;;  %v1615_v7 = vsub.f32 0.0, %v1599_v56  ;;  %v1585_v62 = vmul.f32 %v11822_v18, %v1565_v1  ;;  %v12132_v39 = vpop.eup %10278  ;;  %v12139_v49 = vld [vmem:[%s15406_s2 + $0x8] ss:$0 sm:$0xff] }
 0x2e8   : > { %v1033_v53 = vmul.f32 %v12139_v49, %v1013_v5  ;;  %v12148_v56 = vpop.permute.xlu0 %1529  ;;  %v12150_v17 = vpop.eup %10280  ;;  %v1448_v1 = vmul.f32 1.442695, %v1429_v50  ;;  %v1430_v5 = vsub.f32 0.0, %v12098_v22  ;;  %v1962_v54 = vmul.f32 %v11881_v33, %v1942_v44 }
 0x2e9   : > { %v1214_v27 = vmul.f32 %v12145_v23, %v1194_v14  ;;  %v1634_v30 = vmul.f32 1.442695, %v1615_v7  ;;  %v1601_v20 = vmul.f32 %v1585_v62, %v1585_v62  ;;  %v12154_v19 = vpop.eup %10282  ;;  %v1970_v14 = vmul.f32 %v1954_v37, %v1954_v37 }
 0x2ea   : > { %v12152_v2 = vpop.permute.xlu1 %1177  ;;  %v12161_v36 = vpop.eup %10284  ;;  %v1818_v7 = vmul.f32 1.442695, %v1800_v13  ;;  %v1438_v62 = vsub.f32 0.0, %v1422_v24  ;;  %v1049_v43 = vmul.f32 %v1033_v53, %v1033_v53  ;;  %v1450_v47 = vmul.f32 1.442695, %v1430_v5  ;;  %v15516_v24 = vld [vmem:[#allocation12_spill] sm:$0xff] }
 0x2eb   : > { %v1230_v3 = vmul.f32 %v1214_v27, %v1214_v27  ;;  %9699 = vset.pattern.permute.xlu1 %v15476_v29  ;;  %10290 = vpow2.f32 %v1634_v30  ;;  %v1617_v50 = vsub.f32 0.0, %v1601_v20  ;;  %v1636_v27 = vmul.f32 1.442695, %v1616_v42  ;;  %v12166_v29 = vpop.eup %10286 }
 0x2ec   : > { %2293 = vperm.xlu1 %9699, %v11393_v10   ;;  %v12164_v28 = vpop.permute.xlu0 %1537  ;;  %10292 = vpow2.f32 %v1448_v1  ;;  %v1431_v20 = vsub.f32 0.0, %v1415_v15  ;;  %v1986_v9 = vsub.f32 0.0, %v1970_v14  ;;  %v1770_v13 = vmul.f32 %v11858_v0, %v1750_v4  ;;  %v15517_v1 = vld [vmem:[#allocation14_spill] sm:$0xff] }
 0x2ed   : > { %v1246_v22 = vsub.f32 0.0, %v1230_v3  ;;  %v1638_v37 = vmul.f32 1.442695, %v1617_v50  ;;  %10294 = vpow2.f32 %v1270_v26  ;;  %v1466_v3 = vmul.f32 1.442695, %v1438_v62  ;;  %v15518_v50 = vld [vmem:[#allocation17_spill] sm:$0xff] }
 0x2ee   : > { %v1201_v53 = vsub.f32 %v15516_v24, %v12124_v58  ;;  %v1385_v42 = vsub.f32 %v15517_v1, %v11786_v40  ;;  %v1978_v5 = vmul.f32 %v1962_v54, %v1962_v54  ;;  %v1065_v14 = vsub.f32 0.0, %v1049_v43  ;;  %v15519_v54 = vld [vmem:[#allocation10_spill] sm:$0xff] }
 0x2ef   : > { %v1268_v30 = vmul.f32 1.442695, %v1246_v22  ;;  %v1518_v10 = vpop.permute.xlu1 %1517  ;;  %10296 = vpow2.f32 %v1638_v37  ;;  %v1008_v22 = vsub.f32 %v15518_v50, %v12109_v12  ;;  %v1452_v62 = vmul.f32 1.442695, %v1431_v20 }
 0x2f0   : > { %v1566_v44 = vsub.f32 %v1518_v10, %v11796_v16  ;;  %2297 = vperm.xlu1 %9699, %v11406_v11   ;;  %v12175_v26 = vpop.permute.xlu0 %1545  ;;  %v2004_v24 = vmul.f32 1.442695, %v1986_v9  ;;  %v12186_v1 = vmul.f32 %v1770_v13, %v1770_v13  ;;  %v1758_v43 = vsub.f32 %v15519_v54, %v11828_v51 }
 0x2f1   : > { %10298 = vpow2.f32 %v1268_v30  ;;  %v10289_v15 = vpop.eup %10288  ;;  %v9989_v30 = vld [vmem:[%s15407_s3 + $0x380] sm:$0xff]   ;;  %v1405_v20 = vmul.f32 %v11809_v61, %v1385_v42  ;;  %v1092_v50 = vmul.f32 1.442695, %v1065_v14 }
 0x2f2   : > { %10300 = vpow2.f32 %v1636_v27  ;;  %v1586_v4 = vmul.f32 %v11822_v18, %v1566_v44  ;;  %v1660_v10 = vpack.c.bf16 %v12048_v60, %v10289_v15  ;;  %v1221_v60 = vmul.f32 %v12145_v23, %v1201_v53  ;;  %v15520_v44 = vld [vmem:[#allocation15_spill] sm:$0xff] }
 0x2f3   : > { %10302 = vpow2.f32 %v1818_v7  ;;  %v12180_v37 = vpop.permute.xlu1 %1549  ;;  %v9992_v7 = vld [vmem:[%s15407_s3 + $0x3c8] sm:$0xff]   ;;  %v1937_v9 = vsub.f32 %v15520_v44, %v11850_v34  ;;  %v1028_v53 = vmul.f32 %v12139_v49, %v1008_v22 }
 0x2f4   : > { %v1602_v27 = vmul.f32 %v1586_v4, %v1586_v4  ;;  %9700 = vset.pattern.permute.xlu1 %v15482_v59  ;;  %10304 = vpow2.f32 %v1450_v47  ;;  %3125 = vmatprep.mubr.bf16.mxu0 %v1660_v10  ;;  %v1522_v13 = vpop.permute.xlu0 %1521  ;;  %v1994_v4 = vsub.f32 0.0, %v1978_v5  ;;  %v15521_v47 = vpack.c.bf16 %v12038_v45, %v11958_v32  ;;  %v9996_v32 = vld [vmem:[%s15407_s3 + $0x3d0] sm:$0xff]  }
 0x2f5   : > { %2111 = vperm.xlu1 %9700, %v11406_v11   ;;  %v10291_v15 = vpop.eup %10290  ;;  %10306 = vpow2.f32 %v1466_v3  ;;  %v1567_v54 = vsub.f32 %v1522_v13, %v11796_v16  ;;  %v9993_v11 = vld [vmem:[%s15407_s3 + $0x388] sm:$0xff]   ;;  %v1237_v10 = vmul.f32 %v1221_v60, %v1221_v60  ;;  %v1778_v13 = vmul.f32 %v11858_v0, %v1758_v43 }
 0x2f6   : > { %3126 = vmatmul.mubr.bf16.vlgmr.msra.gmra.mrb[16].mxu0 %v15521_v47  ;;  %10308 = vpow2.f32 %v1452_v62  ;;  %v1618_v42 = vsub.f32 0.0, %v1602_v27  ;;  %v1661_v34 = vpack.c.bf16 %v10291_v15, %v12154_v19  ;;  %v10293_v3 = vpop.eup %10292  ;;  %v1802_v62 = vsub.f32 0.0, %v12186_v1  ;;  %v15523_v15 = vld [vmem:[#allocation20_spill] sm:$0xff] }
 0x2f7   : > { %9011 = vmatpush3.bf16.msra.mxu0 %v9989_v30  ;;  %10310 = vpow2.f32 %v2004_v24  ;;  %v1587_v5 = vmul.f32 %v11822_v18, %v1567_v54  ;;  %v10295_v22 = vpop.eup %10294  ;;  %v1421_v30 = vmul.f32 %v1405_v20, %v1405_v20  ;;  %v1957_v24 = vmul.f32 %v11881_v33, %v1937_v9  ;;  %v15524_v1 = vld [vmem:[#allocation16_spill] sm:$0xff]  ;;  %v9997_v9 = vld [vmem:[%s15407_s3 + $0x390] sm:$0xff]  }
 0x2f8   : > { %v12209_v14 = vpop.permute.xlu1 %1889  ;;  %9012 = vmatprep.subr.bf16.mxu0 %v9992_v7  ;;  %3133 = vmatprep.mubr.bf16.mxu0 %v1661_v34  ;;  %v15522_v27 = vmov 1   ;;  %v2020_v44 = vmul.f32 1.442695, %v1994_v4  ;;  %v1380_v54 = vsub.f32 %v15523_v15, %v11786_v40  ;;  %10312 = vpow2.f32 %v1092_v50 }
 0x2f9   : > { %9702 = vset.pattern.permute.xlu1 %v15522_v27  ;;  %v10297_v7 = vpop.eup %10296  ;;  %v1603_v47 = vmul.f32 %v1587_v5, %v1587_v5  ;;  %v12224_v45 = vpop.permute.xlu0 %2273  ;;  %v1749_v60 = vsub.f32 %v15524_v1, %v11828_v51  ;;  %v1044_v20 = vmul.f32 %v1028_v53, %v1028_v53  ;;  %v1640_v33 = vmul.f32 1.442695, %v1618_v42  ;;  %v10000_v51 = vld [vmem:[%s15407_s3 + $0x3d8] sm:$0xff]   ;;  %v15525_v27 = vld [vmem:[#allocation19_spill] sm:$0xff] }
 0x2fa   : > { %v1569_v43 = vsub.f32 %v12148_v56, %v11796_v16  ;;  %v1475_v34 = vpack.c.bf16 %v10293_v3, %v12132_v39  ;;  %v1253_v53 = vsub.f32 0.0, %v1237_v10  ;;  %v1437_v42 = vsub.f32 0.0, %v1421_v30  ;;  %v10001_v30 = vld [vmem:[%s15407_s3 + $0x398] sm:$0xff]  }
 0x2fb   : > { %v10299_v19 = vpop.eup %10298  ;;  %9013 = vmatpush3.bf16.msra.mxu0 %v9993_v11  ;;  %v1619_v40 = vsub.f32 0.0, %v1603_v47  ;;  %v1973_v11 = vmul.f32 %v1957_v24, %v1957_v24  ;;  %v1016_v59 = vsub.f32 %v15525_v27, %v12109_v12  ;;  %v1400_v16 = vmul.f32 %v11809_v61, %v1380_v54 }
 0x2fc   : > { %v10301_v4 = vpop.eup %10300  ;;  %v1291_v5 = vpack.c.bf16 %v10295_v22, %v10299_v19  ;;  %9014 = vmatprep.subr.bf16.mxu0 %v9996_v32  ;;  %v1822_v32 = vmul.f32 1.442695, %v1802_v62  ;;  %v1769_v19 = vmul.f32 %v11858_v0, %v1749_v60  ;;  %v1060_v22 = vsub.f32 0.0, %v1044_v20  ;;  %v10004_v0 = vld [vmem:[%s15407_s3 + $0x3e0] sm:$0xff]  }
 0x2fd   : > { %v12237_v50 = vpop.eup %10302  ;;  %v956_v15 = vpop.permute.xlu1 %955  ;;  %v1662_v1 = vpack.c.bf16 %v10297_v7, %v10301_v4  ;;  %v1642_v56 = vmul.f32 1.442695, %v1619_v40  ;;  %10314 = vpow2.f32 %v1640_v33  ;;  %v12251_v24 = vmul.f32 %v1778_v13, %v1778_v13 }
 0x2fe   : > { %v1009_v39 = vsub.f32 %v956_v15, %v12109_v12  ;;  %3134 = vmatmul.mubr.bf16.gmra.mrb[20].mxu0 %v1475_v34  ;;  %3052 = vmatprep.mubr.bf16.mxu1 %v1291_v5  ;;  %v10305_v3 = vpop.eup %10304  ;;  %v12244_v10 = vpop.permute.xlu0 %2055  ;;  %v1589_v27 = vmul.f32 %v11822_v18, %v1569_v43  ;;  %v1282_v54 = vmul.f32 1.442695, %v1253_v53  ;;  %v1989_v47 = vsub.f32 0.0, %v1973_v11 }
 0x2ff   : > { %3141 = vmatprep.mubr.bf16.mxu0 %v1662_v1  ;;  %9015 = vmatpush3.bf16.msra.mxu0 %v9997_v9  ;;  %v12249_v61 = vpop.eup %10306  ;;  %15526 = vst [vmem:[#allocation11_spill] sm:$0xff] %v12251_v24  ;;  %10316 = vpow2.f32 %v1642_v56  ;;  %v1200_v60 = vsub.f32 %v11917_v63, %v12124_v58  ;;  %v1464_v18 = vmul.f32 1.442695, %v1437_v42  ;;  %v1036_v33 = vmul.f32 %v12139_v49, %v1016_v59  ;;  %v10005_v59 = vld [vmem:[%s15407_s3 + $0x3a0] sm:$0xff]   ;;  %v15527_v56 = vld [vmem:[#allocation18_spill] sm:$0xff] }
 0x300   : > { %v1029_v62 = vmul.f32 %v12139_v49, %v1009_v39  ;;  %9016 = vmatprep.subr.bf16.mxu0 %v10000_v51  ;;  %v10309_v7 = vpop.eup %10308  ;;  %10318 = vpow2.f32 %v2020_v44  ;;  %v1416_v9 = vmul.f32 %v1400_v16, %v1400_v16  ;;  %v1785_v43 = vmul.f32 %v1769_v19, %v1769_v19  ;;  %v12268_v44 = vld [vmem:[%s15405_s1 + $0xa] ss:$0 sm:$0xff]  ;;  %v12280_v51 = vld [vmem:[%s15405_s1 + $0xb] ss:$0 sm:$0xff]  ;;  %v12292_v16 = vld [vmem:[%s15405_s1 + $0xc] ss:$0 sm:$0xff] }
 0x301   : > { %v12260_v20 = vpop.permute.xlu1 %995  ;;  %v12262_v13 = vpop.eup %10310  ;;  %10320 = vpow2.f32 %v1822_v32  ;;  %v1082_v40 = vmul.f32 1.442695, %v1060_v22  ;;  %v1388_v63 = vsub.f32 %v11922_v25, %v12268_v44  ;;  %v1605_v5 = vmul.f32 %v1589_v27, %v1589_v27  ;;  %v10008_v25 = vld [vmem:[%s15407_s3 + $0x3e8] sm:$0xff]  }
 0x302   : > { %v1045_v4 = vmul.f32 %v1029_v62, %v1029_v62  ;;  %v12272_v34 = vpop.permute.xlu0 %2067  ;;  %v1571_v53 = vsub.f32 %v12164_v28, %v12280_v51  ;;  %v1476_v11 = vpack.c.bf16 %v10309_v7, %v10305_v3  ;;  %v12287_v15 = vpop.eup %10312  ;;  %10322 = vpow2.f32 %v1282_v54  ;;  %v10009_v7 = vld [vmem:[%s15407_s3 + $0x3a8] sm:$0xff]  }
 0x303   : > { %9017 = vmatpush3.bf16.msra.mxu0 %v10001_v30  ;;  %v2010_v1 = vmul.f32 1.442695, %v1989_v47  ;;  %v1757_v39 = vsub.f32 %v15527_v56, %v12292_v16  ;;  %v1220_v28 = vmul.f32 %v12145_v23, %v1200_v60  ;;  %10324 = vpow2.f32 %v1464_v18  ;;  %v12300_v30 = vld [vmem:[%s15406_s2 + $0xa] ss:$0 sm:$0xff]  ;;  %v12314_v18 = vld [vmem:[%s15406_s2 + $0xb] ss:$0 sm:$0xff] }
 0x304   : > { %v1061_v42 = vsub.f32 0.0, %v1045_v4  ;;  %9018 = vmatprep.subr.bf16.mxu0 %v10004_v0  ;;  %v1052_v3 = vmul.f32 %v1036_v33, %v1036_v33  ;;  %v1432_v32 = vsub.f32 0.0, %v1416_v9  ;;  %10326 = vpow2.f32 %v1082_v40  ;;  %v10013_v9 = vld [vmem:[%s15407_s3 + $0x3f0] sm:$0xff]  }
 0x305   : > { %v1408_v27 = vmul.f32 %v12300_v30, %v1388_v63  ;;  %v1801_v47 = vsub.f32 0.0, %v1785_v43  ;;  %v1621_v60 = vsub.f32 0.0, %v1605_v5  ;;  %v1591_v33 = vmul.f32 %v12314_v18, %v1571_v53  ;;  %v12323_v43 = vld [vmem:[%s15406_s2 + $0xc] ss:$0 sm:$0xff] }
 0x306   : > { %v1084_v19 = vmul.f32 1.442695, %v1061_v42  ;;  %3142 = vmatmul.mubr.bf16.gmra.mrb[24].mxu0 %v1476_v11  ;;  %v1336_v22 = vpop.permute.xlu1 %1335  ;;  %v12304_v0 = vpop.permute.xlu0 %2075  ;;  %v1777_v40 = vmul.f32 %v12323_v43, %v1757_v39  ;;  %v1236_v63 = vmul.f32 %v1220_v28, %v1220_v28  ;;  %v1068_v53 = vsub.f32 0.0, %v1052_v3 }
 0x307   : > { %v1381_v62 = vsub.f32 %v1336_v22, %v12268_v44  ;;  %15528 = vst [vmem:[#allocation8_spill] sm:$0xff] %v12304_v0  ;;  %9019 = vmatpush3.bf16.msra.mxu0 %v10005_v59  ;;  %v10315_v4 = vpop.eup %10314  ;;  %v1454_v42 = vmul.f32 1.442695, %v1432_v32  ;;  %v1015_v11 = vsub.f32 %v12014_v21, %v12109_v12  ;;  %v12333_v56 = vmul.f32 %v1408_v27, %v1408_v27  ;;  %v10015_v21 = vld [vmem:[%s15407_s3 + $0x3b0] sm:$0xff]  }
 0x308   : > { %10328 = vpow2.f32 %v1084_v19  ;;  %9020 = vmatprep.subr.bf16.mxu0 %v10008_v25  ;;  %v1202_v19 = vsub.f32 %v12152_v2, %v12124_v58  ;;  %v1820_v32 = vmul.f32 1.442695, %v1801_v47  ;;  %v1607_v54 = vmul.f32 %v1591_v33, %v1591_v33  ;;  %v10016_v2 = vld [vmem:[%s15407_s3 + $0x3f8] sm:$0xff]  }
 0x309   : > { %10330 = vpow2.f32 %v2010_v1  ;;  %v1401_v59 = vmul.f32 %v12300_v30, %v1381_v62  ;;  %v10317_v5 = vpop.eup %10316  ;;  %v1646_v62 = vmul.f32 1.442695, %v1621_v60  ;;  %v1573_v27 = vsub.f32 %v12175_v26, %v12280_v51 }
 0x30a   : > { %v12331_v1 = vpop.eup %10318  ;;  %v12337_v28 = vpop.permute.xlu0 %2087  ;;  %v1663_v3 = vpack.c.bf16 %v10317_v5, %v10315_v4  ;;  %v12351_v25 = vmul.f32 %v1777_v40, %v1777_v40  ;;  %v1203_v4 = vsub.f32 %v11995_v48, %v12124_v58  ;;  %v1098_v47 = vmul.f32 1.442695, %v1068_v53  ;;  %v10017_v58 = vld [vmem:[%s15407_s3 + $0x3b8] sm:$0xff]  }
 0x30b   : > { %15529 = vst [vmem:[#allocation9_spill] sm:$0xff] %v12331_v1  ;;  %v1417_v39 = vmul.f32 %v1401_v59, %v1401_v59  ;;  %15530 = vst [vmem:[#allocation12_spill] sm:$0xff] %v12337_v28  ;;  %v12339_v22 = vpop.permute.xlu1 %1913  ;;  %9021 = vmatpush3.bf16.msra.mxu0 %v10009_v7  ;;  %v12349_v59 = vpop.eup %10320  ;;  %v1252_v7 = vsub.f32 0.0, %v1236_v63  ;;  %v1752_v60 = vsub.f32 %v11940_v46, %v12292_v16  ;;  %10332 = vpow2.f32 %v1454_v42  ;;  %v12373_v42 = vld [vmem:[%s15405_s1 + $0xd] ss:$0 sm:$0xff] }
 0x30c   : > { %15531 = vst [vmem:[#allocation14_spill] sm:$0xff] %v12339_v22  ;;  %9022 = vmatprep.subr.bf16.mxu0 %v10013_v9  ;;  %15532 = vst [vmem:[#allocation17_spill] sm:$0xff] %v12349_v59  ;;  %3149 = vmatprep.mubr.bf16.mxu0 %v1663_v3  ;;  %v1572_v26 = vsub.f32 %v11949_v41, %v12280_v51  ;;  %v1035_v33 = vmul.f32 %v12139_v49, %v1015_v11  ;;  %v12360_v9 = vpop.eup %10322  ;;  %v1440_v40 = vsub.f32 0.0, %v12333_v56 }
 0x30d   : > { %v1433_v5 = vsub.f32 0.0, %v1417_v39  ;;  %v1222_v63 = vmul.f32 %v12145_v23, %v1202_v19  ;;  %v12367_v46 = vpop.eup %10324  ;;  %10334 = vpow2.f32 %v1646_v62  ;;  %v1623_v41 = vsub.f32 0.0, %v1607_v54 }
 0x30e   : > { %v1593_v53 = vmul.f32 %v12314_v18, %v1573_v27  ;;  %v10327_v19 = vpop.eup %10326  ;;  %v1280_v39 = vmul.f32 1.442695, %v1252_v7  ;;  %v1223_v3 = vmul.f32 %v12145_v23, %v1203_v4  ;;  %v1592_v62 = vmul.f32 %v12314_v18, %v1572_v26 }
 0x30f   : > { %v1456_v1 = vmul.f32 1.442695, %v1433_v5  ;;  %v1922_v48 = vpop.permute.xlu1 %1921  ;;  %9023 = vmatpush3.bf16.msra.mxu0 %v10015_v21  ;;  %v1554_v56 = vpop.permute.xlu0 %1553  ;;  %v1387_v21 = vsub.f32 %v12043_v31, %v12268_v44  ;;  %v1051_v27 = vmul.f32 %v1035_v33, %v1035_v33  ;;  %v1017_v5 = vsub.f32 %v12260_v20, %v12109_v12 }
 0x310   : > { %v1946_v11 = vsub.f32 %v1922_v48, %v12373_v42  ;;  %9024 = vmatprep.subr.bf16.mxu0 %v10016_v2  ;;  %v12385_v48 = vld [vmem:[%s15406_s2 + $0xd] ss:$0 sm:$0xff]  ;;  %v1772_v31 = vmul.f32 %v12323_v43, %v1752_v60  ;;  %v1238_v7 = vmul.f32 %v1222_v63, %v1222_v63  ;;  %v1650_v12 = vmul.f32 1.442695, %v1623_v41  ;;  %v12401_v60 = vld [vmem:[%s15405_s1 + $0xf] ss:$0 sm:$0xff] }
 0x311   : > { %10336 = vpow2.f32 %v1456_v1  ;;  %v1936_v1 = vsub.f32 %v11972_v52, %v12373_v42  ;;  %v1609_v20 = vmul.f32 %v1593_v53, %v1593_v53  ;;  %v1575_v26 = vsub.f32 %v1554_v56, %v12280_v51 }
 0x312   : > { %v10329_v54 = vpop.eup %10328  ;;  %v12388_v2 = vmul.f32 %v12385_v48, %v1946_v11  ;;  %10338 = vpow2.f32 %v1820_v32  ;;  %v1470_v11 = vmul.f32 1.442695, %v1440_v40  ;;  %v1239_v24 = vmul.f32 %v1223_v3, %v1223_v3 }
 0x313   : > { %v12390_v23 = vpop.eup %10330  ;;  %v1105_v4 = vpack.c.bf16 %v10329_v54, %v10327_v19  ;;  %9025 = vmatpush3.bf16.msra.mxu0 %v10017_v58  ;;  %10340 = vpow2.f32 %v1098_v47  ;;  %v1407_v52 = vmul.f32 %v12300_v30, %v1387_v21  ;;  %v1608_v32 = vmul.f32 %v1592_v62, %v1592_v62  ;;  %v15533_v47 = vld [vmem:[#allocation21_spill] sm:$0xff] }
 0x314   : > { %v12396_v33 = vpop.permute.xlu1 %2051  ;;  %v12404_v63 = vpop.permute.xlu0 %1901  ;;  %v1067_v58 = vsub.f32 0.0, %v1051_v27  ;;  %v1574_v41 = vsub.f32 %v12180_v37, %v12280_v51  ;;  %v1037_v53 = vmul.f32 %v12139_v49, %v1017_v5  ;;  %v15534_v40 = vpack.c.bf16 %v12027_v35, %v15533_v47  ;;  %v15535_v21 = vld [vmem:[#allocation29_spill] sm:$0xff]  ;;  %v12422_v51 = vld [vmem:[%s15406_s2 + $0xf] ss:$0 sm:$0xff] }
 0x315   : > { %3053 = vmatmul.mubr.bf16.gmra.mrb[28].mxu1 %v1105_v4  ;;  %10342 = vpow2.f32 %v1280_v39  ;;  %v1788_v56 = vmul.f32 %v1772_v31, %v1772_v31  ;;  %v1956_v19 = vmul.f32 %v12385_v48, %v1936_v1  ;;  %v1254_v3 = vsub.f32 0.0, %v1238_v7  ;;  %v10333_v37 = vpop.eup %10332 }
 0x316   : > { %3060 = vmatprep.mubr.bf16.mxu1 %v15534_v40  ;;  %v2304_v54 = vsub.f32 %v15535_v21, %v12401_v60  ;;  %10344 = vpow2.f32 %v1650_v12  ;;  %v1625_v62 = vsub.f32 0.0, %v1609_v20  ;;  %v1595_v27 = vmul.f32 %v12314_v18, %v1575_v26 }
 0x317   : > { %v1809_v49 = vsub.f32 0.0, %v12351_v25  ;;  %10346 = vpow2.f32 %v1470_v11  ;;  %v1255_v35 = vsub.f32 0.0, %v1239_v24  ;;  %v1423_v39 = vmul.f32 %v1407_v52, %v1407_v52  ;;  %v10335_v31 = vpop.eup %10334  ;;  %v15537_v25 = vld [vmem:[#allocation13_spill] sm:$0xff] }
 0x318   : > { %v12416_v4 = vpop.permute.xlu1 %2059  ;;  %v12424_v5 = vpop.permute.xlu0 %1909  ;;  %v1624_v1 = vsub.f32 0.0, %v1608_v32  ;;  %v1096_v7 = vmul.f32 1.442695, %v1067_v58  ;;  %v1594_v12 = vmul.f32 %v12314_v18, %v1574_v41  ;;  %v1053_v20 = vmul.f32 %v1037_v53, %v1037_v53  ;;  %v15538_v32 = vld [vmem:[#allocation32_spill] sm:$0xff]  ;;  %v15539_v53 = vld [vmem:[#allocation30_spill] sm:$0xff] }
 0x319   : > { %15536 = vst [vmem:[#allocation10_spill] sm:$0xff] %v12424_v5  ;;  %v1804_v47 = vsub.f32 0.0, %v1788_v56  ;;  %v1972_v40 = vmul.f32 %v1956_v19, %v1956_v19  ;;  %v1751_v24 = vsub.f32 %v15537_v25, %v12292_v16  ;;  %v1284_v11 = vmul.f32 1.442695, %v1254_v3  ;;  %v15540_v56 = vld [vmem:[#allocation22_spill] sm:$0xff]  ;;  %v15542_v25 = vld [vmem:[#allocation24_spill] sm:$0xff] }
 0x31a   : > { %v2324_v21 = vmul.f32 %v12422_v51, %v2304_v54  ;;  %v1654_v22 = vmul.f32 1.442695, %v1625_v62  ;;  %v1611_v28 = vmul.f32 %v1595_v27, %v1595_v27  ;;  %v1286_v5 = vmul.f32 1.442695, %v1255_v35 }
 0x31b   : > { %v10337_v26 = vpop.eup %10336  ;;  %v2307_v58 = vsub.f32 %v15538_v32, %v12401_v60  ;;  %v1439_v18 = vsub.f32 0.0, %v1423_v39  ;;  %v15541_v19 = vpack.c.bf16 %v15539_v53, %v15540_v56  ;;  %v1664_v3 = vpack.c.bf16 %v10335_v31, %v15542_v25 }
 0x31c   : > { %v12430_v52 = vpop.permute.xlu1 %2063  ;;  %v1477_v59 = vpack.c.bf16 %v10337_v26, %v10333_v37  ;;  %v12434_v41 = vpop.permute.xlu0 %1917  ;;  %v1652_v54 = vmul.f32 1.442695, %v1624_v1  ;;  %10348 = vpow2.f32 %v1096_v7  ;;  %v1610_v62 = vmul.f32 %v1594_v12, %v1594_v12 }
 0x31d   : > { %3061 = vmatmul.mubr.bf16.gmra.mrb[32].mxu1 %v15541_v19  ;;  %v12440_v0 = vpop.eup %10338  ;;  %v1069_v27 = vsub.f32 0.0, %v1053_v20  ;;  %v15543_v37 = vpack.c.bf16 %v12128_v57, %v12117_v38  ;;  %v12447_v39 = vmul.f32 1.442695, %v1809_v49  ;;  %v1988_v26 = vsub.f32 0.0, %v1972_v40  ;;  %v15544_v57 = vld [vmem:[#allocation33_spill] sm:$0xff] }
 0x31e   : > { %3150 = vmatmul.mubr.bf16.gmra.mrb[28].mxu0 %v1477_v59  ;;  %v12445_v35 = vpop.eup %10340  ;;  %v1771_v32 = vmul.f32 %v12323_v43, %v1751_v24  ;;  %10350 = vpow2.f32 %v1284_v11  ;;  %v1826_v31 = vmul.f32 1.442695, %v1804_v47  ;;  %v2340_v53 = vmul.f32 %v2324_v21, %v2324_v21  ;;  %v15545_v47 = vld [vmem:[#allocation6_spill] sm:$0xff]  ;;  %v15546_v21 = vld [vmem:[#allocation23_spill] sm:$0xff] }
 0x31f   : > { %3068 = vmatprep.mubr.bf16.mxu1 %v15543_v37  ;;  %3157 = vmatprep.mubr.bf16.mxu0 %v1664_v3  ;;  %10352 = vpow2.f32 %v1654_v22  ;;  %v1627_v1 = vsub.f32 0.0, %v1611_v28  ;;  %v10343_v12 = vpop.eup %10342  ;;  %v2327_v38 = vmul.f32 %v12422_v51, %v2307_v58  ;;  %v2309_v59 = vsub.f32 %v15544_v57, %v12401_v60 }
 0x320   : > { %v12450_v7 = vpop.permute.xlu1 %2071  ;;  %10354 = vpow2.f32 %v1286_v5  ;;  %v1468_v49 = vmul.f32 1.442695, %v1439_v18  ;;  %v12455_v20 = vpop.permute.xlu0 %1893  ;;  %v1626_v24 = vsub.f32 0.0, %v1610_v62  ;;  %v1100_v11 = vmul.f32 1.442695, %v1069_v27 }
 0x321   : > { %v10345_v40 = vpop.eup %10344  ;;  %10356 = vpow2.f32 %v1652_v54  ;;  %v1479_v22 = vpack.c.bf16 %v12367_v46, %v15545_v47  ;;  %v12463_v5 = vmul.f32 %v15546_v21, %v15546_v21  ;;  %v2008_v58 = vmul.f32 1.442695, %v1988_v26 }
 0x322   : > { %v12459_v28 = vpop.eup %10346  ;;  %v1787_v56 = vmul.f32 %v1771_v32, %v1771_v32  ;;  %v1982_v18 = vmul.f32 %v12388_v2, %v12388_v2  ;;  %10358 = vpow2.f32 %v1826_v31  ;;  %v2356_v19 = vsub.f32 0.0, %v2340_v53  ;;  %v12476_v2 = vld [vmem:[%s15405_s1 + $0xe] ss:$0 sm:$0xff]  ;;  %v15548_v53 = vld [vmem:[#allocation31_spill] sm:$0xff] }
 0x323   : > { %v1658_v25 = vmul.f32 1.442695, %v1627_v1  ;;  %v1294_v3 = vpack.c.bf16 %v12360_v9, %v10343_v12  ;;  %v2343_v54 = vmul.f32 %v2327_v38, %v2327_v38  ;;  %v2329_v62 = vmul.f32 %v12422_v51, %v2309_v59  ;;  %v15549_v1 = vld [vmem:[#allocation25_spill] sm:$0xff] }
 0x324   : > { %10360 = vpow2.f32 %v1468_v49  ;;  %v1926_v27 = vpop.permute.xlu0 %1925  ;;  %v15547_v57 = vpack.c.bf16 %v12287_v15, %v12078_v55  ;;  %v1665_v26 = vpack.c.bf16 %v10345_v40, %v12161_v36  ;;  %v1656_v32 = vmul.f32 1.442695, %v1626_v24 }
 0x325   : > { %v2242_v37 = vpop.permute.xlu1 %2241  ;;  %10362 = vpow2.f32 %v1100_v11  ;;  %v1947_v9 = vsub.f32 %v1926_v27, %v12373_v42  ;;  %v15550_v12 = vpack.c.bf16 %v15548_v53, %v15549_v1  ;;  %v1812_v55 = vsub.f32 0.0, %v12463_v5 }
 0x326   : > { %3069 = vmatmul.mubr.bf16.gmra.mrb[36].mxu1 %v15547_v57  ;;  %v2305_v31 = vsub.f32 %v2242_v37, %v12401_v60  ;;  %10364 = vpow2.f32 %v2008_v58  ;;  %v1803_v36 = vsub.f32 0.0, %v1787_v56  ;;  %v1998_v15 = vsub.f32 0.0, %v1982_v18  ;;  %v10349_v38 = vpop.eup %10348 }
 0x327   : > { %3076 = vmatprep.mubr.bf16.mxu1 %v1294_v3  ;;  %3158 = vmatmul.mubr.bf16.gmra.mrb[32].mxu0 %v15550_v12  ;;  %10366 = vpow2.f32 %v1658_v25  ;;  %v2118_v59 = vsub.f32 %v12396_v33, %v12476_v2  ;;  %v1967_v49 = vmul.f32 %v12385_v48, %v1947_v9  ;;  %v2372_v11 = vmul.f32 1.442695, %v2356_v19  ;;  %v12497_v33 = vld [vmem:[%s15406_s2 + $0xe] ss:$0 sm:$0xff] }
 0x328   : > { %3165 = vmatprep.mubr.bf16.mxu0 %v1665_v26  ;;  %v2325_v40 = vmul.f32 %v12422_v51, %v2305_v31  ;;  %v10351_v24 = vpop.eup %10350  ;;  %v2359_v21 = vsub.f32 0.0, %v2343_v54  ;;  %v12488_v3 = vmul.f32 %v2329_v62, %v2329_v62  ;;  %v2119_v58 = vsub.f32 %v12244_v10, %v12476_v2 }
 0x329   : > { %v10353_v56 = vpop.eup %10352  ;;  %10368 = vpow2.f32 %v1656_v32  ;;  %v1938_v18 = vsub.f32 %v12209_v14, %v12373_v42  ;;  %v1983_v25 = vmul.f32 %v1967_v49, %v1967_v49  ;;  %v2028_v54 = vmul.f32 1.442695, %v1998_v15 }
 0x32a   : > { %v2341_v27 = vmul.f32 %v2325_v40, %v2325_v40  ;;  %v1368_v37 = vpop.permute.xlu1 %1367  ;;  %v10355_v19 = vpop.eup %10354  ;;  %v1939_v62 = vsub.f32 %v12455_v20, %v12373_v42  ;;  %v1108_v57 = vpack.c.bf16 %v10349_v38, %v12166_v29  ;;  %v1824_v32 = vmul.f32 1.442695, %v1803_v36 }
 0x32b   : > { %v1389_v10 = vsub.f32 %v1368_v37, %v12268_v44  ;;  %v10357_v26 = vpop.eup %10356  ;;  %v2138_v14 = vmul.f32 %v12497_v33, %v2118_v59  ;;  %v1999_v9 = vsub.f32 0.0, %v1983_v25  ;;  %v1295_v31 = vpack.c.bf16 %v10355_v19, %v10351_v24 }
 0x32c   : > { %v2139_v53 = vmul.f32 %v12497_v33, %v2119_v58  ;;  %v2357_v1 = vsub.f32 0.0, %v2341_v27  ;;  %v1666_v15 = vpack.c.bf16 %v10353_v56, %v10357_v26  ;;  %v12506_v49 = vpop.eup %10358  ;;  %10370 = vpow2.f32 %v2372_v11 }
 0x32d   : > { %v1409_v12 = vmul.f32 %v12300_v30, %v1389_v10  ;;  %v2378_v20 = vmul.f32 1.442695, %v2359_v21  ;;  %v1958_v44 = vmul.f32 %v12385_v48, %v1938_v18  ;;  %v2030_v29 = vmul.f32 1.442695, %v1999_v9 }
 0x32e   : > { %3077 = vmatmul.mubr.bf16.gmra.mrb[40].mxu1 %v1108_v57  ;;  %v10361_v36 = vpop.eup %10360  ;;  %v2361_v38 = vsub.f32 0.0, %v12488_v3  ;;  %10372 = vpow2.f32 %v2028_v54  ;;  %v1959_v30 = vmul.f32 %v12385_v48, %v1939_v62  ;;  %v2154_v11 = vmul.f32 %v2138_v14, %v2138_v14 }
 0x32f   : > { %3084 = vmatprep.mubr.bf16.mxu1 %v1295_v31  ;;  %3166 = vmatmul.mubr.bf16.gmra.mrb[36].mxu0 %v1479_v22  ;;  %v1425_v59 = vmul.f32 %v1409_v12, %v1409_v12  ;;  %v2246_v40 = vpop.permute.xlu1 %2245  ;;  %v10363_v24 = vpop.eup %10362  ;;  %v2121_v21 = vsub.f32 %v12430_v52, %v12476_v2  ;;  %10374 = vpow2.f32 %v2030_v29  ;;  %v2155_v46 = vmul.f32 %v2139_v53, %v2139_v53 }
 0x330   : > { %3173 = vmatprep.mubr.bf16.mxu0 %v1666_v15  ;;  %v2306_v58 = vsub.f32 %v2246_v40, %v12401_v60  ;;  %v12517_v56 = vpop.eup %10364  ;;  %10376 = vpow2.f32 %v1824_v32  ;;  %v2374_v47 = vmul.f32 1.442695, %v2357_v1  ;;  %v1974_v18 = vmul.f32 %v1958_v44, %v1958_v44 }
 0x331   : > { %v1441_v22 = vsub.f32 0.0, %v1425_v59  ;;  %v10367_v3 = vpop.eup %10366  ;;  %v2120_v25 = vsub.f32 %v12416_v4, %v12476_v2  ;;  %v1480_v37 = vpack.c.bf16 %v10361_v36, %v12249_v61  ;;  %v2122_v52 = vsub.f32 %v12272_v34, %v12476_v2 }
 0x332   : > { %v2326_v27 = vmul.f32 %v12422_v51, %v2306_v58  ;;  %v1975_v19 = vmul.f32 %v1959_v30, %v1959_v30  ;;  %v1109_v10 = vpack.c.bf16 %v10363_v24, %v12445_v35  ;;  %v2170_v26 = vsub.f32 0.0, %v2154_v11  ;;  %v2266_v24 = vpop.permute.xlu0 %2265 }
 0x333   : > { %v1472_v54 = vmul.f32 1.442695, %v1441_v22  ;;  %v2254_v62 = vpop.permute.xlu1 %2253  ;;  %v10369_v57 = vpop.eup %10368  ;;  %v2141_v32 = vmul.f32 %v12497_v33, %v2121_v21  ;;  %v2382_v4 = vmul.f32 1.442695, %v2361_v38  ;;  %v2171_v31 = vsub.f32 0.0, %v2155_v46 }
 0x334   : > { %v2342_v14 = vmul.f32 %v2326_v27, %v2326_v27  ;;  %v2308_v9 = vsub.f32 %v2254_v62, %v12401_v60  ;;  %10378 = vpow2.f32 %v2374_v47  ;;  %v1667_v61 = vpack.c.bf16 %v10367_v3, %v10369_v57  ;;  %v15552_v62 = vld [vmem:[#allocation3_spill] sm:$0xff] }
 0x335   : > { %v2140_v53 = vmul.f32 %v12497_v33, %v2120_v25  ;;  %10380 = vpow2.f32 %v1472_v54  ;;  %v15551_v35 = vpack.c.bf16 %v12096_v6, %v12017_v8  ;;  %v2123_v12 = vsub.f32 %v12450_v7, %v12476_v2 }
 0x336   : > { %3085 = vmatmul.mubr.bf16.gmra.mrb[44].mxu1 %v1109_v10  ;;  %v2358_v34 = vsub.f32 0.0, %v2342_v14  ;;  %v2328_v1 = vmul.f32 %v12422_v51, %v2308_v9  ;;  %10382 = vpow2.f32 %v2378_v20  ;;  %v1991_v15 = vsub.f32 0.0, %v1975_v19  ;;  %v12537_v36 = vpop.eup %10370  ;;  %v15553_v10 = vld [vmem:[#allocation26_spill] sm:$0xff] }
 0x337   : > { %3174 = vmatmul.mubr.bf16.gmra.mrb[40].mxu0 %v1480_v37  ;;  %3222 = vmatprep.mubr.bf16.mxu1 %v15551_v35  ;;  %v2262_v44 = vpop.permute.xlu1 %2261  ;;  %v1847_v29 = vpack.c.bf16 %v12440_v0, %v12237_v50  ;;  %v1990_v38 = vsub.f32 0.0, %v1974_v18  ;;  %v2142_v30 = vmul.f32 %v12497_v33, %v2122_v52  ;;  %v2186_v59 = vmul.f32 1.442695, %v2170_v26  ;;  %v15555_v26 = vld [vmem:[#allocation5_spill] sm:$0xff]  ;;  %v15561_v50 = vld [vmem:[#allocation14_spill] sm:$0xff] }
 0x338   : > { %3181 = vmatprep.mubr.bf16.mxu0 %v1667_v61  ;;  %v2157_v40 = vmul.f32 %v2141_v32, %v2141_v32  ;;  %v12540_v8 = vpop.eup %10372  ;;  %v1941_v6 = vsub.f32 %v12404_v63, %v12373_v42  ;;  %v2376_v7 = vmul.f32 1.442695, %v2358_v34  ;;  %v2344_v20 = vmul.f32 %v2328_v1, %v2328_v1 }
 0x339   : > { %v2310_v11 = vsub.f32 %v2262_v44, %v12401_v60  ;;  %v12545_v21 = vpop.eup %10374  ;;  %v12549_v58 = vmul.f32 1.442695, %v1812_v55  ;;  %10384 = vpow2.f32 %v2382_v4  ;;  %v2188_v46 = vmul.f32 1.442695, %v2171_v31 }
 0x33a   : > { %v2156_v47 = vmul.f32 %v2140_v53, %v2140_v53  ;;  %v12551_v22 = vpop.eup %10376  ;;  %v2143_v3 = vmul.f32 %v12497_v33, %v2123_v12  ;;  %v2014_v18 = vmul.f32 1.442695, %v1991_v15  ;;  %v2311_v63 = vsub.f32 %v2266_v24, %v12401_v60  ;;  %v15557_v12 = vld [vmem:[#allocation8_spill] sm:$0xff] }
 0x33b   : > { %v12555_v25 = vpop.permute.xlu1 %2269  ;;  %v2039_v27 = vpack.c.bf16 %v12545_v21, %v12540_v8  ;;  %v2012_v37 = vmul.f32 1.442695, %v1990_v38  ;;  %v2158_v52 = vmul.f32 %v2142_v30, %v2142_v30  ;;  %10386 = vpow2.f32 %v2186_v59 }
 0x33c   : > { %v2173_v5 = vsub.f32 0.0, %v2157_v40  ;;  %v1961_v55 = vmul.f32 %v12385_v48, %v1941_v6  ;;  %10388 = vpow2.f32 %v2376_v7  ;;  %v2360_v19 = vsub.f32 0.0, %v2344_v20  ;;  %v15558_v7 = vld [vmem:[#allocation10_spill] sm:$0xff] }
 0x33d   : > { %v2330_v54 = vmul.f32 %v12422_v51, %v2310_v11  ;;  %v15554_v57 = vpack.c.bf16 %v15552_v62, %v15553_v10  ;;  %v1759_v32 = vsub.f32 %v15555_v26, %v12292_v16  ;;  %v2313_v14 = vsub.f32 %v12224_v45, %v12401_v60 }
 0x33e   : > { %10390 = vpow2.f32 %v2188_v46  ;;  %v2172_v9 = vsub.f32 0.0, %v2156_v47  ;;  %v15556_v4 = vpack.c.bf16 %v12150_v17, %v12262_v13  ;;  %v10379_v31 = vpop.eup %10378  ;;  %v2159_v61 = vmul.f32 %v2143_v3, %v2143_v3  ;;  %v15559_v3 = vld [vmem:[#allocation17_spill] sm:$0xff] }
 0x33f   : > { %3223 = vmatmul.mubr.bf16.vlgmr.msra.gmra.mrb[48].mxu1 %v15554_v57  ;;  %10392 = vpow2.f32 %v2014_v18  ;;  %v2331_v53 = vmul.f32 %v12422_v51, %v2311_v63  ;;  %v2034_v34 = vpack.c.bf16 %v12390_v23, %v12517_v56  ;;  %v10381_v1 = vpop.eup %10380  ;;  %v2174_v35 = vsub.f32 0.0, %v2158_v52 }
 0x340   : > { %3230 = vmatprep.mubr.bf16.mxu1 %v15556_v4  ;;  %10394 = vpow2.f32 %v2012_v37  ;;  %v2124_v45 = vsub.f32 %v15557_v12, %v12476_v2  ;;  %v2192_v15 = vmul.f32 1.442695, %v2173_v5  ;;  %v12576_v44 = vpop.permute.xlu1 %2083  ;;  %v12578_v38 = vpop.eup %10382  ;;  %v1977_v17 = vmul.f32 %v1961_v55, %v1961_v55 }
 0x341   : > { %v2380_v13 = vmul.f32 1.442695, %v2360_v19  ;;  %v2346_v30 = vmul.f32 %v2330_v54, %v2330_v54  ;;  %v1481_v59 = vpack.c.bf16 %v10381_v1, %v12459_v28  ;;  %v12582_v40 = vmul.f32 %v12323_v43, %v1759_v32  ;;  %v15560_v32 = vld [vmem:[#allocation12_spill] sm:$0xff] }
 0x342   : > { %v2333_v23 = vmul.f32 %v12422_v51, %v2313_v14  ;;  %v2190_v56 = vmul.f32 1.442695, %v2172_v9  ;;  %v8834_v24 = vpop.f32.mrb[16].mxu1  ;;  %v2404_v6 = vpack.c.bf16 %v10379_v31, %v12537_v36  ;;  %v1943_v20 = vsub.f32 %v15558_v7, %v12373_v42 }
 0x343   : > { %v2175_v11 = vsub.f32 0.0, %v2159_v61  ;;  %v2347_v46 = vmul.f32 %v2331_v53, %v2331_v53  ;;  %3182 = vmatmul.mubr.bf16.gmra.mrb[44].mxu0 %v1481_v59  ;;  %v8835_v47 = vpop.f32.mrb[17].mxu1  ;;  %v1848_v18 = vpack.c.bf16 %v12551_v22, %v15559_v3  ;;  %v12590_v28 = vpop.eup %10384  ;;  %v2144_v63 = vmul.f32 %v12497_v33, %v2124_v45 }
 0x344   : > { %10396 = vpow2.f32 %v2192_v15  ;;  %v2312_v37 = vsub.f32 %v12555_v25, %v12401_v60  ;;  %v12595_v52 = vadd.f32 %v8835_v47, %v8834_v24  ;;  %3319 = vmatprep.mubr.bf16.mxu0 %v2404_v6  ;;  %v8837_v36 = vpop.f32.mrb[18].mxu1  ;;  %v2194_v5 = vmul.f32 1.442695, %v2174_v35 }
 0x345   : > { %v1993_v55 = vsub.f32 0.0, %v1977_v17  ;;  %10398 = vpow2.f32 %v2380_v13  ;;  %v2362_v19 = vsub.f32 0.0, %v2346_v30  ;;  %v1708_v54 = vpop.permute.xlu1 %1707  ;;  %v8838_v62 = vpop.f32.mrb[19].mxu1  ;;  %v2349_v10 = vmul.f32 %v2333_v23, %v2333_v23 }
 0x346   : > { %v10387_v22 = vpop.eup %10386  ;;  %10400 = vpow2.f32 %v2190_v56  ;;  %v1753_v57 = vsub.f32 %v1708_v54, %v12292_v16  ;;  %v12601_v25 = vadd.f32 %v8838_v62, %v8837_v36  ;;  %v2127_v14 = vsub.f32 %v15560_v32, %v12476_v2 }
 0x347   : > { %3231 = vmatmul.mubr.bf16.gmra.mrb[52].mxu1 %v1847_v29  ;;  %v10389_v26 = vpop.eup %10388  ;;  %v1963_v9 = vmul.f32 %v12385_v48, %v1943_v20  ;;  %v2196_v4 = vmul.f32 1.442695, %v2175_v11  ;;  %v2363_v31 = vsub.f32 0.0, %v2347_v46  ;;  %v2160_v53 = vmul.f32 %v2144_v63, %v2144_v63 }
 0x348   : > { %3238 = vmatprep.mubr.bf16.mxu1 %v2034_v34  ;;  %v10391_v61 = vpop.eup %10390  ;;  %v1944_v0 = vsub.f32 %v15561_v50, %v12373_v42  ;;  %v2332_v29 = vmul.f32 %v12422_v51, %v2312_v37  ;;  %v1773_v1 = vmul.f32 %v12323_v43, %v1753_v57  ;;  %10402 = vpow2.f32 %v2194_v5 }
 0x349   : > { %v10393_v35 = vpop.eup %10392  ;;  %v2018_v34 = vmul.f32 1.442695, %v1993_v55  ;;  %v2384_v12 = vmul.f32 1.442695, %v2362_v19  ;;  %v1740_v45 = vpop.permute.xlu1 %1739  ;;  %v2218_v15 = vpack.c.bf16 %v10391_v61, %v10387_v22  ;;  %v1945_v13 = vsub.f32 %v12434_v41, %v12373_v42 }
 0x34a   : > { %v10395_v17 = vpop.eup %10394  ;;  %v1789_v30 = vmul.f32 %v1773_v1, %v1773_v1  ;;  %v1761_v59 = vsub.f32 %v1740_v45, %v12292_v16  ;;  %v2405_v23 = vpack.c.bf16 %v12578_v38, %v10389_v26  ;;  %v1979_v56 = vmul.f32 %v1963_v9, %v1963_v9  ;;  %v12618_v16 = vpop.permute.xlu0 %2091 }
 0x34b   : > { %10404 = vpow2.f32 %v2196_v4  ;;  %v2386_v24 = vmul.f32 1.442695, %v2363_v31  ;;  %v2126_v6 = vsub.f32 %v12576_v44, %v12476_v2  ;;  %3320 = vmatmul.mubr.bf16.vlgmr.msra.gmra.mrb[48].mxu0 %v2218_v15  ;;  %v2348_v7 = vmul.f32 %v2332_v29, %v2332_v29 }
 0x34c   : > { %v1805_v20 = vsub.f32 0.0, %v1789_v30  ;;  %v1781_v11 = vmul.f32 %v12323_v43, %v1761_v59  ;;  %3327 = vmatprep.mubr.bf16.mxu0 %v2405_v23  ;;  %v2035_v46 = vpack.c.bf16 %v10393_v35, %v10395_v17  ;;  %v2365_v47 = vsub.f32 0.0, %v2349_v10 }
 0x34d   : > { %v2176_v42 = vsub.f32 0.0, %v2160_v53  ;;  %v2147_v41 = vmul.f32 %v12497_v33, %v2127_v14  ;;  %10406 = vpow2.f32 %v2384_v12  ;;  %v1965_v3 = vmul.f32 %v12385_v48, %v1945_v13 }
 0x34e   : > { %v10397_v38 = vpop.eup %10396  ;;  %10408 = vpow2.f32 %v2018_v34  ;;  %v1828_v44 = vmul.f32 1.442695, %v1805_v20  ;;  %v1797_v63 = vmul.f32 %v1781_v11, %v1781_v11  ;;  %v2080_v37 = vpop.permute.xlu1 %2079  ;;  %v1995_v43 = vsub.f32 0.0, %v1979_v56 }
 0x34f   : > { %3239 = vmatmul.mubr.bf16.gmra.mrb[56].mxu1 %v1848_v18  ;;  %v10399_v36 = vpop.eup %10398  ;;  %10410 = vpow2.f32 %v2386_v24  ;;  %v2146_v5 = vmul.f32 %v12497_v33, %v2126_v6  ;;  %v2125_v55 = vsub.f32 %v2080_v37, %v12476_v2  ;;  %v1964_v54 = vmul.f32 %v12385_v48, %v1944_v0  ;;  %v2286_v53 = vpop.permute.xlu0 %2285 }
 0x350   : > { %3246 = vmatprep.mubr.bf16.mxu1 %v2035_v46  ;;  %v10401_v19 = vpop.eup %10400  ;;  %v2364_v62 = vsub.f32 0.0, %v2348_v7  ;;  %10412 = vpow2.f32 %v1828_v44  ;;  %v1813_v18 = vsub.f32 0.0, %v1797_v63  ;;  %v2390_v22 = vmul.f32 1.442695, %v2365_v47 }
 0x351   : > { %v2163_v10 = vmul.f32 %v2147_v41, %v2147_v41  ;;  %v2145_v57 = vmul.f32 %v12497_v33, %v2125_v55  ;;  %v2219_v26 = vpack.c.bf16 %v10397_v38, %v10401_v19  ;;  %v2198_v32 = vmul.f32 1.442695, %v2176_v42 }
 0x352   : > { %v1981_v14 = vmul.f32 %v1965_v3, %v1965_v3  ;;  %v1844_v9 = vmul.f32 1.442695, %v1813_v18  ;;  %v2406_v4 = vpack.c.bf16 %v12590_v28, %v10399_v36  ;;  %v10403_v31 = vpop.eup %10402  ;;  %10414 = vpow2.f32 %v12549_v58 }
 0x353   : > { %v2022_v61 = vmul.f32 1.442695, %v1995_v43  ;;  %v2162_v50 = vmul.f32 %v2146_v5, %v2146_v5  ;;  %v2161_v48 = vmul.f32 %v2145_v57, %v2145_v57  ;;  %3328 = vmatmul.mubr.bf16.gmra.mrb[52].mxu0 %v2219_v26  ;;  %v2278_v0 = vpop.permute.xlu1 %2277  ;;  %v1980_v29 = vmul.f32 %v1964_v54, %v1964_v54  ;;  %v2104_v47 = vpop.permute.xlu0 %2103  ;;  %v15562_v54 = vld [vmem:[#allocation28_spill] sm:$0xff]  ;;  %v15563_v26 = vld [vmem:[#allocation11_spill] sm:$0xff] }
 0x354   : > { %v2388_v1 = vmul.f32 1.442695, %v2364_v62  ;;  %10416 = vpow2.f32 %v1844_v9  ;;  %v2314_v35 = vsub.f32 %v2278_v0, %v12401_v60  ;;  %3335 = vmatprep.mubr.bf16.mxu0 %v2406_v4  ;;  %v2179_v12 = vsub.f32 0.0, %v2163_v10 }
 0x355   : > { %v10405_v34 = vpop.eup %10404  ;;  %10418 = vpow2.f32 %v2390_v22  ;;  %v2128_v28 = vsub.f32 %v12618_v16, %v12476_v2  ;;  %v2177_v45 = vsub.f32 0.0, %v2161_v48  ;;  %v12632_v58 = vmul.f32 %v12582_v40, %v12582_v40 }
 0x356   : > { %10420 = vpow2.f32 %v2198_v32  ;;  %v1997_v15 = vsub.f32 0.0, %v1981_v14  ;;  %v2334_v17 = vmul.f32 %v12422_v51, %v2314_v35  ;;  %v2316_v30 = vsub.f32 %v2286_v53, %v12401_v60 }
 0x357   : > { %v10407_v13 = vpop.eup %10406  ;;  %10422 = vpow2.f32 %v2022_v61  ;;  %v2178_v59 = vsub.f32 0.0, %v2162_v50  ;;  %v2200_v23 = vmul.f32 1.442695, %v2177_v45  ;;  %v2282_v56 = vpop.permute.xlu1 %2281  ;;  %v1996_v6 = vsub.f32 0.0, %v1980_v29 }
 0x358   : > { %v10409_v24 = vpop.eup %10408  ;;  %10424 = vpow2.f32 %v2388_v1  ;;  %v2350_v7 = vmul.f32 %v2334_v17, %v2334_v17  ;;  %v2315_v20 = vsub.f32 %v2282_v56, %v12401_v60  ;;  %v2204_v40 = vmul.f32 1.442695, %v2179_v12 }
 0x359   : > { %v10411_v11 = vpop.eup %10410  ;;  %v2148_v46 = vmul.f32 %v12497_v33, %v2128_v28  ;;  %10426 = vpow2.f32 %v2200_v23  ;;  %v2220_v42 = vpack.c.bf16 %v10405_v34, %v10403_v31  ;;  %v2026_v16 = vmul.f32 1.442695, %v1997_v15 }
 0x35a   : > { %v10413_v41 = vpop.eup %10412  ;;  %v2366_v38 = vsub.f32 0.0, %v2350_v7  ;;  %v2335_v3 = vmul.f32 %v12422_v51, %v2315_v20  ;;  %v2407_v44 = vpack.c.bf16 %v10411_v11, %v10407_v13  ;;  %10428 = vpow2.f32 %v12447_v39  ;;  %v15564_v13 = vld [vmem:[#allocation27_spill] sm:$0xff] }
 0x35b   : > { %v2336_v63 = vmul.f32 %v12422_v51, %v2316_v30  ;;  %v2202_v37 = vmul.f32 1.442695, %v2178_v59  ;;  %3336 = vmatmul.mubr.bf16.gmra.mrb[56].mxu0 %v2220_v42  ;;  %v1849_v36 = vpack.c.bf16 %v10413_v41, %v12506_v49  ;;  %v2024_v43 = vmul.f32 1.442695, %v1996_v6  ;;  %v15565_v30 = vld [vmem:[#allocation4_spill] sm:$0xff] }
 0x35c   : > { %v2131_v5 = vsub.f32 %v2104_v47, %v12476_v2  ;;  %v2351_v55 = vmul.f32 %v2335_v3, %v2335_v3  ;;  %3343 = vmatprep.mubr.bf16.mxu0 %v2407_v44  ;;  %v2096_v19 = vpop.permute.xlu1 %2095  ;;  %v2036_v62 = vpack.c.bf16 %v10409_v24, %v15562_v54  ;;  %v12644_v18 = vpop.eup %10414  ;;  %10430 = vpow2.f32 %v2204_v40  ;;  %v15566_v24 = vld [vmem:[#allocation9_spill] sm:$0xff] }
 0x35d   : > { %v2164_v22 = vmul.f32 %v2148_v46, %v2148_v46  ;;  %v2392_v10 = vmul.f32 1.442695, %v2366_v38  ;;  %v2129_v39 = vsub.f32 %v2096_v19, %v12476_v2  ;;  %3247 = vmatmul.mubr.bf16.gmra.mrb[60].mxu1 %v1849_v36  ;;  %v1810_v49 = vsub.f32 0.0, %v15563_v26  ;;  %v2108_v38 = vpop.permute.xlu0 %2107 }
 0x35e   : > { %v12647_v57 = vpop.eup %10416  ;;  %v1811_v32 = vsub.f32 0.0, %v12632_v58  ;;  %10432 = vpow2.f32 %v2026_v16  ;;  %v2367_v14 = vsub.f32 0.0, %v2351_v55  ;;  %3254 = vmatprep.mubr.bf16.mxu1 %v2036_v62  ;;  %v2352_v4 = vmul.f32 %v2336_v63, %v2336_v63 }
 0x35f   : > { %v10419_v9 = vpop.eup %10418  ;;  %10434 = vpow2.f32 %v2202_v37  ;;  %v2149_v31 = vmul.f32 %v12497_v33, %v2129_v39  ;;  %v1853_v61 = vpack.c.bf16 %v12647_v57, %v12644_v18  ;;  %v2151_v50 = vmul.f32 %v12497_v33, %v2131_v5 }
 0x360   : > { %v10421_v53 = vpop.eup %10420  ;;  %10436 = vpow2.f32 %v2024_v43  ;;  %v2394_v48 = vmul.f32 1.442695, %v2367_v14  ;;  %v2180_v29 = vsub.f32 0.0, %v2164_v22  ;;  %v1840_v12 = vmul.f32 1.442695, %v1811_v32 }
 0x361   : > { %v10423_v0 = vpop.eup %10422  ;;  %10438 = vpow2.f32 %v2392_v10  ;;  %v2165_v1 = vmul.f32 %v2149_v31, %v2149_v31  ;;  %v2290_v35 = vpop.permute.xlu1 %2289  ;;  %v1838_v58 = vmul.f32 1.442695, %v1810_v49  ;;  %v2368_v15 = vsub.f32 0.0, %v2352_v4  ;;  %v15567_v10 = vld [vmem:[#allocation7_spill] sm:$0xff] }
 0x362   : > { %v10425_v34 = vpop.eup %10424  ;;  %10440 = vpow2.f32 %v2394_v48  ;;  %v2317_v28 = vsub.f32 %v2290_v35, %v12401_v60  ;;  %v1850_v59 = vpack.c.bf16 %v15565_v30, %v15564_v13  ;;  %v2167_v23 = vmul.f32 %v2151_v50, %v2151_v50 }
 0x363   : > { %v10427_v45 = vpop.eup %10426  ;;  %v2181_v17 = vsub.f32 0.0, %v2165_v1  ;;  %v2037_v6 = vpack.c.bf16 %v10423_v0, %v15566_v24  ;;  %v2206_v11 = vmul.f32 1.442695, %v2180_v29  ;;  %v2408_v46 = vpack.c.bf16 %v10419_v9, %v10425_v34 }
 0x364   : > { %v2337_v56 = vmul.f32 %v12422_v51, %v2317_v28  ;;  %v2221_v7 = vpack.c.bf16 %v10427_v45, %v10421_v53  ;;  %v10429_v20 = vpop.eup %10428  ;;  %10442 = vpow2.f32 %v1840_v12  ;;  %v2396_v16 = vmul.f32 1.442695, %v2368_v15 }
 0x365   : > { %v2208_v40 = vmul.f32 1.442695, %v2181_v17  ;;  %3255 = vmatmul.mubr.bf16.gmra.mrb[64].mxu1 %v1850_v59  ;;  %v2183_v63 = vsub.f32 0.0, %v2167_v23  ;;  %v2132_v55 = vsub.f32 %v2108_v38, %v12476_v2  ;;  %v1851_v39 = vpack.c.bf16 %v10429_v20, %v15567_v10 }
 0x366   : > { %v2353_v47 = vmul.f32 %v2337_v56, %v2337_v56  ;;  %v2100_v42 = vpop.permute.xlu1 %2099  ;;  %3262 = vmatprep.mubr.bf16.mxu1 %v2037_v6  ;;  %3344 = vmatmul.mubr.bf16.gmra.mrb[60].mxu0 %v2221_v7  ;;  %v10431_v41 = vpop.eup %10430 }
 0x367   : > { %10444 = vpow2.f32 %v2208_v40  ;;  %v2130_v3 = vsub.f32 %v2100_v42, %v12476_v2  ;;  %3351 = vmatprep.mubr.bf16.mxu0 %v2408_v46  ;;  %v2212_v32 = vmul.f32 1.442695, %v2183_v63  ;;  %v2152_v53 = vmul.f32 %v12497_v33, %v2132_v55 }
 0x368   : > { %v10433_v44 = vpop.eup %10432  ;;  %10446 = vpow2.f32 %v1838_v58  ;;  %v2369_v37 = vsub.f32 0.0, %v2353_v47 }
 0x369   : > { %v10435_v36 = vpop.eup %10434  ;;  %10448 = vpow2.f32 %v2206_v11  ;;  %v2150_v43 = vmul.f32 %v12497_v33, %v2130_v3  ;;  %v2168_v28 = vmul.f32 %v2152_v53, %v2152_v53 }
 0x36a   : > { %v10437_v5 = vpop.eup %10436  ;;  %v2398_v19 = vmul.f32 1.442695, %v2369_v37  ;;  %10450 = vpow2.f32 %v2396_v16  ;;  %v2222_v9 = vpack.c.bf16 %v10431_v41, %v10435_v36 }
 0x36b   : > { %v10439_v54 = vpop.eup %10438  ;;  %v2166_v62 = vmul.f32 %v2150_v43, %v2150_v43  ;;  %v2294_v22 = vpop.permute.xlu1 %2293  ;;  %v2038_v26 = vpack.c.bf16 %v10433_v44, %v10437_v5  ;;  %v2184_v7 = vsub.f32 0.0, %v2168_v28 }
 0x36c   : > { %v10441_v49 = vpop.eup %10440  ;;  %10452 = vpow2.f32 %v2398_v19  ;;  %v2318_v14 = vsub.f32 %v2294_v22, %v12401_v60 }
 0x36d   : > { %v2182_v4 = vsub.f32 0.0, %v2166_v62  ;;  %3263 = vmatmul.mubr.bf16.gmra.mrb[68].mxu1 %v1851_v39  ;;  %v2409_v31 = vpack.c.bf16 %v10441_v49, %v10439_v54  ;;  %10454 = vpow2.f32 %v2212_v32  ;;  %v2214_v47 = vmul.f32 1.442695, %v2184_v7 }
 0x36e   : > { %v2338_v50 = vmul.f32 %v12422_v51, %v2318_v14  ;;  %3270 = vmatprep.mubr.bf16.mxu1 %v2038_v26  ;;  %3352 = vmatmul.mubr.bf16.gmra.mrb[64].mxu0 %v2222_v9  ;;  %v10443_v29 = vpop.eup %10442 }
 0x36f   : > { %v2210_v48 = vmul.f32 1.442695, %v2182_v4  ;;  %v2298_v0 = vpop.permute.xlu1 %2297  ;;  %3359 = vmatprep.mubr.bf16.mxu0 %v2409_v31 }
 0x370   : > { %v2354_v1 = vmul.f32 %v2338_v50, %v2338_v50  ;;  %v2319_v35 = vsub.f32 %v2298_v0, %v12401_v60 }
 0x371   : > { %v10445_v34 = vpop.eup %10444  ;;  %10456 = vpow2.f32 %v2210_v48 }
 0x372   : > { %v10447_v12 = vpop.eup %10446  ;;  %v2370_v45 = vsub.f32 0.0, %v2354_v1  ;;  %v2339_v58 = vmul.f32 %v12422_v51, %v2319_v35 }
 0x373   : > { %v10449_v15 = vpop.eup %10448  ;;  %v1852_v17 = vpack.c.bf16 %v10443_v29, %v10447_v12 }
 0x374   : > { %v2355_v13 = vmul.f32 %v2339_v58, %v2339_v58  ;;  %v2112_v30 = vpop.permute.xlu1 %2111  ;;  %v2223_v59 = vpack.c.bf16 %v10445_v34, %v10449_v15  ;;  %v10451_v23 = vpop.eup %10450  ;;  %v2400_v56 = vmul.f32 1.442695, %v2370_v45 }
 0x375   : > { %v2133_v24 = vsub.f32 %v2112_v30, %v12476_v2  ;;  %3271 = vmatmul.mubr.bf16.gmra.mrb[72].mxu1 %v1852_v17 }
 0x376   : > { %v10453_v6 = vpop.eup %10452  ;;  %v2371_v60 = vsub.f32 0.0, %v2355_v13  ;;  %3278 = vmatprep.mubr.bf16.mxu1 %v2039_v27  ;;  %3360 = vmatmul.mubr.bf16.gmra.mrb[68].mxu0 %v2223_v59  ;;  %10458 = vpow2.f32 %v2400_v56 }
 0x377   : > { %v2153_v51 = vmul.f32 %v12497_v33, %v2133_v24  ;;  %v2410_v20 = vpack.c.bf16 %v10453_v6, %v10451_v23  ;;  %v10455_v46 = vpop.eup %10454 }
 0x378   : > { %v2402_v11 = vmul.f32 1.442695, %v2371_v60 }
 0x379   : > { %v2169_v40 = vmul.f32 %v2153_v51, %v2153_v51  ;;  %3367 = vmatprep.mubr.bf16.mxu0 %v2410_v20 }
 0x37a   : > { %10460 = vpow2.f32 %v2402_v11 }
 0x37b   : > { %v10457_v2 = vpop.eup %10456  ;;  %v2185_v42 = vsub.f32 0.0, %v2169_v40  ;;  %10462 = vpow2.f32 %v2214_v47 }
 0x37c   : > { %v2224_v41 = vpack.c.bf16 %v10455_v46, %v10457_v2 }
 0x37d   : > { %v2216_v16 = vmul.f32 1.442695, %v2185_v42  ;;  %3279 = vmatmul.mubr.bf16.gmra.mrb[76].mxu1 %v1853_v61 }
 0x37e   : > { %3368 = vmatmul.mubr.bf16.gmra.mrb[72].mxu0 %v2224_v41 }
 0x37f   : > { %10464 = vpow2.f32 %v2216_v16 }
 0x380   : > { %v10459_v33 = vpop.eup %10458 }
 0x384   : > { %v10461_v8 = vpop.eup %10460  ;;  %v8840_v21 = vpop.f32.mrb[20].mxu1 }
 0x385   : > { %v2411_v27 = vpack.c.bf16 %v10461_v8, %v10459_v33  ;;  %v8841_v38 = vpop.f32.mrb[21].mxu1  ;;  %v10463_v63 = vpop.eup %10462 }
 0x386   : > { %v8842_v3 = vadd.f32 %v8841_v38, %v8840_v21  ;;  %v8843_v44 = vpop.f32.mrb[22].mxu1 }
 0x387   : > { %3375 = vmatprep.mubr.bf16.mxu0 %v2411_v27  ;;  %v8844_v37 = vpop.f32.mrb[23].mxu1 }
 0x388   : > { %v8845_v43 = vadd.f32 %v8844_v37, %v8843_v44 }
 0x389   : > { %v10465_v36 = vpop.eup %10464 }
 0x38a   : > { %v2225_v5 = vpack.c.bf16 %v10465_v36, %v10463_v63 }
 0x38c   : > { %3376 = vmatmul.mubr.bf16.gmra.mrb[76].mxu0 %v2225_v5 }
 0x3b7   : > { %v8846_v55 = vpop.f32.mrb[24].mxu1 }
 0x3b8   : > { %v8847_v18 = vpop.f32.mrb[25].mxu1 }
 0x3b9   : > { %v8848_v57 = vadd.f32 %v8847_v18, %v8846_v55  ;;  %v8849_v61 = vpop.f32.mrb[26].mxu1 }
 0x3ba   : > { %v8850_v19 = vpop.f32.mrb[27].mxu1 }
 0x3bb   : > { %v8851_v54 = vadd.f32 %v8850_v19, %v8849_v61 }
 0x3c9   : > { %v8898_v62 = vpop.f32.mrb[16].mxu0 }
 0x3ca   : > { %v8899_v22 = vpop.f32.mrb[17].mxu0 }
 0x3cb   : > { %v8900_v10 = vadd.f32 %v8899_v22, %v8898_v62  ;;  %v8901_v39 = vpop.f32.mrb[18].mxu0 }
 0x3cc   : > { %v8902_v26 = vpop.f32.mrb[19].mxu0 }
 0x3cd   : > { %v12678_v49 = vadd.f32 %v8900_v10, %v12595_v52  ;;  %v8903_v32 = vadd.f32 %v8902_v26, %v8901_v39 }
 0x3cf   : > { %v12681_v14 = vadd.f32 %v8903_v32, %v12601_v25 }
 0x3d1   : > { %v8904_v9 = vpop.f32.mrb[20].mxu0 }
 0x3d2   : > { %v8905_v4 = vpop.f32.mrb[21].mxu0 }
 0x3d3   : > { %v8906_v31 = vadd.f32 %v8905_v4, %v8904_v9  ;;  %v8907_v53 = vpop.f32.mrb[22].mxu0 }
 0x3d4   : > { %v8908_v50 = vpop.f32.mrb[23].mxu0 }
 0x3d5   : > { %v12683_v48 = vadd.f32 %v8906_v31, %v8842_v3  ;;  %v8909_v0 = vadd.f32 %v8908_v50, %v8907_v53 }
 0x3d7   : > { %v12685_v29 = vadd.f32 %v8909_v0, %v8845_v43 }
 0x3d9   : > { %v8910_v1 = vpop.f32.mrb[24].mxu0 }
 0x3da   : > { %v8911_v35 = vpop.f32.mrb[25].mxu0 }
 0x3db   : > { %v8912_v34 = vadd.f32 %v8911_v35, %v8910_v1  ;;  %v8913_v12 = vpop.f32.mrb[26].mxu0 }
 0x3dc   : > { %v8914_v52 = vpop.f32.mrb[27].mxu0 }
 0x3dd   : > { %v12687_v28 = vadd.f32 %v8912_v34, %v8848_v57  ;;  %v8915_v45 = vadd.f32 %v8914_v52, %v8913_v12 }
 0x3df   : > { %v12689_v25 = vadd.f32 %v8915_v45, %v8851_v54 }
 0x3e8   : > { %v8852_v58 = vpop.f32.mrb[28].mxu1 }
 0x3e9   : > { %v8853_v15 = vpop.f32.mrb[29].mxu1 }
 0x3ea   : > { %v8854_v17 = vadd.f32 %v8853_v15, %v8852_v58  ;;  %v8855_v13 = vpop.f32.mrb[30].mxu1 }
 0x3eb   : > { %v8856_v30 = vpop.f32.mrb[31].mxu1 }
 0x3ec   : > { %v8857_v59 = vadd.f32 %v8856_v30, %v8855_v13 }
 0x3f0   : > { %v8858_v23 = vpop.f32.mrb[32].mxu1 }
 0x3f1   : > { %v8859_v56 = vpop.f32.mrb[33].mxu1  ;;  %v8916_v24 = vpop.f32.mrb[28].mxu0 }
 0x3f2   : > { %v8860_v6 = vadd.f32 %v8859_v56, %v8858_v23  ;;  %v8861_v7 = vpop.f32.mrb[34].mxu1  ;;  %v8917_v60 = vpop.f32.mrb[29].mxu0 }
 0x3f3   : > { %v8918_v51 = vadd.f32 %v8917_v60, %v8916_v24  ;;  %v8862_v20 = vpop.f32.mrb[35].mxu1  ;;  %v8919_v11 = vpop.f32.mrb[30].mxu0 }
 0x3f4   : > { %v8863_v40 = vadd.f32 %v8862_v20, %v8861_v7  ;;  %v8920_v46 = vpop.f32.mrb[31].mxu0 }
 0x3f5   : > { %v12691_v47 = vadd.f32 %v8918_v51, %v8854_v17  ;;  %v8921_v2 = vadd.f32 %v8920_v46, %v8919_v11 }
 0x3f7   : > { %v12693_v42 = vadd.f32 %v8921_v2, %v8857_v59 }
 0x3f9   : > { %v8864_v41 = vpop.f32.mrb[36].mxu1 }
 0x3fa   : > { %v8865_v16 = vpop.f32.mrb[37].mxu1  ;;  %v8922_v33 = vpop.f32.mrb[32].mxu0 }
 0x3fb   : > { %v8866_v8 = vadd.f32 %v8865_v16, %v8864_v41  ;;  %v8867_v21 = vpop.f32.mrb[38].mxu1  ;;  %v8923_v27 = vpop.f32.mrb[33].mxu0 }
 0x3fc   : > { %v8924_v38 = vadd.f32 %v8923_v27, %v8922_v33  ;;  %v8868_v3 = vpop.f32.mrb[39].mxu1  ;;  %v8925_v44 = vpop.f32.mrb[34].mxu0 }
 0x3fd   : > { %v8869_v63 = vadd.f32 %v8868_v3, %v8867_v21  ;;  %v8926_v37 = vpop.f32.mrb[35].mxu0 }
 0x3fe   : > { %v12695_v36 = vadd.f32 %v8924_v38, %v8860_v6  ;;  %v8927_v43 = vadd.f32 %v8926_v37, %v8925_v44 }
 0x400   : > { %v12697_v5 = vadd.f32 %v8927_v43, %v8863_v40 }
 0x401   : > { %v8870_v55 = vpop.f32.mrb[40].mxu1 }
 0x402   : > { %v8871_v18 = vpop.f32.mrb[41].mxu1  ;;  %v8928_v57 = vpop.f32.mrb[36].mxu0 }
 0x403   : > { %v8872_v61 = vadd.f32 %v8871_v18, %v8870_v55  ;;  %v8873_v19 = vpop.f32.mrb[42].mxu1  ;;  %v8929_v54 = vpop.f32.mrb[37].mxu0  ;;  %v12718_v18 = vld [vmem:[%s15408_s4 + $0x2] ss:$0 sm:$0xff] }
 0x404   : > { %v8930_v62 = vadd.f32 %v8929_v54, %v8928_v57  ;;  %v8874_v22 = vpop.f32.mrb[43].mxu1  ;;  %v8931_v10 = vpop.f32.mrb[38].mxu0 }
 0x405   : > { %v8875_v39 = vadd.f32 %v8874_v22, %v8873_v19  ;;  %v8932_v26 = vpop.f32.mrb[39].mxu0 }
 0x406   : > { %v12699_v32 = vadd.f32 %v8930_v62, %v8866_v8  ;;  %v8933_v9 = vadd.f32 %v8932_v26, %v8931_v10 }
 0x408   : > { %v12701_v4 = vadd.f32 %v8933_v9, %v8869_v63 }
 0x409   : > { %v8876_v31 = vpop.f32.mrb[44].mxu1 }
 0x40a   : > { %v8877_v53 = vpop.f32.mrb[45].mxu1  ;;  %v8934_v50 = vpop.f32.mrb[40].mxu0 }
 0x40b   : > { %v8878_v0 = vadd.f32 %v8877_v53, %v8876_v31  ;;  %v8879_v1 = vpop.f32.mrb[46].mxu1  ;;  %v8935_v35 = vpop.f32.mrb[41].mxu0 }
 0x40c   : > { %v8936_v34 = vadd.f32 %v8935_v35, %v8934_v50  ;;  %v8880_v12 = vpop.f32.mrb[47].mxu1  ;;  %v8937_v52 = vpop.f32.mrb[42].mxu0 }
 0x40d   : > { %v8881_v45 = vadd.f32 %v8880_v12, %v8879_v1  ;;  %v8938_v58 = vpop.f32.mrb[43].mxu0 }
 0x40e   : > { %v12703_v15 = vadd.f32 %v8936_v34, %v8872_v61  ;;  %v8939_v17 = vadd.f32 %v8938_v58, %v8937_v52  ;;  %v15568_v58 = vmov 3  }
 0x410   : > { %v12705_v13 = vadd.f32 %v8939_v17, %v8875_v39 }
 0x412   : > { %v8962_v30 = vpop.f32.mrb[48].mxu1 }
 0x413   : > { %v8963_v59 = vpop.f32.mrb[49].mxu1 }
 0x414   : > { %v8964_v23 = vadd.f32 %v8963_v59, %v8962_v30  ;;  %v8965_v56 = vpop.f32.mrb[50].mxu1 }
 0x415   : > { %v8966_v24 = vpop.f32.mrb[51].mxu1 }
 0x416   : > { %v3225_v6 = vadd.f32 %v8964_v23, %v12678_v49  ;;  %v8967_v7 = vadd.f32 %v8966_v24, %v8965_v56  ;;  %v8940_v51 = vpop.f32.mrb[44].mxu0  ;;  %v15570_v24 = vmov 5  }
 0x417   : > { %v8941_v20 = vpop.f32.mrb[45].mxu0 }
 0x418   : > { %v3228_v60 = vadd.f32 %v8967_v7, %v12681_v14  ;;  %v8942_v11 = vadd.f32 %v8941_v20, %v8940_v51  ;;  %v8943_v40 = vpop.f32.mrb[46].mxu0 }
 0x419   : > { %v8944_v2 = vpop.f32.mrb[47].mxu0 }
 0x41a   : > { %v8968_v46 = vpop.f32.mrb[52].mxu1  ;;  %v12709_v16 = vadd.f32 %v8942_v11, %v8878_v0  ;;  %v8945_v33 = vadd.f32 %v8944_v2, %v8943_v40 }
 0x41b   : > { %v8969_v41 = vpop.f32.mrb[53].mxu1 }
 0x41c   : > { %v8970_v8 = vadd.f32 %v8969_v41, %v8968_v46  ;;  %v8971_v21 = vpop.f32.mrb[54].mxu1  ;;  %v12711_v38 = vadd.f32 %v8945_v33, %v8881_v45  ;;  %v10018_v46 = vld [vmem:[%s15407_s3 + $0x440] sm:$0xff]  }
 0x41d   : > { %v8972_v27 = vpop.f32.mrb[55].mxu1  ;;  %9074 = vmatprep.subr.bf16.mxu1 %v10018_v46 }
 0x41e   : > { %v3233_v49 = vadd.f32 %v8970_v8, %v12683_v48  ;;  %v8973_v3 = vadd.f32 %v8972_v27, %v8971_v21  ;;  %v9026_v44 = vpop.f32.mrb[48].mxu0  ;;  %v12723_v48 = vld [vmem:[%s15408_s4 + $0x3] ss:$0 sm:$0xff] }
 0x41f   : > { %v9027_v63 = vpop.f32.mrb[49].mxu0  ;;  %v10019_v8 = vld [vmem:[%s15407_s3 + $0x400] sm:$0xff]  }
 0x420   : > { %v3236_v14 = vadd.f32 %v8973_v3, %v12685_v29  ;;  %v9028_v37 = vadd.f32 %v9027_v63, %v9026_v44  ;;  %v9029_v43 = vpop.f32.mrb[50].mxu0  ;;  %v15573_v3 = vmov 6   ;;  %9075 = vmatpush3.bf16.msra.mxu1 %v10019_v8  ;;  %v10022_v44 = vld [vmem:[%s15407_s3 + $0x4c0] sm:$0xff]  }
 0x421   : > { %v9030_v57 = vpop.f32.mrb[51].mxu0  ;;  %9138 = vmatprep.subr.bf16.mxu0 %v10022_v44 }
 0x422   : > { %v8974_v55 = vpop.f32.mrb[56].mxu1  ;;  %v3322_v19 = vadd.f32 %v9028_v37, %v3225_v6  ;;  %v9031_v54 = vadd.f32 %v9030_v57, %v9029_v43  ;;  %v15571_v6 = vmov 4  }
 0x423   : > { %v8975_v61 = vpop.f32.mrb[57].mxu1 }
 0x424   : > { %v8976_v62 = vadd.f32 %v8975_v61, %v8974_v55  ;;  %v8977_v22 = vpop.f32.mrb[58].mxu1  ;;  %v3389_v10 = vmul.f32 %v12718_v18, %v3322_v19  ;;  %v3325_v39 = vadd.f32 %v9031_v54, %v3228_v60  ;;  %v10023_v19 = vld [vmem:[%s15407_s3 + $0x480] sm:$0xff]   ;;  %v15574_v54 = vmov 0  }
 0x425   : > { %v8978_v29 = vpop.f32.mrb[59].mxu1  ;;  %9139 = vmatpush3.bf16.msra.mxu0 %v10023_v19  ;;  %v10038_v19 = vld [vmem:[%s15407_s3 + $0x4e0] sm:$0xff]  }
 0x426   : > { %v3241_v26 = vadd.f32 %v8976_v62, %v12687_v28  ;;  %v8979_v9 = vadd.f32 %v8978_v29, %v8977_v22  ;;  %v3410_v31 = vadd.f32 %v12723_v48, %v3389_v10  ;;  %v9032_v50 = vpop.f32.mrb[52].mxu0  ;;  %v15569_v28 = vmov 2  }
 0x427   : > { %v9033_v0 = vpop.f32.mrb[53].mxu0  ;;  %v3390_v21 = vmul.f32 %v12718_v18, %v3325_v39  ;;  %v15575_v62 = vmov 1   ;;  %v10024_v39 = vld [vmem:[%s15407_s3 + $0x450] sm:$0xff]  }
 0x428   : > { %v3244_v53 = vadd.f32 %v8979_v9, %v12689_v25  ;;  %v9034_v1 = vadd.f32 %v9033_v0, %v9032_v50  ;;  %v9035_v35 = vpop.f32.mrb[54].mxu0  ;;  %3631 = vperm.xlu1 %9702, %v3410_v31   ;;  %3430 = vperm.xlu0 %9701, %v3410_v31  }
 0x429   : > { %v9036_v34 = vpop.f32.mrb[55].mxu0  ;;  %v12762_v43 = vadd.f32 %v12723_v48, %v3390_v21  ;;  %v10032_v21 = vld [vmem:[%s15407_s3 + $0x460] sm:$0xff]  }
 0x42a   : > { %v12729_v12 = vadd.f32 %v9034_v1, %v3233_v49  ;;  %v9037_v52 = vadd.f32 %v9036_v34, %v9035_v35  ;;  %v15572_v49 = vmov 7   ;;  %v10027_v35 = vld [vmem:[%s15407_s3 + $0x488] sm:$0xff]  }
 0x42c   : > { %v12731_v45 = vadd.f32 %v9037_v52, %v3236_v14  ;;  %9704 = vset.pattern.permute.xlu1 %v15568_v58  ;;  %9703 = vset.pattern.permute.xlu0 %v15569_v28  ;;  %v10028_v52 = vld [vmem:[%s15407_s3 + $0x458] sm:$0xff]  }
 0x42d   : > { %4003 = vperm.xlu1 %9704, %v3410_v31   ;;  %3817 = vperm.xlu0 %9703, %v3410_v31  }
 0x42e   : > { %v9038_v17 = vpop.f32.mrb[56].mxu0 }
 0x42f   : > { %v9039_v25 = vpop.f32.mrb[57].mxu0 }
 0x430   : > { %v9040_v30 = vadd.f32 %v9039_v25, %v9038_v17  ;;  %v9041_v59 = vpop.f32.mrb[58].mxu0  ;;  %v8980_v23 = vpop.f32.mrb[60].mxu1  ;;  %v3391_v17 = vmul.f32 %v12718_v18, %v12729_v12  ;;  %v10030_v25 = vld [vmem:[%s15407_s3 + $0x4d0] sm:$0xff]  }
 0x431   : > { %v9042_v56 = vpop.f32.mrb[59].mxu0  ;;  %9706 = vset.pattern.permute.xlu1 %v15570_v24  ;;  %9705 = vset.pattern.permute.xlu0 %v15571_v6  ;;  %v8981_v7 = vpop.f32.mrb[61].mxu1 }
 0x432   : > { %v12737_v60 = vadd.f32 %v9040_v30, %v3241_v26  ;;  %v9043_v51 = vadd.f32 %v9042_v56, %v9041_v59  ;;  %4375 = vperm.xlu1 %9706, %v3410_v31   ;;  %4189 = vperm.xlu0 %9705, %v3410_v31   ;;  %v8982_v20 = vadd.f32 %v8981_v7, %v8980_v23  ;;  %v8983_v11 = vpop.f32.mrb[62].mxu1 }
 0x433   : > { %v8984_v40 = vpop.f32.mrb[63].mxu1  ;;  %v12808_v46 = vadd.f32 %v12723_v48, %v3391_v17 }
 0x434   : > { %v12742_v2 = vadd.f32 %v9043_v51, %v3244_v53  ;;  %v3249_v41 = vadd.f32 %v8982_v20, %v12691_v47  ;;  %v8985_v33 = vadd.f32 %v8984_v40, %v8983_v11  ;;  %v10020_v47 = vld [vmem:[%s15407_s3 + $0x448] sm:$0xff]   ;;  %v10029_v11 = vld [vmem:[%s15407_s3 + $0x418] sm:$0xff]   ;;  %v10031_v40 = vld [vmem:[%s15407_s3 + $0x490] sm:$0xff]  }
 0x435   : > { %9076 = vmatprep.subr.bf16.mxu1 %v10020_v47  ;;  %v10026_v53 = vld [vmem:[%s15407_s3 + $0x4c8] sm:$0xff]   ;;  %v3392_v47 = vmul.f32 %v12718_v18, %v12731_v45  ;;  %v10033_v45 = vld [vmem:[%s15407_s3 + $0x420] sm:$0xff]  }
 0x436   : > { %v3252_v27 = vadd.f32 %v8985_v33, %v12693_v42  ;;  %9707 = vset.pattern.permute.xlu1 %v15572_v49  ;;  %9708 = vset.pattern.permute.xlu0 %v15573_v3  ;;  %v10021_v42 = vld [vmem:[%s15407_s3 + $0x408] sm:$0xff]  }
 0x437   : > { %4747 = vperm.xlu1 %9707, %v3410_v31   ;;  %4561 = vperm.xlu0 %9708, %v3410_v31  }
 0x438   : > { %v8986_v14 = vpop.f32.mrb[64].mxu1  ;;  %9077 = vmatpush3.bf16.msra.mxu1 %v10021_v42  ;;  %9140 = vmatprep.subr.bf16.mxu0 %v10026_v53  ;;  %v10035_v42 = vld [vmem:[%s15407_s3 + $0x498] sm:$0xff]  }
 0x439   : > { %v8987_v63 = vpop.f32.mrb[65].mxu1  ;;  %v9044_v37 = vpop.f32.mrb[60].mxu0  ;;  %9078 = vmatprep.subr.bf16.mxu1 %v10024_v39  ;;  %9141 = vmatpush3.bf16.msra.mxu0 %v10027_v35  ;;  %v10037_v35 = vld [vmem:[%s15407_s3 + $0x428] sm:$0xff]  }
 0x43a   : > { %v8988_v55 = vadd.f32 %v8987_v63, %v8986_v14  ;;  %v8989_v57 = vpop.f32.mrb[66].mxu1  ;;  %v9045_v61 = vpop.f32.mrb[61].mxu0  ;;  %9142 = vmatprep.subr.bf16.mxu0 %v10030_v25 }
 0x43b   : > { %9709 = vset.pattern.permute.xlu1 %v15574_v54  ;;  %9710 = vset.pattern.permute.xlu0 %v15575_v62  ;;  %v9046_v22 = vadd.f32 %v9045_v61, %v9044_v37  ;;  %v8990_v29 = vpop.f32.mrb[67].mxu1  ;;  %v9047_v10 = vpop.f32.mrb[62].mxu0  ;;  %v10036_v61 = vld [vmem:[%s15407_s3 + $0x468] sm:$0xff]  }
 0x43c   : > { %v3257_v26 = vadd.f32 %v8988_v55, %v12695_v36  ;;  %3435 = vperm.xlu1 %9709, %v12762_v43   ;;  %3635 = vperm.xlu0 %9710, %v12762_v43   ;;  %v8991_v9 = vadd.f32 %v8990_v29, %v8989_v57  ;;  %v9048_v31 = vpop.f32.mrb[63].mxu0  ;;  %v10025_v36 = vld [vmem:[%s15407_s3 + $0x410] sm:$0xff]  }
 0x43d   : > { %v12778_v50 = vadd.f32 %v9046_v22, %v3249_v41  ;;  %v9049_v0 = vadd.f32 %v9048_v31, %v9047_v10  ;;  %9079 = vmatpush3.bf16.msra.mxu1 %v10025_v36  ;;  %9143 = vmatpush3.bf16.msra.mxu0 %v10031_v40 }
 0x43e   : > { %v3260_v1 = vadd.f32 %v8991_v9, %v12697_v5  ;;  %9080 = vmatprep.subr.bf16.mxu1 %v10028_v52  ;;  %v10039_v52 = vld [vmem:[%s15407_s3 + $0x4a0] sm:$0xff]  }
 0x43f   : > { %v12787_v34 = vadd.f32 %v9049_v0, %v3252_v27  ;;  %v10034_v27 = vld [vmem:[%s15407_s3 + $0x4d8] sm:$0xff]  }
 0x440   : > { %9711 = vset.pattern.permute.xlu1 %v15569_v28  ;;  %9712 = vset.pattern.permute.xlu0 %v15568_v58  ;;  %v8992_v5 = vpop.f32.mrb[68].mxu1 }
 0x441   : > { %3821 = vperm.xlu1 %9711, %v12762_v43   ;;  %4007 = vperm.xlu0 %9712, %v12762_v43   ;;  %v8993_v30 = vpop.f32.mrb[69].mxu1  ;;  %v9050_v59 = vpop.f32.mrb[64].mxu0 }
 0x442   : > { %v8994_v23 = vadd.f32 %v8993_v30, %v8992_v5  ;;  %v8995_v56 = vpop.f32.mrb[70].mxu1  ;;  %v9051_v7 = vpop.f32.mrb[65].mxu0  ;;  %9081 = vmatpush3.bf16.msra.mxu1 %v10029_v11  ;;  %9144 = vmatprep.subr.bf16.mxu0 %v10034_v27  ;;  %v10042_v5 = vld [vmem:[%s15407_s3 + $0x4e8] sm:$0xff]  }
 0x443   : > { %v9052_v12 = vadd.f32 %v9051_v7, %v9050_v59  ;;  %v8996_v51 = vpop.f32.mrb[71].mxu1  ;;  %v9053_v20 = vpop.f32.mrb[66].mxu0  ;;  %9082 = vmatprep.subr.bf16.mxu1 %v10032_v21  ;;  %9145 = vmatpush3.bf16.msra.mxu0 %v10035_v42 }
 0x444   : > { %v3265_v41 = vadd.f32 %v8994_v23, %v12699_v32  ;;  %v8997_v33 = vadd.f32 %v8996_v51, %v8995_v56  ;;  %v9054_v8 = vpop.f32.mrb[67].mxu0  ;;  %9146 = vmatprep.subr.bf16.mxu0 %v10038_v19  ;;  %v10043_v51 = vld [vmem:[%s15407_s3 + $0x4a8] sm:$0xff]  }
 0x445   : > { %v12819_v14 = vadd.f32 %v9052_v12, %v3257_v26  ;;  %9713 = vset.pattern.permute.xlu1 %v15571_v6  ;;  %9723 = vset.pattern.permute.xlu0 %v15573_v3  ;;  %v9055_v32 = vadd.f32 %v9054_v8, %v9053_v20  ;;  %v10041_v12 = vld [vmem:[%s15407_s3 + $0x430] sm:$0xff]   ;;  %v3393_v8 = vmul.f32 %v12718_v18, %v12737_v60 }
 0x446   : > { %v3268_v44 = vadd.f32 %v8997_v33, %v12701_v4  ;;  %4193 = vperm.xlu1 %9713, %v12762_v43   ;;  %4569 = vperm.xlu0 %9723, %v12808_v46   ;;  %v12835_v4 = vadd.f32 %v12723_v48, %v3392_v47  ;;  %v10046_v33 = vld [vmem:[%s15407_s3 + $0x4f0] sm:$0xff]  }
 0x447   : > { %v12826_v63 = vadd.f32 %v9055_v32, %v3260_v1  ;;  %9083 = vmatpush3.bf16.msra.mxu1 %v10033_v45  ;;  %9147 = vmatpush3.bf16.msra.mxu0 %v10039_v52  ;;  %v10047_v45 = vld [vmem:[%s15407_s3 + $0x4b0] sm:$0xff]   ;;  %v12900_v42 = vadd.f32 %v12723_v48, %v3393_v8 }
 0x448   : > { %v8998_v37 = vpop.f32.mrb[72].mxu1  ;;  %9084 = vmatprep.subr.bf16.mxu1 %v10036_v61  ;;  %9148 = vmatprep.subr.bf16.mxu0 %v10042_v5  ;;  %v13013_v5 = vld [vmem:[%s15405_s1 + $0x11] ss:$0 sm:$0xff]  ;;  %v13065_v8 = vld [vmem:[%s15406_s2 + $0x13] ss:$0 sm:$0xff] }
 0x449   : > { %v8999_v55 = vpop.f32.mrb[73].mxu1  ;;  %v9056_v57 = vpop.f32.mrb[68].mxu0 }
 0x44a   : > { %9714 = vset.pattern.permute.xlu1 %v15572_v49  ;;  %9724 = vset.pattern.permute.xlu0 %v15574_v54  ;;  %v9000_v22 = vadd.f32 %v8999_v55, %v8998_v37  ;;  %v9001_v29 = vpop.f32.mrb[74].mxu1  ;;  %v9057_v10 = vpop.f32.mrb[69].mxu0  ;;  %v10049_v55 = vld [vmem:[%s15407_s3 + $0x4b8] sm:$0xff]  }
 0x44b   : > { %4751 = vperm.xlu1 %9714, %v12762_v43   ;;  %3445 = vperm.xlu0 %9724, %v12835_v4   ;;  %v9058_v39 = vadd.f32 %v9057_v10, %v9056_v57  ;;  %v9002_v26 = vpop.f32.mrb[75].mxu1  ;;  %v9059_v9 = vpop.f32.mrb[70].mxu0  ;;  %v3394_v10 = vmul.f32 %v12718_v18, %v12742_v2  ;;  %v3395_v2 = vmul.f32 %v12718_v18, %v12778_v50 }
 0x44c   : > { %v3273_v31 = vadd.f32 %v9000_v22, %v12703_v15  ;;  %v9003_v53 = vadd.f32 %v9002_v26, %v9001_v29  ;;  %v9060_v0 = vpop.f32.mrb[71].mxu0  ;;  %v10040_v15 = vld [vmem:[%s15407_s3 + $0x470] sm:$0xff]   ;;  %9085 = vmatpush3.bf16.msra.mxu1 %v10037_v35  ;;  %9149 = vmatpush3.bf16.msra.mxu0 %v10043_v51  ;;  %v3396_v50 = vmul.f32 %v12718_v18, %v12787_v34 }
 0x44d   : > { %v12848_v1 = vadd.f32 %v9058_v39, %v3265_v41  ;;  %v9061_v36 = vadd.f32 %v9060_v0, %v9059_v9  ;;  %9086 = vmatprep.subr.bf16.mxu1 %v10040_v15  ;;  %v10044_v41 = vld [vmem:[%s15407_s3 + $0x478] sm:$0xff]   ;;  %9150 = vmatprep.subr.bf16.mxu0 %v10046_v33  ;;  %v3397_v34 = vmul.f32 %v12718_v18, %v12819_v14  ;;  %v13043_v51 = vld [vmem:[%s15406_s2 + $0x10] ss:$0 sm:$0xff] }
 0x44e   : > { %v3276_v17 = vadd.f32 %v9003_v53, %v12705_v13  ;;  %v12944_v53 = vadd.f32 %v12723_v48, %v3395_v2  ;;  %v3398_v14 = vmul.f32 %v12718_v18, %v12826_v63 }
 0x44f   : > { %v12863_v25 = vadd.f32 %v9061_v36, %v3268_v44  ;;  %9715 = vset.pattern.permute.xlu1 %v15573_v3  ;;  %9726 = vset.pattern.permute.xlu0 %v15569_v28  ;;  %v12974_v0 = vadd.f32 %v12723_v48, %v3397_v34  ;;  %v3399_v63 = vmul.f32 %v12718_v18, %v12848_v1 }
 0x450   : > { %4565 = vperm.xlu1 %9715, %v12762_v43   ;;  %3829 = vperm.xlu0 %9726, %v12835_v4   ;;  %v9004_v30 = vpop.f32.mrb[76].mxu1  ;;  %v12991_v36 = vadd.f32 %v12723_v48, %v3398_v14 }
 0x451   : > { %v9005_v13 = vpop.f32.mrb[77].mxu1  ;;  %v9062_v59 = vpop.f32.mrb[72].mxu0  ;;  %9087 = vmatpush3.bf16.msra.mxu1 %v10041_v12  ;;  %9151 = vmatpush3.bf16.msra.mxu0 %v10047_v45 }
 0x452   : > { %v9006_v23 = vadd.f32 %v9005_v13, %v9004_v30  ;;  %v9007_v56 = vpop.f32.mrb[78].mxu1  ;;  %v9063_v7 = vpop.f32.mrb[73].mxu0  ;;  %9088 = vmatprep.subr.bf16.mxu1 %v10044_v41  ;;  %v3400_v30 = vmul.f32 %v12718_v18, %v12863_v25  ;;  %v13020_v13 = vld [vmem:[%s15405_s1 + $0x10] ss:$0 sm:$0xff] }
 0x453   : > { %v9064_v20 = vadd.f32 %v9063_v7, %v9062_v59  ;;  %v9008_v11 = vpop.f32.mrb[79].mxu1  ;;  %v9065_v40 = vpop.f32.mrb[74].mxu0 }
 0x454   : > { %v3281_v21 = vadd.f32 %v9006_v23, %v12709_v16  ;;  %9716 = vset.pattern.permute.xlu1 %v15574_v54  ;;  %9728 = vset.pattern.permute.xlu0 %v15571_v6  ;;  %v9009_v27 = vadd.f32 %v9008_v11, %v9007_v56  ;;  %v9066_v47 = vpop.f32.mrb[75].mxu0  ;;  %v10045_v16 = vld [vmem:[%s15407_s3 + $0x438] sm:$0xff]   ;;  %v13030_v23 = vld [vmem:[%s15406_s2 + $0x11] ss:$0 sm:$0xff]  ;;  %v13038_v12 = vadd.f32 %v12723_v48, %v3400_v30  ;;  %v13053_v11 = vld [vmem:[%s15405_s1 + $0x12] ss:$0 sm:$0xff] }
 0x455   : > { %v12886_v32 = vadd.f32 %v9064_v20, %v3273_v31  ;;  %3440 = vperm.xlu1 %9716, %v12808_v46   ;;  %4201 = vperm.xlu0 %9728, %v12835_v4   ;;  %v9067_v44 = vadd.f32 %v9066_v47, %v9065_v40  ;;  %v12927_v31 = vadd.f32 %v12723_v48, %v3394_v10  ;;  %v13048_v20 = vld [vmem:[%s15405_s1 + $0x13] ss:$0 sm:$0xff] }
 0x456   : > { %v3284_v37 = vadd.f32 %v9009_v27, %v12711_v38  ;;  %v10048_v38 = vld [vmem:[%s15407_s3 + $0x4f8] sm:$0xff]   ;;  %9089 = vmatpush3.bf16.msra.mxu1 %v10045_v16 }
 0x457   : > { %v12891_v60 = vadd.f32 %v9067_v44, %v3276_v17  ;;  %9152 = vmatprep.subr.bf16.mxu0 %v10048_v38  ;;  %v13004_v17 = vadd.f32 %v12723_v48, %v3399_v63  ;;  %v13075_v44 = vld [vmem:[%s15406_s2 + $0x12] ss:$0 sm:$0xff] }
 0x458   : > { %9153 = vmatpush3.bf16.msra.mxu0 %v10049_v55 }
 0x459   : > { %9717 = vset.pattern.permute.xlu1 %v15575_v62  ;;  %9732 = vset.pattern.permute.xlu0 %v15575_v62 }
 0x45a   : > { %3639 = vperm.xlu1 %9717, %v12808_v46   ;;  %3647 = vperm.xlu0 %9732, %v12900_v42  }
 0x45e   : > { %9718 = vset.pattern.permute.xlu1 %v15569_v28  ;;  %9734 = vset.pattern.permute.xlu0 %v15568_v58 }
 0x45f   : > { %3825 = vperm.xlu1 %9718, %v12808_v46   ;;  %4019 = vperm.xlu0 %9734, %v12900_v42   ;;  %v9068_v57 = vpop.f32.mrb[76].mxu0 }
 0x460   : > { %v9069_v61 = vpop.f32.mrb[77].mxu0 }
 0x461   : > { %v9070_v19 = vadd.f32 %v9069_v61, %v9068_v57  ;;  %v9071_v22 = vpop.f32.mrb[78].mxu0 }
 0x462   : > { %v9072_v29 = vpop.f32.mrb[79].mxu0 }
 0x463   : > { %v12918_v39 = vadd.f32 %v9070_v19, %v3281_v21  ;;  %9719 = vset.pattern.permute.xlu1 %v15568_v58  ;;  %9738 = vset.pattern.permute.xlu0 %v15573_v3  ;;  %v9073_v26 = vadd.f32 %v9072_v29, %v9071_v22 }
 0x464   : > { %4011 = vperm.xlu1 %9719, %v12808_v46   ;;  %4577 = vperm.xlu0 %9738, %v12900_v42  }
 0x465   : > { %v12924_v9 = vadd.f32 %v9073_v26, %v3284_v37  ;;  %v3401_v37 = vmul.f32 %v12718_v18, %v12886_v32 }
 0x467   : > { %v13086_v61 = vadd.f32 %v12723_v48, %v3401_v37 }
 0x468   : > { %9720 = vset.pattern.permute.xlu1 %v15571_v6  ;;  %9739 = vset.pattern.permute.xlu0 %v15574_v54 }
 0x469   : > { %4197 = vperm.xlu1 %9720, %v12808_v46   ;;  %3455 = vperm.xlu0 %9739, %v12927_v31  }
 0x46d   : > { %9721 = vset.pattern.permute.xlu1 %v15570_v24  ;;  %9741 = vset.pattern.permute.xlu0 %v15569_v28 }
 0x46e   : > { %4383 = vperm.xlu1 %9721, %v12808_v46   ;;  %3837 = vperm.xlu0 %9741, %v12927_v31  }
 0x472   : > { %9722 = vset.pattern.permute.xlu1 %v15572_v49  ;;  %9743 = vset.pattern.permute.xlu0 %v15571_v6 }
 0x473   : > { %4755 = vperm.xlu1 %9722, %v12808_v46   ;;  %4209 = vperm.xlu0 %9743, %v12927_v31   ;;  %v12957_v46 = vadd.f32 %v12723_v48, %v3396_v50 }
 0x477   : > { %9725 = vset.pattern.permute.xlu1 %v15575_v62  ;;  %9747 = vset.pattern.permute.xlu0 %v15575_v62 }
 0x478   : > { %3643 = vperm.xlu1 %9725, %v12835_v4   ;;  %3655 = vperm.xlu0 %9747, %v12944_v53  }
 0x47c   : > { %9727 = vset.pattern.permute.xlu1 %v15568_v58  ;;  %9749 = vset.pattern.permute.xlu0 %v15568_v58 }
 0x47d   : > { %4015 = vperm.xlu1 %9727, %v12835_v4   ;;  %4027 = vperm.xlu0 %9749, %v12944_v53  }
 0x481   : > { %9729 = vset.pattern.permute.xlu1 %v15572_v49  ;;  %9753 = vset.pattern.permute.xlu0 %v15574_v54 }
 0x482   : > { %4759 = vperm.xlu1 %9729, %v12835_v4   ;;  %3465 = vperm.xlu0 %9753, %v12957_v46  }
 0x486   : > { %9730 = vset.pattern.permute.xlu1 %v15573_v3  ;;  %9755 = vset.pattern.permute.xlu0 %v15569_v28 }
 0x487   : > { %4573 = vperm.xlu1 %9730, %v12835_v4   ;;  %3845 = vperm.xlu0 %9755, %v12957_v46  }
 0x48b   : > { %9731 = vset.pattern.permute.xlu1 %v15574_v54  ;;  %9759 = vset.pattern.permute.xlu0 %v15573_v3 }
 0x48c   : > { %3450 = vperm.xlu1 %9731, %v12900_v42   ;;  %4589 = vperm.xlu0 %9759, %v12957_v46  }
 0x490   : > { %9733 = vset.pattern.permute.xlu1 %v15569_v28  ;;  %9761 = vset.pattern.permute.xlu0 %v15575_v62 }
 0x491   : > { %3833 = vperm.xlu1 %9733, %v12900_v42   ;;  %3663 = vperm.xlu0 %9761, %v12974_v0  }
 0x495   : > { %9735 = vset.pattern.permute.xlu1 %v15571_v6  ;;  %9763 = vset.pattern.permute.xlu0 %v15568_v58 }
 0x496   : > { %4205 = vperm.xlu1 %9735, %v12900_v42   ;;  %4035 = vperm.xlu0 %9763, %v12974_v0  }
 0x49a   : > { %9736 = vset.pattern.permute.xlu1 %v15570_v24  ;;  %9765 = vset.pattern.permute.xlu0 %v15571_v6 }
 0x49b   : > { %4391 = vperm.xlu1 %9736, %v12900_v42   ;;  %4221 = vperm.xlu0 %9765, %v12974_v0  }
 0x49f   : > { %9737 = vset.pattern.permute.xlu1 %v15572_v49  ;;  %9768 = vset.pattern.permute.xlu0 %v15574_v54 }
 0x4a0   : > { %4763 = vperm.xlu1 %9737, %v12900_v42   ;;  %3475 = vperm.xlu0 %9768, %v12991_v36  }
 0x4a4   : > { %9740 = vset.pattern.permute.xlu1 %v15575_v62  ;;  %9770 = vset.pattern.permute.xlu0 %v15569_v28 }
 0x4a5   : > { %3651 = vperm.xlu1 %9740, %v12927_v31   ;;  %3853 = vperm.xlu0 %9770, %v12991_v36  }
 0x4a7   : > { %v3632_v35 = vpop.permute.xlu1 %3631  ;;  %v3431_v52 = vpop.permute.xlu0 %3430 }
 0x4a8   : > { %v3698_v59 = vsub.f32 %v3632_v35, %v13013_v5  ;;  %v3512_v25 = vsub.f32 %v3431_v52, %v13020_v13 }
 0x4a9   : > { %9742 = vset.pattern.permute.xlu1 %v15568_v58  ;;  %9775 = vset.pattern.permute.xlu0 %v15575_v62 }
 0x4aa   : > { %4023 = vperm.xlu1 %9742, %v12927_v31   ;;  %3671 = vperm.xlu0 %9775, %v13004_v17   ;;  %v3718_v40 = vmul.f32 %v13030_v23, %v3698_v59  ;;  %v3532_v41 = vmul.f32 %v13043_v51, %v3512_v25  ;;  %v3402_v25 = vmul.f32 %v12718_v18, %v12891_v60 }
 0x4ac   : > { %v4004_v1 = vpop.permute.xlu1 %4003  ;;  %v3818_v15 = vpop.permute.xlu0 %3817  ;;  %v3734_v16 = vmul.f32 %v3718_v40, %v3718_v40  ;;  %v3548_v45 = vmul.f32 %v3532_v41, %v3532_v41 }
 0x4ad   : > { %v4070_v33 = vsub.f32 %v4004_v1, %v13048_v20  ;;  %v3884_v21 = vsub.f32 %v3818_v15, %v13053_v11 }
 0x4ae   : > { %9744 = vset.pattern.permute.xlu1 %v15572_v49  ;;  %9777 = vset.pattern.permute.xlu0 %v15568_v58  ;;  %v3750_v32 = vsub.f32 0.0, %v3734_v16  ;;  %v3564_v29 = vsub.f32 0.0, %v3548_v45 }
 0x4af   : > { %4767 = vperm.xlu1 %9744, %v12927_v31   ;;  %4043 = vperm.xlu0 %9777, %v13004_v17   ;;  %v4090_v42 = vmul.f32 %v13065_v8, %v4070_v33  ;;  %v3904_v38 = vmul.f32 %v13075_v44, %v3884_v21 }
 0x4b0   : > { %v3766_v34 = vmul.f32 1.442695, %v3750_v32  ;;  %v3580_v1 = vmul.f32 1.442695, %v3564_v29 }
 0x4b1   : > { %v13033_v56 = vpop.permute.xlu1 %4375  ;;  %v13035_v7 = vpop.permute.xlu0 %4189  ;;  %v4106_v10 = vmul.f32 %v4090_v42, %v4090_v42  ;;  %v3920_v26 = vmul.f32 %v3904_v38, %v3904_v38 }
 0x4b2   : > { %10466 = vpow2.f32 %v3766_v34 }
 0x4b3   : > { %9745 = vset.pattern.permute.xlu1 %v15573_v3  ;;  %9778 = vset.pattern.permute.xlu0 %v15574_v54  ;;  %v4122_v15 = vsub.f32 0.0, %v4106_v10  ;;  %v3936_v40 = vsub.f32 0.0, %v3920_v26  ;;  %10468 = vpow2.f32 %v3580_v1 }
 0x4b4   : > { %4581 = vperm.xlu1 %9745, %v12927_v31   ;;  %3485 = vperm.xlu0 %9778, %v13038_v12  }
 0x4b5   : > { %v4138_v60 = vmul.f32 1.442695, %v4122_v15  ;;  %v3952_v32 = vmul.f32 1.442695, %v3936_v40 }
 0x4b6   : > { %v13068_v27 = vpop.permute.xlu1 %4747  ;;  %v13070_v47 = vpop.permute.xlu0 %4561 }
 0x4b8   : > { %9746 = vset.pattern.permute.xlu1 %v15574_v54  ;;  %9780 = vset.pattern.permute.xlu0 %v15569_v28 }
 0x4b9   : > { %3460 = vperm.xlu1 %9746, %v12944_v53   ;;  %3861 = vperm.xlu0 %9780, %v13038_v12  }
 0x4bb   : > { %v3436_v55 = vpop.permute.xlu1 %3435  ;;  %v3636_v57 = vpop.permute.xlu0 %3635 }
 0x4bc   : > { %v3513_v19 = vsub.f32 %v3436_v55, %v13020_v13  ;;  %v3699_v22 = vsub.f32 %v3636_v57, %v13013_v5  ;;  %v13109_v57 = vadd.f32 %v12723_v48, %v3402_v25 }
 0x4bd   : > { %9748 = vset.pattern.permute.xlu1 %v15569_v28  ;;  %9783 = vset.pattern.permute.xlu0 %v15575_v62 }
 0x4be   : > { %v3533_v2 = vmul.f32 %v13043_v51, %v3513_v19  ;;  %v3719_v50 = vmul.f32 %v13030_v23, %v3699_v22  ;;  %3841 = vperm.xlu1 %9748, %v12944_v53   ;;  %3679 = vperm.xlu0 %9783, %v13086_v61  }
 0x4c0   : > { %v3549_v14 = vmul.f32 %v3533_v2, %v3533_v2  ;;  %v3735_v63 = vmul.f32 %v3719_v50, %v3719_v50  ;;  %v3822_v35 = vpop.permute.xlu1 %3821  ;;  %v4008_v52 = vpop.permute.xlu0 %4007  ;;  %v3403_v2 = vmul.f32 %v12718_v18, %v12918_v39 }
 0x4c1   : > { %v3885_v30 = vsub.f32 %v3822_v35, %v13053_v11  ;;  %v4071_v59 = vsub.f32 %v4008_v52, %v13048_v20  ;;  %v10467_v50 = vpop.eup %10466 }
 0x4c2   : > { %v3565_v41 = vsub.f32 0.0, %v3549_v14  ;;  %v3751_v33 = vsub.f32 0.0, %v3735_v63  ;;  %9750 = vset.pattern.permute.xlu1 %v15570_v24  ;;  %9785 = vset.pattern.permute.xlu0 %v15568_v58  ;;  %v10469_v34 = vpop.eup %10468  ;;  %v13126_v35 = vadd.f32 %v12723_v48, %v3403_v2 }
 0x4c3   : > { %v3905_v21 = vmul.f32 %v13075_v44, %v3885_v30  ;;  %v4091_v37 = vmul.f32 %v13065_v8, %v4071_v59  ;;  %4399 = vperm.xlu1 %9750, %v12944_v53   ;;  %4051 = vperm.xlu0 %9785, %v13086_v61  }
 0x4c4   : > { %v3582_v16 = vmul.f32 1.442695, %v3565_v41  ;;  %v3768_v45 = vmul.f32 1.442695, %v3751_v33  ;;  %v3404_v41 = vmul.f32 %v12718_v18, %v12924_v9 }
 0x4c5   : > { %v3921_v42 = vmul.f32 %v3905_v21, %v3905_v21  ;;  %v4107_v38 = vmul.f32 %v4091_v37, %v4091_v37  ;;  %v13106_v55 = vpop.permute.xlu1 %4193  ;;  %v13149_v9 = vpop.permute.xlu0 %4569 }
 0x4c6   : > { %10470 = vpow2.f32 %v3582_v16  ;;  %v13139_v16 = vadd.f32 %v12723_v48, %v3404_v41 }
 0x4c7   : > { %10472 = vpow2.f32 %v3768_v45  ;;  %v3937_v19 = vsub.f32 0.0, %v3921_v42  ;;  %v4123_v22 = vsub.f32 0.0, %v4107_v38  ;;  %9751 = vset.pattern.permute.xlu1 %v15571_v6  ;;  %9786 = vset.pattern.permute.xlu0 %v15574_v54 }
 0x4c8   : > { %4213 = vperm.xlu1 %9751, %v12944_v53   ;;  %3495 = vperm.xlu0 %9786, %v13109_v57   ;;  %10474 = vpow2.f32 %v4138_v60 }
 0x4c9   : > { %v3954_v29 = vmul.f32 1.442695, %v3937_v19  ;;  %v4140_v10 = vmul.f32 1.442695, %v4123_v22  ;;  %10476 = vpow2.f32 %v3952_v32 }
 0x4ca   : > { %v13115_v26 = vpop.permute.xlu1 %4751  ;;  %v3446_v60 = vpop.permute.xlu0 %3445 }
 0x4cb   : > { %10478 = vpow2.f32 %v3954_v29  ;;  %v3515_v19 = vsub.f32 %v3446_v60, %v13020_v13 }
 0x4cc   : > { %10480 = vpow2.f32 %v4140_v10  ;;  %9752 = vset.pattern.permute.xlu1 %v15573_v3  ;;  %9788 = vset.pattern.permute.xlu0 %v15569_v28 }
 0x4cd   : > { %4585 = vperm.xlu1 %9752, %v12944_v53   ;;  %3869 = vperm.xlu0 %9788, %v13109_v57  }
 0x4cf   : > { %v13123_v14 = vpop.permute.xlu1 %4565  ;;  %v3830_v29 = vpop.permute.xlu0 %3829 }
 0x4d0   : > { %v10471_v63 = vpop.eup %10470 }
 0x4d1   : > { %v10473_v52 = vpop.eup %10472  ;;  %9754 = vset.pattern.permute.xlu1 %v15575_v62  ;;  %9791 = vset.pattern.permute.xlu0 %v15575_v62  ;;  %v3612_v39 = vpack.c.bf16 %v10471_v63, %v10469_v34  ;;  %v3535_v34 = vmul.f32 %v13043_v51, %v3515_v19  ;;  %v3887_v63 = vsub.f32 %v3830_v29, %v13053_v11 }
 0x4d2   : > { %3659 = vperm.xlu1 %9754, %v12957_v46   ;;  %3687 = vperm.xlu0 %9791, %v13126_v35   ;;  %v3798_v1 = vpack.c.bf16 %v10473_v52, %v10467_v50  ;;  %v10475_v15 = vpop.eup %10474 }
 0x4d3   : > { %v10477_v30 = vpop.eup %10476 }
 0x4d4   : > { %5538 = vmatprep.mubr.bf16.mxu1 %v3798_v1  ;;  %v3441_v59 = vpop.permute.xlu1 %3440 }
 0x4d5   : > { %v10479_v25 = vpop.eup %10478  ;;  %5539 = vmatmul.mubr.bf16.vlgmr.msra.gmra.mrb[80].mxu1 %v3612_v39  ;;  %v3514_v42 = vsub.f32 %v3441_v59, %v13020_v13  ;;  %v3907_v59 = vmul.f32 %v13075_v44, %v3887_v63 }
 0x4d6   : > { %v10481_v40 = vpop.eup %10480  ;;  %9756 = vset.pattern.permute.xlu1 %v15568_v58  ;;  %9793 = vset.pattern.permute.xlu0 %v15568_v58  ;;  %v3984_v33 = vpack.c.bf16 %v10479_v25, %v10477_v30 }
 0x4d7   : > { %4031 = vperm.xlu1 %9756, %v12957_v46   ;;  %4059 = vperm.xlu0 %9793, %v13126_v35   ;;  %v4170_v21 = vpack.c.bf16 %v10481_v40, %v10475_v15  ;;  %v3534_v22 = vmul.f32 %v13043_v51, %v3514_v42  ;;  %v3551_v15 = vmul.f32 %v3535_v34, %v3535_v34 }
 0x4d9   : > { %5635 = vmatprep.mubr.bf16.mxu0 %v4170_v21  ;;  %v3640_v37 = vpop.permute.xlu1 %3639 }
 0x4da   : > { %5636 = vmatmul.mubr.bf16.vlgmr.msra.gmra.mrb[80].mxu0 %v3984_v33  ;;  %v3700_v38 = vsub.f32 %v3640_v37, %v13013_v5  ;;  %v3567_v37 = vsub.f32 0.0, %v3551_v15 }
 0x4db   : > { %9757 = vset.pattern.permute.xlu1 %v15571_v6  ;;  %9794 = vset.pattern.permute.xlu0 %v15574_v54 }
 0x4dc   : > { %4217 = vperm.xlu1 %9757, %v12957_v46   ;;  %3505 = vperm.xlu0 %9794, %v13139_v16   ;;  %v3720_v10 = vmul.f32 %v13030_v23, %v3700_v38 }
 0x4de   : > { %v3826_v18 = vpop.permute.xlu1 %3825  ;;  %v3736_v52 = vmul.f32 %v3720_v10, %v3720_v10 }
 0x4e0   : > { %9758 = vset.pattern.permute.xlu1 %v15572_v49  ;;  %9796 = vset.pattern.permute.xlu0 %v15569_v28  ;;  %v3752_v40 = vsub.f32 0.0, %v3736_v52 }
 0x4e1   : > { %4775 = vperm.xlu1 %9758, %v12957_v46   ;;  %3877 = vperm.xlu0 %9796, %v13139_v16  }
 0x4e2   : > { %v3770_v38 = vmul.f32 1.442695, %v3752_v40 }
 0x4e3   : > { %v4012_v48 = vpop.permute.xlu1 %4011 }
 0x4e4   : > { %v4072_v2 = vsub.f32 %v4012_v48, %v13048_v20 }
 0x4e5   : > { %9760 = vset.pattern.permute.xlu1 %v15574_v54  ;;  %9801 = vset.pattern.permute.xlu0 %v15571_v6 }
 0x4e6   : > { %3470 = vperm.xlu1 %9760, %v12974_v0   ;;  %4233 = vperm.xlu0 %9801, %v13038_v12   ;;  %v4092_v1 = vmul.f32 %v13065_v8, %v4072_v2 }
 0x4e8   : > { %v13155_v45 = vpop.permute.xlu1 %4197  ;;  %v4108_v33 = vmul.f32 %v4092_v1, %v4092_v1 }
 0x4ea   : > { %9762 = vset.pattern.permute.xlu1 %v15569_v28  ;;  %9802 = vset.pattern.permute.xlu0 %v15570_v24  ;;  %v4124_v29 = vsub.f32 0.0, %v4108_v33 }
 0x4eb   : > { %3849 = vperm.xlu1 %9762, %v12974_v0   ;;  %4379 = vperm.xlu0 %9802, %v12762_v43   ;;  %v3886_v43 = vsub.f32 %v3826_v18, %v13053_v11  ;;  %v13188_v18 = vpop.permute.xlu0 %4201 }
 0x4ec   : > { %v4142_v1 = vmul.f32 1.442695, %v4124_v29 }
 0x4ed   : > { %v13163_v32 = vpop.permute.xlu1 %4383  ;;  %v3906_v39 = vmul.f32 %v13075_v44, %v3886_v43  ;;  %v3586_v43 = vmul.f32 1.442695, %v3567_v37 }
 0x4ef   : > { %9764 = vset.pattern.permute.xlu1 %v15570_v24  ;;  %4387 = vperm.xlu0 %9802, %v12835_v4   ;;  %v3550_v4 = vmul.f32 %v3534_v22, %v3534_v22  ;;  %v3922_v41 = vmul.f32 %v3906_v39, %v3906_v39  ;;  %v13196_v63 = vpop.permute.xlu0 %3647 }
 0x4f0   : > { %4407 = vperm.xlu1 %9764, %v12974_v0  }
 0x4f1   : > { %v3566_v25 = vsub.f32 0.0, %v3550_v4  ;;  %v3938_v19 = vsub.f32 0.0, %v3922_v41 }
 0x4f2   : > { %v13173_v50 = vpop.permute.xlu1 %4755 }
 0x4f3   : > { %4395 = vperm.xlu0 %9802, %v12927_v31   ;;  %v3584_v48 = vmul.f32 1.442695, %v3566_v25  ;;  %v3956_v4 = vmul.f32 1.442695, %v3938_v19 }
 0x4f4   : > { %9766 = vset.pattern.permute.xlu1 %v15572_v49 }
 0x4f5   : > { %4779 = vperm.xlu1 %9766, %v12974_v0   ;;  %10482 = vpow2.f32 %v3584_v48 }
 0x4f6   : > { %10484 = vpow2.f32 %v3770_v38 }
 0x4f7   : > { %v3644_v30 = vpop.permute.xlu1 %3643  ;;  %4403 = vperm.xlu0 %9802, %v12957_v46   ;;  %v3923_v46 = vmul.f32 %v3907_v59, %v3907_v59 }
 0x4f8   : > { %v3701_v31 = vsub.f32 %v3644_v30, %v13013_v5 }
 0x4f9   : > { %9767 = vset.pattern.permute.xlu1 %v15573_v3  ;;  %v3939_v2 = vsub.f32 0.0, %v3923_v46 }
 0x4fa   : > { %v3721_v21 = vmul.f32 %v13030_v23, %v3701_v31  ;;  %4593 = vperm.xlu1 %9767, %v12974_v0   ;;  %v4020_v31 = vpop.permute.xlu0 %4019 }
 0x4fb   : > { %4415 = vperm.xlu0 %9802, %v13004_v17   ;;  %v3958_v30 = vmul.f32 1.442695, %v3939_v2  ;;  %v3702_v2 = vsub.f32 %v13196_v63, %v13013_v5 }
 0x4fc   : > { %v3737_v60 = vmul.f32 %v3721_v21, %v3721_v21  ;;  %v4016_v42 = vpop.permute.xlu1 %4015 }
 0x4fd   : > { %v4073_v22 = vsub.f32 %v4016_v42, %v13048_v20 }
 0x4fe   : > { %v3753_v10 = vsub.f32 0.0, %v3737_v60  ;;  %9769 = vset.pattern.permute.xlu1 %v15575_v62  ;;  %v13210_v37 = vpop.permute.xlu0 %4577 }
 0x4ff   : > { %v4093_v0 = vmul.f32 %v13065_v8, %v4073_v22  ;;  %3667 = vperm.xlu1 %9769, %v12991_v36   ;;  %4427 = vperm.xlu0 %9802, %v13109_v57   ;;  %v10483_v40 = vpop.eup %10482 }
 0x500   : > { %v3772_v34 = vmul.f32 1.442695, %v3753_v10  ;;  %v10485_v41 = vpop.eup %10484 }
 0x501   : > { %v4109_v52 = vmul.f32 %v4093_v0, %v4093_v0  ;;  %v13198_v39 = vpop.permute.xlu1 %4759 }
 0x502   : > { %10486 = vpow2.f32 %v3772_v34  ;;  %v3456_v10 = vpop.permute.xlu0 %3455 }
 0x503   : > { %10488 = vpow2.f32 %v3586_v43  ;;  %v4125_v15 = vsub.f32 0.0, %v4109_v52  ;;  %9771 = vset.pattern.permute.xlu1 %v15568_v58  ;;  %9806 = vset.pattern.permute.xlu0 %v15572_v49 }
 0x504   : > { %4039 = vperm.xlu1 %9771, %v12991_v36   ;;  %4771 = vperm.xlu0 %9806, %v12944_v53   ;;  %10490 = vpow2.f32 %v3956_v4 }
 0x505   : > { %v4144_v59 = vmul.f32 1.442695, %v4125_v15  ;;  %10492 = vpow2.f32 %v4142_v1  ;;  %v3517_v1 = vsub.f32 %v3456_v10, %v13020_v13  ;;  %v3722_v15 = vmul.f32 %v13030_v23, %v3702_v2 }
 0x506   : > { %v13204_v25 = vpop.permute.xlu1 %4573  ;;  %v3838_v34 = vpop.permute.xlu0 %3837 }
 0x507   : > { %10494 = vpow2.f32 %v4144_v59 }
 0x508   : > { %10496 = vpow2.f32 %v3958_v30  ;;  %9772 = vset.pattern.permute.xlu1 %v15570_v24  ;;  %4783 = vperm.xlu0 %9806, %v12991_v36   ;;  %v4074_v30 = vsub.f32 %v4020_v31, %v13048_v20 }
 0x509   : > { %4411 = vperm.xlu1 %9772, %v12991_v36  }
 0x50a   : > { %v13237_v59 = vpop.permute.xlu0 %4209  ;;  %v4094_v31 = vmul.f32 %v13065_v8, %v4074_v30 }
 0x50b   : > { %v3451_v33 = vpop.permute.xlu1 %3450 }
 0x50c   : > { %v10487_v21 = vpop.eup %10486  ;;  %4795 = vperm.xlu0 %9806, %v13086_v61   ;;  %v3516_v4 = vsub.f32 %v3451_v33, %v13020_v13  ;;  %v3537_v33 = vmul.f32 %v13043_v51, %v3517_v1  ;;  %v4110_v10 = vmul.f32 %v4094_v31, %v4094_v31 }
 0x50d   : > { %v10489_v53 = vpop.eup %10488  ;;  %9773 = vset.pattern.permute.xlu1 %v15571_v6  ;;  %v3799_v46 = vpack.c.bf16 %v10487_v21, %v10485_v41  ;;  %v3738_v21 = vmul.f32 %v3722_v15, %v3722_v15 }
 0x50e   : > { %4225 = vperm.xlu1 %9773, %v12991_v36   ;;  %v3613_v48 = vpack.c.bf16 %v10489_v53, %v10483_v40  ;;  %v10491_v60 = vpop.eup %10490  ;;  %v3536_v63 = vmul.f32 %v13043_v51, %v3516_v4  ;;  %v3889_v53 = vsub.f32 %v3838_v34, %v13053_v11 }
 0x50f   : > { %5546 = vmatprep.mubr.bf16.mxu1 %v3799_v46  ;;  %v10493_v42 = vpop.eup %10492 }
 0x510   : > { %v3834_v38 = vpop.permute.xlu1 %3833  ;;  %9808 = vset.pattern.permute.xlu0 %v15573_v3  ;;  %5547 = vmatmul.mubr.bf16.gmra.mrb[84].mxu1 %v3613_v48  ;;  %v3552_v46 = vmul.f32 %v3536_v63, %v3536_v63 }
 0x511   : > { %v10495_v19 = vpop.eup %10494  ;;  %4601 = vperm.xlu0 %9808, %v13004_v17   ;;  %v3888_v40 = vsub.f32 %v3834_v38, %v13053_v11  ;;  %v3754_v38 = vsub.f32 0.0, %v3738_v21 }
 0x512   : > { %v10497_v22 = vpop.eup %10496  ;;  %9774 = vset.pattern.permute.xlu1 %v15574_v54  ;;  %v4171_v29 = vpack.c.bf16 %v10495_v19, %v10493_v42  ;;  %v3909_v19 = vmul.f32 %v13075_v44, %v3889_v53 }
 0x513   : > { %3480 = vperm.xlu1 %9774, %v13004_v17   ;;  %v3985_v43 = vpack.c.bf16 %v10497_v22, %v10491_v60  ;;  %v3908_v48 = vmul.f32 %v13075_v44, %v3888_v40  ;;  %v3553_v60 = vmul.f32 %v3537_v33, %v3537_v33  ;;  %v13251_v22 = vpop.permute.xlu0 %3655  ;;  %v3774_v1 = vmul.f32 1.442695, %v3754_v38 }
 0x514   : > { %5643 = vmatprep.mubr.bf16.mxu0 %v4171_v29  ;;  %v3925_v15 = vmul.f32 %v3909_v19, %v3909_v19  ;;  %v4126_v40 = vsub.f32 0.0, %v4110_v10 }
 0x515   : > { %v13218_v0 = vpop.permute.xlu1 %4205  ;;  %4613 = vperm.xlu0 %9808, %v13109_v57   ;;  %5644 = vmatmul.mubr.bf16.gmra.mrb[84].mxu0 %v3985_v43  ;;  %v3568_v43 = vsub.f32 0.0, %v3552_v46  ;;  %v3924_v2 = vmul.f32 %v3908_v48, %v3908_v48  ;;  %v3569_v4 = vsub.f32 0.0, %v3553_v60  ;;  %10498 = vpow2.f32 %v3774_v1  ;;  %v10050_v1 = vld [vmem:[%s15407_s3 + $0x540] sm:$0xff]  }
 0x516   : > { %v3941_v60 = vsub.f32 0.0, %v3925_v15  ;;  %v4146_v19 = vmul.f32 1.442695, %v4126_v40  ;;  %v10051_v15 = vld [vmem:[%s15407_s3 + $0x500] sm:$0xff]   ;;  %9202 = vmatprep.subr.bf16.mxu1 %v10050_v1 }
 0x517   : > { %9776 = vset.pattern.permute.xlu1 %v15569_v28  ;;  %v3588_v33 = vmul.f32 1.442695, %v3568_v43  ;;  %v13258_v53 = vpop.permute.xlu0 %4027  ;;  %v3940_v31 = vsub.f32 0.0, %v3924_v2  ;;  %v3590_v48 = vmul.f32 1.442695, %v3569_v4  ;;  %v10053_v40 = vld [vmem:[%s15407_s3 + $0x580] sm:$0xff]   ;;  %9203 = vmatpush3.bf16.msra.mxu1 %v10051_v15 }
 0x518   : > { %3857 = vperm.xlu1 %9776, %v13004_v17  }
 0x519   : > { %9812 = vset.pattern.permute.xlu0 %v15571_v6  ;;  %10500 = vpow2.f32 %v3588_v33  ;;  %v3960_v43 = vmul.f32 1.442695, %v3940_v31 }
 0x51a   : > { %v13227_v52 = vpop.permute.xlu1 %4391  ;;  %4245 = vperm.xlu0 %9812, %v13126_v35  }
 0x51b   : > { %15576 = vst [vmem:[#allocation15_spill] sm:$0xff] %v13227_v52  ;;  %v13266_v4 = vpop.permute.xlu0 %3465 }
 0x51c   : > { %9779 = vset.pattern.permute.xlu1 %v15575_v62 }
 0x51d   : > { %3675 = vperm.xlu1 %9779, %v13038_v12  }
 0x51e   : > { %9816 = vset.pattern.permute.xlu0 %v15572_v49 }
 0x51f   : > { %v13240_v41 = vpop.permute.xlu1 %4763  ;;  %4807 = vperm.xlu0 %9816, %v13139_v16   ;;  %v10499_v31 = vpop.eup %10498 }
 0x521   : > { %9781 = vset.pattern.permute.xlu1 %v15568_v58 }
 0x522   : > { %4047 = vperm.xlu1 %9781, %v13038_v12  }
 0x523   : > { %9818 = vset.pattern.permute.xlu0 %v15574_v54 }
 0x524   : > { %v3652_v42 = vpop.permute.xlu1 %3651 }
 0x525   : > { %v3703_v29 = vsub.f32 %v3652_v42, %v13013_v5 }
 0x526   : > { %9782 = vset.pattern.permute.xlu1 %v15574_v54 }
 0x527   : > { %v3723_v34 = vmul.f32 %v13030_v23, %v3703_v29  ;;  %3490 = vperm.xlu1 %9782, %v13086_v61  }
 0x529   : > { %v3739_v30 = vmul.f32 %v3723_v34, %v3723_v34  ;;  %v4024_v63 = vpop.permute.xlu1 %4023  ;;  %v3962_v34 = vmul.f32 1.442695, %v3941_v60 }
 0x52a   : > { %v4075_v21 = vsub.f32 %v4024_v63, %v13048_v20 }
 0x52b   : > { %v3755_v46 = vsub.f32 0.0, %v3739_v30  ;;  %9784 = vset.pattern.permute.xlu1 %v15569_v28  ;;  %v10052_v30 = vld [vmem:[%s15407_s3 + $0x5c0] sm:$0xff]  }
 0x52c   : > { %v4095_v42 = vmul.f32 %v13065_v8, %v4075_v21  ;;  %3865 = vperm.xlu1 %9784, %v13086_v61   ;;  %9266 = vmatprep.subr.bf16.mxu0 %v10052_v30  ;;  %v10054_v21 = vld [vmem:[%s15407_s3 + $0x548] sm:$0xff]  }
 0x52d   : > { %v3776_v38 = vmul.f32 1.442695, %v3755_v46  ;;  %9267 = vmatpush3.bf16.msra.mxu0 %v10053_v40  ;;  %v13288_v46 = vpop.permute.xlu0 %3845  ;;  %9204 = vmatprep.subr.bf16.mxu1 %v10054_v21 }
 0x52e   : > { %v4111_v29 = vmul.f32 %v4095_v42, %v4095_v42  ;;  %v13263_v10 = vpop.permute.xlu1 %4767 }
 0x52f   : > { %15577 = vst [vmem:[#allocation20_spill] sm:$0xff] %v13263_v10  ;;  %10502 = vpow2.f32 %v3776_v38 }
 0x530   : > { %10504 = vpow2.f32 %v3590_v48  ;;  %v4127_v2 = vsub.f32 0.0, %v4111_v29  ;;  %9787 = vset.pattern.permute.xlu1 %v15575_v62  ;;  %v10501_v48 = vpop.eup %10500 }
 0x531   : > { %3683 = vperm.xlu1 %9787, %v13109_v57   ;;  %10506 = vpow2.f32 %v4146_v19  ;;  %v13301_v30 = vpop.permute.xlu0 %4589 }
 0x532   : > { %v4148_v63 = vmul.f32 1.442695, %v4127_v2  ;;  %10508 = vpow2.f32 %v3960_v43  ;;  %v10055_v43 = vld [vmem:[%s15407_s3 + $0x508] sm:$0xff]  }
 0x533   : > { %v13281_v33 = vpop.permute.xlu1 %4581  ;;  %v10056_v2 = vld [vmem:[%s15407_s3 + $0x5c8] sm:$0xff]   ;;  %9205 = vmatpush3.bf16.msra.mxu1 %v10055_v43 }
 0x534   : > { %15578 = vst [vmem:[#allocation16_spill] sm:$0xff] %v13281_v33  ;;  %10510 = vpow2.f32 %v4148_v63  ;;  %9268 = vmatprep.subr.bf16.mxu0 %v10056_v2  ;;  %v10061_v2 = vld [vmem:[%s15407_s3 + $0x590] sm:$0xff]  }
 0x535   : > { %10512 = vpow2.f32 %v3962_v34  ;;  %9789 = vset.pattern.permute.xlu1 %v15568_v58  ;;  %v10057_v34 = vld [vmem:[%s15407_s3 + $0x588] sm:$0xff]   ;;  %v13316_v43 = vpop.permute.xlu0 %3663 }
 0x536   : > { %4055 = vperm.xlu1 %9789, %v13109_v57   ;;  %9269 = vmatpush3.bf16.msra.mxu0 %v10057_v34  ;;  %v3704_v34 = vsub.f32 %v13251_v22, %v13013_v5  ;;  %v10062_v22 = vld [vmem:[%s15407_s3 + $0x558] sm:$0xff]  }
 0x538   : > { %v3461_v42 = vpop.permute.xlu1 %3460 }
 0x539   : > { %v10503_v60 = vpop.eup %10502 }
 0x53a   : > { %v10505_v38 = vpop.eup %10504  ;;  %9790 = vset.pattern.permute.xlu1 %v15574_v54  ;;  %v3800_v19 = vpack.c.bf16 %v10503_v60, %v10499_v31  ;;  %v10058_v60 = vld [vmem:[%s15407_s3 + $0x550] sm:$0xff]  }
 0x53b   : > { %3500 = vperm.xlu1 %9790, %v13126_v35   ;;  %v3614_v29 = vpack.c.bf16 %v10505_v38, %v10501_v48  ;;  %v10507_v1 = vpop.eup %10506  ;;  %v10059_v38 = vld [vmem:[%s15407_s3 + $0x510] sm:$0xff]   ;;  %9206 = vmatprep.subr.bf16.mxu1 %v10058_v60  ;;  %v10065_v60 = vld [vmem:[%s15407_s3 + $0x598] sm:$0xff]  }
 0x53c   : > { %5554 = vmatprep.mubr.bf16.mxu1 %v3800_v19  ;;  %v10509_v15 = vpop.eup %10508  ;;  %v10060_v19 = vld [vmem:[%s15407_s3 + $0x5d0] sm:$0xff]   ;;  %9207 = vmatpush3.bf16.msra.mxu1 %v10059_v38 }
 0x53d   : > { %v3842_v63 = vpop.permute.xlu1 %3841  ;;  %5555 = vmatmul.mubr.bf16.gmra.mrb[88].mxu1 %v3614_v29  ;;  %9270 = vmatprep.subr.bf16.mxu0 %v10060_v19 }
 0x53e   : > { %v10511_v40 = vpop.eup %10510  ;;  %9271 = vmatpush3.bf16.msra.mxu0 %v10061_v2  ;;  %v3890_v38 = vsub.f32 %v3842_v63, %v13053_v11  ;;  %9208 = vmatprep.subr.bf16.mxu1 %v10062_v22  ;;  %v10066_v63 = vld [vmem:[%s15407_s3 + $0x560] sm:$0xff]  }
 0x53f   : > { %v10513_v21 = vpop.eup %10512  ;;  %9792 = vset.pattern.permute.xlu1 %v15569_v28  ;;  %v4172_v31 = vpack.c.bf16 %v10511_v40, %v10507_v1  ;;  %v3518_v1 = vsub.f32 %v3461_v42, %v13020_v13  ;;  %v3519_v40 = vsub.f32 %v13266_v4, %v13020_v13  ;;  %v10063_v42 = vld [vmem:[%s15407_s3 + $0x518] sm:$0xff]   ;;  %v4076_v4 = vsub.f32 %v13258_v53, %v13048_v20 }
 0x540   : > { %3873 = vperm.xlu1 %9792, %v13126_v35   ;;  %v3986_v48 = vpack.c.bf16 %v10513_v21, %v10509_v15  ;;  %v13330_v21 = vpop.permute.xlu0 %4035  ;;  %v10064_v13 = vld [vmem:[%s15407_s3 + $0x5d8] sm:$0xff]   ;;  %9209 = vmatpush3.bf16.msra.mxu1 %v10063_v42  ;;  %v3891_v53 = vsub.f32 %v13288_v46, %v13053_v11 }
 0x541   : > { %5651 = vmatprep.mubr.bf16.mxu0 %v4172_v31  ;;  %v3724_v31 = vmul.f32 %v13030_v23, %v3704_v34  ;;  %9272 = vmatprep.subr.bf16.mxu0 %v10064_v13  ;;  %v3539_v2 = vmul.f32 %v13043_v51, %v3519_v40  ;;  %v3910_v40 = vmul.f32 %v13075_v44, %v3890_v38 }
 0x542   : > { %v13314_v29 = vpop.permute.xlu1 %4399  ;;  %5652 = vmatmul.mubr.bf16.gmra.mrb[88].mxu0 %v3986_v48  ;;  %v3538_v48 = vmul.f32 %v13043_v51, %v3518_v1  ;;  %v4096_v1 = vmul.f32 %v13065_v8, %v4076_v4  ;;  %v10067_v51 = vld [vmem:[%s15407_s3 + $0x520] sm:$0xff]   ;;  %9210 = vmatprep.subr.bf16.mxu1 %v10066_v63  ;;  %v3911_v22 = vmul.f32 %v13075_v44, %v3891_v53 }
 0x543   : > { %15579 = vst [vmem:[#allocation19_spill] sm:$0xff] %v13314_v29  ;;  %9273 = vmatpush3.bf16.msra.mxu0 %v10065_v60  ;;  %v3740_v34 = vmul.f32 %v3724_v31, %v3724_v31  ;;  %v3555_v11 = vmul.f32 %v3539_v2, %v3539_v2  ;;  %v3926_v4 = vmul.f32 %v3910_v40, %v3910_v40  ;;  %v10068_v60 = vld [vmem:[%s15407_s3 + $0x5e0] sm:$0xff]  }
 0x544   : > { %9795 = vset.pattern.permute.xlu1 %v15575_v62  ;;  %v13358_v54 = vpop.permute.xlu0 %4221  ;;  %v3554_v28 = vmul.f32 %v3538_v48, %v3538_v48  ;;  %9211 = vmatpush3.bf16.msra.mxu1 %v10067_v51  ;;  %v10069_v44 = vld [vmem:[%s15407_s3 + $0x5a0] sm:$0xff]  }
 0x545   : > { %3691 = vperm.xlu1 %9795, %v13139_v16   ;;  %15582 = vst [vmem:[#allocation29_spill] sm:$0xff] %v13358_v54  ;;  %v3756_v31 = vsub.f32 0.0, %v3740_v34  ;;  %v3571_v38 = vsub.f32 0.0, %v3555_v11  ;;  %9274 = vmatprep.subr.bf16.mxu0 %v10068_v60  ;;  %v3942_v51 = vsub.f32 0.0, %v3926_v4  ;;  %v10070_v11 = vld [vmem:[%s15407_s3 + $0x568] sm:$0xff]  }
 0x546   : > { %v3570_v13 = vsub.f32 0.0, %v3554_v28  ;;  %v3927_v28 = vmul.f32 %v3911_v22, %v3911_v22  ;;  %v10071_v22 = vld [vmem:[%s15407_s3 + $0x528] sm:$0xff]   ;;  %9212 = vmatprep.subr.bf16.mxu1 %v10070_v11 }
 0x547   : > { %v13326_v15 = vpop.permute.xlu1 %4213  ;;  %v3778_v2 = vmul.f32 1.442695, %v3756_v31  ;;  %9275 = vmatpush3.bf16.msra.mxu0 %v10069_v44  ;;  %v3964_v44 = vmul.f32 1.442695, %v3942_v51  ;;  %v10076_v51 = vld [vmem:[%s15407_s3 + $0x5f0] sm:$0xff]  }
 0x548   : > { %15580 = vst [vmem:[#allocation18_spill] sm:$0xff] %v13326_v15  ;;  %9213 = vmatpush3.bf16.msra.mxu1 %v10071_v22  ;;  %v10080_v22 = vld [vmem:[%s15407_s3 + $0x5f8] sm:$0xff]  }
 0x549   : > { %9797 = vset.pattern.permute.xlu1 %v15568_v58  ;;  %10514 = vpow2.f32 %v3778_v2 }
 0x54a   : > { %4063 = vperm.xlu1 %9797, %v13139_v16  }
 0x54c   : > { %v13351_v19 = vpop.permute.xlu1 %4585 }
 0x54d   : > { %15581 = vst [vmem:[#allocation21_spill] sm:$0xff] %v13351_v19 }
 0x54e   : > { %9798 = vset.pattern.permute.xlu1 %v15573_v3 }
 0x54f   : > { %4597 = vperm.xlu1 %9798, %v12991_v36   ;;  %v4112_v36 = vmul.f32 %v4096_v1, %v4096_v1 }
 0x551   : > { %v3660_v46 = vpop.permute.xlu1 %3659  ;;  %v4128_v1 = vsub.f32 0.0, %v4112_v36  ;;  %v3943_v36 = vsub.f32 0.0, %v3927_v28  ;;  %v10075_v28 = vld [vmem:[%s15407_s3 + $0x530] sm:$0xff]  }
 0x552   : > { %v3705_v42 = vsub.f32 %v3660_v46, %v13013_v5  ;;  %v13379_v5 = vpop.permute.xlu0 %3475  ;;  %v3594_v46 = vmul.f32 1.442695, %v3571_v38  ;;  %v10074_v38 = vld [vmem:[%s15407_s3 + $0x570] sm:$0xff]  }
 0x553   : > { %9799 = vset.pattern.permute.xlu1 %v15570_v24  ;;  %v4150_v4 = vmul.f32 1.442695, %v4128_v1  ;;  %9214 = vmatprep.subr.bf16.mxu1 %v10074_v38  ;;  %v10515_v11 = vpop.eup %10514 }
 0x554   : > { %v3725_v48 = vmul.f32 %v13030_v23, %v3705_v42  ;;  %4419 = vperm.xlu1 %9799, %v13038_v12   ;;  %v3592_v23 = vmul.f32 1.442695, %v3570_v13  ;;  %v10073_v42 = vld [vmem:[%s15407_s3 + $0x5a8] sm:$0xff]   ;;  %9215 = vmatpush3.bf16.msra.mxu1 %v10075_v28 }
 0x556   : > { %v3741_v34 = vmul.f32 %v3725_v48, %v3725_v48  ;;  %v4032_v53 = vpop.permute.xlu1 %4031  ;;  %10516 = vpow2.f32 %v3592_v23  ;;  %v10078_v23 = vld [vmem:[%s15407_s3 + $0x578] sm:$0xff]  }
 0x557   : > { %v4077_v63 = vsub.f32 %v4032_v53, %v13048_v20  ;;  %v10072_v20 = vld [vmem:[%s15407_s3 + $0x5e8] sm:$0xff]   ;;  %9216 = vmatprep.subr.bf16.mxu1 %v10078_v23  ;;  %v13458_v23 = vld [vmem:[%s15406_s2 + $0x15] ss:$0 sm:$0xff] }
 0x558   : > { %v3757_v40 = vsub.f32 0.0, %v3741_v34  ;;  %9800 = vset.pattern.permute.xlu1 %v15571_v6  ;;  %9276 = vmatprep.subr.bf16.mxu0 %v10072_v20  ;;  %v3966_v34 = vmul.f32 1.442695, %v3943_v36  ;;  %v10081_v36 = vld [vmem:[%s15407_s3 + $0x5b8] sm:$0xff]  }
 0x559   : > { %v4097_v31 = vmul.f32 %v13065_v8, %v4077_v63  ;;  %4229 = vperm.xlu1 %9800, %v13004_v17   ;;  %v13397_v8 = vpop.permute.xlu0 %3853  ;;  %9277 = vmatpush3.bf16.msra.mxu0 %v10073_v42  ;;  %v13434_v42 = vld [vmem:[%s15405_s1 + $0x15] ss:$0 sm:$0xff] }
 0x55a   : > { %v3780_v13 = vmul.f32 1.442695, %v3757_v40  ;;  %v10077_v40 = vld [vmem:[%s15407_s3 + $0x5b0] sm:$0xff]   ;;  %9278 = vmatprep.subr.bf16.mxu0 %v10076_v51  ;;  %v4442_v28 = vsub.f32 %v13033_v56, %v13434_v42 }
 0x55b   : > { %v4113_v48 = vmul.f32 %v4097_v31, %v4097_v31  ;;  %v13399_v60 = vpop.permute.xlu1 %4217  ;;  %v13467_v56 = vld [vmem:[%s15406_s2 + $0x14] ss:$0 sm:$0xff] }
 0x55c   : > { %15583 = vst [vmem:[#allocation13_spill] sm:$0xff] %v13399_v60  ;;  %10518 = vpow2.f32 %v3780_v13 }
 0x55d   : > { %10520 = vpow2.f32 %v3594_v46  ;;  %v4129_v2 = vsub.f32 0.0, %v4113_v48  ;;  %9803 = vset.pattern.permute.xlu1 %v15572_v49  ;;  %v13414_v63 = vpop.permute.xlu0 %3671  ;;  %9279 = vmatpush3.bf16.msra.mxu0 %v10077_v40  ;;  %v13472_v40 = vld [vmem:[%s15405_s1 + $0x16] ss:$0 sm:$0xff] }
 0x55e   : > { %4787 = vperm.xlu1 %9803, %v13004_v17   ;;  %10522 = vpow2.f32 %v4150_v4  ;;  %v10079_v17 = vld [vmem:[%s15407_s3 + $0x538] sm:$0xff]   ;;  %v13443_v4 = vld [vmem:[%s15405_s1 + $0x14] ss:$0 sm:$0xff]  ;;  %9280 = vmatprep.subr.bf16.mxu0 %v10080_v22  ;;  %v4462_v22 = vmul.f32 %v13458_v23, %v4442_v28 }
 0x55f   : > { %v4152_v53 = vmul.f32 1.442695, %v4129_v2  ;;  %10524 = vpow2.f32 %v3964_v44  ;;  %9217 = vmatpush3.bf16.msra.mxu1 %v10079_v17 }
 0x560   : > { %v13409_v1 = vpop.permute.xlu1 %4775  ;;  %v10517_v46 = vpop.eup %10516 }
 0x561   : > { %15584 = vst [vmem:[#allocation32_spill] sm:$0xff] %v13409_v1  ;;  %10526 = vpow2.f32 %v4152_v53  ;;  %v13445_v48 = vpop.permute.xlu0 %4043  ;;  %9281 = vmatpush3.bf16.msra.mxu0 %v10081_v36  ;;  %v13526_v1 = vld [vmem:[%s15406_s2 + $0x11] ss:$0 sm:$0xff] }
 0x562   : > { %10528 = vpow2.f32 %v3966_v34  ;;  %4791 = vperm.xlu1 %9803, %v13038_v12   ;;  %v13453_v34 = vld [vmem:[%s15405_s1 + $0x17] ss:$0 sm:$0xff] }
 0x565   : > { %v13426_v31 = vpop.permute.xlu1 %3470  ;;  %v13484_v36 = vpop.permute.xlu0 %3485 }
 0x566   : > { %v10519_v20 = vpop.eup %10518  ;;  %9804 = vset.pattern.permute.xlu1 %v15573_v3 }
 0x567   : > { %v10521_v13 = vpop.eup %10520  ;;  %4605 = vperm.xlu1 %9804, %v13038_v12   ;;  %v3801_v44 = vpack.c.bf16 %v10519_v20, %v10515_v11  ;;  %v4256_v12 = vsub.f32 %v13035_v7, %v13443_v4  ;;  %v4814_v7 = vsub.f32 %v13068_v27, %v13453_v34  ;;  %v13482_v20 = vld [vmem:[%s15406_s2 + $0x17] ss:$0 sm:$0xff]  ;;  %v13492_v27 = vld [vmem:[%s15406_s2 + $0x16] ss:$0 sm:$0xff] }
 0x568   : > { %v3615_v38 = vpack.c.bf16 %v10521_v13, %v10517_v46  ;;  %v10523_v2 = vpop.eup %10522 }
 0x569   : > { %5562 = vmatprep.mubr.bf16.mxu1 %v3801_v44  ;;  %v10525_v53 = vpop.eup %10524  ;;  %v4276_v44 = vmul.f32 %v13467_v56, %v4256_v12  ;;  %v4834_v28 = vmul.f32 %v13482_v20, %v4814_v7  ;;  %v13512_v7 = vld [vmem:[%s15405_s1 + $0x10] ss:$0 sm:$0xff] }
 0x56a   : > { %v13462_v51 = vpop.permute.xlu1 %3849  ;;  %5563 = vmatmul.mubr.bf16.gmra.mrb[92].mxu1 %v3615_v38  ;;  %v4628_v38 = vsub.f32 %v13070_v47, %v13472_v40  ;;  %v13503_v47 = vld [vmem:[%s15405_s1 + $0x11] ss:$0 sm:$0xff] }
 0x56b   : > { %v10527_v17 = vpop.eup %10526  ;;  %9805 = vset.pattern.permute.xlu1 %v15570_v24 }
 0x56c   : > { %v10529_v11 = vpop.eup %10528  ;;  %4423 = vperm.xlu1 %9805, %v13086_v61   ;;  %v4173_v46 = vpack.c.bf16 %v10527_v17, %v10523_v2  ;;  %v4478_v17 = vmul.f32 %v4462_v22, %v4462_v22  ;;  %v4648_v12 = vmul.f32 %v13492_v27, %v4628_v38  ;;  %v3520_v22 = vsub.f32 %v13426_v31, %v13512_v7 }
 0x56d   : > { %v3987_v13 = vpack.c.bf16 %v10529_v11, %v10525_v53  ;;  %v4292_v53 = vmul.f32 %v4276_v44, %v4276_v44  ;;  %v3706_v11 = vsub.f32 %v13316_v43, %v13503_v47  ;;  %v3521_v43 = vsub.f32 %v13379_v5, %v13512_v7 }
 0x56e   : > { %5659 = vmatprep.mubr.bf16.mxu0 %v4173_v46  ;;  %v13507_v46 = vpop.permute.xlu0 %3861  ;;  %v4494_v38 = vsub.f32 0.0, %v4478_v17  ;;  %v13532_v17 = vld [vmem:[%s15405_s1 + $0x13] ss:$0 sm:$0xff] }
 0x56f   : > { %v13494_v2 = vpop.permute.xlu1 %4407  ;;  %5660 = vmatmul.mubr.bf16.gmra.mrb[92].mxu0 %v3987_v13  ;;  %v4850_v13 = vmul.f32 %v4834_v28, %v4834_v28  ;;  %v4308_v58 = vsub.f32 0.0, %v4292_v53  ;;  %v4257_v28 = vsub.f32 %v13106_v55, %v13443_v4  ;;  %v3726_v31 = vmul.f32 %v13526_v1, %v3706_v11  ;;  %v13539_v55 = vld [vmem:[%s15406_s2 + $0x10] ss:$0 sm:$0xff]  ;;  %v13547_v11 = vld [vmem:[%s15405_s1 + $0x12] ss:$0 sm:$0xff] }
 0x570   : > { %15585 = vst [vmem:[#allocation30_spill] sm:$0xff] %v13494_v2  ;;  %9807 = vset.pattern.permute.xlu1 %v15571_v6  ;;  %v4664_v2 = vmul.f32 %v4648_v12, %v4648_v12  ;;  %v4078_v53 = vsub.f32 %v13330_v21, %v13532_v17  ;;  %v3540_v5 = vmul.f32 %v13539_v55, %v3520_v22  ;;  %v4510_v12 = vmul.f32 1.442695, %v4494_v38 }
 0x571   : > { %4237 = vperm.xlu1 %9807, %v13086_v61   ;;  %v4866_v19 = vsub.f32 0.0, %v4850_v13  ;;  %v3892_v13 = vsub.f32 %v13462_v51, %v13547_v11  ;;  %v4324_v21 = vmul.f32 1.442695, %v4308_v58  ;;  %v4630_v22 = vsub.f32 %v13149_v9, %v13472_v40 }
 0x572   : > { %v4680_v60 = vsub.f32 0.0, %v4664_v2  ;;  %v3541_v38 = vmul.f32 %v13539_v55, %v3521_v43  ;;  %v4277_v15 = vmul.f32 %v13467_v56, %v4257_v28  ;;  %v3742_v33 = vmul.f32 %v3726_v31, %v3726_v31 }
 0x573   : > { %v3893_v54 = vsub.f32 %v13397_v8, %v13547_v11  ;;  %v4882_v51 = vmul.f32 1.442695, %v4866_v19  ;;  %v3556_v2 = vmul.f32 %v3540_v5, %v3540_v5  ;;  %10530 = vpow2.f32 %v4510_v12 }
 0x574   : > { %v13516_v44 = vpop.permute.xlu1 %4779  ;;  %10532 = vpow2.f32 %v4324_v21  ;;  %v4696_v43 = vmul.f32 1.442695, %v4680_v60  ;;  %v4650_v19 = vmul.f32 %v13492_v27, %v4630_v22  ;;  %v3557_v8 = vmul.f32 %v3541_v38, %v3541_v38 }
 0x575   : > { %15586 = vst [vmem:[#allocation22_spill] sm:$0xff] %v13516_v44  ;;  %4241 = vperm.xlu1 %9807, %v13109_v57   ;;  %v13542_v44 = vpop.permute.xlu0 %3679  ;;  %v4293_v31 = vmul.f32 %v4277_v15, %v4277_v15  ;;  %v3758_v10 = vsub.f32 0.0, %v3742_v33  ;;  %10534 = vpow2.f32 %v4882_v51  ;;  %v4815_v60 = vsub.f32 %v13115_v26, %v13453_v34 }
 0x576   : > { %v3572_v21 = vsub.f32 0.0, %v3556_v2  ;;  %v4629_v22 = vsub.f32 %v13123_v14, %v13472_v40  ;;  %v4259_v33 = vsub.f32 %v13188_v18, %v13443_v4  ;;  %10536 = vpow2.f32 %v4696_v43 }
 0x577   : > { %v4666_v38 = vmul.f32 %v4650_v19, %v4650_v19  ;;  %v3573_v51 = vsub.f32 0.0, %v3557_v8  ;;  %v4835_v14 = vmul.f32 %v13482_v20, %v4815_v60 }
 0x578   : > { %v3596_v18 = vmul.f32 1.442695, %v3572_v21  ;;  %v4649_v43 = vmul.f32 %v13492_v27, %v4629_v22  ;;  %v4258_v21 = vsub.f32 %v13155_v45, %v13443_v4 }
 0x579   : > { %v13551_v29 = vpop.permute.xlu1 %4593  ;;  %9809 = vset.pattern.permute.xlu1 %v15572_v49  ;;  %v13576_v5 = vpop.permute.xlu0 %4051 }
 0x57a   : > { %15587 = vst [vmem:[#allocation24_spill] sm:$0xff] %v13551_v29  ;;  %4799 = vperm.xlu1 %9809, %v13109_v57   ;;  %v13564_v29 = vld [vmem:[%s15406_s2 + $0x13] ss:$0 sm:$0xff]  ;;  %v13570_v57 = vld [vmem:[%s15406_s2 + $0x12] ss:$0 sm:$0xff]  ;;  %15588 = vst [vmem:[#allocation33_spill] sm:$0xff] %v13576_v5 }
 0x57b   : > { %v4098_v58 = vmul.f32 %v13564_v29, %v4078_v53  ;;  %v3912_v9 = vmul.f32 %v13570_v57, %v3892_v13  ;;  %v3913_v53 = vmul.f32 %v13570_v57, %v3893_v54  ;;  %v3782_v5 = vmul.f32 1.442695, %v3758_v10 }
 0x57d   : > { %v4114_v13 = vmul.f32 %v4098_v58, %v4098_v58  ;;  %v3928_v15 = vmul.f32 %v3912_v9, %v3912_v9  ;;  %v3929_v26 = vmul.f32 %v3913_v53, %v3913_v53  ;;  %v13595_v19 = vpop.permute.xlu0 %3495  ;;  %10538 = vpow2.f32 %v3782_v5 }
 0x57e   : > { %v3668_v28 = vpop.permute.xlu1 %3667  ;;  %9810 = vset.pattern.permute.xlu1 %v15573_v3  ;;  %15589 = vst [vmem:[#allocation6_spill] sm:$0xff] %v13595_v19  ;;  %10540 = vpow2.f32 %v3596_v18  ;;  %v4278_v18 = vmul.f32 %v13467_v56, %v4258_v21 }
 0x57f   : > { %v3707_v12 = vsub.f32 %v3668_v28, %v13503_v47  ;;  %4609 = vperm.xlu1 %9810, %v13086_v61   ;;  %v4632_v61 = vsub.f32 %v13210_v37, %v13472_v40  ;;  %v4309_v28 = vsub.f32 0.0, %v4293_v31  ;;  %v4130_v52 = vsub.f32 0.0, %v4114_v13  ;;  %v13599_v13 = vpop.eup %10530 }
 0x580   : > { %v4279_v37 = vmul.f32 %v13467_v56, %v4259_v33  ;;  %v3944_v10 = vsub.f32 0.0, %v3928_v15  ;;  %v4682_v31 = vsub.f32 0.0, %v4666_v38  ;;  %v4851_v33 = vmul.f32 %v4835_v14, %v4835_v14 }
 0x581   : > { %v3727_v54 = vmul.f32 %v13526_v1, %v3707_v12  ;;  %v4652_v53 = vmul.f32 %v13492_v27, %v4632_v61  ;;  %v3598_v12 = vmul.f32 1.442695, %v3573_v51  ;;  %v4154_v19 = vmul.f32 1.442695, %v4130_v52 }
 0x582   : > { %v4665_v61 = vmul.f32 %v4649_v43, %v4649_v43  ;;  %v4295_v51 = vmul.f32 %v4279_v37, %v4279_v37  ;;  %v4326_v14 = vmul.f32 1.442695, %v4309_v28  ;;  %v13616_v37 = vpop.permute.xlu0 %3869 }
 0x583   : > { %v3743_v58 = vmul.f32 %v3727_v54, %v3727_v54  ;;  %v4040_v2 = vpop.permute.xlu1 %4039  ;;  %9811 = vset.pattern.permute.xlu1 %v15570_v24  ;;  %v3945_v54 = vsub.f32 0.0, %v3929_v26  ;;  %v4668_v5 = vmul.f32 %v4652_v53, %v4652_v53  ;;  %v4444_v26 = vsub.f32 %v13163_v32, %v13434_v42 }
 0x584   : > { %v4079_v9 = vsub.f32 %v4040_v2, %v13532_v17  ;;  %4431 = vperm.xlu1 %9811, %v13126_v35   ;;  %v13603_v2 = vpop.eup %10532  ;;  %v4261_v53 = vsub.f32 %v13237_v59, %v13443_v4  ;;  %v4700_v32 = vmul.f32 1.442695, %v4682_v31  ;;  %v4294_v59 = vmul.f32 %v4278_v18, %v4278_v18 }
 0x585   : > { %v3759_v8 = vsub.f32 0.0, %v3743_v58  ;;  %15590 = vst [vmem:[#allocation23_spill] sm:$0xff] %v13603_v2  ;;  %v3968_v58 = vmul.f32 1.442695, %v3944_v10  ;;  %v13609_v45 = vpop.eup %10534  ;;  %v3970_v43 = vmul.f32 1.442695, %v3945_v54  ;;  %v4464_v21 = vmul.f32 %v13458_v23, %v4444_v26 }
 0x586   : > { %v4099_v60 = vmul.f32 %v13564_v29, %v4079_v9  ;;  %15591 = vst [vmem:[#allocation31_spill] sm:$0xff] %v13609_v45  ;;  %v4816_v9 = vsub.f32 %v13173_v50, %v13453_v34  ;;  %v13618_v10 = vpop.eup %10536  ;;  %v4684_v50 = vsub.f32 0.0, %v4668_v5  ;;  %v4817_v54 = vsub.f32 %v13198_v39, %v13453_v34 }
 0x587   : > { %v3784_v22 = vmul.f32 1.442695, %v3759_v8  ;;  %15592 = vst [vmem:[#allocation25_spill] sm:$0xff] %v13618_v10  ;;  %v4867_v8 = vsub.f32 0.0, %v4851_v33  ;;  %v4631_v31 = vsub.f32 %v13204_v25, %v13472_v40  ;;  %v3708_v39 = vsub.f32 %v13414_v63, %v13503_v47 }
 0x588   : > { %v4115_v15 = vmul.f32 %v4099_v60, %v4099_v60  ;;  %v13605_v38 = vpop.permute.xlu1 %4411  ;;  %9813 = vset.pattern.permute.xlu1 %v15572_v49  ;;  %v4480_v18 = vmul.f32 %v4464_v21, %v4464_v21  ;;  %v4080_v21 = vsub.f32 %v13445_v48, %v13532_v17 }
 0x589   : > { %10542 = vpow2.f32 %v3784_v22  ;;  %4803 = vperm.xlu1 %9813, %v13126_v35   ;;  %v4311_v22 = vsub.f32 0.0, %v4295_v51  ;;  %v4884_v33 = vmul.f32 1.442695, %v4867_v8 }
 0x58a   : > { %10544 = vpow2.f32 %v3598_v12  ;;  %v4131_v52 = vsub.f32 0.0, %v4115_v15  ;;  %v4681_v12 = vsub.f32 0.0, %v4665_v61  ;;  %v4281_v15 = vmul.f32 %v13467_v56, %v4261_v53  ;;  %v10539_v61 = vpop.eup %10538 }
 0x58b   : > { %10546 = vpow2.f32 %v4154_v19  ;;  %v4836_v19 = vmul.f32 %v13482_v20, %v4816_v9  ;;  %v10541_v5 = vpop.eup %10540  ;;  %v4330_v26 = vmul.f32 1.442695, %v4311_v22  ;;  %v4837_v9 = vmul.f32 %v13482_v20, %v4817_v54 }
 0x58c   : > { %v4156_v60 = vmul.f32 1.442695, %v4131_v52  ;;  %10548 = vpow2.f32 %v3968_v58  ;;  %v4698_v51 = vmul.f32 1.442695, %v4681_v12  ;;  %v13635_v58 = vpop.permute.xlu0 %3687  ;;  %v4704_v52 = vmul.f32 1.442695, %v4684_v50 }
 0x58d   : > { %v13622_v28 = vpop.permute.xlu1 %4225  ;;  %9814 = vset.pattern.permute.xlu1 %v15570_v24  ;;  %v4852_v8 = vmul.f32 %v4836_v19, %v4836_v19  ;;  %v4651_v53 = vmul.f32 %v13492_v27, %v4631_v31  ;;  %v3523_v12 = vsub.f32 %v13484_v36, %v13512_v7  ;;  %v3728_v50 = vmul.f32 %v13526_v1, %v3708_v39 }
 0x58e   : > { %15593 = vst [vmem:[#allocation3_spill] sm:$0xff] %v13622_v28  ;;  %10550 = vpow2.f32 %v4156_v60  ;;  %4435 = vperm.xlu1 %9814, %v13139_v16   ;;  %v4496_v19 = vsub.f32 0.0, %v4480_v18  ;;  %v4853_v31 = vmul.f32 %v4837_v9, %v4837_v9 }
 0x58f   : > { %10552 = vpow2.f32 %v3970_v43  ;;  %v4310_v43 = vsub.f32 0.0, %v4294_v59  ;;  %v4868_v49 = vsub.f32 0.0, %v4852_v8  ;;  %v4667_v36 = vmul.f32 %v4651_v53, %v4651_v53 }
 0x590   : > { %10554 = vpow2.f32 %v4326_v14  ;;  %v3744_v9 = vmul.f32 %v3728_v50, %v3728_v50 }
 0x591   : > { %10556 = vpow2.f32 %v4700_v32  ;;  %v4297_v32 = vmul.f32 %v4281_v15, %v4281_v15  ;;  %v4328_v15 = vmul.f32 1.442695, %v4310_v43  ;;  %v3895_v43 = vsub.f32 %v13507_v46, %v13547_v11 }
 0x592   : > { %v3481_v25 = vpop.permute.xlu1 %3480  ;;  %9815 = vset.pattern.permute.xlu1 %v15571_v6  ;;  %10558 = vpow2.f32 %v4884_v33  ;;  %v4260_v46 = vsub.f32 %v13218_v0, %v13443_v4 }
 0x593   : > { %v10543_v14 = vpop.eup %10542  ;;  %v3522_v60 = vsub.f32 %v3481_v25, %v13512_v7  ;;  %4249 = vperm.xlu1 %9815, %v13139_v16   ;;  %10560 = vpow2.f32 %v4698_v51  ;;  %v4313_v39 = vsub.f32 0.0, %v4297_v32 }
 0x594   : > { %v10545_v63 = vpop.eup %10544  ;;  %v3802_v22 = vpack.c.bf16 %v10543_v14, %v10539_v61  ;;  %10562 = vpow2.f32 %v4330_v26  ;;  %v13648_v61 = vpop.permute.xlu0 %4059  ;;  %v3543_v26 = vmul.f32 %v13539_v55, %v3523_v12  ;;  %v4100_v14 = vmul.f32 %v13564_v29, %v4080_v21 }
 0x595   : > { %v3616_v54 = vpack.c.bf16 %v10545_v63, %v10541_v5  ;;  %v10547_v59 = vpop.eup %10546  ;;  %v3542_v25 = vmul.f32 %v13539_v55, %v3522_v60  ;;  %10564 = vpow2.f32 %v4704_v52  ;;  %v4635_v5 = vsub.f32 %v13301_v30, %v13472_v40 }
 0x596   : > { %5570 = vmatprep.mubr.bf16.mxu1 %v3802_v22  ;;  %v10549_v33 = vpop.eup %10548  ;;  %v4514_v60 = vmul.f32 1.442695, %v4496_v19  ;;  %v4869_v63 = vsub.f32 0.0, %v4853_v31  ;;  %10566 = vpow2.f32 %v4328_v15  ;;  %v4886_v12 = vmul.f32 1.442695, %v4868_v49 }
 0x597   : > { %v3858_v51 = vpop.permute.xlu1 %3857  ;;  %9817 = vset.pattern.permute.xlu1 %v15573_v3  ;;  %5571 = vmatmul.mubr.bf16.gmra.mrb[96].mxu1 %v3616_v54  ;;  %v3558_v32 = vmul.f32 %v3542_v25, %v3542_v25  ;;  %v4683_v54 = vsub.f32 0.0, %v4667_v36  ;;  %v4334_v50 = vmul.f32 1.442695, %v4313_v39  ;;  %v4655_v21 = vmul.f32 %v13492_v27, %v4635_v5  ;;  %v15603_v3 = vld [vmem:[#allocation20_spill] sm:$0xff] }
 0x598   : > { %v10551_v48 = vpop.eup %10550  ;;  %v3894_v18 = vsub.f32 %v3858_v51, %v13547_v11  ;;  %4617 = vperm.xlu1 %9817, %v13126_v35   ;;  %v3760_v19 = vsub.f32 0.0, %v3744_v9  ;;  %v4116_v31 = vmul.f32 %v4100_v14, %v4100_v14  ;;  %v3915_v25 = vmul.f32 %v13570_v57, %v3895_v43  ;;  %v13669_v49 = vpop.permute.xlu0 %3505 }
 0x599   : > { %v10553_v52 = vpop.eup %10552  ;;  %v4174_v8 = vpack.c.bf16 %v10551_v48, %v10547_v59  ;;  %v3559_v59 = vmul.f32 %v3543_v26, %v3543_v26  ;;  %10568 = vpow2.f32 %v4514_v60  ;;  %v4888_v36 = vmul.f32 1.442695, %v4869_v63 }
 0x59a   : > { %v13659_v53 = vpop.eup %10554  ;;  %v3988_v30 = vpack.c.bf16 %v10553_v52, %v10549_v33  ;;  %v3914_v35 = vmul.f32 %v13570_v57, %v3894_v18  ;;  %v3574_v48 = vsub.f32 0.0, %v3558_v32  ;;  %10570 = vpow2.f32 %v4886_v12 }
 0x59b   : > { %15594 = vst [vmem:[#allocation26_spill] sm:$0xff] %v13659_v53  ;;  %v13661_v22 = vpop.eup %10556  ;;  %5667 = vmatprep.mubr.bf16.mxu0 %v4174_v8  ;;  %v4702_v0 = vmul.f32 1.442695, %v4683_v54  ;;  %10572 = vpow2.f32 %v4334_v50  ;;  %v4671_v18 = vmul.f32 %v4655_v21, %v4655_v21  ;;  %v4280_v52 = vmul.f32 %v13467_v56, %v4260_v46 }
 0x59c   : > { %v3676_v51 = vpop.permute.xlu1 %3675  ;;  %4621 = vperm.xlu1 %9817, %v13139_v16   ;;  %5668 = vmatmul.mubr.bf16.gmra.mrb[96].mxu0 %v3988_v30  ;;  %v13672_v15 = vpop.eup %10558  ;;  %v3930_v5 = vmul.f32 %v3914_v35, %v3914_v35  ;;  %v3575_v9 = vsub.f32 0.0, %v3559_v59  ;;  %v3786_v43 = vmul.f32 1.442695, %v3760_v19  ;;  %v4132_v8 = vsub.f32 0.0, %v4116_v31 }
 0x59d   : > { %v3709_v33 = vsub.f32 %v3676_v51, %v13503_v47  ;;  %15595 = vst [vmem:[#allocation5_spill] sm:$0xff] %v13672_v15  ;;  %v13674_v39 = vpop.eup %10560  ;;  %v3931_v60 = vmul.f32 %v3915_v25, %v3915_v25  ;;  %10574 = vpow2.f32 %v4888_v36  ;;  %v3600_v30 = vmul.f32 1.442695, %v3574_v48  ;;  %v13686_v35 = vpop.permute.xlu0 %3877 }
 0x59e   : > { %15596 = vst [vmem:[#allocation8_spill] sm:$0xff] %v13674_v39  ;;  %v13677_v26 = vpop.eup %10562  ;;  %10576 = vpow2.f32 %v4702_v0  ;;  %v3710_v54 = vsub.f32 %v13542_v44, %v13503_v47  ;;  %v3946_v50 = vsub.f32 0.0, %v3930_v5  ;;  %v4687_v46 = vsub.f32 0.0, %v4671_v18 }
 0x59f   : > { %v3729_v16 = vmul.f32 %v13526_v1, %v3709_v33  ;;  %v13681_v14 = vpop.eup %10564  ;;  %v4296_v59 = vmul.f32 %v4280_v52, %v4280_v52  ;;  %v3602_v51 = vmul.f32 1.442695, %v3575_v9  ;;  %10578 = vpow2.f32 %v3786_v43 }
 0x5a0   : > { %9819 = vset.pattern.permute.xlu1 %v15575_v62  ;;  %15597 = vst [vmem:[#allocation10_spill] sm:$0xff] %v13681_v14  ;;  %v13689_v31 = vpop.eup %10566  ;;  %v4158_v25 = vmul.f32 1.442695, %v4132_v8  ;;  %v3947_v33 = vsub.f32 0.0, %v3931_v60  ;;  %v4818_v48 = vsub.f32 %v13240_v41, %v13453_v34  ;;  %10580 = vpow2.f32 %v3600_v30  ;;  %v15599_v8 = vld [vmem:[#allocation6_spill] sm:$0xff] }
 0x5a1   : > { %v3745_v63 = vmul.f32 %v3729_v16, %v3729_v16  ;;  %v4048_v32 = vpop.permute.xlu1 %4047  ;;  %v3730_v16 = vmul.f32 %v13526_v1, %v3710_v54  ;;  %v3972_v18 = vmul.f32 1.442695, %v3946_v50  ;;  %v4710_v43 = vmul.f32 1.442695, %v4687_v46  ;;  %v13705_v50 = vpop.permute.xlu0 %4233  ;;  %v15602_v46 = vld [vmem:[#allocation33_spill] sm:$0xff] }
 0x5a2   : > { %v4081_v12 = vsub.f32 %v4048_v32, %v13532_v17  ;;  %v3525_v60 = vsub.f32 %v15599_v8, %v13512_v7  ;;  %v4312_v30 = vsub.f32 0.0, %v4296_v59  ;;  %v3974_v54 = vmul.f32 1.442695, %v3947_v33 }
 0x5a3   : > { %v3761_v21 = vsub.f32 0.0, %v3745_v63  ;;  %v13697_v9 = vpop.eup %10568  ;;  %v4838_v59 = vmul.f32 %v13482_v20, %v4818_v48  ;;  %v3897_v48 = vsub.f32 %v13616_v37, %v13547_v11 }
 0x5a4   : > { %v4101_v19 = vmul.f32 %v13564_v29, %v4081_v12  ;;  %15598 = vst [vmem:[#allocation17_spill] sm:$0xff] %v13697_v9  ;;  %v13701_v32 = vpop.eup %10570  ;;  %v15600_v12 = vld [vmem:[#allocation15_spill] sm:$0xff]  ;;  %v3545_v6 = vmul.f32 %v13539_v55, %v3525_v60 }
 0x5a5   : > { %v3788_v36 = vmul.f32 1.442695, %v3761_v21  ;;  %v4446_v21 = vsub.f32 %v15600_v12, %v13434_v42  ;;  %v4819_v12 = vsub.f32 %v15603_v3, %v13453_v34  ;;  %v13733_v37 = vpop.permute.xlu0 %4379 }
 0x5a6   : > { %v4117_v44 = vmul.f32 %v4101_v19, %v4101_v19  ;;  %v3491_v0 = vpop.permute.xlu1 %3490 }
 0x5a7   : > { %10582 = vpow2.f32 %v3788_v36  ;;  %v3524_v52 = vsub.f32 %v3491_v0, %v13512_v7  ;;  %v13707_v36 = vpop.eup %10572 }
 0x5a8   : > { %10584 = vpow2.f32 %v3602_v51  ;;  %v4133_v41 = vsub.f32 0.0, %v4117_v44  ;;  %v9090_v63 = vpop.f32.mrb[80].mxu1  ;;  %15601 = vst [vmem:[#allocation12_spill] sm:$0xff] %v13707_v36  ;;  %v4082_v51 = vsub.f32 %v15602_v46, %v13532_v17  ;;  %v13715_v62 = vpop.eup %10574 }
 0x5a9   : > { %10586 = vpow2.f32 %v4158_v25  ;;  %v9091_v19 = vpop.f32.mrb[81].mxu1  ;;  %v3544_v44 = vmul.f32 %v13539_v55, %v3524_v52  ;;  %v3746_v25 = vmul.f32 %v3730_v16, %v3730_v16  ;;  %v13719_v52 = vpop.eup %10576 }
 0x5aa   : > { %v4160_v0 = vmul.f32 1.442695, %v4133_v41  ;;  %v9092_v8 = vadd.f32 %v9091_v19, %v9090_v63  ;;  %v9093_v5 = vpop.f32.mrb[82].mxu1  ;;  %10588 = vpow2.f32 %v3972_v18  ;;  %15604 = vst [vmem:[#allocation14_spill] sm:$0xff] %v13719_v52  ;;  %v15605_v18 = vld [vmem:[#allocation29_spill] sm:$0xff] }
 0x5ab   : > { %v9094_v33 = vpop.f32.mrb[83].mxu1  ;;  %v3866_v24 = vpop.permute.xlu1 %3865  ;;  %v4264_v60 = vsub.f32 %v15605_v18, %v13443_v4  ;;  %v4839_v18 = vmul.f32 %v13482_v20, %v4819_v12  ;;  %v3762_v10 = vsub.f32 0.0, %v3746_v25 }
 0x5ac   : > { %10590 = vpow2.f32 %v4160_v0  ;;  %v9095_v46 = vadd.f32 %v9094_v33, %v9093_v5  ;;  %v3896_v41 = vsub.f32 %v3866_v24, %v13547_v11  ;;  %v4102_v5 = vmul.f32 %v13564_v29, %v4082_v51  ;;  %v10579_v0 = vpop.eup %10578 }
 0x5ad   : > { %10592 = vpow2.f32 %v3974_v54  ;;  %v9154_v63 = vpop.f32.mrb[80].mxu0  ;;  %v3560_v24 = vmul.f32 %v3544_v44, %v3544_v44  ;;  %v4332_v54 = vmul.f32 1.442695, %v4312_v30  ;;  %v13731_v33 = vmul.f32 %v13458_v23, %v4446_v21  ;;  %v10581_v16 = vpop.eup %10580 }
 0x5ae   : > { %10594 = vpow2.f32 %v4710_v43  ;;  %v9155_v19 = vpop.f32.mrb[81].mxu0  ;;  %v3916_v3 = vmul.f32 %v13570_v57, %v3896_v41  ;;  %v13736_v43 = vmul.f32 %v4838_v59, %v4838_v59  ;;  %v3561_v51 = vmul.f32 %v3545_v6, %v3545_v6 }
 0x5af   : > { %v9156_v14 = vadd.f32 %v9155_v19, %v9154_v63  ;;  %v9157_v2 = vpop.f32.mrb[82].mxu0  ;;  %v3917_v30 = vmul.f32 %v13570_v57, %v3897_v48  ;;  %v15606_v63 = vld [vmem:[#allocation16_spill] sm:$0xff]  ;;  %v4118_v59 = vmul.f32 %v4102_v5, %v4102_v5  ;;  %v3576_v15 = vsub.f32 0.0, %v3560_v24  ;;  %v13752_v5 = vpop.permute.xlu0 %4387 }
 0x5b0   : > { %v9158_v44 = vpop.f32.mrb[83].mxu0  ;;  %v3684_v39 = vpop.permute.xlu1 %3683  ;;  %v4633_v19 = vsub.f32 %v15606_v63, %v13472_v40  ;;  %v3932_v25 = vmul.f32 %v3916_v3, %v3916_v3  ;;  %10596 = vpow2.f32 %v4332_v54  ;;  %v4870_v48 = vsub.f32 0.0, %v13736_v43 }
 0x5b1   : > { %v10583_v53 = vpop.eup %10582  ;;  %v13740_v21 = vadd.f32 %v9156_v14, %v9092_v8  ;;  %v9159_v9 = vadd.f32 %v9158_v44, %v9157_v2  ;;  %v3711_v45 = vsub.f32 %v3684_v39, %v13503_v47  ;;  %v4284_v14 = vmul.f32 %v13467_v56, %v4264_v60 }
 0x5b2   : > { %v10585_v41 = vpop.eup %10584  ;;  %v3803_v28 = vpack.c.bf16 %v10583_v53, %v10579_v0  ;;  %v3790_v2 = vmul.f32 1.442695, %v3762_v10  ;;  %v3577_v8 = vsub.f32 0.0, %v3561_v51  ;;  %v3933_v44 = vmul.f32 %v3917_v30, %v3917_v30 }
 0x5b3   : > { %v10587_v12 = vpop.eup %10586  ;;  %v13745_v6 = vadd.f32 %v9159_v9, %v9095_v46  ;;  %v3731_v36 = vmul.f32 %v13526_v1, %v3711_v45  ;;  %v3617_v52 = vpack.c.bf16 %v10585_v41, %v10581_v16  ;;  %v3712_v53 = vsub.f32 %v13635_v58, %v13503_v47 }
 0x5b4   : > { %5578 = vmatprep.mubr.bf16.mxu1 %v3803_v28  ;;  %v10589_v39 = vpop.eup %10588  ;;  %v4855_v3 = vmul.f32 %v4839_v18, %v4839_v18  ;;  %v4134_v16 = vsub.f32 0.0, %v4118_v59  ;;  %v3604_v24 = vmul.f32 1.442695, %v3576_v15  ;;  %v4653_v28 = vmul.f32 %v13492_v27, %v4633_v19 }
 0x5b5   : > { %v3747_v9 = vmul.f32 %v3731_v36, %v3731_v36  ;;  %v4056_v46 = vpop.permute.xlu1 %4055  ;;  %5579 = vmatmul.mubr.bf16.gmra.mrb[100].mxu1 %v3617_v52  ;;  %v3948_v0 = vsub.f32 0.0, %v3932_v25  ;;  %10598 = vpow2.f32 %v3790_v2  ;;  %v3606_v58 = vmul.f32 1.442695, %v3577_v8  ;;  %v13762_v2 = vpop.permute.xlu0 %4395 }
 0x5b6   : > { %v10591_v45 = vpop.eup %10590  ;;  %v4083_v10 = vsub.f32 %v4056_v46, %v13532_v17  ;;  %v3949_v52 = vsub.f32 0.0, %v3933_v44  ;;  %v3732_v18 = vmul.f32 %v13526_v1, %v3712_v53  ;;  %v4443_v15 = vsub.f32 %v13733_v37, %v13434_v42 }
 0x5b7   : > { %v10593_v60 = vpop.eup %10592  ;;  %v3763_v54 = vsub.f32 0.0, %v3747_v9  ;;  %v4175_v43 = vpack.c.bf16 %v10591_v45, %v10587_v12  ;;  %v4871_v63 = vsub.f32 0.0, %v4855_v3  ;;  %v4162_v19 = vmul.f32 1.442695, %v4134_v16 }
 0x5b8   : > { %v13756_v51 = vpop.eup %10594  ;;  %v4103_v36 = vmul.f32 %v13564_v29, %v4083_v10  ;;  %v3989_v30 = vpack.c.bf16 %v10593_v60, %v10589_v39  ;;  %10600 = vpow2.f32 %v3604_v24  ;;  %v4669_v25 = vmul.f32 %v4653_v28, %v4653_v28 }
 0x5b9   : > { %v3792_v41 = vmul.f32 1.442695, %v3763_v54  ;;  %5675 = vmatprep.mubr.bf16.mxu0 %v4175_v43  ;;  %v3976_v8 = vmul.f32 1.442695, %v3948_v0  ;;  %v13767_v44 = vmul.f32 %v13731_v33, %v13731_v33  ;;  %v3527_v37 = vsub.f32 %v13669_v49, %v13512_v7  ;;  %v15607_v49 = vld [vmem:[#allocation18_spill] sm:$0xff] }
 0x5ba   : > { %v4119_v59 = vmul.f32 %v4103_v36, %v4103_v36  ;;  %v3501_v12 = vpop.permute.xlu1 %3500  ;;  %5676 = vmatmul.mubr.bf16.gmra.mrb[100].mxu0 %v3989_v30  ;;  %v4890_v9 = vmul.f32 1.442695, %v4870_v48  ;;  %v3978_v46 = vmul.f32 1.442695, %v3949_v52  ;;  %v3748_v45 = vmul.f32 %v3732_v18, %v3732_v18  ;;  %v13772_v16 = vpop.eup %10596  ;;  %v15608_v18 = vld [vmem:[#allocation13_spill] sm:$0xff] }
 0x5bb   : > { %10602 = vpow2.f32 %v3792_v41  ;;  %v3526_v39 = vsub.f32 %v3501_v12, %v13512_v7  ;;  %v4463_v3 = vmul.f32 %v13458_v23, %v4443_v15  ;;  %v4084_v24 = vsub.f32 %v13648_v61, %v13532_v17 }
 0x5bc   : > { %10604 = vpow2.f32 %v3606_v58  ;;  %v4135_v53 = vsub.f32 0.0, %v4119_v59  ;;  %v13777_v60 = vmul.f32 %v4284_v14, %v4284_v14  ;;  %v4892_v28 = vmul.f32 1.442695, %v4871_v63  ;;  %v13785_v14 = vpop.permute.xlu0 %4403  ;;  %v15609_v59 = vld [vmem:[#allocation19_spill] sm:$0xff] }
 0x5bd   : > { %10606 = vpow2.f32 %v4162_v19  ;;  %v3546_v33 = vmul.f32 %v13539_v55, %v3526_v39  ;;  %v4685_v0 = vsub.f32 0.0, %v4669_v25  ;;  %v4262_v48 = vsub.f32 %v15607_v49, %v13443_v4 }
 0x5be   : > { %v4164_v10 = vmul.f32 1.442695, %v4135_v53  ;;  %10608 = vpow2.f32 %v3976_v8  ;;  %v3547_v54 = vmul.f32 %v13539_v55, %v3527_v37  ;;  %v3764_v58 = vsub.f32 0.0, %v3748_v45 }
 0x5bf   : > { %v3874_v7 = vpop.permute.xlu1 %3873  ;;  %v3899_v61 = vsub.f32 %v13686_v35, %v13547_v11  ;;  %v4479_v36 = vmul.f32 %v4463_v3, %v4463_v3  ;;  %v10599_v30 = vpop.eup %10598  ;;  %v4104_v52 = vmul.f32 %v13564_v29, %v4084_v24  ;;  %v4263_v15 = vsub.f32 %v15608_v18, %v13443_v4 }
 0x5c0   : > { %10610 = vpow2.f32 %v4164_v10  ;;  %v3898_v43 = vsub.f32 %v3874_v7, %v13547_v11  ;;  %v3562_v41 = vmul.f32 %v3546_v33, %v3546_v33  ;;  %v4498_v55 = vsub.f32 0.0, %v13767_v44 }
 0x5c1   : > { %10612 = vpow2.f32 %v3978_v46  ;;  %v4445_v63 = vsub.f32 %v13752_v5, %v13434_v42  ;;  %v13794_v35 = vmul.f32 1.442695, %v4685_v0  ;;  %v4448_v12 = vsub.f32 %v15609_v59, %v13434_v42  ;;  %v13803_v0 = vpop.permute.xlu0 %4415 }
 0x5c2   : > { %10614 = vpow2.f32 %v4890_v9  ;;  %v3918_v19 = vmul.f32 %v13570_v57, %v3898_v43  ;;  %v10601_v11 = vpop.eup %10600  ;;  %v4282_v25 = vmul.f32 %v13467_v56, %v4262_v48  ;;  %v3563_v8 = vmul.f32 %v3547_v54, %v3547_v54 }
 0x5c3   : > { %10616 = vpow2.f32 %v4892_v28  ;;  %v3794_v53 = vmul.f32 1.442695, %v3764_v58  ;;  %v3919_v9 = vmul.f32 %v13570_v57, %v3899_v61  ;;  %v4495_v46 = vsub.f32 0.0, %v4479_v36 }
 0x5c4   : > { %v3692_v39 = vpop.permute.xlu1 %3691  ;;  %v4120_v3 = vmul.f32 %v4104_v52, %v4104_v52  ;;  %v4283_v24 = vmul.f32 %v13467_v56, %v4263_v15  ;;  %v3578_v10 = vsub.f32 0.0, %v3562_v41  ;;  %v4465_v28 = vmul.f32 %v13458_v23, %v4445_v63 }
 0x5c5   : > { %v10603_v37 = vpop.eup %10602  ;;  %v3713_v45 = vsub.f32 %v3692_v39, %v13503_v47  ;;  %v3934_v7 = vmul.f32 %v3918_v19, %v3918_v19  ;;  %v13807_v57 = vmul.f32 %v13458_v23, %v4448_v12  ;;  %v13809_v43 = vmul.f32 %v4282_v25, %v4282_v25 }
 0x5c6   : > { %v10605_v5 = vpop.eup %10604  ;;  %v3804_v33 = vpack.c.bf16 %v10603_v37, %v10599_v30  ;;  %v3579_v47 = vsub.f32 0.0, %v3563_v8  ;;  %v4447_v58 = vsub.f32 %v13762_v2, %v13434_v42  ;;  %10618 = vpow2.f32 %v3794_v53 }
 0x5c7   : > { %v3733_v49 = vmul.f32 %v13526_v1, %v3713_v45  ;;  %v3618_v48 = vpack.c.bf16 %v10605_v5, %v10601_v11  ;;  %v10607_v54 = vpop.eup %10606  ;;  %v3935_v36 = vmul.f32 %v3919_v9, %v3919_v9  ;;  %v4512_v30 = vmul.f32 1.442695, %v4495_v46  ;;  %v15610_v46 = vld [vmem:[#allocation21_spill] sm:$0xff] }
 0x5c8   : > { %5586 = vmatprep.mubr.bf16.mxu1 %v3804_v33  ;;  %v10609_v61 = vpop.eup %10608  ;;  %v4136_v15 = vsub.f32 0.0, %v4120_v3  ;;  %v4299_v41 = vmul.f32 %v4283_v24, %v4283_v24  ;;  %v3608_v63 = vmul.f32 1.442695, %v3578_v10  ;;  %v4481_v59 = vmul.f32 %v4465_v28, %v4465_v28  ;;  %v15611_v10 = vld [vmem:[#allocation32_spill] sm:$0xff] }
 0x5c9   : > { %v3749_v52 = vmul.f32 %v3733_v49, %v3733_v49  ;;  %v4064_v18 = vpop.permute.xlu1 %4063  ;;  %5587 = vmatmul.mubr.bf16.gmra.mrb[104].mxu1 %v3618_v48  ;;  %v3950_v12 = vsub.f32 0.0, %v3934_v7  ;;  %v3610_v2 = vmul.f32 1.442695, %v3579_v47  ;;  %v4467_v39 = vmul.f32 %v13458_v23, %v4447_v58 }
 0x5ca   : > { %v10611_v1 = vpop.eup %10610  ;;  %v4085_v19 = vsub.f32 %v4064_v18, %v13532_v17  ;;  %v4634_v45 = vsub.f32 %v15610_v46, %v13472_v40  ;;  %v3951_v5 = vsub.f32 0.0, %v3935_v36  ;;  %10620 = vpow2.f32 %v4512_v30  ;;  %v13822_v17 = vpop.permute.xlu0 %4427  ;;  %v15612_v36 = vld [vmem:[#allocation30_spill] sm:$0xff] }
 0x5cb   : > { %v10613_v11 = vpop.eup %10612  ;;  %v3765_v25 = vsub.f32 0.0, %v3749_v52  ;;  %v4176_v8 = vpack.c.bf16 %v10611_v1, %v10607_v54  ;;  %v4166_v24 = vmul.f32 1.442695, %v4136_v15  ;;  %v4821_v33 = vsub.f32 %v15611_v10, %v13453_v34 }
 0x5cc   : > { %v13814_v42 = vpop.eup %10614  ;;  %v4105_v37 = vmul.f32 %v13564_v29, %v4085_v19  ;;  %v3990_v53 = vpack.c.bf16 %v10613_v11, %v10609_v61  ;;  %10622 = vpow2.f32 %v3608_v63  ;;  %v4267_v29 = vsub.f32 %v13705_v50, %v13443_v4  ;;  %v13835_v61 = vld [vmem:[%s15405_s1 + $0x15] ss:$0 sm:$0xff] }
 0x5cd   : > { %v13818_v9 = vpop.eup %10616  ;;  %v3796_v3 = vmul.f32 1.442695, %v3765_v25  ;;  %5683 = vmatprep.mubr.bf16.mxu0 %v4176_v8  ;;  %v4497_v7 = vsub.f32 0.0, %v4481_v59  ;;  %v3980_v40 = vmul.f32 1.442695, %v3950_v12  ;;  %v4315_v49 = vsub.f32 0.0, %v4299_v41 }
 0x5ce   : > { %v4121_v23 = vmul.f32 %v4105_v37, %v4105_v37  ;;  %v13826_v28 = vpop.permute.xlu1 %4597  ;;  %5684 = vmatmul.mubr.bf16.gmra.mrb[104].mxu0 %v3990_v53  ;;  %v4483_v48 = vmul.f32 %v4467_v39, %v4467_v39  ;;  %v4314_v47 = vsub.f32 0.0, %v13809_v43  ;;  %v4654_v58 = vmul.f32 %v13492_v27, %v4634_v45  ;;  %v4772_v15 = vpop.permute.xlu0 %4771  ;;  %v15613_v45 = vld [vmem:[#allocation22_spill] sm:$0xff] }
 0x5cf   : > { %10624 = vpow2.f32 %v3796_v3  ;;  %v3982_v34 = vmul.f32 1.442695, %v3951_v5  ;;  %v4450_v4 = vsub.f32 %v15612_v36, %v13835_v61  ;;  %v4841_v50 = vmul.f32 %v13482_v20, %v4821_v33 }
 0x5d0   : > { %10626 = vpow2.f32 %v3610_v2  ;;  %v4137_v54 = vsub.f32 0.0, %v4121_v23  ;;  %v4449_v30 = vsub.f32 %v13785_v14, %v13835_v61  ;;  %v10619_v18 = vpop.eup %10618  ;;  %v4316_v43 = vsub.f32 0.0, %v13777_v60  ;;  %v13851_v60 = vld [vmem:[%s15406_s2 + $0x15] ss:$0 sm:$0xff] }
 0x5d1   : > { %10628 = vpow2.f32 %v4166_v24  ;;  %v4287_v27 = vmul.f32 %v13467_v56, %v4267_v29  ;;  %v4516_v1 = vmul.f32 1.442695, %v4497_v7  ;;  %v4484_v63 = vmul.f32 %v13807_v57, %v13807_v57  ;;  %v13859_v57 = vld [vmem:[%s15405_s1 + $0x17] ss:$0 sm:$0xff] }
 0x5d2   : > { %v4168_v52 = vmul.f32 1.442695, %v4137_v54  ;;  %10630 = vpow2.f32 %v3980_v40  ;;  %v4338_v19 = vmul.f32 1.442695, %v4315_v49  ;;  %v4499_v11 = vsub.f32 0.0, %v4483_v48 }
 0x5d3   : > { %v13844_v41 = vpop.permute.xlu1 %4419  ;;  %v4336_v20 = vmul.f32 1.442695, %v4314_v47  ;;  %v4670_v59 = vmul.f32 %v4654_v58, %v4654_v58  ;;  %v4470_v56 = vmul.f32 %v13851_v60, %v4450_v4  ;;  %v4857_v14 = vmul.f32 %v4841_v50, %v4841_v50  ;;  %v13873_v7 = vld [vmem:[%s15406_s2 + $0x17] ss:$0 sm:$0xff]  ;;  %v4784_v50 = vpop.permute.xlu0 %4783 }
 0x5d4   : > { %10632 = vpow2.f32 %v4168_v52  ;;  %v4469_v12 = vmul.f32 %v13851_v60, %v4449_v30  ;;  %v4820_v25 = vsub.f32 %v4772_v15, %v13859_v57  ;;  %v10621_v8 = vpop.eup %10620  ;;  %v4518_v2 = vmul.f32 1.442695, %v4498_v55 }
 0x5d5   : > { %10634 = vpow2.f32 %v3982_v34  ;;  %v4303_v39 = vmul.f32 %v4287_v27, %v4287_v27  ;;  %v4357_v37 = vpack.c.bf16 %v13677_v26, %v13689_v31  ;;  %v4500_v53 = vsub.f32 0.0, %v4484_v63 }
 0x5d6   : > { %10636 = vpow2.f32 %v13794_v35  ;;  %v10623_v35 = vpop.eup %10622  ;;  %v4520_v46 = vmul.f32 1.442695, %v4499_v11  ;;  %v4822_v5 = vsub.f32 %v15613_v45, %v13859_v57  ;;  %v4340_v10 = vmul.f32 1.442695, %v4316_v43  ;;  %v15615_v45 = vld [vmem:[#allocation12_spill] sm:$0xff] }
 0x5d7   : > { %10638 = vpow2.f32 %v4516_v1  ;;  %v4686_v33 = vsub.f32 0.0, %v4670_v59  ;;  %v4486_v44 = vmul.f32 %v4470_v56, %v4470_v56  ;;  %v4873_v23 = vsub.f32 0.0, %v4857_v14 }
 0x5d8   : > { %10640 = vpow2.f32 %v4338_v19  ;;  %v13868_v3 = vpop.permute.xlu1 %4229  ;;  %v4485_v29 = vmul.f32 %v4469_v12, %v4469_v12  ;;  %v4840_v40 = vmul.f32 %v13873_v7, %v4820_v25  ;;  %v4319_v48 = vsub.f32 0.0, %v4303_v39 }
 0x5d9   : > { %v10625_v24 = vpop.eup %10624  ;;  %10642 = vpow2.f32 %v4336_v20  ;;  %v4451_v54 = vsub.f32 %v13605_v38, %v13835_v61  ;;  %v4915_v58 = vpack.c.bf16 %v13715_v62, %v13701_v32  ;;  %v4522_v36 = vmul.f32 1.442695, %v4500_v53  ;;  %v15614_v38 = vld [vmem:[#allocation14_spill] sm:$0xff] }
 0x5da   : > { %v10627_v55 = vpop.eup %10626  ;;  %v3805_v49 = vpack.c.bf16 %v10625_v24, %v10619_v18  ;;  %10644 = vpow2.f32 %v4520_v46  ;;  %v4842_v4 = vmul.f32 %v13873_v7, %v4822_v5  ;;  %v4542_v30 = vpack.c.bf16 %v10621_v8, %v13599_v13 }
 0x5db   : > { %v3619_v47 = vpack.c.bf16 %v10627_v55, %v10623_v35  ;;  %v10629_v34 = vpop.eup %10628  ;;  %10646 = vpow2.f32 %v4518_v2  ;;  %v4708_v18 = vmul.f32 1.442695, %v4686_v33  ;;  %v4502_v43 = vsub.f32 0.0, %v4486_v44  ;;  %v15616_v44 = vld [vmem:[#allocation3_spill] sm:$0xff] }
 0x5dc   : > { %5594 = vmatprep.mubr.bf16.mxu1 %v3805_v49  ;;  %v10631_v52 = vpop.eup %10630  ;;  %10648 = vpow2.f32 %v4340_v10  ;;  %v4896_v63 = vmul.f32 1.442695, %v4873_v23  ;;  %v4501_v19 = vsub.f32 0.0, %v4485_v29  ;;  %v4856_v11 = vmul.f32 %v4840_v40, %v4840_v40  ;;  %v13910_v49 = vpop.permute.xlu0 %4795 }
 0x5dd   : > { %v13882_v27 = vpop.permute.xlu1 %4787  ;;  %5595 = vmatmul.mubr.bf16.gmra.mrb[108].mxu1 %v3619_v47  ;;  %v4346_v59 = vmul.f32 1.442695, %v4319_v48  ;;  %v4823_v13 = vsub.f32 %v4784_v50, %v13859_v57  ;;  %v4471_v56 = vmul.f32 %v13851_v60, %v4451_v54  ;;  %10650 = vpow2.f32 %v4522_v36  ;;  %v15617_v47 = vld [vmem:[#allocation5_spill] sm:$0xff] }
 0x5de   : > { %v10633_v15 = vpop.eup %10632  ;;  %5732 = vmatprep.mubr.bf16.mxu1 %v4542_v30  ;;  %v4858_v25 = vmul.f32 %v4842_v4, %v4842_v4  ;;  %v4452_v8 = vsub.f32 %v13803_v0, %v13835_v61  ;;  %10652 = vpow2.f32 %v4708_v18  ;;  %v4526_v35 = vmul.f32 1.442695, %v4502_v43  ;;  %v13903_v0 = vld [vmem:[%s15405_s1 + $0x14] ss:$0 sm:$0xff]  ;;  %v13920_v50 = vld [vmem:[%s15405_s1 + $0x16] ss:$0 sm:$0xff] }
 0x5df   : > { %v10635_v20 = vpop.eup %10634  ;;  %v4177_v14 = vpack.c.bf16 %v10633_v15, %v10629_v34  ;;  %10654 = vpow2.f32 %v4896_v63  ;;  %v4524_v10 = vmul.f32 1.442695, %v4501_v19  ;;  %v4872_v33 = vsub.f32 0.0, %v4856_v11  ;;  %v15618_v34 = vld [vmem:[#allocation31_spill] sm:$0xff]  ;;  %v15620_v30 = vld [vmem:[#allocation24_spill] sm:$0xff]  ;;  %v15621_v15 = vld [vmem:[#allocation17_spill] sm:$0xff] }
 0x5e0   : > { %v13888_v12 = vpop.eup %10636  ;;  %v3991_v2 = vpack.c.bf16 %v10635_v20, %v10631_v52  ;;  %v4265_v55 = vsub.f32 %v15616_v44, %v13903_v0  ;;  %10656 = vpow2.f32 %v4346_v59  ;;  %v4843_v29 = vmul.f32 %v13873_v7, %v4823_v13  ;;  %v15622_v11 = vld [vmem:[#allocation26_spill] sm:$0xff]  ;;  %v15623_v20 = vld [vmem:[#allocation23_spill] sm:$0xff] }
 0x5e1   : > { %v10639_v39 = vpop.eup %10638  ;;  %v13892_v53 = vpop.permute.xlu1 %4791  ;;  %5691 = vmatprep.mubr.bf16.mxu0 %v4177_v14  ;;  %v4487_v40 = vmul.f32 %v4471_v56, %v4471_v56  ;;  %v4453_v48 = vsub.f32 %v13844_v41, %v13835_v61  ;;  %v15619_v36 = vpack.c.bf16 %v15617_v47, %v15618_v34  ;;  %v4874_v4 = vsub.f32 0.0, %v4858_v25  ;;  %v15625_v13 = vld [vmem:[#allocation10_spill] sm:$0xff]  ;;  %v15626_v14 = vld [vmem:[#allocation8_spill] sm:$0xff]  ;;  %v15627_v56 = vld [vmem:[#allocation25_spill] sm:$0xff] }
 0x5e2   : > { %v13898_v24 = vpop.eup %10640  ;;  %5692 = vmatmul.mubr.bf16.gmra.mrb[108].mxu0 %v3991_v2  ;;  %v4636_v52 = vsub.f32 %v15620_v30, %v13920_v50  ;;  %v4472_v18 = vmul.f32 %v13851_v60, %v4452_v8  ;;  %v4543_v63 = vpack.c.bf16 %v10639_v39, %v15621_v15  ;;  %10658 = vpow2.f32 %v4526_v35  ;;  %v13936_v8 = vld [vmem:[%s15406_s2 + $0x14] ss:$0 sm:$0xff] }
 0x5e3   : > { %v13907_v23 = vpop.eup %10642  ;;  %v9096_v54 = vpop.f32.mrb[84].mxu1  ;;  %5829 = vmatprep.mubr.bf16.mxu0 %v15619_v36  ;;  %v15624_v59 = vpack.c.bf16 %v15622_v11, %v15623_v20  ;;  %10660 = vpow2.f32 %v4524_v10  ;;  %v4894_v2 = vmul.f32 1.442695, %v4872_v33  ;;  %v4285_v39 = vmul.f32 %v13936_v8, %v4265_v55  ;;  %v13949_v55 = vld [vmem:[%s15406_s2 + $0x16] ss:$0 sm:$0xff] }
 0x5e4   : > { %v9097_v43 = vpop.f32.mrb[85].mxu1  ;;  %v10645_v25 = vpop.eup %10644  ;;  %v4637_v35 = vsub.f32 %v13826_v28, %v13920_v50  ;;  %v4859_v34 = vmul.f32 %v4843_v29, %v4843_v29  ;;  %v4503_v36 = vsub.f32 0.0, %v4487_v40  ;;  %v4473_v10 = vmul.f32 %v13851_v60, %v4453_v48 }
 0x5e5   : > { %v9098_v41 = vadd.f32 %v9097_v43, %v9096_v54  ;;  %v9099_v19 = vpop.f32.mrb[86].mxu1  ;;  %5733 = vmatmul.mubr.bf16.vlgmr.msra.gmra.mrb[112].mxu1 %v15624_v59  ;;  %v10647_v47 = vpop.eup %10646  ;;  %v4898_v43 = vmul.f32 1.442695, %v4874_v4  ;;  %v4656_v28 = vmul.f32 %v13949_v55, %v4636_v52  ;;  %v4488_v15 = vmul.f32 %v4472_v18, %v4472_v18 }
 0x5e6   : > { %v13941_v44 = vpop.permute.xlu1 %4605  ;;  %v9100_v54 = vpop.f32.mrb[87].mxu1  ;;  %5740 = vmatprep.mubr.bf16.mxu1 %v4543_v63  ;;  %v4825_v63 = vsub.f32 %v13892_v53, %v13859_v57  ;;  %v4455_v29 = vsub.f32 %v13822_v17, %v13835_v61  ;;  %v4826_v40 = vsub.f32 %v13910_v49, %v13859_v57  ;;  %v4266_v4 = vsub.f32 %v13868_v3, %v13903_v0 }
 0x5e7   : > { %v9101_v33 = vadd.f32 %v9100_v54, %v9099_v19  ;;  %v13944_v30 = vpop.eup %10648  ;;  %v13958_v48 = vpop.permute.xlu0 %4601  ;;  %v4544_v20 = vpack.c.bf16 %v10645_v25, %v10647_v47  ;;  %v4301_v52 = vmul.f32 %v4285_v39, %v4285_v39  ;;  %v4657_v18 = vmul.f32 %v13949_v55, %v4637_v35 }
 0x5e8   : > { %v9160_v11 = vpop.f32.mrb[84].mxu0  ;;  %v13962_v59 = vpop.eup %10650  ;;  %v4824_v53 = vsub.f32 %v13882_v27, %v13859_v57  ;;  %v15628_v49 = vpack.c.bf16 %v15626_v14, %v15627_v56  ;;  %10662 = vpow2.f32 %v4894_v2  ;;  %v4875_v3 = vsub.f32 0.0, %v4859_v34 }
 0x5e9   : > { %v9161_v19 = vpop.f32.mrb[85].mxu0  ;;  %v13970_v5 = vpop.eup %10652  ;;  %v4528_v46 = vmul.f32 1.442695, %v4503_v36  ;;  %v4489_v25 = vmul.f32 %v4473_v10, %v4473_v10  ;;  %v4845_v27 = vmul.f32 %v13873_v7, %v4825_v63  ;;  %v4672_v2 = vmul.f32 %v4656_v28, %v4656_v28 }
 0x5ea   : > { %v9162_v54 = vadd.f32 %v9161_v19, %v9160_v11  ;;  %v9163_v17 = vpop.f32.mrb[86].mxu0  ;;  %5830 = vmatmul.mubr.bf16.vlgmr.msra.gmra.mrb[112].mxu0 %v15628_v49  ;;  %v13975_v39 = vpop.eup %10654  ;;  %v4504_v34 = vsub.f32 0.0, %v4488_v15  ;;  %v4475_v36 = vmul.f32 %v13851_v60, %v4455_v29  ;;  %v4286_v10 = vmul.f32 %v13936_v8, %v4266_v4 }
 0x5eb   : > { %v4424_v47 = vpop.permute.xlu1 %4423  ;;  %v9164_v1 = vpop.f32.mrb[87].mxu0  ;;  %5837 = vmatprep.mubr.bf16.mxu0 %v4915_v58  ;;  %v4317_v62 = vsub.f32 0.0, %v4301_v52  ;;  %v4673_v32 = vmul.f32 %v4657_v18, %v4657_v18  ;;  %v4844_v58 = vmul.f32 %v13873_v7, %v4824_v53  ;;  %10664 = vpow2.f32 %v4528_v46 }
 0x5ec   : > { %v13978_v35 = vadd.f32 %v9162_v54, %v9098_v41  ;;  %v4454_v56 = vsub.f32 %v4424_v47, %v13835_v61  ;;  %v9165_v14 = vadd.f32 %v9164_v1, %v9163_v17  ;;  %v13981_v11 = vpop.eup %10656  ;;  %v13993_v28 = vpop.permute.xlu0 %4613  ;;  %v4505_v15 = vsub.f32 0.0, %v4489_v25 }
 0x5ed   : > { %5741 = vmatmul.mubr.bf16.gmra.mrb[116].mxu1 %v4357_v37  ;;  %v13991_v1 = vpop.eup %10658  ;;  %v4639_v63 = vsub.f32 %v13941_v44, %v13920_v50  ;;  %10666 = vpow2.f32 %v4898_v43  ;;  %v4900_v31 = vmul.f32 1.442695, %v4875_v3  ;;  %v4846_v37 = vmul.f32 %v13873_v7, %v4826_v40 }
 0x5ee   : > { %v13989_v41 = vadd.f32 %v9165_v14, %v9101_v33  ;;  %5748 = vmatprep.mubr.bf16.mxu1 %v4544_v20  ;;  %v4474_v29 = vmul.f32 %v13851_v60, %v4454_v56  ;;  %v10661_v26 = vpop.eup %10660  ;;  %v4861_v4 = vmul.f32 %v4845_v27, %v4845_v27  ;;  %v4688_v19 = vsub.f32 0.0, %v4672_v2 }
 0x5ef   : > { %v4530_v20 = vmul.f32 1.442695, %v4504_v34  ;;  %v4638_v46 = vsub.f32 %v13958_v48, %v13920_v50  ;;  %v4302_v52 = vmul.f32 %v4286_v10, %v4286_v10  ;;  %v4491_v18 = vmul.f32 %v4475_v36, %v4475_v36 }
 0x5f0   : > { %v4238_v33 = vpop.permute.xlu1 %4237  ;;  %v4342_v53 = vmul.f32 1.442695, %v4317_v62  ;;  %v4689_v54 = vsub.f32 0.0, %v4673_v32  ;;  %v4860_v17 = vmul.f32 %v4844_v58, %v4844_v58  ;;  %v15629_v44 = vpack.c.bf16 %v15614_v38, %v13661_v22  ;;  %v14011_v38 = vpop.permute.xlu0 %4245 }
 0x5f1   : > { %v4532_v43 = vmul.f32 1.442695, %v4505_v15  ;;  %v4659_v49 = vmul.f32 %v13949_v55, %v4639_v63  ;;  %v4490_v40 = vmul.f32 %v4474_v29, %v4474_v29  ;;  %v15630_v3 = vpack.c.bf16 %v13818_v9, %v13814_v42 }
 0x5f2   : > { %5838 = vmatmul.mubr.bf16.gmra.mrb[116].mxu0 %v15629_v44  ;;  %v4545_v25 = vpack.c.bf16 %v10661_v26, %v13962_v59  ;;  %10668 = vpow2.f32 %v4900_v31  ;;  %v4862_v48 = vmul.f32 %v4846_v37, %v4846_v37  ;;  %v4877_v47 = vsub.f32 0.0, %v4861_v4  ;;  %v10663_v14 = vpop.eup %10662 }
 0x5f3   : > { %5845 = vmatprep.mubr.bf16.mxu0 %v15630_v3  ;;  %v4268_v27 = vsub.f32 %v4238_v33, %v13903_v0  ;;  %v4712_v2 = vmul.f32 1.442695, %v4688_v19  ;;  %v4658_v22 = vmul.f32 %v13949_v55, %v4638_v46  ;;  %v4318_v34 = vsub.f32 0.0, %v4302_v52 }
 0x5f4   : > { %v4242_v56 = vpop.permute.xlu1 %4241  ;;  %v15631_v42 = vpack.c.bf16 %v15615_v45, %v13772_v16  ;;  %v4507_v9 = vsub.f32 0.0, %v4491_v18  ;;  %10670 = vpow2.f32 %v4342_v53  ;;  %v4714_v59 = vmul.f32 1.442695, %v4689_v54  ;;  %v4808_v53 = vpop.permute.xlu0 %4807 }
 0x5f5   : > { %v4269_v36 = vsub.f32 %v4242_v56, %v13903_v0  ;;  %v4876_v10 = vsub.f32 0.0, %v4860_v17  ;;  %10672 = vpow2.f32 %v4532_v43  ;;  %v4675_v62 = vmul.f32 %v4659_v49, %v4659_v49  ;;  %v10665_v26 = vpop.eup %10664 }
 0x5f6   : > { %5749 = vmatmul.mubr.bf16.gmra.mrb[120].mxu1 %v15631_v42  ;;  %v4506_v32 = vsub.f32 0.0, %v4490_v40  ;;  %10674 = vpow2.f32 %v4530_v20  ;;  %v4878_v15 = vsub.f32 0.0, %v4862_v48  ;;  %v4904_v63 = vmul.f32 1.442695, %v4877_v47 }
 0x5f7   : > { %5756 = vmatprep.mubr.bf16.mxu1 %v4545_v25  ;;  %v4289_v58 = vmul.f32 %v13936_v8, %v4269_v36  ;;  %v4288_v29 = vmul.f32 %v13936_v8, %v4268_v27  ;;  %v4674_v31 = vmul.f32 %v4658_v22, %v4658_v22  ;;  %v4641_v16 = vsub.f32 %v13993_v28, %v13920_v50  ;;  %v10667_v33 = vpop.eup %10666 }
 0x5f8   : > { %v4344_v45 = vmul.f32 1.442695, %v4318_v34  ;;  %v4917_v4 = vpack.c.bf16 %v13975_v39, %v10663_v14  ;;  %10676 = vpow2.f32 %v4712_v2  ;;  %v4902_v19 = vmul.f32 1.442695, %v4876_v10 }
 0x5f9   : > { %v4800_v37 = vpop.permute.xlu1 %4799  ;;  %v4305_v46 = vmul.f32 %v4289_v58, %v4289_v58  ;;  %v15632_v20 = vpack.c.bf16 %v13888_v12, %v15625_v13  ;;  %v4536_v18 = vmul.f32 1.442695, %v4507_v9  ;;  %10678 = vpow2.f32 %v4714_v59 }
 0x5fa   : > { %v4827_v52 = vsub.f32 %v4800_v37, %v13859_v57  ;;  %v4691_v54 = vsub.f32 0.0, %v4675_v62  ;;  %v4534_v17 = vmul.f32 1.442695, %v4506_v32  ;;  %10680 = vpow2.f32 %v4904_v63 }
 0x5fb   : > { %5846 = vmatmul.mubr.bf16.gmra.mrb[120].mxu0 %v15632_v20  ;;  %v4304_v28 = vmul.f32 %v4288_v29, %v4288_v29  ;;  %v4546_v44 = vpack.c.bf16 %v10665_v26, %v13991_v1  ;;  %v4906_v43 = vmul.f32 1.442695, %v4878_v15  ;;  %v4690_v49 = vsub.f32 0.0, %v4674_v31 }
 0x5fc   : > { %5853 = vmatprep.mubr.bf16.mxu0 %v4917_v4  ;;  %v4847_v39 = vmul.f32 %v13873_v7, %v4827_v52  ;;  %v4661_v40 = vmul.f32 %v13949_v55, %v4641_v16  ;;  %10682 = vpow2.f32 %v4344_v45  ;;  %v15633_v12 = vpack.c.bf16 %v13898_v24, %v13907_v23  ;;  %v10669_v13 = vpop.eup %10668 }
 0x5fd   : > { %v4829_v3 = vsub.f32 %v4808_v53, %v13859_v57  ;;  %10684 = vpow2.f32 %v4902_v19  ;;  %v4321_v25 = vsub.f32 0.0, %v4305_v46  ;;  %v4718_v27 = vmul.f32 1.442695, %v4691_v54 }
 0x5fe   : > { %5757 = vmatmul.mubr.bf16.gmra.mrb[124].mxu1 %v15633_v12  ;;  %v4863_v48 = vmul.f32 %v4847_v39, %v4847_v39  ;;  %v4610_v47 = vpop.permute.xlu1 %4609  ;;  %10686 = vpow2.f32 %v4534_v17  ;;  %v10671_v56 = vpop.eup %10670  ;;  %v4320_v14 = vsub.f32 0.0, %v4304_v28  ;;  %v4731_v24 = vpack.c.bf16 %v13756_v51, %v13970_v5 }
 0x5ff   : > { %5764 = vmatprep.mubr.bf16.mxu1 %v4546_v44  ;;  %v4640_v1 = vsub.f32 %v4610_v47, %v13920_v50  ;;  %10688 = vpow2.f32 %v4536_v18  ;;  %v10673_v23 = vpop.eup %10672  ;;  %v4716_v22 = vmul.f32 1.442695, %v4690_v49  ;;  %v4677_v34 = vmul.f32 %v4661_v40, %v4661_v40 }
 0x600   : > { %v4879_v2 = vsub.f32 0.0, %v4863_v48  ;;  %v4918_v42 = vpack.c.bf16 %v10669_v13, %v10667_v33  ;;  %v10675_v9 = vpop.eup %10674  ;;  %10690 = vpow2.f32 %v4906_v43  ;;  %v4849_v59 = vmul.f32 %v13873_v7, %v4829_v3 }
 0x601   : > { %v4660_v36 = vmul.f32 %v13949_v55, %v4640_v1  ;;  %v4350_v10 = vmul.f32 1.442695, %v4321_v25  ;;  %10692 = vpow2.f32 %v4718_v27  ;;  %v4360_v15 = vpack.c.bf16 %v10671_v56, %v13944_v30 }
 0x602   : > { %v4908_v62 = vmul.f32 1.442695, %v4879_v2  ;;  %v10677_v51 = vpop.eup %10676  ;;  %v4348_v5 = vmul.f32 1.442695, %v4320_v14  ;;  %v4547_v29 = vpack.c.bf16 %v10673_v23, %v10675_v9  ;;  %v4693_v31 = vsub.f32 0.0, %v4677_v34 }
 0x603   : > { %5854 = vmatmul.mubr.bf16.gmra.mrb[124].mxu0 %v4731_v24  ;;  %v4676_v32 = vmul.f32 %v4660_v36, %v4660_v36  ;;  %v4432_v58 = vpop.permute.xlu1 %4431  ;;  %v10679_v26 = vpop.eup %10678  ;;  %v4865_v37 = vmul.f32 %v4849_v59, %v4849_v59  ;;  %v4270_v46 = vsub.f32 %v14011_v38, %v13903_v0 }
 0x604   : > { %5861 = vmatprep.mubr.bf16.mxu0 %v4918_v42  ;;  %10694 = vpow2.f32 %v4908_v62  ;;  %v4456_v63 = vsub.f32 %v4432_v58, %v13835_v61  ;;  %v10681_v45 = vpop.eup %10680  ;;  %v4732_v20 = vpack.c.bf16 %v10679_v26, %v10677_v51  ;;  %v4722_v53 = vmul.f32 1.442695, %v4693_v31 }
 0x605   : > { %10696 = vpow2.f32 %v4716_v22  ;;  %v4692_v16 = vsub.f32 0.0, %v4676_v32  ;;  %v4881_v39 = vsub.f32 0.0, %v4865_v37  ;;  %v4290_v38 = vmul.f32 %v13936_v8, %v4270_v46 }
 0x606   : > { %5765 = vmatmul.mubr.bf16.gmra.mrb[128].mxu1 %v4360_v15  ;;  %10698 = vpow2.f32 %v4350_v10  ;;  %v10683_v4 = vpop.eup %10682  ;;  %v4476_v19 = vmul.f32 %v13851_v60, %v4456_v63 }
 0x607   : > { %5772 = vmatprep.mubr.bf16.mxu1 %v4547_v29  ;;  %v4720_v33 = vmul.f32 1.442695, %v4692_v16  ;;  %v10685_v30 = vpop.eup %10684  ;;  %10700 = vpow2.f32 %v4348_v5  ;;  %v4361_v49 = vpack.c.bf16 %v13981_v11, %v10683_v4  ;;  %v4912_v48 = vmul.f32 1.442695, %v4881_v39 }
 0x608   : > { %v4804_v52 = vpop.permute.xlu1 %4803  ;;  %v10687_v18 = vpop.eup %10686  ;;  %v4919_v17 = vpack.c.bf16 %v10681_v45, %v10685_v30  ;;  %v4492_v44 = vmul.f32 %v4476_v19, %v4476_v19  ;;  %v4306_v14 = vmul.f32 %v4290_v38, %v4290_v38 }
 0x609   : > { %v4828_v54 = vsub.f32 %v4804_v52, %v13859_v57  ;;  %v10689_v28 = vpop.eup %10688  ;;  %10702 = vpow2.f32 %v4720_v33 }
 0x60a   : > { %v10691_v40 = vpop.eup %10690  ;;  %v4548_v12 = vpack.c.bf16 %v10689_v28, %v10687_v18  ;;  %10704 = vpow2.f32 %v4722_v53  ;;  %v4508_v1 = vsub.f32 0.0, %v4492_v44 }
 0x60b   : > { %5862 = vmatmul.mubr.bf16.gmra.mrb[128].mxu0 %v4732_v20  ;;  %v4848_v43 = vmul.f32 %v13873_v7, %v4828_v54  ;;  %v10693_v13 = vpop.eup %10692  ;;  %10706 = vpow2.f32 %v4912_v48 }
 0x60c   : > { %5869 = vmatprep.mubr.bf16.mxu0 %v4919_v17 }
 0x60d   : > { %v4864_v3 = vmul.f32 %v4848_v43, %v4848_v43  ;;  %v4436_v25 = vpop.permute.xlu1 %4435 }
 0x60e   : > { %5773 = vmatmul.mubr.bf16.gmra.mrb[132].mxu1 %v4361_v49  ;;  %v10695_v57 = vpop.eup %10694  ;;  %v4457_v47 = vsub.f32 %v4436_v25, %v13835_v61  ;;  %v4538_v61 = vmul.f32 1.442695, %v4508_v1 }
 0x60f   : > { %5780 = vmatprep.mubr.bf16.mxu1 %v4548_v12  ;;  %v10697_v27 = vpop.eup %10696  ;;  %v4880_v7 = vsub.f32 0.0, %v4864_v3  ;;  %v4920_v34 = vpack.c.bf16 %v10695_v57, %v10691_v40 }
 0x610   : > { %v10699_v56 = vpop.eup %10698  ;;  %v4477_v11 = vmul.f32 %v13851_v60, %v4457_v47  ;;  %v9102_v2 = vpop.f32.mrb[88].mxu1  ;;  %v4733_v24 = vpack.c.bf16 %v10693_v13, %v10697_v27  ;;  %v4322_v60 = vsub.f32 0.0, %v4306_v14 }
 0x611   : > { %v4910_v23 = vmul.f32 1.442695, %v4880_v7  ;;  %v9103_v22 = vpop.f32.mrb[89].mxu1  ;;  %v10701_v36 = vpop.eup %10700 }
 0x612   : > { %v4493_v42 = vmul.f32 %v4477_v11, %v4477_v11  ;;  %v9104_v9 = vadd.f32 %v9103_v22, %v9102_v2  ;;  %v4250_v59 = vpop.permute.xlu1 %4249  ;;  %v9105_v10 = vpop.f32.mrb[90].mxu1  ;;  %v4362_v58 = vpack.c.bf16 %v10699_v56, %v10701_v36 }
 0x613   : > { %5870 = vmatmul.mubr.bf16.gmra.mrb[132].mxu0 %v4733_v24  ;;  %10708 = vpow2.f32 %v4910_v23  ;;  %v4271_v62 = vsub.f32 %v4250_v59, %v13903_v0  ;;  %v9106_v32 = vpop.f32.mrb[91].mxu1  ;;  %v10703_v5 = vpop.eup %10702  ;;  %v4352_v0 = vmul.f32 1.442695, %v4322_v60 }
 0x614   : > { %5877 = vmatprep.mubr.bf16.mxu0 %v4920_v34  ;;  %v4509_v15 = vsub.f32 0.0, %v4493_v42  ;;  %v9107_v51 = vadd.f32 %v9106_v32, %v9105_v10  ;;  %v10705_v16 = vpop.eup %10704  ;;  %10710 = vpow2.f32 %v4538_v61 }
 0x615   : > { %v4291_v63 = vmul.f32 %v13936_v8, %v4271_v62  ;;  %v9166_v29 = vpop.f32.mrb[88].mxu0  ;;  %v4734_v46 = vpack.c.bf16 %v10705_v16, %v10703_v5  ;;  %v10707_v28 = vpop.eup %10706 }
 0x616   : > { %5781 = vmatmul.mubr.bf16.gmra.mrb[136].mxu1 %v4362_v58  ;;  %v4540_v26 = vmul.f32 1.442695, %v4509_v15  ;;  %v9167_v31 = vpop.f32.mrb[89].mxu0 }
 0x617   : > { %v4307_v45 = vmul.f32 %v4291_v63, %v4291_v63  ;;  %v9168_v37 = vadd.f32 %v9167_v31, %v9166_v29  ;;  %v4618_v4 = vpop.permute.xlu1 %4617  ;;  %v9169_v33 = vpop.f32.mrb[90].mxu0 }
 0x618   : > { %10712 = vpow2.f32 %v4540_v26  ;;  %v4642_v19 = vsub.f32 %v4618_v4, %v13920_v50  ;;  %v9170_v30 = vpop.f32.mrb[91].mxu0 }
 0x619   : > { %v4323_v52 = vsub.f32 0.0, %v4307_v45  ;;  %v14052_v20 = vadd.f32 %v9168_v37, %v9104_v9  ;;  %v9171_v8 = vadd.f32 %v9170_v30, %v9169_v33  ;;  %10714 = vpow2.f32 %v4352_v0 }
 0x61a   : > { %v4662_v18 = vmul.f32 %v13949_v55, %v4642_v19 }
 0x61b   : > { %5878 = vmatmul.mubr.bf16.gmra.mrb[136].mxu0 %v4734_v46  ;;  %v4354_v53 = vmul.f32 1.442695, %v4323_v52  ;;  %v14055_v54 = vadd.f32 %v9171_v8, %v9107_v51  ;;  %v4622_v17 = vpop.permute.xlu1 %4621 }
 0x61c   : > { %v4678_v39 = vmul.f32 %v4662_v18, %v4662_v18  ;;  %v4643_v44 = vsub.f32 %v4622_v17, %v13920_v50 }
 0x61d   : > { %v10709_v43 = vpop.eup %10708  ;;  %10716 = vpow2.f32 %v4354_v53 }
 0x61e   : > { %v4694_v49 = vsub.f32 0.0, %v4678_v39  ;;  %v4663_v40 = vmul.f32 %v13949_v55, %v4643_v44  ;;  %v4921_v38 = vpack.c.bf16 %v10707_v28, %v10709_v43  ;;  %v10711_v13 = vpop.eup %10710 }
 0x620   : > { %v4679_v12 = vmul.f32 %v4663_v40, %v4663_v40  ;;  %5885 = vmatprep.mubr.bf16.mxu0 %v4921_v38  ;;  %v4724_v3 = vmul.f32 1.442695, %v4694_v49 }
 0x622   : > { %v10713_v25 = vpop.eup %10712  ;;  %v4695_v57 = vsub.f32 0.0, %v4679_v12  ;;  %10718 = vpow2.f32 %v4724_v3 }
 0x623   : > { %v4549_v48 = vpack.c.bf16 %v10713_v25, %v10711_v13  ;;  %v10715_v27 = vpop.eup %10714 }
 0x624   : > { %v4726_v47 = vmul.f32 1.442695, %v4695_v57 }
 0x625   : > { %5788 = vmatprep.mubr.bf16.mxu1 %v4549_v48 }
 0x626   : > { %10720 = vpow2.f32 %v4726_v47 }
 0x627   : > { %v10717_v1 = vpop.eup %10716 }
 0x628   : > { %v4363_v50 = vpack.c.bf16 %v10717_v1, %v10715_v27 }
 0x62a   : > { %5789 = vmatmul.mubr.bf16.gmra.mrb[140].mxu1 %v4363_v50 }
 0x62c   : > { %v10719_v7 = vpop.eup %10718 }
 0x630   : > { %v10721_v56 = vpop.eup %10720 }
 0x631   : > { %v4735_v14 = vpack.c.bf16 %v10721_v56, %v10719_v7 }
 0x633   : > { %5886 = vmatmul.mubr.bf16.gmra.mrb[140].mxu0 %v4735_v14 }
 0x63d   : > { %v9108_v55 = vpop.f32.mrb[92].mxu1 }
 0x63e   : > { %v9109_v11 = vpop.f32.mrb[93].mxu1 }
 0x63f   : > { %v9110_v2 = vadd.f32 %v9109_v11, %v9108_v55  ;;  %v9111_v24 = vpop.f32.mrb[94].mxu1 }
 0x640   : > { %v9112_v23 = vpop.f32.mrb[95].mxu1 }
 0x641   : > { %v9113_v22 = vadd.f32 %v9112_v23, %v9111_v24 }
 0x642   : > { %v9172_v34 = vpop.f32.mrb[92].mxu0 }
 0x643   : > { %v9173_v36 = vpop.f32.mrb[93].mxu0 }
 0x644   : > { %v9174_v42 = vadd.f32 %v9173_v36, %v9172_v34  ;;  %v9175_v9 = vpop.f32.mrb[94].mxu0 }
 0x645   : > { %v9176_v59 = vpop.f32.mrb[95].mxu0 }
 0x646   : > { %v14059_v10 = vadd.f32 %v9174_v42, %v9110_v2  ;;  %v9177_v61 = vadd.f32 %v9176_v59, %v9175_v9 }
 0x648   : > { %v14061_v62 = vadd.f32 %v9177_v61, %v9113_v22 }
 0x66a   : > { %v9114_v32 = vpop.f32.mrb[96].mxu1 }
 0x66b   : > { %v9115_v58 = vpop.f32.mrb[97].mxu1 }
 0x66c   : > { %v9116_v60 = vadd.f32 %v9115_v58, %v9114_v32  ;;  %v9117_v15 = vpop.f32.mrb[98].mxu1 }
 0x66d   : > { %v9118_v51 = vpop.f32.mrb[99].mxu1 }
 0x66e   : > { %v9119_v5 = vadd.f32 %v9118_v51, %v9117_v15 }
 0x66f   : > { %v9178_v63 = vpop.f32.mrb[96].mxu0 }
 0x670   : > { %v9179_v29 = vpop.f32.mrb[97].mxu0 }
 0x671   : > { %v9180_v26 = vadd.f32 %v9179_v29, %v9178_v63  ;;  %v9181_v31 = vpop.f32.mrb[98].mxu0 }
 0x672   : > { %v9182_v16 = vpop.f32.mrb[99].mxu0 }
 0x673   : > { %v14063_v45 = vadd.f32 %v9180_v26, %v9116_v60  ;;  %v9183_v37 = vadd.f32 %v9182_v16, %v9181_v31 }
 0x675   : > { %v14065_v4 = vadd.f32 %v9183_v37, %v9119_v5 }
 0x688   : > { %v9120_v33 = vpop.f32.mrb[100].mxu1 }
 0x689   : > { %v9121_v0 = vpop.f32.mrb[101].mxu1 }
 0x68a   : > { %v9122_v19 = vadd.f32 %v9121_v0, %v9120_v33  ;;  %v9123_v30 = vpop.f32.mrb[102].mxu1  ;;  %v14084_v33 = vld [vmem:[%s15408_s4 + $0x4] ss:$0 sm:$0xff] }
 0x68b   : > { %v9124_v46 = vpop.f32.mrb[103].mxu1 }
 0x68c   : > { %v9125_v52 = vadd.f32 %v9124_v46, %v9123_v30 }
 0x68d   : > { %v9184_v8 = vpop.f32.mrb[100].mxu0 }
 0x68e   : > { %v9185_v18 = vpop.f32.mrb[101].mxu0 }
 0x68f   : > { %v9186_v53 = vadd.f32 %v9185_v18, %v9184_v8  ;;  %v9187_v17 = vpop.f32.mrb[102].mxu0 }
 0x690   : > { %v9188_v28 = vpop.f32.mrb[103].mxu0 }
 0x691   : > { %v14067_v39 = vadd.f32 %v9186_v53, %v9122_v19  ;;  %v9189_v44 = vadd.f32 %v9188_v28, %v9187_v17 }
 0x693   : > { %v14069_v43 = vadd.f32 %v9189_v44, %v9125_v52 }
 0x69c   : > { %v9126_v49 = vpop.f32.mrb[104].mxu1 }
 0x69d   : > { %v9127_v40 = vpop.f32.mrb[105].mxu1 }
 0x69e   : > { %v9128_v38 = vadd.f32 %v9127_v40, %v9126_v49  ;;  %v9129_v12 = vpop.f32.mrb[106].mxu1 }
 0x69f   : > { %v9130_v13 = vpop.f32.mrb[107].mxu1 }
 0x6a0   : > { %v9131_v3 = vadd.f32 %v9130_v13, %v9129_v12 }
 0x6a1   : > { %v9190_v25 = vpop.f32.mrb[104].mxu0 }
 0x6a2   : > { %v9191_v57 = vpop.f32.mrb[105].mxu0 }
 0x6a3   : > { %v9192_v48 = vadd.f32 %v9191_v57, %v9190_v25  ;;  %v9193_v47 = vpop.f32.mrb[106].mxu0 }
 0x6a4   : > { %v9194_v27 = vpop.f32.mrb[107].mxu0 }
 0x6a5   : > { %v14071_v1 = vadd.f32 %v9192_v48, %v9128_v38  ;;  %v9195_v50 = vadd.f32 %v9194_v27, %v9193_v47 }
 0x6a7   : > { %v14073_v7 = vadd.f32 %v9195_v50, %v9131_v3 }
 0x6b0   : > { %v9132_v56 = vpop.f32.mrb[108].mxu1 }
 0x6b1   : > { %v9133_v14 = vpop.f32.mrb[109].mxu1 }
 0x6b2   : > { %v9134_v55 = vadd.f32 %v9133_v14, %v9132_v56  ;;  %v9135_v11 = vpop.f32.mrb[110].mxu1 }
 0x6b3   : > { %v9136_v2 = vpop.f32.mrb[111].mxu1 }
 0x6b4   : > { %v9137_v24 = vadd.f32 %v9136_v2, %v9135_v11 }
 0x6b5   : > { %v9196_v23 = vpop.f32.mrb[108].mxu0 }
 0x6b6   : > { %v9197_v22 = vpop.f32.mrb[109].mxu0 }
 0x6b7   : > { %v9198_v34 = vadd.f32 %v9197_v22, %v9196_v23  ;;  %v9199_v36 = vpop.f32.mrb[110].mxu0 }
 0x6b8   : > { %v9200_v42 = vpop.f32.mrb[111].mxu0  ;;  %v9218_v9 = vpop.f32.mrb[112].mxu1 }
 0x6b9   : > { %v14075_v59 = vadd.f32 %v9198_v34, %v9134_v55  ;;  %v9201_v61 = vadd.f32 %v9200_v42, %v9199_v36  ;;  %v9219_v32 = vpop.f32.mrb[113].mxu1  ;;  %v15634_v55 = vmov 3  }
 0x6ba   : > { %v9220_v58 = vadd.f32 %v9219_v32, %v9218_v9  ;;  %v9221_v60 = vpop.f32.mrb[114].mxu1  ;;  %v15636_v32 = vmov 2  }
 0x6bb   : > { %v14077_v15 = vadd.f32 %v9201_v61, %v9137_v24  ;;  %v9222_v51 = vpop.f32.mrb[115].mxu1 }
 0x6bc   : > { %v5735_v5 = vadd.f32 %v9220_v58, %v13740_v21  ;;  %v9223_v63 = vadd.f32 %v9222_v51, %v9221_v60  ;;  %v14089_v21 = vld [vmem:[%s15408_s4 + $0x5] ss:$0 sm:$0xff]  ;;  %v15637_v58 = vmov 1  }
 0x6bd   : > { %v9282_v29 = vpop.f32.mrb[112].mxu0 }
 0x6be   : > { %v5738_v26 = vadd.f32 %v9223_v63, %v13745_v6  ;;  %v9283_v31 = vpop.f32.mrb[113].mxu0 }
 0x6bf   : > { %v9284_v16 = vadd.f32 %v9283_v31, %v9282_v29  ;;  %v9285_v37 = vpop.f32.mrb[114].mxu0 }
 0x6c0   : > { %v9224_v0 = vpop.f32.mrb[116].mxu1  ;;  %v9286_v19 = vpop.f32.mrb[115].mxu0 }
 0x6c1   : > { %v5832_v30 = vadd.f32 %v9284_v16, %v5735_v5  ;;  %v9287_v46 = vadd.f32 %v9286_v19, %v9285_v37  ;;  %v9225_v52 = vpop.f32.mrb[117].mxu1  ;;  %v15638_v37 = vmov 5  }
 0x6c2   : > { %v9226_v8 = vadd.f32 %v9225_v52, %v9224_v0  ;;  %v9227_v6 = vpop.f32.mrb[118].mxu1 }
 0x6c3   : > { %v5899_v18 = vmul.f32 %v14084_v33, %v5832_v30  ;;  %v5835_v53 = vadd.f32 %v9287_v46, %v5738_v26  ;;  %v9228_v17 = vpop.f32.mrb[119].mxu1 }
 0x6c4   : > { %v5743_v28 = vadd.f32 %v9226_v8, %v13978_v35  ;;  %v9229_v44 = vadd.f32 %v9228_v17, %v9227_v6 }
 0x6c5   : > { %v14094_v49 = vadd.f32 %v14089_v21, %v5899_v18  ;;  %v9288_v40 = vpop.f32.mrb[116].mxu0  ;;  %v5900_v56 = vmul.f32 %v14084_v33, %v5835_v53 }
 0x6c6   : > { %v5746_v38 = vadd.f32 %v9229_v44, %v13989_v41  ;;  %v9289_v12 = vpop.f32.mrb[117].mxu0  ;;  %v15635_v41 = vmov 4   ;;  %v15639_v44 = vmov 7  }
 0x6c7   : > { %v9290_v13 = vadd.f32 %v9289_v12, %v9288_v40  ;;  %v9291_v3 = vpop.f32.mrb[118].mxu0  ;;  %6141 = vperm.xlu1 %9819, %v14094_v49   ;;  %5940 = vperm.xlu0 %9818, %v14094_v49   ;;  %v14109_v36 = vadd.f32 %v14089_v21, %v5900_v56  ;;  %v10082_v12 = vld [vmem:[%s15407_s3 + $0x640] sm:$0xff]   ;;  %v10084_v56 = vld [vmem:[%s15407_s3 + $0x648] sm:$0xff]  }
 0x6c8   : > { %v9292_v57 = vpop.f32.mrb[119].mxu0  ;;  %9330 = vmatprep.subr.bf16.mxu1 %v10082_v12 }
 0x6c9   : > { %v9230_v25 = vpop.f32.mrb[120].mxu1  ;;  %v5840_v48 = vadd.f32 %v9290_v13, %v5743_v28  ;;  %v9293_v47 = vadd.f32 %v9292_v57, %v9291_v3 }
 0x6ca   : > { %v9231_v27 = vpop.f32.mrb[121].mxu1 }
 0x6cb   : > { %v9232_v35 = vadd.f32 %v9231_v27, %v9230_v25  ;;  %v9233_v50 = vpop.f32.mrb[122].mxu1  ;;  %v14100_v14 = vadd.f32 %v9293_v47, %v5746_v38  ;;  %9820 = vset.pattern.permute.xlu1 %v15634_v55  ;;  %9823 = vset.pattern.permute.xlu0 %v15635_v41  ;;  %v5901_v17 = vmul.f32 %v14084_v33, %v5840_v48  ;;  %v10083_v25 = vld [vmem:[%s15407_s3 + $0x600] sm:$0xff]  }
 0x6cc   : > { %v9234_v11 = vpop.f32.mrb[123].mxu1  ;;  %6513 = vperm.xlu1 %9820, %v14094_v49   ;;  %6699 = vperm.xlu0 %9823, %v14094_v49  }
 0x6cd   : > { %v5751_v2 = vadd.f32 %v9232_v35, %v14052_v20  ;;  %v9235_v24 = vadd.f32 %v9234_v11, %v9233_v50  ;;  %v14142_v48 = vadd.f32 %v14089_v21, %v5901_v17  ;;  %9331 = vmatpush3.bf16.msra.mxu1 %v10083_v25  ;;  %v15640_v50 = vmov 6   ;;  %v10096_v25 = vld [vmem:[%s15407_s3 + $0x660] sm:$0xff]  }
 0x6ce   : > { %v9294_v23 = vpop.f32.mrb[120].mxu0  ;;  %9332 = vmatprep.subr.bf16.mxu1 %v10084_v56  ;;  %v10099_v56 = vld [vmem:[%s15407_s3 + $0x698] sm:$0xff]  }
 0x6cf   : > { %v5754_v22 = vadd.f32 %v9235_v24, %v14055_v54  ;;  %v9295_v34 = vpop.f32.mrb[121].mxu0  ;;  %v10086_v24 = vld [vmem:[%s15407_s3 + $0x6c0] sm:$0xff]  }
 0x6d0   : > { %v9296_v42 = vadd.f32 %v9295_v34, %v9294_v23  ;;  %v9297_v9 = vpop.f32.mrb[122].mxu0  ;;  %9821 = vset.pattern.permute.xlu1 %v15636_v32  ;;  %9827 = vset.pattern.permute.xlu0 %v15637_v58 }
 0x6d1   : > { %v9298_v61 = vpop.f32.mrb[123].mxu0  ;;  %v9236_v20 = vpop.f32.mrb[124].mxu1  ;;  %6327 = vperm.xlu1 %9821, %v14094_v49   ;;  %6145 = vperm.xlu0 %9827, %v14109_v36  }
 0x6d2   : > { %v14113_v60 = vadd.f32 %v9296_v42, %v5751_v2  ;;  %v9299_v51 = vadd.f32 %v9298_v61, %v9297_v9  ;;  %v9237_v54 = vpop.f32.mrb[125].mxu1  ;;  %9394 = vmatprep.subr.bf16.mxu0 %v10086_v24 }
 0x6d3   : > { %v9238_v5 = vadd.f32 %v9237_v54, %v9236_v20  ;;  %v9239_v63 = vpop.f32.mrb[126].mxu1 }
 0x6d4   : > { %v14117_v29 = vadd.f32 %v9299_v51, %v5754_v22  ;;  %v9240_v26 = vpop.f32.mrb[127].mxu1  ;;  %v10088_v51 = vld [vmem:[%s15407_s3 + $0x650] sm:$0xff]  }
 0x6d5   : > { %v5759_v31 = vadd.f32 %v9238_v5, %v14059_v10  ;;  %v9241_v16 = vadd.f32 %v9240_v26, %v9239_v63  ;;  %9822 = vset.pattern.permute.xlu1 %v15638_v37  ;;  %9828 = vset.pattern.permute.xlu0 %v15634_v55  ;;  %v15641_v63 = vmov 0   ;;  %v10089_v26 = vld [vmem:[%s15407_s3 + $0x610] sm:$0xff]  }
 0x6d6   : > { %v9300_v0 = vpop.f32.mrb[124].mxu0  ;;  %6885 = vperm.xlu1 %9822, %v14094_v49   ;;  %6517 = vperm.xlu0 %9828, %v14109_v36  }
 0x6d7   : > { %v5762_v19 = vadd.f32 %v9241_v16, %v14061_v62  ;;  %v9301_v30 = vpop.f32.mrb[125].mxu0 }
 0x6d8   : > { %v9302_v46 = vadd.f32 %v9301_v30, %v9300_v0  ;;  %v9303_v52 = vpop.f32.mrb[126].mxu0 }
 0x6d9   : > { %v9242_v8 = vpop.f32.mrb[128].mxu1  ;;  %v9304_v6 = vpop.f32.mrb[127].mxu0 }
 0x6da   : > { %v14125_v18 = vadd.f32 %v9302_v46, %v5759_v31  ;;  %v9305_v10 = vadd.f32 %v9304_v6, %v9303_v52  ;;  %v9243_v53 = vpop.f32.mrb[129].mxu1  ;;  %9824 = vset.pattern.permute.xlu1 %v15639_v44  ;;  %9832 = vset.pattern.permute.xlu0 %v15639_v44  ;;  %v10090_v31 = vld [vmem:[%s15407_s3 + $0x6c8] sm:$0xff]   ;;  %v10092_v52 = vld [vmem:[%s15407_s3 + $0x658] sm:$0xff]  }
 0x6db   : > { %v9244_v28 = vadd.f32 %v9243_v53, %v9242_v8  ;;  %v9245_v62 = vpop.f32.mrb[130].mxu1  ;;  %7257 = vperm.xlu1 %9824, %v14094_v49   ;;  %7261 = vperm.xlu0 %9832, %v14109_v36  }
 0x6dc   : > { %v14130_v40 = vadd.f32 %v9305_v10, %v5762_v19  ;;  %v9246_v38 = vpop.f32.mrb[131].mxu1  ;;  %v10093_v10 = vld [vmem:[%s15407_s3 + $0x618] sm:$0xff]  }
 0x6dd   : > { %v5767_v13 = vadd.f32 %v9244_v28, %v14063_v45  ;;  %v9247_v3 = vadd.f32 %v9246_v38, %v9245_v62  ;;  %v10095_v62 = vld [vmem:[%s15407_s3 + $0x690] sm:$0xff]  }
 0x6de   : > { %v9306_v57 = vpop.f32.mrb[128].mxu0 }
 0x6df   : > { %v5770_v47 = vadd.f32 %v9247_v3, %v14065_v4  ;;  %v9307_v27 = vpop.f32.mrb[129].mxu0  ;;  %9825 = vset.pattern.permute.xlu1 %v15640_v50  ;;  %9836 = vset.pattern.permute.xlu0 %v15634_v55  ;;  %v10085_v4 = vld [vmem:[%s15407_s3 + $0x608] sm:$0xff]  }
 0x6e0   : > { %v9308_v35 = vadd.f32 %v9307_v27, %v9306_v57  ;;  %v9309_v45 = vpop.f32.mrb[130].mxu0  ;;  %7071 = vperm.xlu1 %9825, %v14094_v49   ;;  %6521 = vperm.xlu0 %9836, %v14142_v48   ;;  %v10087_v49 = vld [vmem:[%s15407_s3 + $0x680] sm:$0xff]  }
 0x6e1   : > { %v9248_v11 = vpop.f32.mrb[132].mxu1  ;;  %v9310_v2 = vpop.f32.mrb[131].mxu0  ;;  %9333 = vmatpush3.bf16.msra.mxu1 %v10085_v4  ;;  %9395 = vmatpush3.bf16.msra.mxu0 %v10087_v49  ;;  %v10097_v27 = vld [vmem:[%s15407_s3 + $0x620] sm:$0xff]  }
 0x6e2   : > { %v14158_v23 = vadd.f32 %v9308_v35, %v5767_v13  ;;  %v9311_v22 = vadd.f32 %v9310_v2, %v9309_v45  ;;  %v9249_v34 = vpop.f32.mrb[133].mxu1  ;;  %9334 = vmatprep.subr.bf16.mxu1 %v10088_v51  ;;  %9396 = vmatprep.subr.bf16.mxu0 %v10090_v31  ;;  %v10098_v35 = vld [vmem:[%s15407_s3 + $0x6d8] sm:$0xff]   ;;  %v10107_v31 = vld [vmem:[%s15407_s3 + $0x6a8] sm:$0xff]  }
 0x6e3   : > { %v9250_v42 = vadd.f32 %v9249_v34, %v9248_v11  ;;  %v9251_v9 = vpop.f32.mrb[134].mxu1 }
 0x6e4   : > { %v14163_v61 = vadd.f32 %v9311_v22, %v5770_v47  ;;  %v9252_v20 = vpop.f32.mrb[135].mxu1  ;;  %9826 = vset.pattern.permute.xlu1 %v15641_v63  ;;  %9837 = vset.pattern.permute.xlu0 %v15636_v32  ;;  %v10100_v22 = vld [vmem:[%s15407_s3 + $0x668] sm:$0xff]  }
 0x6e5   : > { %v5775_v54 = vadd.f32 %v9250_v42, %v14067_v39  ;;  %v9253_v5 = vadd.f32 %v9252_v20, %v9251_v9  ;;  %5945 = vperm.xlu1 %9826, %v14109_v36   ;;  %6335 = vperm.xlu0 %9837, %v14142_v48   ;;  %v10091_v39 = vld [vmem:[%s15407_s3 + $0x688] sm:$0xff]   ;;  %v10103_v9 = vld [vmem:[%s15407_s3 + $0x6a0] sm:$0xff]  }
 0x6e6   : > { %v9312_v16 = vpop.f32.mrb[132].mxu0  ;;  %9335 = vmatpush3.bf16.msra.mxu1 %v10089_v26  ;;  %9397 = vmatpush3.bf16.msra.mxu0 %v10091_v39  ;;  %v10101_v42 = vld [vmem:[%s15407_s3 + $0x628] sm:$0xff]   ;;  %v10105_v26 = vld [vmem:[%s15407_s3 + $0x630] sm:$0xff]   ;;  %v5903_v39 = vmul.f32 %v14084_v33, %v14113_v60 }
 0x6e7   : > { %v5778_v0 = vadd.f32 %v9253_v5, %v14069_v43  ;;  %v9313_v19 = vpop.f32.mrb[133].mxu0  ;;  %v10094_v43 = vld [vmem:[%s15407_s3 + $0x6d0] sm:$0xff]   ;;  %9336 = vmatprep.subr.bf16.mxu1 %v10092_v52  ;;  %v10106_v5 = vld [vmem:[%s15407_s3 + $0x6e8] sm:$0xff]  }
 0x6e8   : > { %v9314_v30 = vadd.f32 %v9313_v19, %v9312_v16  ;;  %v9315_v46 = vpop.f32.mrb[134].mxu0  ;;  %9398 = vmatprep.subr.bf16.mxu0 %v10094_v43  ;;  %v10108_v16 = vld [vmem:[%s15407_s3 + $0x678] sm:$0xff]   ;;  %v10111_v60 = vld [vmem:[%s15407_s3 + $0x6b0] sm:$0xff]  }
 0x6e9   : > { %v9254_v8 = vpop.f32.mrb[136].mxu1  ;;  %v9316_v6 = vpop.f32.mrb[135].mxu0  ;;  %9829 = vset.pattern.permute.xlu1 %v15636_v32  ;;  %9838 = vset.pattern.permute.xlu0 %v15638_v37  ;;  %v10109_v19 = vld [vmem:[%s15407_s3 + $0x638] sm:$0xff]  }
 0x6ea   : > { %v14192_v53 = vadd.f32 %v9314_v30, %v5775_v54  ;;  %v9317_v17 = vadd.f32 %v9316_v6, %v9315_v46  ;;  %v9255_v28 = vpop.f32.mrb[137].mxu1  ;;  %6331 = vperm.xlu1 %9829, %v14109_v36   ;;  %6893 = vperm.xlu0 %9838, %v14142_v48   ;;  %v10104_v54 = vld [vmem:[%s15407_s3 + $0x670] sm:$0xff]   ;;  %v14277_v30 = vadd.f32 %v14089_v21, %v5903_v39  ;;  %v10113_v43 = vld [vmem:[%s15407_s3 + $0x6b8] sm:$0xff]  }
 0x6eb   : > { %v9256_v38 = vadd.f32 %v9255_v28, %v9254_v8  ;;  %v9257_v12 = vpop.f32.mrb[138].mxu1  ;;  %9337 = vmatpush3.bf16.msra.mxu1 %v10093_v10  ;;  %9399 = vmatpush3.bf16.msra.mxu0 %v10095_v62  ;;  %v5904_v62 = vmul.f32 %v14084_v33, %v14117_v29 }
 0x6ec   : > { %v14201_v13 = vadd.f32 %v9317_v17, %v5778_v0  ;;  %v9258_v3 = vpop.f32.mrb[139].mxu1  ;;  %9338 = vmatprep.subr.bf16.mxu1 %v10096_v25  ;;  %9400 = vmatprep.subr.bf16.mxu0 %v10098_v35  ;;  %v10110_v0 = vld [vmem:[%s15407_s3 + $0x6f0] sm:$0xff]   ;;  %v5905_v35 = vmul.f32 %v14084_v33, %v14125_v18  ;;  %v5906_v18 = vmul.f32 %v14084_v33, %v14130_v40 }
 0x6ed   : > { %v5783_v57 = vadd.f32 %v9256_v38, %v14071_v1  ;;  %v9259_v47 = vadd.f32 %v9258_v3, %v9257_v12  ;;  %v5902_v1 = vmul.f32 %v14084_v33, %v14100_v14  ;;  %v14298_v12 = vadd.f32 %v14089_v21, %v5904_v62 }
 0x6ee   : > { %v9318_v45 = vpop.f32.mrb[136].mxu0  ;;  %9830 = vset.pattern.permute.xlu1 %v15638_v37  ;;  %9841 = vset.pattern.permute.xlu0 %v15640_v50  ;;  %v5907_v40 = vmul.f32 %v14084_v33, %v14158_v23  ;;  %v5908_v23 = vmul.f32 %v14084_v33, %v14163_v61  ;;  %v5909_v61 = vmul.f32 %v14084_v33, %v14192_v53 }
 0x6ef   : > { %v5786_v11 = vadd.f32 %v9259_v47, %v14073_v7  ;;  %v9319_v2 = vpop.f32.mrb[137].mxu0  ;;  %6889 = vperm.xlu1 %9830, %v14109_v36   ;;  %7079 = vperm.xlu0 %9841, %v14142_v48   ;;  %v10102_v7 = vld [vmem:[%s15407_s3 + $0x6e0] sm:$0xff]   ;;  %v14238_v20 = vadd.f32 %v14089_v21, %v5902_v1 }
 0x6f0   : > { %v9320_v4 = vadd.f32 %v9319_v2, %v9318_v45  ;;  %v9321_v24 = vpop.f32.mrb[138].mxu0  ;;  %9339 = vmatpush3.bf16.msra.mxu1 %v10097_v27  ;;  %9401 = vmatpush3.bf16.msra.mxu0 %v10099_v56  ;;  %v14336_v45 = vadd.f32 %v14089_v21, %v5906_v18  ;;  %v14349_v56 = vadd.f32 %v14089_v21, %v5907_v40 }
 0x6f1   : > { %v9322_v34 = vpop.f32.mrb[139].mxu0  ;;  %9340 = vmatprep.subr.bf16.mxu1 %v10100_v22  ;;  %9402 = vmatprep.subr.bf16.mxu0 %v10102_v7  ;;  %v14362_v1 = vadd.f32 %v14089_v21, %v5908_v23  ;;  %v5910_v22 = vmul.f32 %v14084_v33, %v14201_v13  ;;  %v14403_v7 = vld [vmem:[%s15405_s1 + $0x1b] ss:$0 sm:$0xff] }
 0x6f2   : > { %v14229_v14 = vadd.f32 %v9320_v4, %v5783_v57  ;;  %v9323_v49 = vadd.f32 %v9322_v34, %v9321_v24  ;;  %v14386_v24 = vadd.f32 %v14089_v21, %v5909_v61  ;;  %v14394_v34 = vld [vmem:[%s15406_s2 + $0x19] ss:$0 sm:$0xff] }
 0x6f3   : > { %9831 = vset.pattern.permute.xlu1 %v15635_v41  ;;  %9842 = vset.pattern.permute.xlu0 %v15641_v63 }
 0x6f4   : > { %v14240_v51 = vadd.f32 %v9323_v49, %v5786_v11  ;;  %6703 = vperm.xlu1 %9831, %v14109_v36   ;;  %5955 = vperm.xlu0 %9842, %v14238_v20   ;;  %v14381_v11 = vld [vmem:[%s15405_s1 + $0x19] ss:$0 sm:$0xff] }
 0x6f5   : > { %9341 = vmatpush3.bf16.msra.mxu1 %v10101_v42  ;;  %9403 = vmatpush3.bf16.msra.mxu0 %v10103_v9  ;;  %v14409_v9 = vadd.f32 %v14089_v21, %v5910_v22 }
 0x6f6   : > { %9342 = vmatprep.subr.bf16.mxu1 %v10104_v54  ;;  %9404 = vmatprep.subr.bf16.mxu0 %v10106_v5  ;;  %v14415_v54 = vld [vmem:[%s15406_s2 + $0x1b] ss:$0 sm:$0xff] }
 0x6f8   : > { %9833 = vset.pattern.permute.xlu1 %v15640_v50  ;;  %9847 = vset.pattern.permute.xlu0 %v15635_v41 }
 0x6f9   : > { %7075 = vperm.xlu1 %9833, %v14109_v36   ;;  %6711 = vperm.xlu0 %9847, %v14238_v20   ;;  %v10112_v36 = vld [vmem:[%s15407_s3 + $0x6f8] sm:$0xff]  }
 0x6fa   : > { %9343 = vmatpush3.bf16.msra.mxu1 %v10105_v26  ;;  %9405 = vmatpush3.bf16.msra.mxu0 %v10107_v31 }
 0x6fb   : > { %9344 = vmatprep.subr.bf16.mxu1 %v10108_v16  ;;  %9406 = vmatprep.subr.bf16.mxu0 %v10110_v0  ;;  %v5911_v0 = vmul.f32 %v14084_v33, %v14229_v14 }
 0x6fd   : > { %9834 = vset.pattern.permute.xlu1 %v15641_v63  ;;  %9851 = vset.pattern.permute.xlu0 %v15637_v58  ;;  %v9260_v46 = vpop.f32.mrb[140].mxu1 }
 0x6fe   : > { %5950 = vperm.xlu1 %9834, %v14142_v48   ;;  %6157 = vperm.xlu0 %9851, %v14277_v30   ;;  %v9261_v52 = vpop.f32.mrb[141].mxu1 }
 0x6ff   : > { %v9262_v8 = vadd.f32 %v9261_v52, %v9260_v46  ;;  %v9263_v6 = vpop.f32.mrb[142].mxu1  ;;  %9345 = vmatpush3.bf16.msra.mxu1 %v10109_v19  ;;  %9407 = vmatpush3.bf16.msra.mxu0 %v10111_v60 }
 0x700   : > { %v9264_v10 = vpop.f32.mrb[143].mxu1  ;;  %9408 = vmatprep.subr.bf16.mxu0 %v10112_v36 }
 0x701   : > { %v5791_v17 = vadd.f32 %v9262_v8, %v14075_v59  ;;  %v9265_v28 = vadd.f32 %v9264_v10, %v9263_v6  ;;  %v14433_v6 = vadd.f32 %v14089_v21, %v5911_v0  ;;  %v5912_v10 = vmul.f32 %v14084_v33, %v14240_v51 }
 0x702   : > { %9835 = vset.pattern.permute.xlu1 %v15637_v58  ;;  %9852 = vset.pattern.permute.xlu0 %v15634_v55 }
 0x703   : > { %v5794_v38 = vadd.f32 %v9265_v28, %v14077_v15  ;;  %6149 = vperm.xlu1 %9835, %v14142_v48   ;;  %6529 = vperm.xlu0 %9852, %v14277_v30  }
 0x704   : > { %9409 = vmatpush3.bf16.msra.mxu0 %v10113_v43 }
 0x706   : > { %v9324_v3 = vpop.f32.mrb[140].mxu0 }
 0x707   : > { %9839 = vset.pattern.permute.xlu1 %v15635_v41  ;;  %9857 = vset.pattern.permute.xlu0 %v15641_v63  ;;  %v9325_v59 = vpop.f32.mrb[141].mxu0 }
 0x708   : > { %v9326_v29 = vadd.f32 %v9325_v59, %v9324_v3  ;;  %6707 = vperm.xlu1 %9839, %v14142_v48   ;;  %5965 = vperm.xlu0 %9857, %v14298_v12   ;;  %v9327_v15 = vpop.f32.mrb[142].mxu0 }
 0x709   : > { %v9328_v25 = vpop.f32.mrb[143].mxu0 }
 0x70a   : > { %v14304_v57 = vadd.f32 %v9326_v29, %v5791_v17  ;;  %v9329_v47 = vadd.f32 %v9328_v25, %v9327_v15  ;;  %v14441_v17 = vld [vmem:[%s15405_s1 + $0x18] ss:$0 sm:$0xff]  ;;  %v14453_v15 = vadd.f32 %v14089_v21, %v5912_v10 }
 0x70b   : > { %v14458_v25 = vld [vmem:[%s15406_s2 + $0x18] ss:$0 sm:$0xff] }
 0x70c   : > { %v14306_v27 = vadd.f32 %v9329_v47, %v5794_v38  ;;  %9840 = vset.pattern.permute.xlu1 %v15639_v44  ;;  %9860 = vset.pattern.permute.xlu0 %v15636_v32 }
 0x70d   : > { %7265 = vperm.xlu1 %9840, %v14142_v48   ;;  %6347 = vperm.xlu0 %9860, %v14298_v12   ;;  %v14323_v48 = vadd.f32 %v14089_v21, %v5905_v35 }
 0x711   : > { %9843 = vset.pattern.permute.xlu1 %v15637_v58  ;;  %9861 = vset.pattern.permute.xlu0 %v15638_v37 }
 0x712   : > { %6153 = vperm.xlu1 %9843, %v14238_v20   ;;  %6905 = vperm.xlu0 %9861, %v14298_v12  }
 0x716   : > { %9844 = vset.pattern.permute.xlu1 %v15634_v55  ;;  %9864 = vset.pattern.permute.xlu0 %v15640_v50 }
 0x717   : > { %6525 = vperm.xlu1 %9844, %v14238_v20   ;;  %7091 = vperm.xlu0 %9864, %v14298_v12  }
 0x71b   : > { %9845 = vset.pattern.permute.xlu1 %v15636_v32  ;;  %9867 = vset.pattern.permute.xlu0 %v15634_v55 }
 0x71c   : > { %6339 = vperm.xlu1 %9845, %v14238_v20   ;;  %6537 = vperm.xlu0 %9867, %v14323_v48  }
 0x720   : > { %9846 = vset.pattern.permute.xlu1 %v15638_v37  ;;  %9870 = vset.pattern.permute.xlu0 %v15635_v41 }
 0x721   : > { %6897 = vperm.xlu1 %9846, %v14238_v20   ;;  %6723 = vperm.xlu0 %9870, %v14323_v48  }
 0x725   : > { %9848 = vset.pattern.permute.xlu1 %v15639_v44  ;;  %9873 = vset.pattern.permute.xlu0 %v15641_v63 }
 0x726   : > { %7269 = vperm.xlu1 %9848, %v14238_v20   ;;  %5975 = vperm.xlu0 %9873, %v14336_v45  }
 0x72a   : > { %9849 = vset.pattern.permute.xlu1 %v15640_v50  ;;  %9876 = vset.pattern.permute.xlu0 %v15636_v32 }
 0x72b   : > { %7083 = vperm.xlu1 %9849, %v14238_v20   ;;  %6355 = vperm.xlu0 %9876, %v14336_v45  }
 0x72f   : > { %9850 = vset.pattern.permute.xlu1 %v15641_v63  ;;  %9882 = vset.pattern.permute.xlu0 %v15634_v55 }
 0x730   : > { %5960 = vperm.xlu1 %9850, %v14277_v30   ;;  %6545 = vperm.xlu0 %9882, %v14349_v56  }
 0x734   : > { %9853 = vset.pattern.permute.xlu1 %v15636_v32  ;;  %9886 = vset.pattern.permute.xlu0 %v15640_v50 }
 0x735   : > { %6343 = vperm.xlu1 %9853, %v14277_v30   ;;  %7103 = vperm.xlu0 %9886, %v14349_v56  }
 0x739   : > { %9854 = vset.pattern.permute.xlu1 %v15638_v37  ;;  %9887 = vset.pattern.permute.xlu0 %v15641_v63 }
 0x73a   : > { %6901 = vperm.xlu1 %9854, %v14277_v30   ;;  %5985 = vperm.xlu0 %9887, %v14362_v1  }
 0x73e   : > { %9855 = vset.pattern.permute.xlu1 %v15635_v41  ;;  %9890 = vset.pattern.permute.xlu0 %v15636_v32 }
 0x73f   : > { %6715 = vperm.xlu1 %9855, %v14277_v30   ;;  %6363 = vperm.xlu0 %9890, %v14362_v1  }
 0x743   : > { %9856 = vset.pattern.permute.xlu1 %v15640_v50  ;;  %9892 = vset.pattern.permute.xlu0 %v15635_v41 }
 0x744   : > { %7087 = vperm.xlu1 %9856, %v14277_v30   ;;  %6735 = vperm.xlu0 %9892, %v14362_v1  }
 0x746   : > { %v6142_v2 = vpop.permute.xlu1 %6141  ;;  %v14383_v4 = vpop.permute.xlu0 %5940 }
 0x747   : > { %v6208_v53 = vsub.f32 %v6142_v2, %v14381_v11  ;;  %v6022_v51 = vsub.f32 %v14383_v4, %v14441_v17  ;;  %v14476_v2 = vld [vmem:[%s15406_s2 + $0x1a] ss:$0 sm:$0xff]  ;;  %v5913_v4 = vmul.f32 %v14084_v33, %v14304_v57 }
 0x748   : > { %9858 = vset.pattern.permute.xlu1 %v15637_v58  ;;  %9896 = vset.pattern.permute.xlu0 %v15634_v55 }
 0x749   : > { %6161 = vperm.xlu1 %9858, %v14298_v12   ;;  %6553 = vperm.xlu0 %9896, %v14386_v24   ;;  %v6228_v13 = vmul.f32 %v14394_v34, %v6208_v53  ;;  %v6042_v18 = vmul.f32 %v14458_v25, %v6022_v51 }
 0x74b   : > { %v6514_v49 = vpop.permute.xlu1 %6513  ;;  %v14406_v42 = vpop.permute.xlu0 %6699  ;;  %v6244_v5 = vmul.f32 %v6228_v13, %v6228_v13  ;;  %v6058_v53 = vmul.f32 %v6042_v18, %v6042_v18 }
 0x74c   : > { %v6580_v20 = vsub.f32 %v6514_v49, %v14403_v7 }
 0x74d   : > { %9859 = vset.pattern.permute.xlu1 %v15634_v55  ;;  %9898 = vset.pattern.permute.xlu0 %v15641_v63  ;;  %v6260_v19 = vsub.f32 0.0, %v6244_v5 }
 0x74e   : > { %6533 = vperm.xlu1 %9859, %v14298_v12   ;;  %5995 = vperm.xlu0 %9898, %v14409_v9   ;;  %v6600_v26 = vmul.f32 %v14415_v54, %v6580_v20  ;;  %v14486_v20 = vadd.f32 %v14089_v21, %v5913_v4 }
 0x74f   : > { %v6276_v43 = vmul.f32 1.442695, %v6260_v19 }
 0x750   : > { %v6328_v31 = vpop.permute.xlu1 %6327  ;;  %v6146_v16 = vpop.permute.xlu0 %6145  ;;  %v6616_v36 = vmul.f32 %v6600_v26, %v6600_v26  ;;  %v5914_v26 = vmul.f32 %v14084_v33, %v14306_v27 }
 0x751   : > { %v6209_v39 = vsub.f32 %v6146_v16, %v14381_v11  ;;  %10722 = vpow2.f32 %v6276_v43 }
 0x752   : > { %9862 = vset.pattern.permute.xlu1 %v15635_v41  ;;  %9901 = vset.pattern.permute.xlu0 %v15636_v32  ;;  %v6632_v62 = vsub.f32 0.0, %v6616_v36  ;;  %v14499_v33 = vadd.f32 %v14089_v21, %v5914_v26 }
 0x753   : > { %v6229_v60 = vmul.f32 %v14394_v34, %v6209_v39  ;;  %6719 = vperm.xlu1 %9862, %v14298_v12   ;;  %6371 = vperm.xlu0 %9901, %v14409_v9  }
 0x754   : > { %v6648_v47 = vmul.f32 1.442695, %v6632_v62 }
 0x755   : > { %v6245_v46 = vmul.f32 %v6229_v60, %v6229_v60  ;;  %v14430_v52 = vpop.permute.xlu1 %6885  ;;  %v6518_v8 = vpop.permute.xlu0 %6517 }
 0x756   : > { %v6581_v14 = vsub.f32 %v6518_v8, %v14403_v7 }
 0x757   : > { %v6261_v28 = vsub.f32 0.0, %v6245_v46  ;;  %9863 = vset.pattern.permute.xlu1 %v15639_v44  ;;  %9904 = vset.pattern.permute.xlu0 %v15634_v55 }
 0x758   : > { %v6601_v38 = vmul.f32 %v14415_v54, %v6581_v14  ;;  %7277 = vperm.xlu1 %9863, %v14298_v12   ;;  %6561 = vperm.xlu0 %9904, %v14433_v6   ;;  %v14463_v12 = vld [vmem:[%s15405_s1 + $0x1a] ss:$0 sm:$0xff] }
 0x759   : > { %v6278_v3 = vmul.f32 1.442695, %v6261_v28  ;;  %v6394_v23 = vsub.f32 %v6328_v31, %v14463_v12  ;;  %v6074_v31 = vsub.f32 0.0, %v6058_v53 }
 0x75a   : > { %v6617_v59 = vmul.f32 %v6601_v38, %v6601_v38  ;;  %v14450_v29 = vpop.permute.xlu1 %7257  ;;  %v14496_v19 = vpop.permute.xlu0 %7261 }
 0x75b   : > { %10724 = vpow2.f32 %v6278_v3  ;;  %v6414_v22 = vmul.f32 %v14476_v2, %v6394_v23  ;;  %v10723_v49 = vpop.eup %10722  ;;  %v6090_v27 = vmul.f32 1.442695, %v6074_v31 }
 0x75c   : > { %v6633_v35 = vsub.f32 0.0, %v6617_v59  ;;  %9865 = vset.pattern.permute.xlu1 %v15641_v63  ;;  %9906 = vset.pattern.permute.xlu0 %v15641_v63  ;;  %10726 = vpow2.f32 %v6648_v47 }
 0x75d   : > { %5970 = vperm.xlu1 %9865, %v14323_v48   ;;  %6005 = vperm.xlu0 %9906, %v14453_v15   ;;  %v6430_v16 = vmul.f32 %v6414_v22, %v6414_v22 }
 0x75e   : > { %v6650_v40 = vmul.f32 1.442695, %v6633_v35 }
 0x75f   : > { %v14471_v61 = vpop.permute.xlu1 %7071  ;;  %v6446_v10 = vsub.f32 0.0, %v6430_v16  ;;  %v14507_v21 = vpop.permute.xlu0 %6521 }
 0x760   : > { %10728 = vpow2.f32 %v6650_v40 }
 0x761   : > { %9866 = vset.pattern.permute.xlu1 %v15637_v58  ;;  %9909 = vset.pattern.permute.xlu0 %v15636_v32  ;;  %10730 = vpow2.f32 %v6090_v27  ;;  %v6462_v59 = vmul.f32 1.442695, %v6446_v10  ;;  %v6582_v27 = vsub.f32 %v14507_v21, %v14403_v7 }
 0x762   : > { %6165 = vperm.xlu1 %9866, %v14323_v48   ;;  %6379 = vperm.xlu0 %9909, %v14453_v15  }
 0x764   : > { %v5946_v13 = vpop.permute.xlu1 %5945  ;;  %v6336_v40 = vpop.permute.xlu0 %6335 }
 0x765   : > { %v6023_v5 = vsub.f32 %v5946_v13, %v14441_v17  ;;  %v10725_v57 = vpop.eup %10724 }
 0x766   : > { %9868 = vset.pattern.permute.xlu1 %v15636_v32  ;;  %9912 = vset.pattern.permute.xlu0 %v15634_v55  ;;  %v6308_v0 = vpack.c.bf16 %v10725_v57, %v10723_v49  ;;  %v10727_v46 = vpop.eup %10726 }
 0x767   : > { %v6043_v39 = vmul.f32 %v14458_v25, %v6023_v5  ;;  %6351 = vperm.xlu1 %9868, %v14323_v48   ;;  %6569 = vperm.xlu0 %9912, %v14486_v20  }
 0x768   : > { %8048 = vmatprep.mubr.bf16.mxu1 %v6308_v0 }
 0x769   : > { %v6059_v60 = vmul.f32 %v6043_v39, %v6043_v39  ;;  %v6332_v36 = vpop.permute.xlu1 %6331  ;;  %v14523_v22 = vpop.permute.xlu0 %6893 }
 0x76a   : > { %v6395_v8 = vsub.f32 %v6332_v36, %v14463_v12  ;;  %v10729_v14 = vpop.eup %10728 }
 0x76b   : > { %v6075_v43 = vsub.f32 0.0, %v6059_v60  ;;  %9869 = vset.pattern.permute.xlu1 %v15638_v37  ;;  %9914 = vset.pattern.permute.xlu0 %v15641_v63  ;;  %v6680_v62 = vpack.c.bf16 %v10729_v14, %v10727_v46  ;;  %v10731_v23 = vpop.eup %10730 }
 0x76c   : > { %v6415_v28 = vmul.f32 %v14476_v2, %v6395_v8  ;;  %6909 = vperm.xlu1 %9869, %v14323_v48   ;;  %6015 = vperm.xlu0 %9914, %v14499_v33  }
 0x76d   : > { %v6092_v38 = vmul.f32 1.442695, %v6075_v43  ;;  %8145 = vmatprep.mubr.bf16.mxu0 %v6680_v62  ;;  %v6396_v62 = vsub.f32 %v6336_v40, %v14463_v12 }
 0x76e   : > { %v6431_v3 = vmul.f32 %v6415_v28, %v6415_v28  ;;  %v14509_v51 = vpop.permute.xlu1 %6889  ;;  %v14531_v26 = vpop.permute.xlu0 %7079  ;;  %v6602_v28 = vmul.f32 %v14415_v54, %v6582_v27 }
 0x76f   : > { %10732 = vpow2.f32 %v6092_v38 }
 0x770   : > { %v6447_v47 = vsub.f32 0.0, %v6431_v3  ;;  %9871 = vset.pattern.permute.xlu1 %v15639_v44  ;;  %9922 = vset.pattern.permute.xlu0 %v15636_v32  ;;  %10734 = vpow2.f32 %v6462_v59 }
 0x771   : > { %7281 = vperm.xlu1 %9871, %v14323_v48   ;;  %6387 = vperm.xlu0 %9922, %v14499_v33  }
 0x772   : > { %v6464_v35 = vmul.f32 1.442695, %v6447_v47 }
 0x773   : > { %v14515_v18 = vpop.permute.xlu1 %6703 }
 0x774   : > { %10736 = vpow2.f32 %v6464_v35  ;;  %v6618_v35 = vmul.f32 %v6602_v28, %v6602_v28 }
 0x775   : > { %9872 = vset.pattern.permute.xlu1 %v15640_v50  ;;  %9923 = vset.pattern.permute.xlu0 %v15640_v50 }
 0x776   : > { %7095 = vperm.xlu1 %9872, %v14323_v48   ;;  %7115 = vperm.xlu0 %9923, %v14409_v9  }
 0x778   : > { %v14521_v4 = vpop.permute.xlu1 %7075 }
 0x779   : > { %v10733_v53 = vpop.eup %10732 }
 0x77a   : > { %9874 = vset.pattern.permute.xlu1 %v15637_v58  ;;  %9924 = vset.pattern.permute.xlu0 %v15639_v44  ;;  %v6122_v13 = vpack.c.bf16 %v10733_v53, %v10731_v23  ;;  %v10735_v49 = vpop.eup %10734 }
 0x77b   : > { %6169 = vperm.xlu1 %9874, %v14336_v45   ;;  %7273 = vperm.xlu0 %9924, %v14277_v30   ;;  %v5956_v30 = vpop.permute.xlu0 %5955 }
 0x77c   : > { %8049 = vmatmul.mubr.bf16.vlgmr.msra.gmra.mrb[144].mxu1 %v6122_v13  ;;  %v6025_v60 = vsub.f32 %v5956_v30, %v14441_v17 }
 0x77d   : > { %v5951_v48 = vpop.permute.xlu1 %5950 }
 0x77e   : > { %v10737_v5 = vpop.eup %10736  ;;  %v6024_v16 = vsub.f32 %v5951_v48, %v14441_v17  ;;  %v6045_v14 = vmul.f32 %v14458_v25, %v6025_v60 }
 0x77f   : > { %9875 = vset.pattern.permute.xlu1 %v15634_v55  ;;  %7285 = vperm.xlu0 %9924, %v14336_v45   ;;  %v6494_v57 = vpack.c.bf16 %v10737_v5, %v10735_v49 }
 0x780   : > { %6541 = vperm.xlu1 %9875, %v14336_v45   ;;  %v6044_v36 = vmul.f32 %v14458_v25, %v6024_v16  ;;  %v6061_v38 = vmul.f32 %v6045_v14, %v6045_v14 }
 0x781   : > { %8146 = vmatmul.mubr.bf16.vlgmr.msra.gmra.mrb[144].mxu0 %v6494_v57  ;;  %v6634_v57 = vsub.f32 0.0, %v6618_v35 }
 0x782   : > { %v6150_v31 = vpop.permute.xlu1 %6149  ;;  %v6060_v10 = vmul.f32 %v6044_v36, %v6044_v36  ;;  %v6077_v53 = vsub.f32 0.0, %v6061_v38 }
 0x783   : > { %7297 = vperm.xlu0 %9924, %v14386_v24   ;;  %v6210_v39 = vsub.f32 %v6150_v31, %v14381_v11  ;;  %v6652_v27 = vmul.f32 1.442695, %v6634_v57 }
 0x784   : > { %9877 = vset.pattern.permute.xlu1 %v15638_v37  ;;  %v6076_v3 = vsub.f32 0.0, %v6060_v10  ;;  %v6096_v16 = vmul.f32 1.442695, %v6077_v53 }
 0x785   : > { %6913 = vperm.xlu1 %9877, %v14336_v45   ;;  %v6230_v46 = vmul.f32 %v14394_v34, %v6210_v39 }
 0x786   : > { %v6094_v13 = vmul.f32 1.442695, %v6076_v3 }
 0x787   : > { %v14539_v0 = vpop.permute.xlu1 %6707  ;;  %7309 = vperm.xlu0 %9924, %v14453_v15   ;;  %v6246_v43 = vmul.f32 %v6230_v46, %v6230_v46 }
 0x788   : > { %10738 = vpow2.f32 %v6094_v13 }
 0x789   : > { %9878 = vset.pattern.permute.xlu1 %v15635_v41  ;;  %v6262_v47 = vsub.f32 0.0, %v6246_v43 }
 0x78a   : > { %6727 = vperm.xlu1 %9878, %v14336_v45  }
 0x78b   : > { %9928 = vset.pattern.permute.xlu0 %v15638_v37  ;;  %v6280_v48 = vmul.f32 1.442695, %v6262_v47 }
 0x78c   : > { %v14550_v8 = vpop.permute.xlu1 %7265  ;;  %6917 = vperm.xlu0 %9928, %v14349_v56  }
 0x78d   : > { %10740 = vpow2.f32 %v6280_v48 }
 0x78e   : > { %9879 = vset.pattern.permute.xlu1 %v15640_v50 }
 0x78f   : > { %7099 = vperm.xlu1 %9879, %v14336_v45   ;;  %v6416_v45 = vmul.f32 %v14476_v2, %v6396_v62 }
 0x790   : > { %6929 = vperm.xlu0 %9928, %v14409_v9  }
 0x791   : > { %v6154_v21 = vpop.permute.xlu1 %6153  ;;  %v6432_v30 = vmul.f32 %v6416_v45, %v6416_v45 }
 0x792   : > { %v6211_v59 = vsub.f32 %v6154_v21, %v14381_v11  ;;  %v10739_v47 = vpop.eup %10738 }
 0x793   : > { %9880 = vset.pattern.permute.xlu1 %v15641_v63  ;;  %v6448_v10 = vsub.f32 0.0, %v6432_v30 }
 0x794   : > { %v6231_v23 = vmul.f32 %v14394_v34, %v6211_v59  ;;  %5980 = vperm.xlu1 %9880, %v14349_v56   ;;  %6941 = vperm.xlu0 %9928, %v14486_v20  }
 0x795   : > { %v6466_v3 = vmul.f32 1.442695, %v6448_v10 }
 0x796   : > { %v6247_v40 = vmul.f32 %v6231_v23, %v6231_v23  ;;  %v6526_v49 = vpop.permute.xlu1 %6525 }
 0x797   : > { %v6583_v5 = vsub.f32 %v6526_v49, %v14403_v7  ;;  %v10741_v23 = vpop.eup %10740 }
 0x798   : > { %v6263_v31 = vsub.f32 0.0, %v6247_v40  ;;  %9881 = vset.pattern.permute.xlu1 %v15637_v58  ;;  %9930 = vset.pattern.permute.xlu0 %v15635_v41 }
 0x799   : > { %v6603_v39 = vmul.f32 %v14415_v54, %v6583_v5  ;;  %6173 = vperm.xlu1 %9881, %v14349_v56   ;;  %6747 = vperm.xlu0 %9930, %v14433_v6   ;;  %v14587_v5 = vpop.permute.xlu0 %6711 }
 0x79a   : > { %v6282_v60 = vmul.f32 1.442695, %v6263_v31 }
 0x79b   : > { %v6619_v36 = vmul.f32 %v6603_v39, %v6603_v39  ;;  %v6340_v46 = vpop.permute.xlu1 %6339 }
 0x79c   : > { %10742 = vpow2.f32 %v6282_v60  ;;  %v6397_v14 = vsub.f32 %v6340_v46, %v14463_v12 }
 0x79d   : > { %10744 = vpow2.f32 %v6096_v16  ;;  %v6635_v43 = vsub.f32 0.0, %v6619_v36  ;;  %9883 = vset.pattern.permute.xlu1 %v15636_v32  ;;  %6759 = vperm.xlu0 %9930, %v14499_v33   ;;  %v6158_v36 = vpop.permute.xlu0 %6157 }
 0x79e   : > { %v6417_v28 = vmul.f32 %v14476_v2, %v6397_v14  ;;  %6359 = vperm.xlu1 %9883, %v14349_v56   ;;  %10746 = vpow2.f32 %v6652_v27 }
 0x79f   : > { %v6654_v62 = vmul.f32 1.442695, %v6635_v43  ;;  %v6212_v43 = vsub.f32 %v6158_v36, %v14381_v11 }
 0x7a0   : > { %v6433_v38 = vmul.f32 %v6417_v28, %v6417_v28  ;;  %v14576_v21 = vpop.permute.xlu1 %6897 }
 0x7a1   : > { %10748 = vpow2.f32 %v6654_v62  ;;  %9935 = vset.pattern.permute.xlu0 %v15640_v50  ;;  %v6530_v27 = vpop.permute.xlu0 %6529 }
 0x7a2   : > { %v6449_v59 = vsub.f32 0.0, %v6433_v38  ;;  %9884 = vset.pattern.permute.xlu1 %v15635_v41  ;;  %7127 = vperm.xlu0 %9935, %v14486_v20   ;;  %10750 = vpow2.f32 %v6466_v3  ;;  %v6232_v3 = vmul.f32 %v14394_v34, %v6212_v43 }
 0x7a3   : > { %6731 = vperm.xlu1 %9884, %v14349_v56  }
 0x7a4   : > { %v6468_v35 = vmul.f32 1.442695, %v6449_v59  ;;  %v6584_v59 = vsub.f32 %v6530_v27, %v14403_v7 }
 0x7a5   : > { %v14582_v45 = vpop.permute.xlu1 %7269  ;;  %v5966_v10 = vpop.permute.xlu0 %5965 }
 0x7a6   : > { %v10743_v53 = vpop.eup %10742  ;;  %10752 = vpow2.f32 %v6468_v35  ;;  %9937 = vset.pattern.permute.xlu0 %v15639_v44  ;;  %v6027_v38 = vsub.f32 %v5966_v10, %v14441_v17 }
 0x7a7   : > { %v10745_v13 = vpop.eup %10744  ;;  %9885 = vset.pattern.permute.xlu1 %v15639_v44  ;;  %v6309_v40 = vpack.c.bf16 %v10743_v53, %v10741_v23 }
 0x7a8   : > { %7289 = vperm.xlu1 %9885, %v14349_v56   ;;  %v6123_v49 = vpack.c.bf16 %v10745_v13, %v10739_v47  ;;  %v10747_v48 = vpop.eup %10746  ;;  %v6047_v13 = vmul.f32 %v14458_v25, %v6027_v38 }
 0x7a9   : > { %8056 = vmatprep.mubr.bf16.mxu1 %v6309_v40  ;;  %v6348_v47 = vpop.permute.xlu0 %6347  ;;  %v6248_v40 = vmul.f32 %v6232_v3, %v6232_v3 }
 0x7aa   : > { %v14589_v57 = vpop.permute.xlu1 %7083  ;;  %8057 = vmatmul.mubr.bf16.gmra.mrb[148].mxu1 %v6123_v49  ;;  %v6399_v49 = vsub.f32 %v6348_v47, %v14463_v12 }
 0x7ab   : > { %v10749_v31 = vpop.eup %10748 }
 0x7ac   : > { %9888 = vset.pattern.permute.xlu1 %v15637_v58  ;;  %v6681_v30 = vpack.c.bf16 %v10749_v31, %v10747_v48  ;;  %v10751_v16 = vpop.eup %10750  ;;  %v6604_v48 = vmul.f32 %v14415_v54, %v6584_v59  ;;  %v6419_v36 = vmul.f32 %v14476_v2, %v6399_v49 }
 0x7ad   : > { %6177 = vperm.xlu1 %9888, %v14362_v1  }
 0x7ae   : > { %8153 = vmatprep.mubr.bf16.mxu0 %v6681_v30  ;;  %v6435_v3 = vmul.f32 %v6419_v36, %v6419_v36 }
 0x7af   : > { %v5961_v39 = vpop.permute.xlu1 %5960 }
 0x7b0   : > { %v10753_v60 = vpop.eup %10752  ;;  %v6026_v28 = vsub.f32 %v5961_v39, %v14441_v17 }
 0x7b1   : > { %9889 = vset.pattern.permute.xlu1 %v15634_v55  ;;  %v6495_v56 = vpack.c.bf16 %v10753_v60, %v10751_v16  ;;  %v6063_v16 = vmul.f32 %v6047_v13, %v6047_v13  ;;  %v6264_v60 = vsub.f32 0.0, %v6248_v40 }
 0x7b2   : > { %6549 = vperm.xlu1 %9889, %v14362_v1   ;;  %v6046_v35 = vmul.f32 %v14458_v25, %v6026_v28 }
 0x7b3   : > { %8154 = vmatmul.mubr.bf16.gmra.mrb[148].mxu0 %v6495_v56  ;;  %v6079_v28 = vsub.f32 0.0, %v6063_v16  ;;  %v6284_v38 = vmul.f32 1.442695, %v6264_v60 }
 0x7b4   : > { %v6344_v46 = vpop.permute.xlu1 %6343  ;;  %v6062_v31 = vmul.f32 %v6046_v35, %v6046_v35 }
 0x7b5   : > { %v6398_v23 = vsub.f32 %v6344_v46, %v14463_v12  ;;  %v6620_v46 = vmul.f32 %v6604_v48, %v6604_v48  ;;  %v6100_v48 = vmul.f32 1.442695, %v6079_v28  ;;  %10754 = vpow2.f32 %v6284_v38 }
 0x7b6   : > { %9891 = vset.pattern.permute.xlu1 %v15638_v37  ;;  %v6078_v27 = vsub.f32 0.0, %v6062_v31 }
 0x7b7   : > { %6921 = vperm.xlu1 %9891, %v14362_v1   ;;  %v6418_v30 = vmul.f32 %v14476_v2, %v6398_v23  ;;  %v6636_v35 = vsub.f32 0.0, %v6620_v46 }
 0x7b8   : > { %v6098_v23 = vmul.f32 1.442695, %v6078_v27 }
 0x7b9   : > { %v14597_v14 = vpop.permute.xlu1 %6901  ;;  %v6434_v10 = vmul.f32 %v6418_v30, %v6418_v30  ;;  %v6451_v30 = vsub.f32 0.0, %v6435_v3 }
 0x7ba   : > { %10756 = vpow2.f32 %v6098_v23 }
 0x7bb   : > { %9893 = vset.pattern.permute.xlu1 %v15639_v44  ;;  %v6450_v40 = vsub.f32 0.0, %v6434_v10  ;;  %v6472_v27 = vmul.f32 1.442695, %v6451_v30  ;;  %v14633_v10 = vpop.permute.xlu0 %6905 }
 0x7bc   : > { %7293 = vperm.xlu1 %9893, %v14362_v1  }
 0x7be   : > { %v14603_v62 = vpop.permute.xlu1 %6715 }
 0x7bf   : > { %15642 = vst [vmem:[#allocation28_spill] sm:$0xff] %v14603_v62  ;;  %v10755_v38 = vpop.eup %10754 }
 0x7c0   : > { %9894 = vset.pattern.permute.xlu1 %v15641_v63 }
 0x7c1   : > { %5990 = vperm.xlu1 %9894, %v14386_v24  }
 0x7c3   : > { %v14612_v53 = vpop.permute.xlu1 %7087 }
 0x7c4   : > { %15643 = vst [vmem:[#allocation11_spill] sm:$0xff] %v14612_v53  ;;  %v10757_v3 = vpop.eup %10756 }
 0x7c5   : > { %9895 = vset.pattern.permute.xlu1 %v15637_v58 }
 0x7c6   : > { %6181 = vperm.xlu1 %9895, %v14386_v24  }
 0x7c8   : > { %v6162_v39 = vpop.permute.xlu1 %6161 }
 0x7c9   : > { %v6213_v56 = vsub.f32 %v6162_v39, %v14381_v11  ;;  %v6656_v39 = vmul.f32 1.442695, %v6636_v35 }
 0x7ca   : > { %9897 = vset.pattern.permute.xlu1 %v15636_v32 }
 0x7cb   : > { %v6233_v43 = vmul.f32 %v14394_v34, %v6213_v56  ;;  %6367 = vperm.xlu1 %9897, %v14386_v24   ;;  %v6470_v56 = vmul.f32 1.442695, %v6450_v40 }
 0x7cd   : > { %v6249_v59 = vmul.f32 %v6233_v43, %v6233_v43  ;;  %v6534_v47 = vpop.permute.xlu1 %6533 }
 0x7ce   : > { %v6585_v13 = vsub.f32 %v6534_v47, %v14403_v7 }
 0x7cf   : > { %v6265_v49 = vsub.f32 0.0, %v6249_v59  ;;  %9899 = vset.pattern.permute.xlu1 %v15637_v58  ;;  %v14639_v59 = vpop.permute.xlu0 %7091 }
 0x7d0   : > { %v6605_v31 = vmul.f32 %v14415_v54, %v6585_v13  ;;  %6185 = vperm.xlu1 %9899, %v14409_v9  }
 0x7d1   : > { %v6286_v16 = vmul.f32 1.442695, %v6265_v49 }
 0x7d2   : > { %v6621_v60 = vmul.f32 %v6605_v31, %v6605_v31  ;;  %v14629_v36 = vpop.permute.xlu1 %6719 }
 0x7d3   : > { %10758 = vpow2.f32 %v6286_v16  ;;  %v6538_v16 = vpop.permute.xlu0 %6537 }
 0x7d4   : > { %10760 = vpow2.f32 %v6100_v48  ;;  %v6637_v46 = vsub.f32 0.0, %v6621_v60  ;;  %9900 = vset.pattern.permute.xlu1 %v15634_v55 }
 0x7d5   : > { %6557 = vperm.xlu1 %9900, %v14409_v9   ;;  %10762 = vpow2.f32 %v6656_v39 }
 0x7d6   : > { %v6658_v43 = vmul.f32 1.442695, %v6637_v46  ;;  %10764 = vpow2.f32 %v6470_v56 }
 0x7d7   : > { %v14635_v28 = vpop.permute.xlu1 %7277 }
 0x7d8   : > { %15644 = vst [vmem:[#allocation27_spill] sm:$0xff] %v14635_v28  ;;  %10766 = vpow2.f32 %v6658_v43 }
 0x7d9   : > { %10768 = vpow2.f32 %v6472_v27  ;;  %9902 = vset.pattern.permute.xlu1 %v15641_v63  ;;  %v14645_v27 = vpop.permute.xlu0 %6723 }
 0x7da   : > { %6000 = vperm.xlu1 %9902, %v14433_v6  }
 0x7dc   : > { %v5971_v47 = vpop.permute.xlu1 %5970 }
 0x7dd   : > { %v10759_v35 = vpop.eup %10758 }
 0x7de   : > { %v10761_v23 = vpop.eup %10760  ;;  %9903 = vset.pattern.permute.xlu1 %v15637_v58  ;;  %v6310_v13 = vpack.c.bf16 %v10759_v35, %v10755_v38  ;;  %v5976_v38 = vpop.permute.xlu0 %5975 }
 0x7df   : > { %6189 = vperm.xlu1 %9903, %v14433_v6   ;;  %v6124_v40 = vpack.c.bf16 %v10761_v23, %v10757_v3  ;;  %v10763_v49 = vpop.eup %10762  ;;  %v6028_v3 = vsub.f32 %v5971_v47, %v14441_v17 }
 0x7e0   : > { %8064 = vmatprep.mubr.bf16.mxu1 %v6310_v13  ;;  %v10765_v48 = vpop.eup %10764  ;;  %v6029_v13 = vsub.f32 %v5976_v38, %v14441_v17 }
 0x7e1   : > { %v6166_v31 = vpop.permute.xlu1 %6165  ;;  %8065 = vmatmul.mubr.bf16.gmra.mrb[152].mxu1 %v6124_v40  ;;  %v6048_v40 = vmul.f32 %v14458_v25, %v6028_v3 }
 0x7e2   : > { %v10767_v30 = vpop.eup %10766  ;;  %v6214_v35 = vsub.f32 %v6166_v31, %v14381_v11  ;;  %v6049_v31 = vmul.f32 %v14458_v25, %v6029_v13 }
 0x7e3   : > { %v10769_v39 = vpop.eup %10768  ;;  %9905 = vset.pattern.permute.xlu1 %v15636_v32  ;;  %v6682_v60 = vpack.c.bf16 %v10767_v30, %v10763_v49  ;;  %v6586_v49 = vsub.f32 %v6538_v16, %v14403_v7  ;;  %v6064_v17 = vmul.f32 %v6048_v40, %v6048_v40  ;;  %v14672_v16 = vld [vmem:[%s15405_s1 + $0x1d] ss:$0 sm:$0xff] }
 0x7e4   : > { %6375 = vperm.xlu1 %9905, %v14433_v6   ;;  %v6496_v56 = vpack.c.bf16 %v10769_v39, %v10765_v48  ;;  %v6356_v48 = vpop.permute.xlu0 %6355  ;;  %v6234_v30 = vmul.f32 %v14394_v34, %v6214_v35  ;;  %v6065_v38 = vmul.f32 %v6049_v31, %v6049_v31  ;;  %v14681_v40 = vld [vmem:[%s15406_s2 + $0x1d] ss:$0 sm:$0xff]  ;;  %v10116_v31 = vld [vmem:[%s15407_s3 + $0x7c0] sm:$0xff]  }
 0x7e5   : > { %8161 = vmatprep.mubr.bf16.mxu0 %v6682_v60  ;;  %v6401_v60 = vsub.f32 %v6356_v48, %v14463_v12  ;;  %v6080_v35 = vsub.f32 0.0, %v6064_v17  ;;  %9522 = vmatprep.subr.bf16.mxu0 %v10116_v31 }
 0x7e6   : > { %v6352_v46 = vpop.permute.xlu1 %6351  ;;  %8162 = vmatmul.mubr.bf16.gmra.mrb[152].mxu0 %v6496_v56  ;;  %v6250_v56 = vmul.f32 %v6234_v30, %v6234_v30 }
 0x7e7   : > { %v6400_v39 = vsub.f32 %v6352_v46, %v14463_v12  ;;  %v6421_v12 = vmul.f32 %v14476_v2, %v6401_v60 }
 0x7e8   : > { %9907 = vset.pattern.permute.xlu1 %v15637_v58  ;;  %v6266_v48 = vsub.f32 0.0, %v6250_v56  ;;  %v14684_v30 = vpop.permute.xlu0 %6545 }
 0x7e9   : > { %6193 = vperm.xlu1 %9907, %v14453_v15   ;;  %v6420_v46 = vmul.f32 %v14476_v2, %v6400_v39  ;;  %v10115_v2 = vld [vmem:[%s15407_s3 + $0x700] sm:$0xff]   ;;  %v6437_v17 = vmul.f32 %v6421_v12, %v6421_v12 }
 0x7eb   : > { %v6910_v43 = vpop.permute.xlu1 %6909  ;;  %v6436_v39 = vmul.f32 %v6420_v46, %v6420_v46  ;;  %v14701_v46 = vld [vmem:[%s15405_s1 + $0x1c] ss:$0 sm:$0xff] }
 0x7ec   : > { %v6958_v25 = vsub.f32 %v6910_v43, %v14672_v16 }
 0x7ed   : > { %9908 = vset.pattern.permute.xlu1 %v15634_v55 }
 0x7ee   : > { %6565 = vperm.xlu1 %9908, %v14453_v15   ;;  %v6978_v60 = vmul.f32 %v14681_v40, %v6958_v25  ;;  %v6452_v25 = vsub.f32 0.0, %v6436_v39 }
 0x7f0   : > { %v14653_v23 = vpop.permute.xlu1 %7281 }
 0x7f1   : > { %15645 = vst [vmem:[#allocation4_spill] sm:$0xff] %v14653_v23 }
 0x7f2   : > { %9910 = vset.pattern.permute.xlu1 %v15641_v63  ;;  %v6606_v63 = vmul.f32 %v14415_v54, %v6586_v49 }
 0x7f3   : > { %6010 = vperm.xlu1 %9910, %v14486_v20  }
 0x7f4   : > { %v6622_v49 = vmul.f32 %v6606_v63, %v6606_v63  ;;  %v6102_v63 = vmul.f32 1.442695, %v6080_v35 }
 0x7f5   : > { %v14662_v47 = vpop.permute.xlu1 %7095 }
 0x7f6   : > { %10770 = vpow2.f32 %v6102_v63  ;;  %v10118_v63 = vld [vmem:[%s15407_s3 + $0x748] sm:$0xff]  }
 0x7f7   : > { %9911 = vset.pattern.permute.xlu1 %v15637_v58 }
 0x7f8   : > { %6197 = vperm.xlu1 %9911, %v14486_v20  }
 0x7fa   : > { %v6170_v3 = vpop.permute.xlu1 %6169 }
 0x7fb   : > { %v6215_v13 = vsub.f32 %v6170_v3, %v14381_v11  ;;  %v10114_v11 = vld [vmem:[%s15407_s3 + $0x740] sm:$0xff]   ;;  %v6638_v3 = vsub.f32 0.0, %v6622_v49 }
 0x7fc   : > { %9913 = vset.pattern.permute.xlu1 %v15636_v32  ;;  %v6081_v32 = vsub.f32 0.0, %v6065_v38  ;;  %9458 = vmatprep.subr.bf16.mxu1 %v10114_v11  ;;  %v6772_v38 = vsub.f32 %v14645_v27, %v14701_v46  ;;  %v10117_v49 = vld [vmem:[%s15407_s3 + $0x780] sm:$0xff]   ;;  %v6453_v27 = vsub.f32 0.0, %v6437_v17 }
 0x7fd   : > { %v6235_v43 = vmul.f32 %v14394_v34, %v6215_v13  ;;  %6383 = vperm.xlu1 %9913, %v14486_v20   ;;  %v6288_v13 = vmul.f32 1.442695, %v6266_v48  ;;  %9459 = vmatpush3.bf16.msra.mxu1 %v10115_v2  ;;  %v14717_v48 = vpop.permute.xlu0 %7103 }
 0x7fe   : > { %v6104_v35 = vmul.f32 1.442695, %v6081_v32  ;;  %15646 = vst [vmem:[#allocation9_spill] sm:$0xff] %v14717_v48  ;;  %9523 = vmatpush3.bf16.msra.mxu0 %v10117_v49  ;;  %9460 = vmatprep.subr.bf16.mxu1 %v10118_v63 }
 0x7ff   : > { %v6251_v34 = vmul.f32 %v6235_v43, %v6235_v43  ;;  %v6542_v56 = vpop.permute.xlu1 %6541  ;;  %v6994_v43 = vmul.f32 %v6978_v60, %v6978_v60  ;;  %10772 = vpow2.f32 %v6288_v13  ;;  %v6474_v60 = vmul.f32 1.442695, %v6452_v25  ;;  %v10120_v25 = vld [vmem:[%s15407_s3 + $0x7c8] sm:$0xff]  }
 0x800   : > { %v6587_v23 = vsub.f32 %v6542_v56, %v14403_v7  ;;  %v14715_v7 = vld [vmem:[%s15405_s1 + $0x1e] ss:$0 sm:$0xff]  ;;  %v6476_v13 = vmul.f32 1.442695, %v6453_v27  ;;  %9524 = vmatprep.subr.bf16.mxu0 %v10120_v25  ;;  %v10124_v25 = vld [vmem:[%s15407_s3 + $0x7d0] sm:$0xff]  }
 0x801   : > { %v6267_v12 = vsub.f32 0.0, %v6251_v34  ;;  %9915 = vset.pattern.permute.xlu1 %v15637_v58  ;;  %v7144_v39 = vsub.f32 %v14662_v47, %v14715_v7  ;;  %v7010_v34 = vsub.f32 0.0, %v6994_v43  ;;  %v10119_v47 = vld [vmem:[%s15407_s3 + $0x708] sm:$0xff]  }
 0x802   : > { %v6607_v11 = vmul.f32 %v14415_v54, %v6587_v23  ;;  %6201 = vperm.xlu1 %9915, %v14499_v33   ;;  %v14722_v54 = vld [vmem:[%s15406_s2 + $0x1c] ss:$0 sm:$0xff]  ;;  %v6660_v23 = vmul.f32 1.442695, %v6638_v3  ;;  %v14738_v3 = vld [vmem:[%s15406_s2 + $0x1e] ss:$0 sm:$0xff]  ;;  %9461 = vmatpush3.bf16.msra.mxu1 %v10119_v47 }
 0x803   : > { %v6290_v58 = vmul.f32 1.442695, %v6267_v12  ;;  %v6792_v32 = vmul.f32 %v14722_v54, %v6772_v38  ;;  %v7164_v12 = vmul.f32 %v14738_v3, %v7144_v39 }
 0x804   : > { %v6623_v2 = vmul.f32 %v6607_v11, %v6607_v11  ;;  %v6914_v31 = vpop.permute.xlu1 %6913  ;;  %v14749_v11 = vpop.permute.xlu0 %5985 }
 0x805   : > { %10774 = vpow2.f32 %v6290_v58  ;;  %v6959_v17 = vsub.f32 %v6914_v31, %v14672_v16  ;;  %v6808_v43 = vmul.f32 %v6792_v32, %v6792_v32  ;;  %v10122_v58 = vld [vmem:[%s15407_s3 + $0x750] sm:$0xff]   ;;  %v7180_v32 = vmul.f32 %v7164_v12, %v7164_v12 }
 0x806   : > { %10776 = vpow2.f32 %v6104_v35  ;;  %v6639_v56 = vsub.f32 0.0, %v6623_v2  ;;  %9916 = vset.pattern.permute.xlu1 %v15634_v55  ;;  %v10121_v55 = vld [vmem:[%s15407_s3 + $0x788] sm:$0xff]   ;;  %v7032_v2 = vmul.f32 1.442695, %v7010_v34  ;;  %9462 = vmatprep.subr.bf16.mxu1 %v10122_v58 }
 0x807   : > { %v6979_v38 = vmul.f32 %v14681_v40, %v6959_v17  ;;  %6573 = vperm.xlu1 %9916, %v14499_v33   ;;  %10778 = vpow2.f32 %v6660_v23  ;;  %9525 = vmatpush3.bf16.msra.mxu0 %v10121_v55  ;;  %v10123_v23 = vld [vmem:[%s15407_s3 + $0x710] sm:$0xff]   ;;  %v10771_v17 = vpop.eup %10770  ;;  %v6824_v63 = vsub.f32 0.0, %v6808_v43 }
 0x808   : > { %v6662_v35 = vmul.f32 1.442695, %v6639_v56  ;;  %10780 = vpow2.f32 %v6474_v60  ;;  %9463 = vmatpush3.bf16.msra.mxu1 %v10123_v23  ;;  %v10126_v56 = vld [vmem:[%s15407_s3 + $0x758] sm:$0xff]   ;;  %v14770_v12 = vpop.permute.xlu0 %6363  ;;  %v10125_v43 = vld [vmem:[%s15407_s3 + $0x790] sm:$0xff]   ;;  %9526 = vmatprep.subr.bf16.mxu0 %v10124_v25 }
 0x809   : > { %v6995_v49 = vmul.f32 %v6979_v38, %v6979_v38  ;;  %v6728_v27 = vpop.permute.xlu1 %6727  ;;  %v10773_v47 = vpop.eup %10772  ;;  %9464 = vmatprep.subr.bf16.mxu1 %v10126_v56 }
 0x80a   : > { %10782 = vpow2.f32 %v6662_v35  ;;  %v6773_v31 = vsub.f32 %v6728_v27, %v14701_v46  ;;  %v7196_v27 = vsub.f32 0.0, %v7180_v32  ;;  %v10128_v32 = vld [vmem:[%s15407_s3 + $0x7d8] sm:$0xff]  }
 0x80b   : > { %10784 = vpow2.f32 %v6476_v13  ;;  %v7011_v39 = vsub.f32 0.0, %v6995_v49  ;;  %9917 = vset.pattern.permute.xlu1 %v15640_v50  ;;  %9527 = vmatpush3.bf16.msra.mxu0 %v10125_v43 }
 0x80c   : > { %v6793_v60 = vmul.f32 %v14722_v54, %v6773_v31  ;;  %7107 = vperm.xlu1 %9917, %v14362_v1   ;;  %10786 = vpow2.f32 %v7032_v2  ;;  %v10127_v1 = vld [vmem:[%s15407_s3 + $0x718] sm:$0xff]   ;;  %v6846_v31 = vmul.f32 1.442695, %v6824_v63  ;;  %v10131_v63 = vld [vmem:[%s15407_s3 + $0x720] sm:$0xff]   ;;  %9528 = vmatprep.subr.bf16.mxu0 %v10128_v32 }
 0x80d   : > { %v7034_v34 = vmul.f32 1.442695, %v7011_v39  ;;  %9465 = vmatpush3.bf16.msra.mxu1 %v10127_v1  ;;  %v7218_v1 = vmul.f32 1.442695, %v7196_v27  ;;  %v10133_v27 = vld [vmem:[%s15407_s3 + $0x728] sm:$0xff]  }
 0x80e   : > { %v6809_v13 = vmul.f32 %v6793_v60, %v6793_v60  ;;  %v7100_v38 = vpop.permute.xlu1 %7099  ;;  %v10130_v60 = vld [vmem:[%s15407_s3 + $0x760] sm:$0xff]  }
 0x80f   : > { %v10775_v55 = vpop.eup %10774  ;;  %10788 = vpow2.f32 %v7034_v34  ;;  %v7145_v35 = vsub.f32 %v7100_v38, %v14715_v7  ;;  %v10129_v38 = vld [vmem:[%s15407_s3 + $0x798] sm:$0xff]   ;;  %9466 = vmatprep.subr.bf16.mxu1 %v10130_v60 }
 0x810   : > { %v10777_v49 = vpop.eup %10776  ;;  %v6825_v58 = vsub.f32 0.0, %v6809_v13  ;;  %9918 = vset.pattern.permute.xlu1 %v15638_v37  ;;  %v6311_v2 = vpack.c.bf16 %v10775_v55, %v10773_v47  ;;  %9529 = vmatpush3.bf16.msra.mxu0 %v10129_v38 }
 0x811   : > { %v7165_v23 = vmul.f32 %v14738_v3, %v7145_v35  ;;  %6925 = vperm.xlu1 %9918, %v14386_v24   ;;  %v6125_v39 = vpack.c.bf16 %v10777_v49, %v10771_v17  ;;  %v10779_v34 = vpop.eup %10778  ;;  %v6736_v35 = vpop.permute.xlu0 %6735  ;;  %9467 = vmatpush3.bf16.msra.mxu1 %v10131_v63  ;;  %v10136_v63 = vld [vmem:[%s15407_s3 + $0x770] sm:$0xff]  }
 0x812   : > { %v6848_v56 = vmul.f32 1.442695, %v6825_v58  ;;  %8072 = vmatprep.mubr.bf16.mxu1 %v6311_v2  ;;  %v10781_v47 = vpop.eup %10780  ;;  %v10132_v58 = vld [vmem:[%s15407_s3 + $0x768] sm:$0xff]  }
 0x813   : > { %v7181_v13 = vmul.f32 %v7165_v23, %v7165_v23  ;;  %v14788_v17 = vpop.permute.xlu1 %5980  ;;  %8073 = vmatmul.mubr.bf16.gmra.mrb[156].mxu1 %v6125_v39  ;;  %9468 = vmatprep.subr.bf16.mxu1 %v10132_v58  ;;  %v10135_v39 = vld [vmem:[%s15407_s3 + $0x7a0] sm:$0xff]   ;;  %v10142_v58 = vld [vmem:[%s15407_s3 + $0x7f0] sm:$0xff]  }
 0x814   : > { %v10783_v25 = vpop.eup %10782  ;;  %10790 = vpow2.f32 %v6848_v56 }
 0x815   : > { %v10785_v55 = vpop.eup %10784  ;;  %10792 = vpow2.f32 %v6846_v31  ;;  %v7197_v43 = vsub.f32 0.0, %v7181_v13  ;;  %9919 = vset.pattern.permute.xlu1 %v15635_v41  ;;  %v6683_v49 = vpack.c.bf16 %v10783_v25, %v10779_v34  ;;  %v10134_v31 = vld [vmem:[%s15407_s3 + $0x7e0] sm:$0xff]   ;;  %v6775_v34 = vsub.f32 %v6736_v35, %v14701_v46  ;;  %9469 = vmatpush3.bf16.msra.mxu1 %v10133_v27  ;;  %v10138_v13 = vld [vmem:[%s15407_s3 + $0x7e8] sm:$0xff]   ;;  %v10140_v35 = vld [vmem:[%s15407_s3 + $0x778] sm:$0xff]  }
 0x816   : > { %6739 = vperm.xlu1 %9919, %v14386_v24   ;;  %v6497_v2 = vpack.c.bf16 %v10785_v55, %v10781_v47  ;;  %v14807_v60 = vpop.eup %10786  ;;  %10794 = vpow2.f32 %v7218_v1  ;;  %9530 = vmatprep.subr.bf16.mxu0 %v10134_v31  ;;  %v10137_v47 = vld [vmem:[%s15407_s3 + $0x730] sm:$0xff]   ;;  %v10139_v25 = vld [vmem:[%s15407_s3 + $0x7a8] sm:$0xff]  }
 0x817   : > { %v7220_v23 = vmul.f32 1.442695, %v7197_v43  ;;  %8169 = vmatprep.mubr.bf16.mxu0 %v6683_v49  ;;  %15647 = vst [vmem:[#allocation7_spill] sm:$0xff] %v14807_v60  ;;  %9531 = vmatpush3.bf16.msra.mxu0 %v10135_v39  ;;  %v6795_v1 = vmul.f32 %v14722_v54, %v6775_v34  ;;  %v10141_v49 = vld [vmem:[%s15407_s3 + $0x738] sm:$0xff]   ;;  %v10143_v27 = vld [vmem:[%s15407_s3 + $0x7b0] sm:$0xff]  }
 0x818   : > { %v6174_v56 = vpop.permute.xlu1 %6173  ;;  %8170 = vmatmul.mubr.bf16.gmra.mrb[156].mxu0 %v6497_v2  ;;  %9470 = vmatprep.subr.bf16.mxu1 %v10136_v63  ;;  %v14851_v39 = vld [vmem:[%s15405_s1 + $0x18] ss:$0 sm:$0xff]  ;;  %v14860_v63 = vld [vmem:[%s15405_s1 + $0x19] ss:$0 sm:$0xff] }
 0x819   : > { %v14810_v32 = vpop.eup %10788  ;;  %10796 = vpow2.f32 %v7220_v23  ;;  %9532 = vmatprep.subr.bf16.mxu0 %v10138_v13  ;;  %9471 = vmatpush3.bf16.msra.mxu1 %v10137_v47  ;;  %v6811_v31 = vmul.f32 %v6795_v1, %v6795_v1  ;;  %v6030_v34 = vsub.f32 %v14788_v17, %v14851_v39  ;;  %v6216_v47 = vsub.f32 %v6174_v56, %v14860_v63 }
 0x81a   : > { %15648 = vst [vmem:[#allocation6_spill] sm:$0xff] %v14810_v32  ;;  %6743 = vperm.xlu1 %9919, %v14409_v9   ;;  %9472 = vmatprep.subr.bf16.mxu1 %v10140_v35  ;;  %v10145_v35 = vld [vmem:[%s15407_s3 + $0x7b8] sm:$0xff]  }
 0x81b   : > { %9533 = vmatpush3.bf16.msra.mxu0 %v10139_v25  ;;  %v10144_v25 = vld [vmem:[%s15407_s3 + $0x7f8] sm:$0xff]   ;;  %v6827_v56 = vsub.f32 0.0, %v6811_v31 }
 0x81c   : > { %9534 = vmatprep.subr.bf16.mxu0 %v10142_v58  ;;  %v6031_v58 = vsub.f32 %v14749_v11, %v14851_v39  ;;  %v14888_v11 = vld [vmem:[%s15405_s1 + $0x1b] ss:$0 sm:$0xff]  ;;  %v14895_v31 = vld [vmem:[%s15406_s2 + $0x19] ss:$0 sm:$0xff] }
 0x81d   : > { %v6360_v55 = vpop.permute.xlu1 %6359  ;;  %9473 = vmatpush3.bf16.msra.mxu1 %v10141_v49 }
 0x81e   : > { %v14831_v43 = vpop.eup %10790  ;;  %9920 = vset.pattern.permute.xlu1 %v15639_v44 }
 0x81f   : > { %15649 = vst [vmem:[#allocation15_spill] sm:$0xff] %v14831_v43  ;;  %v14840_v2 = vpop.eup %10792  ;;  %7301 = vperm.xlu1 %9920, %v14409_v9   ;;  %9535 = vmatpush3.bf16.msra.mxu0 %v10143_v27  ;;  %v14881_v27 = vld [vmem:[%s15406_s2 + $0x18] ss:$0 sm:$0xff] }
 0x820   : > { %15650 = vst [vmem:[#allocation33_spill] sm:$0xff] %v14840_v2  ;;  %v14855_v9 = vpop.eup %10794  ;;  %9536 = vmatprep.subr.bf16.mxu0 %v10144_v25  ;;  %v6236_v25 = vmul.f32 %v14895_v31, %v6216_v47  ;;  %v6051_v38 = vmul.f32 %v14881_v27, %v6031_v58  ;;  %v14912_v47 = vld [vmem:[%s15406_s2 + $0x1b] ss:$0 sm:$0xff]  ;;  %v14918_v58 = vld [vmem:[%s15406_s2 + $0x1a] ss:$0 sm:$0xff] }
 0x821   : > { %15651 = vst [vmem:[#allocation20_spill] sm:$0xff] %v14855_v9  ;;  %v6852_v9 = vmul.f32 1.442695, %v6827_v56 }
 0x822   : > { %v6732_v13 = vpop.permute.xlu1 %6731 }
 0x823   : > { %v14866_v1 = vpop.eup %10796  ;;  %v6774_v17 = vsub.f32 %v6732_v13, %v14701_v46  ;;  %9921 = vset.pattern.permute.xlu1 %v15640_v50  ;;  %v6050_v13 = vmul.f32 %v14881_v27, %v6030_v34  ;;  %9537 = vmatpush3.bf16.msra.mxu0 %v10145_v35  ;;  %v14901_v34 = vld [vmem:[%s15405_s1 + $0x1a] ss:$0 sm:$0xff]  ;;  %10798 = vpow2.f32 %v6852_v9 }
 0x824   : > { %15652 = vst [vmem:[#allocation29_spill] sm:$0xff] %v14866_v1  ;;  %7111 = vperm.xlu1 %9921, %v14386_v24   ;;  %v6588_v24 = vsub.f32 %v14684_v30, %v14888_v11  ;;  %v6403_v30 = vsub.f32 %v14770_v12, %v14901_v34 }
 0x825   : > { %v6794_v23 = vmul.f32 %v14722_v54, %v6774_v17  ;;  %v6402_v17 = vsub.f32 %v6360_v55, %v14901_v34  ;;  %v6066_v1 = vmul.f32 %v6050_v13, %v6050_v13  ;;  %v6067_v13 = vmul.f32 %v6051_v38, %v6051_v38 }
 0x826   : > { %v6608_v55 = vmul.f32 %v14912_v47, %v6588_v24  ;;  %v6423_v43 = vmul.f32 %v14918_v58, %v6403_v30 }
 0x827   : > { %v6810_v35 = vmul.f32 %v6794_v23, %v6794_v23  ;;  %v7290_v49 = vpop.permute.xlu1 %7289  ;;  %v6252_v23 = vmul.f32 %v6236_v25, %v6236_v25  ;;  %v6422_v56 = vmul.f32 %v14918_v58, %v6402_v17  ;;  %v6082_v60 = vsub.f32 0.0, %v6066_v1 }
 0x828   : > { %9925 = vset.pattern.permute.xlu1 %v15638_v37  ;;  %v6624_v24 = vmul.f32 %v6608_v55, %v6608_v55  ;;  %v6083_v38 = vsub.f32 0.0, %v6067_v13  ;;  %v6439_v9 = vmul.f32 %v6423_v43, %v6423_v43  ;;  %v14937_v13 = vld [vmem:[%s15406_s2 + $0x1f] ss:$0 sm:$0xff] }
 0x829   : > { %v6826_v2 = vsub.f32 0.0, %v6810_v35  ;;  %6933 = vperm.xlu1 %9925, %v14433_v6   ;;  %v6268_v25 = vsub.f32 0.0, %v6252_v23  ;;  %v6438_v48 = vmul.f32 %v6422_v56, %v6422_v56  ;;  %v6106_v17 = vmul.f32 1.442695, %v6082_v60 }
 0x82a   : > { %v6108_v60 = vmul.f32 1.442695, %v6083_v38 }
 0x82b   : > { %v6850_v12 = vmul.f32 1.442695, %v6826_v2  ;;  %v14928_v2 = vld [vmem:[%s15405_s1 + $0x1f] ss:$0 sm:$0xff]  ;;  %v6292_v55 = vmul.f32 1.442695, %v6268_v25 }
 0x82c   : > { %v6178_v35 = vpop.permute.xlu1 %6177  ;;  %v7332_v1 = vsub.f32 %v7290_v49, %v14928_v2 }
 0x82d   : > { %10800 = vpow2.f32 %v6850_v12  ;;  %v6217_v32 = vsub.f32 %v6178_v35, %v14860_v63  ;;  %6937 = vperm.xlu1 %9925, %v14453_v15   ;;  %v6640_v35 = vsub.f32 0.0, %v6624_v24  ;;  %v14941_v25 = vpop.eup %10798 }
 0x82e   : > { %10802 = vpow2.f32 %v6106_v17  ;;  %v7352_v49 = vmul.f32 %v14937_v13, %v7332_v1  ;;  %15653 = vst [vmem:[#allocation16_spill] sm:$0xff] %v14941_v25 }
 0x82f   : > { %v6237_v53 = vmul.f32 %v14895_v31, %v6217_v32  ;;  %v6454_v32 = vsub.f32 0.0, %v6438_v48  ;;  %10804 = vpow2.f32 %v6292_v55 }
 0x830   : > { %v7368_v1 = vmul.f32 %v7352_v49, %v7352_v49 }
 0x831   : > { %v6253_v30 = vmul.f32 %v6237_v53, %v6237_v53  ;;  %v6550_v12 = vpop.permute.xlu1 %6549  ;;  %9926 = vset.pattern.permute.xlu1 %v15635_v41  ;;  %v6455_v53 = vsub.f32 0.0, %v6439_v9  ;;  %v6478_v28 = vmul.f32 1.442695, %v6454_v32 }
 0x832   : > { %v6589_v23 = vsub.f32 %v6550_v12, %v14888_v11  ;;  %6751 = vperm.xlu1 %9926, %v14453_v15   ;;  %v6664_v12 = vmul.f32 1.442695, %v6640_v35 }
 0x833   : > { %v6269_v56 = vsub.f32 0.0, %v6253_v30  ;;  %v6480_v17 = vmul.f32 1.442695, %v6455_v53 }
 0x834   : > { %v6609_v43 = vmul.f32 %v14912_v47, %v6589_v23  ;;  %v6554_v23 = vpop.permute.xlu0 %6553 }
 0x835   : > { %v6294_v24 = vmul.f32 1.442695, %v6269_v56  ;;  %v7384_v56 = vsub.f32 0.0, %v7368_v1 }
 0x836   : > { %v6625_v62 = vmul.f32 %v6609_v43, %v6609_v43  ;;  %v14943_v48 = vpop.permute.xlu1 %6921  ;;  %9927 = vset.pattern.permute.xlu1 %v15639_v44 }
 0x837   : > { %15654 = vst [vmem:[#allocation18_spill] sm:$0xff] %v14943_v48  ;;  %v14946_v30 = vpop.eup %10800  ;;  %10806 = vpow2.f32 %v6294_v24  ;;  %7305 = vperm.xlu1 %9927, %v14433_v6   ;;  %v7408_v24 = vmul.f32 1.442695, %v7384_v56 }
 0x838   : > { %15655 = vst [vmem:[#allocation13_spill] sm:$0xff] %v14946_v30  ;;  %10808 = vpow2.f32 %v6108_v60  ;;  %v6641_v38 = vsub.f32 0.0, %v6625_v62  ;;  %v10803_v60 = vpop.eup %10802 }
 0x839   : > { %10810 = vpow2.f32 %v6664_v12  ;;  %v10805_v43 = vpop.eup %10804 }
 0x83a   : > { %v6666_v35 = vmul.f32 1.442695, %v6641_v38  ;;  %10812 = vpow2.f32 %v6478_v28  ;;  %v5996_v38 = vpop.permute.xlu0 %5995 }
 0x83b   : > { %v7294_v55 = vpop.permute.xlu1 %7293  ;;  %9929 = vset.pattern.permute.xlu1 %v15640_v50 }
 0x83c   : > { %10814 = vpow2.f32 %v6666_v35  ;;  %v7333_v32 = vsub.f32 %v7294_v55, %v14928_v2  ;;  %7119 = vperm.xlu1 %9929, %v14433_v6  }
 0x83d   : > { %10816 = vpow2.f32 %v6480_v17 }
 0x83e   : > { %v7353_v62 = vmul.f32 %v14937_v13, %v7333_v32  ;;  %10818 = vpow2.f32 %v7408_v24 }
 0x840   : > { %v7369_v53 = vmul.f32 %v7353_v62, %v7353_v62  ;;  %v5991_v49 = vpop.permute.xlu1 %5990  ;;  %7123 = vperm.xlu1 %9929, %v14453_v15   ;;  %v6033_v62 = vsub.f32 %v5996_v38, %v14851_v39 }
 0x841   : > { %v10807_v28 = vpop.eup %10806  ;;  %v6032_v6 = vsub.f32 %v5991_v49, %v14851_v39 }
 0x842   : > { %v10809_v12 = vpop.eup %10808  ;;  %v7385_v9 = vsub.f32 0.0, %v7369_v53  ;;  %v6312_v35 = vpack.c.bf16 %v10807_v28, %v10805_v43  ;;  %v6053_v28 = vmul.f32 %v14881_v27, %v6033_v62  ;;  %v7324_v62 = vsub.f32 %v14450_v29, %v14928_v2 }
 0x843   : > { %v6126_v30 = vpack.c.bf16 %v10809_v12, %v10803_v60  ;;  %v10811_v55 = vpop.eup %10810  ;;  %v6052_v43 = vmul.f32 %v14881_v27, %v6032_v6 }
 0x844   : > { %v7410_v25 = vmul.f32 1.442695, %v7385_v9  ;;  %9931 = vset.pattern.permute.xlu1 %v15635_v41  ;;  %8080 = vmatprep.mubr.bf16.mxu1 %v6312_v35  ;;  %v10813_v17 = vpop.eup %10812  ;;  %v6372_v9 = vpop.permute.xlu0 %6371  ;;  %v6590_v41 = vsub.f32 %v6554_v23, %v14888_v11  ;;  %v6952_v23 = vsub.f32 %v14430_v52, %v14672_v16 }
 0x845   : > { %v6182_v1 = vpop.permute.xlu1 %6181  ;;  %6755 = vperm.xlu1 %9931, %v14486_v20   ;;  %8081 = vmatmul.mubr.bf16.gmra.mrb[160].mxu1 %v6126_v30  ;;  %v6405_v24 = vsub.f32 %v6372_v9, %v14901_v34  ;;  %v6068_v38 = vmul.f32 %v6052_v43, %v6052_v43 }
 0x846   : > { %v10815_v15 = vpop.eup %10814  ;;  %10820 = vpow2.f32 %v7410_v25  ;;  %v6218_v32 = vsub.f32 %v6182_v1, %v14860_v63  ;;  %v6766_v25 = vsub.f32 %v14406_v42, %v14701_v46  ;;  %v6610_v35 = vmul.f32 %v14912_v47, %v6590_v41 }
 0x847   : > { %v10817_v56 = vpop.eup %10816  ;;  %v6684_v60 = vpack.c.bf16 %v10815_v15, %v10811_v55  ;;  %v6425_v1 = vmul.f32 %v14918_v58, %v6405_v24 }
 0x848   : > { %v6498_v53 = vpack.c.bf16 %v10817_v56, %v10813_v17  ;;  %v6238_v49 = vmul.f32 %v14895_v31, %v6218_v32  ;;  %v6786_v42 = vmul.f32 %v14722_v54, %v6766_v25  ;;  %v6069_v17 = vmul.f32 %v6053_v28, %v6053_v28 }
 0x849   : > { %9932 = vset.pattern.permute.xlu1 %v15639_v44  ;;  %8177 = vmatprep.mubr.bf16.mxu0 %v6684_v60  ;;  %v6972_v56 = vmul.f32 %v14681_v40, %v6952_v23  ;;  %v6084_v60 = vsub.f32 0.0, %v6068_v38  ;;  %v6626_v43 = vmul.f32 %v6610_v35, %v6610_v35  ;;  %v7325_v25 = vsub.f32 %v14496_v19, %v14928_v2 }
 0x84a   : > { %v6368_v30 = vpop.permute.xlu1 %6367  ;;  %7313 = vperm.xlu1 %9932, %v14486_v20   ;;  %8178 = vmatmul.mubr.bf16.gmra.mrb[160].mxu0 %v6498_v53  ;;  %v6254_v55 = vmul.f32 %v6238_v49, %v6238_v49  ;;  %v14976_v20 = vpop.eup %10818  ;;  %v6085_v23 = vsub.f32 0.0, %v6069_v17  ;;  %v6441_v29 = vmul.f32 %v6425_v1, %v6425_v1 }
 0x84b   : > { %v6404_v12 = vsub.f32 %v6368_v30, %v14901_v34  ;;  %15656 = vst [vmem:[#allocation19_spill] sm:$0xff] %v14976_v20  ;;  %v6988_v35 = vmul.f32 %v6972_v56, %v6972_v56  ;;  %v7344_v20 = vmul.f32 %v14937_v13, %v7324_v62  ;;  %v6642_v19 = vsub.f32 0.0, %v6626_v43 }
 0x84c   : > { %v6270_v53 = vsub.f32 0.0, %v6254_v55  ;;  %v6110_v55 = vmul.f32 1.442695, %v6084_v60 }
 0x84d   : > { %v6424_v6 = vmul.f32 %v14918_v58, %v6404_v12 }
 0x84e   : > { %9933 = vset.pattern.permute.xlu1 %v15638_v37  ;;  %10822 = vpow2.f32 %v6110_v55 }
 0x84f   : > { %v6186_v15 = vpop.permute.xlu1 %6185  ;;  %6945 = vperm.xlu1 %9933, %v14499_v33   ;;  %v9346_v32 = vpop.f32.mrb[144].mxu1  ;;  %v6440_v28 = vmul.f32 %v6424_v6, %v6424_v6 }
 0x850   : > { %v14981_v52 = vpop.eup %10820  ;;  %v6219_v37 = vsub.f32 %v6186_v15, %v14860_v63  ;;  %v9347_v9 = vpop.f32.mrb[145].mxu1  ;;  %v6802_v15 = vmul.f32 %v6786_v42, %v6786_v42 }
 0x851   : > { %15657 = vst [vmem:[#allocation21_spill] sm:$0xff] %v14981_v52  ;;  %v9348_v41 = vadd.f32 %v9347_v9, %v9346_v32  ;;  %v9349_v49 = vpop.f32.mrb[146].mxu1  ;;  %v14995_v6 = vpop.permute.xlu0 %6561  ;;  %v6457_v52 = vsub.f32 0.0, %v6441_v29 }
 0x852   : > { %v6239_v24 = vmul.f32 %v14895_v31, %v6219_v37  ;;  %v9350_v12 = vpop.f32.mrb[147].mxu1  ;;  %v6296_v37 = vmul.f32 1.442695, %v6270_v53 }
 0x853   : > { %v9351_v38 = vadd.f32 %v9350_v12, %v9349_v49  ;;  %9934 = vset.pattern.permute.xlu1 %v15639_v44  ;;  %v7345_v49 = vmul.f32 %v14937_v13, %v7325_v25  ;;  %v6456_v44 = vsub.f32 0.0, %v6440_v28  ;;  %v6112_v12 = vmul.f32 1.442695, %v6085_v23 }
 0x854   : > { %v6255_v32 = vmul.f32 %v6239_v24, %v6239_v24  ;;  %v6558_v9 = vpop.permute.xlu1 %6557  ;;  %7317 = vperm.xlu1 %9934, %v14499_v33   ;;  %v9410_v30 = vpop.f32.mrb[144].mxu0  ;;  %v7138_v24 = vsub.f32 %v14471_v61, %v14715_v7  ;;  %v6818_v25 = vsub.f32 0.0, %v6802_v15  ;;  %v6668_v28 = vmul.f32 1.442695, %v6642_v19 }
 0x855   : > { %v6591_v17 = vsub.f32 %v6558_v9, %v14888_v11  ;;  %v9411_v1 = vpop.f32.mrb[145].mxu0  ;;  %10824 = vpow2.f32 %v6296_v37  ;;  %v7004_v61 = vsub.f32 0.0, %v6988_v35  ;;  %v6482_v23 = vmul.f32 1.442695, %v6456_v44 }
 0x856   : > { %v6271_v42 = vsub.f32 0.0, %v6255_v32  ;;  %v9412_v56 = vadd.f32 %v9411_v1, %v9410_v30  ;;  %v9413_v60 = vpop.f32.mrb[146].mxu0  ;;  %v7361_v55 = vmul.f32 %v7345_v49, %v7345_v49  ;;  %v6484_v15 = vmul.f32 1.442695, %v6457_v52 }
 0x857   : > { %v6611_v62 = vmul.f32 %v14912_v47, %v6591_v17  ;;  %v9414_v43 = vpop.f32.mrb[147].mxu0  ;;  %v7360_v17 = vmul.f32 %v7344_v20, %v7344_v20  ;;  %v6834_v35 = vmul.f32 1.442695, %v6818_v25  ;;  %v7020_v37 = vmul.f32 1.442695, %v7004_v61 }
 0x858   : > { %v6298_v48 = vmul.f32 1.442695, %v6271_v42  ;;  %v15002_v53 = vadd.f32 %v9412_v56, %v9348_v41  ;;  %v9415_v9 = vadd.f32 %v9414_v43, %v9413_v60  ;;  %9936 = vset.pattern.permute.xlu1 %v15640_v50  ;;  %v6006_v41 = vpop.permute.xlu0 %6005  ;;  %v7158_v42 = vmul.f32 %v14738_v3, %v7138_v24  ;;  %v10823_v24 = vpop.eup %10822 }
 0x859   : > { %v6627_v30 = vmul.f32 %v6611_v62, %v6611_v62  ;;  %v6001_v32 = vpop.permute.xlu1 %6000  ;;  %7131 = vperm.xlu1 %9936, %v14499_v33   ;;  %v6954_v50 = vsub.f32 %v14523_v22, %v14672_v16  ;;  %v7377_v20 = vsub.f32 0.0, %v7361_v55  ;;  %v6035_v22 = vsub.f32 %v6006_v41, %v14851_v39 }
 0x85a   : > { %10826 = vpow2.f32 %v6298_v48  ;;  %v15006_v29 = vadd.f32 %v9415_v9, %v9351_v38  ;;  %v6034_v33 = vsub.f32 %v6001_v32, %v14851_v39  ;;  %v7376_v38 = vsub.f32 0.0, %v7360_v17 }
 0x85b   : > { %10828 = vpow2.f32 %v6112_v12  ;;  %v6643_v1 = vsub.f32 0.0, %v6627_v30  ;;  %v7174_v44 = vmul.f32 %v7158_v42, %v7158_v42  ;;  %v6974_v56 = vmul.f32 %v14681_v40, %v6954_v50 }
 0x85c   : > { %10830 = vpow2.f32 %v6668_v28  ;;  %v6380_v52 = vpop.permute.xlu0 %6379  ;;  %v6054_v60 = vmul.f32 %v14881_v27, %v6034_v33  ;;  %v6953_v12 = vsub.f32 %v14509_v51, %v14672_v16  ;;  %v6592_v62 = vsub.f32 %v14995_v6, %v14888_v11 }
 0x85d   : > { %v6670_v19 = vmul.f32 1.442695, %v6643_v1  ;;  %10832 = vpow2.f32 %v6482_v23  ;;  %v7392_v25 = vmul.f32 1.442695, %v7376_v38  ;;  %v7394_v28 = vmul.f32 1.442695, %v7377_v20 }
 0x85e   : > { %v6190_v48 = vpop.permute.xlu1 %6189  ;;  %v7190_v61 = vsub.f32 0.0, %v7174_v44  ;;  %v6990_v23 = vmul.f32 %v6974_v56, %v6974_v56  ;;  %v6055_v17 = vmul.f32 %v14881_v27, %v6035_v22  ;;  %v7140_v51 = vsub.f32 %v14531_v26, %v14715_v7 }
 0x85f   : > { %10834 = vpow2.f32 %v6670_v19  ;;  %v6220_v49 = vsub.f32 %v6190_v48, %v14860_v63  ;;  %v10825_v9 = vpop.eup %10824  ;;  %v6407_v16 = vsub.f32 %v6380_v52, %v14901_v34  ;;  %v6070_v6 = vmul.f32 %v6054_v60, %v6054_v60 }
 0x860   : > { %10836 = vpow2.f32 %v6484_v15  ;;  %v6973_v42 = vmul.f32 %v14681_v40, %v6953_v12  ;;  %v6612_v50 = vmul.f32 %v14912_v47, %v6592_v62  ;;  %v7206_v38 = vmul.f32 1.442695, %v7190_v61 }
 0x861   : > { %10838 = vpow2.f32 %v6834_v35  ;;  %v6240_v43 = vmul.f32 %v14895_v31, %v6220_v49  ;;  %v6767_v35 = vsub.f32 %v14515_v18, %v14701_v46  ;;  %v7006_v20 = vsub.f32 0.0, %v6990_v23 }
 0x862   : > { %10840 = vpow2.f32 %v7020_v37  ;;  %v15030_v37 = vpop.permute.xlu0 %6569  ;;  %v6071_v49 = vmul.f32 %v6055_v17, %v6055_v17  ;;  %v7160_v56 = vmul.f32 %v14738_v3, %v7140_v51  ;;  %v6427_v22 = vmul.f32 %v14918_v58, %v6407_v16 }
 0x863   : > { %v6376_v30 = vpop.permute.xlu1 %6375  ;;  %v6256_v15 = vmul.f32 %v6240_v43, %v6240_v43  ;;  %10842 = vpow2.f32 %v7392_v25  ;;  %v6086_v52 = vsub.f32 0.0, %v6070_v6  ;;  %v6628_v12 = vmul.f32 %v6612_v50, %v6612_v50 }
 0x864   : > { %v10827_v32 = vpop.eup %10826  ;;  %v6406_v55 = vsub.f32 %v6376_v30, %v14901_v34  ;;  %10844 = vpow2.f32 %v7394_v28  ;;  %v7024_v61 = vmul.f32 1.442695, %v7006_v20  ;;  %v7139_v23 = vsub.f32 %v14521_v4, %v14715_v7 }
 0x865   : > { %v10829_v41 = vpop.eup %10828  ;;  %v6313_v1 = vpack.c.bf16 %v10827_v32, %v10825_v9  ;;  %v6272_v62 = vsub.f32 0.0, %v6256_v15  ;;  %v6787_v9 = vmul.f32 %v14722_v54, %v6767_v35  ;;  %10846 = vpow2.f32 %v7206_v38 }
 0x866   : > { %v6127_v19 = vpack.c.bf16 %v10829_v41, %v10823_v24  ;;  %v10831_v33 = vpop.eup %10830  ;;  %v6426_v48 = vmul.f32 %v14918_v58, %v6406_v55  ;;  %v6989_v24 = vmul.f32 %v6973_v42, %v6973_v42  ;;  %v6087_v17 = vsub.f32 0.0, %v6071_v49  ;;  %v15046_v16 = vpop.permute.xlu0 %6015 }
 0x867   : > { %8088 = vmatprep.mubr.bf16.mxu1 %v6313_v1  ;;  %v10833_v26 = vpop.eup %10832  ;;  %v6769_v41 = vsub.f32 %v14587_v5, %v14701_v46  ;;  %v6443_v51 = vmul.f32 %v6427_v22, %v6427_v22  ;;  %v6114_v6 = vmul.f32 1.442695, %v6086_v52  ;;  %v7176_v50 = vmul.f32 %v7160_v56, %v7160_v56 }
 0x868   : > { %v6194_v40 = vpop.permute.xlu1 %6193  ;;  %8089 = vmatmul.mubr.bf16.gmra.mrb[164].mxu1 %v6127_v19  ;;  %v6442_v25 = vmul.f32 %v6426_v48, %v6426_v48  ;;  %v6644_v15 = vsub.f32 0.0, %v6628_v12  ;;  %v6300_v19 = vmul.f32 1.442695, %v6272_v62  ;;  %v7005_v4 = vsub.f32 0.0, %v6989_v24 }
 0x869   : > { %v10835_v44 = vpop.eup %10834  ;;  %v6221_v18 = vsub.f32 %v6194_v40, %v14860_v63  ;;  %v6803_v7 = vmul.f32 %v6787_v9, %v6787_v9  ;;  %v6768_v5 = vsub.f32 %v14539_v0, %v14701_v46  ;;  %v6116_v38 = vmul.f32 1.442695, %v6087_v17 }
 0x86a   : > { %v10837_v60 = vpop.eup %10836  ;;  %v6685_v43 = vpack.c.bf16 %v10835_v44, %v10831_v33  ;;  %v6458_v35 = vsub.f32 0.0, %v6442_v25  ;;  %v6789_v40 = vmul.f32 %v14722_v54, %v6769_v41  ;;  %v6459_v44 = vsub.f32 0.0, %v6443_v51  ;;  %v15058_v12 = vpop.permute.xlu0 %6387 }
 0x86b   : > { %v6241_v28 = vmul.f32 %v14895_v31, %v6221_v18  ;;  %v6499_v30 = vpack.c.bf16 %v10837_v60, %v10833_v26  ;;  %v15038_v32 = vpop.eup %10838  ;;  %v7159_v26 = vmul.f32 %v14738_v3, %v7139_v23  ;;  %10848 = vpow2.f32 %v6114_v6 }
 0x86c   : > { %8185 = vmatprep.mubr.bf16.mxu0 %v6685_v43  ;;  %v15042_v55 = vpop.eup %10840  ;;  %v6672_v52 = vmul.f32 1.442695, %v6644_v15  ;;  %10850 = vpow2.f32 %v6300_v19  ;;  %v7192_v3 = vsub.f32 0.0, %v7176_v50  ;;  %v6819_v24 = vsub.f32 0.0, %v6803_v7 }
 0x86d   : > { %v6257_v1 = vmul.f32 %v6241_v28, %v6241_v28  ;;  %v6566_v42 = vpop.permute.xlu1 %6565  ;;  %8186 = vmatmul.mubr.bf16.gmra.mrb[164].mxu0 %v6499_v30  ;;  %v15053_v49 = vpop.eup %10842  ;;  %v6486_v0 = vmul.f32 1.442695, %v6458_v35  ;;  %v7175_v46 = vmul.f32 %v7159_v26, %v7159_v26  ;;  %v6788_v62 = vmul.f32 %v14722_v54, %v6768_v5 }
 0x86e   : > { %v6593_v33 = vsub.f32 %v6566_v42, %v14888_v11  ;;  %v15056_v22 = vpop.eup %10844  ;;  %v7022_v9 = vmul.f32 1.442695, %v7005_v4  ;;  %v6805_v25 = vmul.f32 %v6789_v40, %v6789_v40  ;;  %v6488_v28 = vmul.f32 1.442695, %v6459_v44  ;;  %v15069_v19 = vpop.permute.xlu0 %7115 }
 0x86f   : > { %v6273_v48 = vsub.f32 0.0, %v6257_v1  ;;  %v15061_v30 = vpop.eup %10846  ;;  %v7326_v23 = vsub.f32 %v14550_v8, %v14928_v2  ;;  %v7210_v51 = vmul.f32 1.442695, %v7192_v3  ;;  %v6836_v6 = vmul.f32 1.442695, %v6819_v24 }
 0x870   : > { %v6613_v20 = vmul.f32 %v14912_v47, %v6593_v33  ;;  %v7191_v54 = vsub.f32 0.0, %v7175_v46  ;;  %v6804_v42 = vmul.f32 %v6788_v62, %v6788_v62  ;;  %v6821_v50 = vsub.f32 0.0, %v6805_v25  ;;  %v15075_v33 = vld [vmem:[%s15405_s1 + $0x1d] ss:$0 sm:$0xff] }
 0x871   : > { %v6302_v56 = vmul.f32 1.442695, %v6273_v48  ;;  %v6037_v15 = vsub.f32 %v15046_v16, %v14851_v39  ;;  %v7346_v8 = vmul.f32 %v14937_v13, %v7326_v23  ;;  %v6955_v4 = vsub.f32 %v14576_v21, %v15075_v33 }
 0x872   : > { %v6629_v18 = vmul.f32 %v6613_v20, %v6613_v20  ;;  %v6011_v60 = vpop.permute.xlu1 %6010  ;;  %v7208_v26 = vmul.f32 1.442695, %v7191_v54  ;;  %v6820_v5 = vsub.f32 0.0, %v6804_v42  ;;  %v6840_v40 = vmul.f32 1.442695, %v6821_v50 }
 0x873   : > { %10852 = vpow2.f32 %v6302_v56  ;;  %v6036_v41 = vsub.f32 %v6011_v60, %v14851_v39  ;;  %v6594_v39 = vsub.f32 %v15030_v37, %v14888_v11  ;;  %v6057_v44 = vmul.f32 %v14881_v27, %v6037_v15  ;;  %v15090_v37 = vld [vmem:[%s15406_s2 + $0x1d] ss:$0 sm:$0xff] }
 0x874   : > { %10854 = vpow2.f32 %v6116_v38  ;;  %v6645_v43 = vsub.f32 0.0, %v6629_v18  ;;  %v6409_v21 = vsub.f32 %v15058_v12, %v14901_v34  ;;  %v7362_v60 = vmul.f32 %v7346_v8, %v7346_v8  ;;  %v15096_v12 = vpop.permute.xlu0 %7273 }
 0x875   : > { %10856 = vpow2.f32 %v7024_v61  ;;  %v6056_v7 = vmul.f32 %v14881_v27, %v6036_v41  ;;  %v10849_v35 = vpop.eup %10848  ;;  %v6975_v3 = vmul.f32 %v15090_v37, %v6955_v4  ;;  %v6614_v27 = vmul.f32 %v14912_v47, %v6594_v39 }
 0x876   : > { %10858 = vpow2.f32 %v6672_v52  ;;  %v6674_v17 = vmul.f32 1.442695, %v6645_v43  ;;  %v10851_v48 = vpop.eup %10850  ;;  %v6838_v23 = vmul.f32 1.442695, %v6820_v5  ;;  %v6429_v54 = vmul.f32 %v14918_v58, %v6409_v21 }
 0x877   : > { %10860 = vpow2.f32 %v6486_v0  ;;  %v6198_v1 = vpop.permute.xlu1 %6197  ;;  %v6072_v24 = vmul.f32 %v6056_v7, %v6056_v7  ;;  %v7378_v15 = vsub.f32 0.0, %v7362_v60  ;;  %v15106_v8 = vmul.f32 %v6975_v3, %v6975_v3 }
 0x878   : > { %10862 = vpow2.f32 %v6674_v17  ;;  %v6222_v61 = vsub.f32 %v6198_v1, %v14860_v63  ;;  %v6073_v1 = vmul.f32 %v6057_v44, %v6057_v44  ;;  %v6630_v39 = vmul.f32 %v6614_v27, %v6614_v27 }
 0x879   : > { %10864 = vpow2.f32 %v6488_v28  ;;  %v6088_v4 = vsub.f32 0.0, %v6072_v24  ;;  %v7327_v44 = vsub.f32 %v14582_v45, %v14928_v2  ;;  %v6445_v21 = vmul.f32 %v6429_v54, %v6429_v54  ;;  %v15127_v45 = vld [vmem:[%s15405_s1 + $0x1e] ss:$0 sm:$0xff] }
 0x87a   : > { %10866 = vpow2.f32 %v7022_v9  ;;  %v6242_v16 = vmul.f32 %v14895_v31, %v6222_v61 }
 0x87b   : > { %10868 = vpow2.f32 %v7210_v51 }
 0x87c   : > { %10870 = vpow2.f32 %v6836_v6  ;;  %v6384_v38 = vpop.permute.xlu1 %6383  ;;  %v6957_v6 = vsub.f32 %v14633_v10, %v15075_v33 }
 0x87d   : > { %v10853_v20 = vpop.eup %10852  ;;  %v6408_v56 = vsub.f32 %v6384_v38, %v14901_v34  ;;  %v9352_v52 = vpop.f32.mrb[148].mxu1  ;;  %v6258_v34 = vmul.f32 %v6242_v16, %v6242_v16  ;;  %10872 = vpow2.f32 %v7208_v26 }
 0x87e   : > { %v10855_v18 = vpop.eup %10854  ;;  %v9353_v0 = vpop.f32.mrb[149].mxu1  ;;  %v6314_v46 = vpack.c.bf16 %v10853_v20, %v10851_v48  ;;  %10874 = vpow2.f32 %v6840_v40  ;;  %v6977_v20 = vmul.f32 %v15090_v37, %v6957_v6 }
 0x87f   : > { %v15093_v62 = vpop.eup %10856  ;;  %v15098_v43 = vadd.f32 %v9353_v0, %v9352_v52  ;;  %v9355_v9 = vpop.f32.mrb[150].mxu1  ;;  %v6128_v25 = vpack.c.bf16 %v10855_v18, %v10849_v35  ;;  %v6428_v17 = vmul.f32 %v14918_v58, %v6408_v56  ;;  %v6274_v16 = vsub.f32 0.0, %v6258_v34 }
 0x880   : > { %v10859_v28 = vpop.eup %10858  ;;  %v9356_v41 = vpop.f32.mrb[151].mxu1  ;;  %8096 = vmatprep.mubr.bf16.mxu1 %v6314_v46  ;;  %10876 = vpow2.f32 %v6838_v23  ;;  %v15121_v52 = vmul.f32 1.442695, %v7378_v15  ;;  %v7007_v18 = vsub.f32 0.0, %v15106_v8  ;;  %v7141_v0 = vsub.f32 %v14589_v57, %v15127_v45 }
 0x881   : > { %v10861_v51 = vpop.eup %10860  ;;  %v15104_v42 = vadd.f32 %v9356_v41, %v9355_v9  ;;  %v6202_v61 = vpop.permute.xlu1 %6201  ;;  %8097 = vmatmul.mubr.bf16.gmra.mrb[168].mxu1 %v6128_v25  ;;  %v6444_v58 = vmul.f32 %v6428_v17, %v6428_v17  ;;  %v6646_v46 = vsub.f32 0.0, %v6630_v39  ;;  %v6304_v27 = vmul.f32 1.442695, %v6274_v16 }
 0x882   : > { %v10863_v50 = vpop.eup %10862  ;;  %v6223_v7 = vsub.f32 %v6202_v61, %v14860_v63  ;;  %v6089_v63 = vsub.f32 0.0, %v6073_v1  ;;  %v15117_v40 = vpop.permute.xlu0 %7285  ;;  %v6956_v25 = vsub.f32 %v14597_v14, %v15075_v33  ;;  %v6461_v1 = vsub.f32 0.0, %v6445_v21  ;;  %v15144_v14 = vld [vmem:[%s15406_s2 + $0x1e] ss:$0 sm:$0xff] }
 0x883   : > { %v10865_v35 = vpop.eup %10864  ;;  %v6686_v48 = vpack.c.bf16 %v10863_v50, %v10859_v28  ;;  %v6460_v28 = vsub.f32 0.0, %v6444_v58  ;;  %v7161_v8 = vmul.f32 %v15144_v14, %v7141_v0  ;;  %v7143_v21 = vsub.f32 %v14639_v59, %v15127_v45 }
 0x884   : > { %v15109_v10 = vpop.eup %10866  ;;  %v6243_v26 = vmul.f32 %v14895_v31, %v6223_v7  ;;  %v6500_v5 = vpack.c.bf16 %v10865_v35, %v10861_v51  ;;  %v6118_v31 = vmul.f32 1.442695, %v6088_v4  ;;  %v7347_v51 = vmul.f32 %v14937_v13, %v7327_v44 }
 0x885   : > { %v15112_v38 = vpop.eup %10868  ;;  %8193 = vmatprep.mubr.bf16.mxu0 %v6686_v48  ;;  %v6120_v6 = vmul.f32 1.442695, %v6089_v63  ;;  %v6676_v4 = vmul.f32 1.442695, %v6646_v46  ;;  %v6976_v39 = vmul.f32 %v15090_v37, %v6956_v25  ;;  %v6490_v16 = vmul.f32 1.442695, %v6460_v28 }
 0x886   : > { %v15119_v56 = vpop.eup %10870  ;;  %v6259_v60 = vmul.f32 %v6243_v26, %v6243_v26  ;;  %v6574_v3 = vpop.permute.xlu1 %6573  ;;  %8194 = vmatmul.mubr.bf16.gmra.mrb[168].mxu0 %v6500_v5  ;;  %10878 = vpow2.f32 %v6118_v31  ;;  %v7363_v58 = vmul.f32 %v7347_v51, %v7347_v51  ;;  %v7328_v26 = vsub.f32 %v15096_v12, %v14928_v2  ;;  %v15166_v31 = vld [vmem:[%s15405_s1 + $0x1c] ss:$0 sm:$0xff]  ;;  %v15660_v25 = vld [vmem:[#allocation11_spill] sm:$0xff] }
 0x887   : > { %v9416_v24 = vpop.f32.mrb[148].mxu0  ;;  %v6595_v34 = vsub.f32 %v6574_v3, %v14888_v11  ;;  %v15136_v57 = vpop.eup %10872  ;;  %10880 = vpow2.f32 %v6304_v27  ;;  %v6993_v63 = vmul.f32 %v6977_v20, %v6977_v20  ;;  %v7177_v3 = vmul.f32 %v7161_v8, %v7161_v8  ;;  %v15659_v27 = vld [vmem:[#allocation28_spill] sm:$0xff]  ;;  %v15187_v51 = vld [vmem:[%s15406_s2 + $0x1c] ss:$0 sm:$0xff] }
 0x888   : > { %v9417_v9 = vpop.f32.mrb[149].mxu0  ;;  %v6275_v23 = vsub.f32 0.0, %v6259_v60  ;;  %v15147_v7 = vpop.permute.xlu0 %7297  ;;  %v6492_v60 = vmul.f32 1.442695, %v6461_v1  ;;  %v7026_v46 = vmul.f32 1.442695, %v7007_v18  ;;  %v6992_v20 = vmul.f32 %v6976_v39, %v6976_v39 }
 0x889   : > { %v9418_v17 = vadd.f32 %v9417_v9, %v9416_v24  ;;  %v9419_v41 = vpop.f32.mrb[150].mxu0  ;;  %v6615_v54 = vmul.f32 %v14912_v47, %v6595_v34  ;;  %v15155_v48 = vpop.eup %10874  ;;  %v15658_v24 = vld [vmem:[#allocation27_spill] sm:$0xff]  ;;  %v6770_v59 = vsub.f32 %v15659_v27, %v15166_v31  ;;  %v7379_v9 = vsub.f32 0.0, %v7363_v58  ;;  %v15661_v18 = vld [vmem:[#allocation9_spill] sm:$0xff] }
 0x88a   : > { %v9420_v61 = vpop.f32.mrb[151].mxu0  ;;  %v6306_v50 = vmul.f32 1.442695, %v6275_v23  ;;  %v15159_v44 = vpop.eup %10876  ;;  %v7329_v12 = vsub.f32 %v15658_v24, %v14928_v2  ;;  %v7142_v28 = vsub.f32 %v15660_v25, %v15127_v45  ;;  %v7193_v1 = vsub.f32 0.0, %v7177_v3 }
 0x88b   : > { %v15139_v11 = vadd.f32 %v9418_v17, %v15098_v43  ;;  %v9421_v15 = vadd.f32 %v9420_v61, %v9419_v41  ;;  %v6631_v47 = vmul.f32 %v6615_v54, %v6615_v54  ;;  %v15149_v35 = vpop.permute.xlu1 %7107  ;;  %v7163_v17 = vmul.f32 %v15144_v14, %v7143_v21 }
 0x88c   : > { %10882 = vpow2.f32 %v6306_v50  ;;  %v15179_v23 = vpop.permute.xlu0 %7309  ;;  %v7146_v41 = vsub.f32 %v15661_v18, %v15127_v45  ;;  %v7349_v54 = vmul.f32 %v14937_v13, %v7329_v12  ;;  %v7424_v61 = vpack.c.bf16 %v15056_v22, %v15053_v49 }
 0x88d   : > { %v15153_v43 = vadd.f32 %v9421_v15, %v15104_v42  ;;  %10884 = vpow2.f32 %v6120_v6  ;;  %v6647_v5 = vsub.f32 0.0, %v6631_v47  ;;  %v6771_v42 = vsub.f32 %v14629_v36, %v15166_v31 }
 0x88e   : > { %10886 = vpow2.f32 %v6676_v4  ;;  %v7348_v36 = vmul.f32 %v14937_v13, %v7328_v26  ;;  %v7008_v15 = vsub.f32 0.0, %v6992_v20  ;;  %v6790_v8 = vmul.f32 %v15187_v51, %v6770_v59 }
 0x88f   : > { %v6678_v0 = vmul.f32 1.442695, %v6647_v5  ;;  %10888 = vpow2.f32 %v6490_v16  ;;  %v6791_v6 = vmul.f32 %v15187_v51, %v6771_v42  ;;  %v7052_v4 = vpack.c.bf16 %v15109_v10, %v15042_v55  ;;  %v15662_v55 = vld [vmem:[#allocation4_spill] sm:$0xff] }
 0x890   : > { %v15174_v34 = vpop.permute.xlu1 %6925  ;;  %v10879_v50 = vpop.eup %10878  ;;  %v7398_v39 = vmul.f32 1.442695, %v7379_v9  ;;  %v7162_v16 = vmul.f32 %v15144_v14, %v7142_v28  ;;  %v7364_v58 = vmul.f32 %v7348_v36, %v7348_v36  ;;  %v7009_v21 = vsub.f32 0.0, %v6993_v63 }
 0x891   : > { %10890 = vpow2.f32 %v6678_v0  ;;  %v10881_v47 = vpop.eup %10880  ;;  %v7179_v42 = vmul.f32 %v7163_v17, %v7163_v17  ;;  %v6807_v3 = vmul.f32 %v6791_v6, %v6791_v6  ;;  %v7212_v12 = vmul.f32 1.442695, %v7193_v1 }
 0x892   : > { %10892 = vpow2.f32 %v6492_v60  ;;  %v7166_v60 = vmul.f32 %v15144_v14, %v7146_v41  ;;  %v7365_v0 = vmul.f32 %v7349_v54, %v7349_v54  ;;  %v7330_v10 = vsub.f32 %v15662_v55, %v14928_v2 }
 0x893   : > { %10894 = vpow2.f32 %v15121_v52  ;;  %v7331_v52 = vsub.f32 %v15117_v40, %v14928_v2  ;;  %v7028_v27 = vmul.f32 1.442695, %v7008_v15  ;;  %v6806_v59 = vmul.f32 %v6790_v8, %v6790_v8  ;;  %v15663_v40 = vld [vmem:[#allocation18_spill] sm:$0xff] }
 0x894   : > { %10896 = vpow2.f32 %v7026_v46  ;;  %v6918_v46 = vpop.permute.xlu0 %6917  ;;  %v6961_v9 = vsub.f32 %v15663_v40, %v15075_v33  ;;  %v7178_v63 = vmul.f32 %v7162_v16, %v7162_v16  ;;  %v7380_v36 = vsub.f32 0.0, %v7364_v58 }
 0x895   : > { %v15200_v26 = vpop.permute.xlu1 %6739  ;;  %10898 = vpow2.f32 %v7398_v39  ;;  %v7351_v17 = vmul.f32 %v14937_v13, %v7331_v52  ;;  %v7030_v6 = vmul.f32 1.442695, %v7009_v21  ;;  %v7182_v2 = vmul.f32 %v7166_v60, %v7166_v60 }
 0x896   : > { %v10883_v5 = vpop.eup %10882  ;;  %v6823_v1 = vsub.f32 0.0, %v6807_v3  ;;  %v6960_v54 = vsub.f32 %v6918_v46, %v15075_v33  ;;  %v7195_v8 = vsub.f32 0.0, %v7179_v42  ;;  %10900 = vpow2.f32 %v7212_v12 }
 0x897   : > { %v10885_v24 = vpop.eup %10884  ;;  %v6315_v20 = vpack.c.bf16 %v10883_v5, %v10881_v47  ;;  %v7350_v47 = vmul.f32 %v14937_v13, %v7330_v10  ;;  %10902 = vpow2.f32 %v7028_v27  ;;  %v6822_v16 = vsub.f32 0.0, %v6806_v59 }
 0x898   : > { %v6129_v25 = vpack.c.bf16 %v10885_v24, %v10879_v50  ;;  %v10887_v28 = vpop.eup %10886  ;;  %v7381_v50 = vsub.f32 0.0, %v7365_v0  ;;  %v6981_v58 = vmul.f32 %v15090_v37, %v6961_v9  ;;  %v7194_v21 = vsub.f32 0.0, %v7178_v63  ;;  %v6930_v46 = vpop.permute.xlu0 %6929 }
 0x899   : > { %v15208_v18 = vpop.permute.xlu1 %6743  ;;  %8104 = vmatprep.mubr.bf16.mxu1 %v6315_v20  ;;  %v10889_v41 = vpop.eup %10888  ;;  %v7400_v60 = vmul.f32 1.442695, %v7380_v36  ;;  %v7367_v3 = vmul.f32 %v7351_v17, %v7351_v17  ;;  %10904 = vpow2.f32 %v7030_v6  ;;  %v7198_v42 = vsub.f32 0.0, %v7182_v2 }
 0x89a   : > { %8105 = vmatmul.mubr.bf16.gmra.mrb[172].mxu1 %v6129_v25  ;;  %v6844_v12 = vmul.f32 1.442695, %v6823_v1  ;;  %v6980_v0 = vmul.f32 %v15090_v37, %v6960_v54  ;;  %v7366_v10 = vmul.f32 %v7350_v47, %v7350_v47  ;;  %v6866_v20 = vpack.c.bf16 %v15119_v56, %v15038_v32 }
 0x89b   : > { %v10891_v15 = vpop.eup %10890  ;;  %8242 = vmatprep.mubr.bf16.mxu1 %v7052_v4  ;;  %v7402_v4 = vmul.f32 1.442695, %v7381_v50  ;;  %v7238_v27 = vpack.c.bf16 %v15136_v57, %v15061_v30  ;;  %v7216_v59 = vmul.f32 1.442695, %v7195_v8  ;;  %v6842_v40 = vmul.f32 1.442695, %v6822_v16 }
 0x89c   : > { %v10893_v39 = vpop.eup %10892  ;;  %v6687_v52 = vpack.c.bf16 %v10891_v15, %v10887_v28  ;;  %v6997_v9 = vmul.f32 %v6981_v58, %v6981_v58  ;;  %v6962_v25 = vsub.f32 %v15174_v34, %v15075_v33  ;;  %v7214_v28 = vmul.f32 1.442695, %v7194_v21  ;;  %v15245_v50 = vpop.permute.xlu0 %6941 }
 0x89d   : > { %v15213_v5 = vpop.eup %10894  ;;  %v6501_v24 = vpack.c.bf16 %v10893_v39, %v10889_v41  ;;  %10906 = vpow2.f32 %v7400_v60  ;;  %v7383_v63 = vsub.f32 0.0, %v7367_v3  ;;  %v7222_v17 = vmul.f32 1.442695, %v7198_v42 }
 0x89e   : > { %v10897_v55 = vpop.eup %10896  ;;  %v7302_v13 = vpop.permute.xlu1 %7301  ;;  %8201 = vmatprep.mubr.bf16.mxu0 %v6687_v52  ;;  %10908 = vpow2.f32 %v6844_v12  ;;  %v6996_v32 = vmul.f32 %v6980_v0, %v6980_v0  ;;  %v6963_v30 = vsub.f32 %v6930_v46, %v15075_v33  ;;  %v7382_v57 = vsub.f32 0.0, %v7366_v10 }
 0x89f   : > { %8202 = vmatmul.mubr.bf16.gmra.mrb[172].mxu0 %v6501_v24  ;;  %v7053_v36 = vpack.c.bf16 %v10897_v55, %v15093_v62  ;;  %v10899_v56 = vpop.eup %10898  ;;  %10910 = vpow2.f32 %v7402_v4  ;;  %v7149_v34 = vsub.f32 %v15069_v19, %v15127_v45  ;;  %v7147_v49 = vsub.f32 %v15149_v35, %v15127_v45  ;;  %v15236_v62 = vld [vmem:[%s15405_s1 + $0x1f] ss:$0 sm:$0xff] }
 0x8a0   : > { %8339 = vmatprep.mubr.bf16.mxu0 %v7424_v61  ;;  %10912 = vpow2.f32 %v6842_v40  ;;  %v7334_v61 = vsub.f32 %v15147_v7, %v15236_v62  ;;  %v7013_v41 = vsub.f32 0.0, %v6997_v9  ;;  %v6982_v6 = vmul.f32 %v15090_v37, %v6962_v25  ;;  %v10901_v2 = vpop.eup %10900 }
 0x8a1   : > { %10914 = vpow2.f32 %v7214_v28  ;;  %v7406_v19 = vmul.f32 1.442695, %v7383_v63  ;;  %v7335_v35 = vsub.f32 %v7302_v13, %v15236_v62  ;;  %v6867_v1 = vpack.c.bf16 %v15155_v48, %v15159_v44  ;;  %v10903_v54 = vpop.eup %10902  ;;  %v15255_v48 = vld [vmem:[%s15406_s2 + $0x1f] ss:$0 sm:$0xff] }
 0x8a2   : > { %8243 = vmatmul.mubr.bf16.vlgmr.msra.gmra.mrb[176].mxu1 %v6866_v20  ;;  %10916 = vpow2.f32 %v7216_v59  ;;  %v7012_v15 = vsub.f32 0.0, %v6996_v32  ;;  %v6983_v8 = vmul.f32 %v15090_v37, %v6963_v30  ;;  %v7425_v7 = vpack.c.bf16 %v10899_v56, %v15213_v5 }
 0x8a3   : > { %v15231_v22 = vpop.permute.xlu1 %7111  ;;  %8250 = vmatprep.mubr.bf16.mxu1 %v7053_v36  ;;  %v7404_v47 = vmul.f32 1.442695, %v7382_v57  ;;  %v7169_v39 = vmul.f32 %v15144_v14, %v7149_v34  ;;  %v7167_v16 = vmul.f32 %v15144_v14, %v7147_v49  ;;  %v6777_v58 = vsub.f32 %v15208_v18, %v15166_v31  ;;  %v10905_v52 = vpop.eup %10904 }
 0x8a4   : > { %10918 = vpow2.f32 %v7222_v17  ;;  %v7354_v44 = vmul.f32 %v15255_v48, %v7334_v61  ;;  %v7038_v21 = vmul.f32 1.442695, %v7013_v41  ;;  %v6998_v5 = vmul.f32 %v6982_v6, %v6982_v6 }
 0x8a5   : > { %10920 = vpow2.f32 %v7406_v19  ;;  %v6776_v3 = vsub.f32 %v15200_v26, %v15166_v31  ;;  %v7355_v18 = vmul.f32 %v15255_v48, %v7335_v35  ;;  %v7054_v24 = vpack.c.bf16 %v10905_v52, %v10903_v54 }
 0x8a6   : > { %v7036_v55 = vmul.f32 1.442695, %v7012_v15  ;;  %v6999_v42 = vmul.f32 %v6983_v8, %v6983_v8  ;;  %v7239_v0 = vpack.c.bf16 %v10901_v2, %v15112_v38  ;;  %10922 = vpow2.f32 %v7404_v47 }
 0x8a7   : > { %8340 = vmatmul.mubr.bf16.vlgmr.msra.gmra.mrb[176].mxu0 %v7238_v27  ;;  %v10907_v13 = vpop.eup %10906  ;;  %v15263_v4 = vmul.f32 %v7169_v39, %v7169_v39  ;;  %v7183_v10 = vmul.f32 %v7167_v16, %v7167_v16  ;;  %v6797_v46 = vmul.f32 %v15187_v51, %v6777_v58  ;;  %v7370_v26 = vmul.f32 %v7354_v44, %v7354_v44  ;;  %v6748_v27 = vpop.permute.xlu0 %6747 }
 0x8a8   : > { %v6934_v60 = vpop.permute.xlu1 %6933  ;;  %8347 = vmatprep.mubr.bf16.mxu0 %v7425_v7  ;;  %v10909_v20 = vpop.eup %10908  ;;  %10924 = vpow2.f32 %v7038_v21  ;;  %v7014_v59 = vsub.f32 0.0, %v6998_v5  ;;  %v7148_v40 = vsub.f32 %v15231_v22, %v15127_v45  ;;  %v7337_v38 = vsub.f32 %v15179_v23, %v15236_v62 }
 0x8a9   : > { %v6964_v12 = vsub.f32 %v6934_v60, %v15075_v33  ;;  %v10911_v25 = vpop.eup %10910  ;;  %v6796_v28 = vmul.f32 %v15187_v51, %v6776_v3  ;;  %v7371_v63 = vmul.f32 %v7355_v18, %v7355_v18  ;;  %10926 = vpow2.f32 %v7036_v55  ;;  %v15664_v3 = vld [vmem:[#allocation6_spill] sm:$0xff]  ;;  %v15665_v18 = vld [vmem:[#allocation7_spill] sm:$0xff] }
 0x8aa   : > { %8251 = vmatmul.mubr.bf16.gmra.mrb[180].mxu1 %v6867_v1  ;;  %v10913_v17 = vpop.eup %10912  ;;  %v7015_v32 = vsub.f32 0.0, %v6999_v42  ;;  %v7426_v56 = vpack.c.bf16 %v10911_v25, %v10907_v13  ;;  %v6778_v34 = vsub.f32 %v6748_v27, %v15166_v31  ;;  %v7199_v49 = vsub.f32 0.0, %v7183_v10 }
 0x8ab   : > { %8258 = vmatprep.mubr.bf16.mxu1 %v7054_v24  ;;  %v6984_v30 = vmul.f32 %v15090_v37, %v6964_v12  ;;  %v10915_v57 = vpop.eup %10914  ;;  %v6813_v22 = vmul.f32 %v6797_v46, %v6797_v46  ;;  %v7386_v41 = vsub.f32 0.0, %v7370_v26  ;;  %v7040_v6 = vmul.f32 1.442695, %v7014_v59 }
 0x8ac   : > { %v6938_v9 = vpop.permute.xlu1 %6937  ;;  %v10917_v23 = vpop.eup %10916  ;;  %v7168_v2 = vmul.f32 %v15144_v14, %v7148_v40  ;;  %v6868_v19 = vpack.c.bf16 %v10909_v20, %v10913_v17  ;;  %v7357_v35 = vmul.f32 %v15255_v48, %v7337_v38  ;;  %v6812_v1 = vmul.f32 %v6796_v28, %v6796_v28 }
 0x8ad   : > { %v6965_v36 = vsub.f32 %v6938_v9, %v15075_v33  ;;  %v7387_v54 = vsub.f32 0.0, %v7371_v63  ;;  %v7042_v47 = vmul.f32 1.442695, %v7015_v32  ;;  %v7000_v39 = vmul.f32 %v6984_v30, %v6984_v30 }
 0x8ae   : > { %v15277_v7 = vpop.eup %10918  ;;  %v7240_v58 = vpack.c.bf16 %v10917_v23, %v10915_v57  ;;  %v7201_v44 = vsub.f32 0.0, %v15263_v4  ;;  %v6798_v21 = vmul.f32 %v15187_v51, %v6778_v34  ;;  %v7224_v5 = vmul.f32 1.442695, %v7199_v49 }
 0x8af   : > { %v6985_v61 = vmul.f32 %v15090_v37, %v6965_v36  ;;  %8348 = vmatmul.mubr.bf16.gmra.mrb[180].mxu0 %v7239_v0  ;;  %v10921_v52 = vpop.eup %10920  ;;  %v6829_v60 = vsub.f32 0.0, %v6813_v22  ;;  %v15666_v24 = vpack.c.bf16 %v15664_v3, %v15665_v18  ;;  %10928 = vpow2.f32 %v7040_v6 }
 0x8b0   : > { %8355 = vmatprep.mubr.bf16.mxu0 %v7426_v56  ;;  %v7184_v55 = vmul.f32 %v7168_v2, %v7168_v2  ;;  %v10923_v13 = vpop.eup %10922  ;;  %v7412_v10 = vmul.f32 1.442695, %v7386_v41  ;;  %v7373_v46 = vmul.f32 %v7357_v35, %v7357_v35  ;;  %v6828_v20 = vsub.f32 0.0, %v6812_v1  ;;  %v15667_v35 = vld [vmem:[#allocation15_spill] sm:$0xff]  ;;  %v15668_v1 = vld [vmem:[#allocation33_spill] sm:$0xff] }
 0x8b1   : > { %v7001_v15 = vmul.f32 %v6985_v61, %v6985_v61  ;;  %v6752_v8 = vpop.permute.xlu1 %6751  ;;  %v7414_v26 = vmul.f32 1.442695, %v7387_v54  ;;  %10930 = vpow2.f32 %v7042_v47  ;;  %v7016_v59 = vsub.f32 0.0, %v7000_v39 }
 0x8b2   : > { %v6779_v16 = vsub.f32 %v6752_v8, %v15166_v31  ;;  %8259 = vmatmul.mubr.bf16.gmra.mrb[184].mxu1 %v6868_v19  ;;  %v10925_v27 = vpop.eup %10924  ;;  %v7427_v38 = vpack.c.bf16 %v10921_v52, %v10923_v13  ;;  %v6814_v28 = vmul.f32 %v6798_v21, %v6798_v21  ;;  %v6856_v63 = vmul.f32 1.442695, %v6829_v60 }
 0x8b3   : > { %8266 = vmatprep.mubr.bf16.mxu1 %v15666_v24  ;;  %v7017_v42 = vsub.f32 0.0, %v7001_v15  ;;  %v10927_v30 = vpop.eup %10926  ;;  %10932 = vpow2.f32 %v7224_v5  ;;  %v7200_v56 = vsub.f32 0.0, %v7184_v55  ;;  %v6854_v49 = vmul.f32 1.442695, %v6828_v20 }
 0x8b4   : > { %v6799_v12 = vmul.f32 %v15187_v51, %v6779_v16  ;;  %v9358_v0 = vpop.f32.mrb[152].mxu1  ;;  %10934 = vpow2.f32 %v7414_v26  ;;  %v7056_v23 = vpack.c.bf16 %v10925_v27, %v10927_v30  ;;  %v7228_v41 = vmul.f32 1.442695, %v7201_v44 }
 0x8b5   : > { %v9359_v4 = vpop.f32.mrb[153].mxu1  ;;  %v7046_v57 = vmul.f32 1.442695, %v7017_v42  ;;  %10936 = vpow2.f32 %v7412_v10  ;;  %v7389_v6 = vsub.f32 0.0, %v7373_v46  ;;  %v7044_v2 = vmul.f32 1.442695, %v7016_v59 }
 0x8b6   : > { %v9360_v40 = vadd.f32 %v9359_v4, %v9358_v0  ;;  %v7306_v9 = vpop.permute.xlu1 %7305  ;;  %v9361_v25 = vpop.f32.mrb[154].mxu1  ;;  %v6815_v36 = vmul.f32 %v6799_v12, %v6799_v12  ;;  %v15669_v54 = vpack.c.bf16 %v15667_v35, %v15668_v1  ;;  %10938 = vpow2.f32 %v6856_v63  ;;  %v15670_v10 = vld [vmem:[#allocation29_spill] sm:$0xff]  ;;  %v15671_v46 = vld [vmem:[#allocation20_spill] sm:$0xff] }
 0x8b7   : > { %v7336_v17 = vsub.f32 %v7306_v9, %v15236_v62  ;;  %v9362_v32 = vpop.f32.mrb[155].mxu1  ;;  %8356 = vmatmul.mubr.bf16.gmra.mrb[184].mxu0 %v7240_v58  ;;  %v6830_v58 = vsub.f32 0.0, %v6814_v28  ;;  %v7226_v52 = vmul.f32 1.442695, %v7200_v56  ;;  %10940 = vpow2.f32 %v7046_v57  ;;  %v15673_v59 = vld [vmem:[#allocation21_spill] sm:$0xff] }
 0x8b8   : > { %v9363_v34 = vadd.f32 %v9362_v32, %v9361_v25  ;;  %8363 = vmatprep.mubr.bf16.mxu0 %v7427_v38  ;;  %v6831_v15 = vsub.f32 0.0, %v6815_v36  ;;  %10942 = vpow2.f32 %v6854_v49  ;;  %v7418_v24 = vmul.f32 1.442695, %v7389_v6  ;;  %v15677_v32 = vld [vmem:[#allocation13_spill] sm:$0xff] }
 0x8b9   : > { %v7356_v22 = vmul.f32 %v15255_v48, %v7336_v17  ;;  %v9422_v61 = vpop.f32.mrb[152].mxu0  ;;  %v10929_v18 = vpop.eup %10928  ;;  %10944 = vpow2.f32 %v7044_v2  ;;  %v15672_v20 = vpack.c.bf16 %v15670_v10, %v15671_v46  ;;  %v6858_v25 = vmul.f32 1.442695, %v6830_v58  ;;  %v15676_v17 = vld [vmem:[#allocation16_spill] sm:$0xff] }
 0x8ba   : > { %v9423_v19 = vpop.f32.mrb[153].mxu0  ;;  %8267 = vmatmul.mubr.bf16.gmra.mrb[188].mxu1 %v15669_v54  ;;  %10946 = vpow2.f32 %v7228_v41  ;;  %v6860_v42 = vmul.f32 1.442695, %v6831_v15  ;;  %v15678_v30 = vpack.c.bf16 %v15676_v17, %v15677_v32  ;;  %v6966_v57 = vsub.f32 %v15245_v50, %v15075_v33 }
 0x8bb   : > { %v7372_v8 = vmul.f32 %v7356_v22, %v7356_v22  ;;  %v9424_v47 = vadd.f32 %v9423_v19, %v9422_v61  ;;  %v7120_v39 = vpop.permute.xlu1 %7119  ;;  %v9425_v16 = vpop.f32.mrb[154].mxu0  ;;  %8274 = vmatprep.mubr.bf16.mxu1 %v7056_v23  ;;  %10948 = vpow2.f32 %v7226_v52 }
 0x8bc   : > { %v7150_v44 = vsub.f32 %v7120_v39, %v15127_v45  ;;  %v9426_v21 = vpop.f32.mrb[155].mxu0  ;;  %v10931_v26 = vpop.eup %10930  ;;  %v6986_v50 = vmul.f32 %v15090_v37, %v6966_v57 }
 0x8bd   : > { %v7388_v5 = vsub.f32 0.0, %v7372_v8  ;;  %v15292_v60 = vadd.f32 %v9424_v47, %v9360_v40  ;;  %v9427_v3 = vadd.f32 %v9426_v21, %v9425_v16  ;;  %v15674_v40 = vld [vmem:[#allocation19_spill] sm:$0xff]  ;;  %v7057_v38 = vpack.c.bf16 %v10931_v26, %v10929_v18  ;;  %v10933_v28 = vpop.eup %10932 }
 0x8be   : > { %v7170_v55 = vmul.f32 %v15144_v14, %v7150_v44  ;;  %v15675_v9 = vpack.c.bf16 %v15673_v59, %v15674_v40  ;;  %v10935_v56 = vpop.eup %10934  ;;  %v7242_v2 = vpack.c.bf16 %v10933_v28, %v15277_v7 }
 0x8bf   : > { %v7416_v12 = vmul.f32 1.442695, %v7388_v5  ;;  %v15295_v0 = vadd.f32 %v9427_v3, %v9363_v34  ;;  %v7124_v13 = vpop.permute.xlu1 %7123  ;;  %8364 = vmatmul.mubr.bf16.gmra.mrb[188].mxu0 %v15672_v20  ;;  %v6760_v34 = vpop.permute.xlu0 %6759  ;;  %v7002_v3 = vmul.f32 %v6986_v50, %v6986_v50 }
 0x8c0   : > { %v7186_v4 = vmul.f32 %v7170_v55, %v7170_v55  ;;  %v7151_v27 = vsub.f32 %v7124_v13, %v15127_v45  ;;  %8371 = vmatprep.mubr.bf16.mxu0 %v15675_v9  ;;  %v10937_v49 = vpop.eup %10936  ;;  %v6781_v35 = vsub.f32 %v6760_v34, %v15166_v31 }
 0x8c1   : > { %10950 = vpow2.f32 %v7416_v12  ;;  %v10939_v23 = vpop.eup %10938  ;;  %v7429_v54 = vpack.c.bf16 %v10935_v56, %v10937_v49 }
 0x8c2   : > { %10952 = vpow2.f32 %v7418_v24  ;;  %v7202_v63 = vsub.f32 0.0, %v7186_v4  ;;  %v7171_v36 = vmul.f32 %v15144_v14, %v7151_v27  ;;  %8275 = vmatmul.mubr.bf16.gmra.mrb[192].mxu1 %v15678_v30  ;;  %v10941_v19 = vpop.eup %10940  ;;  %v6801_v21 = vmul.f32 %v15187_v51, %v6781_v35 }
 0x8c3   : > { %10954 = vpow2.f32 %v6860_v42  ;;  %8282 = vmatprep.mubr.bf16.mxu1 %v7057_v38  ;;  %v10943_v15 = vpop.eup %10942  ;;  %v7128_v18 = vpop.permute.xlu0 %7127  ;;  %v7018_v4 = vsub.f32 0.0, %v7002_v3 }
 0x8c4   : > { %v7187_v22 = vmul.f32 %v7171_v36, %v7171_v36  ;;  %v6756_v61 = vpop.permute.xlu1 %6755  ;;  %10956 = vpow2.f32 %v6858_v25  ;;  %v7230_v41 = vmul.f32 1.442695, %v7202_v63  ;;  %v10945_v8 = vpop.eup %10944  ;;  %v6871_v16 = vpack.c.bf16 %v10939_v23, %v10943_v15 }
 0x8c5   : > { %v6780_v6 = vsub.f32 %v6756_v61, %v15166_v31  ;;  %v10947_v58 = vpop.eup %10946  ;;  %v7058_v44 = vpack.c.bf16 %v10941_v19, %v10945_v8  ;;  %v6817_v10 = vmul.f32 %v6801_v21, %v6801_v21  ;;  %v7152_v46 = vsub.f32 %v7128_v18, %v15127_v45 }
 0x8c6   : > { %v7203_v1 = vsub.f32 0.0, %v7187_v22  ;;  %10958 = vpow2.f32 %v7230_v41  ;;  %v10949_v7 = vpop.eup %10948  ;;  %v7048_v36 = vmul.f32 1.442695, %v7018_v4 }
 0x8c7   : > { %8372 = vmatmul.mubr.bf16.gmra.mrb[192].mxu0 %v7242_v2  ;;  %v6800_v39 = vmul.f32 %v15187_v51, %v6780_v6  ;;  %v7243_v13 = vpack.c.bf16 %v10947_v58, %v10949_v7  ;;  %v6833_v38 = vsub.f32 0.0, %v6817_v10  ;;  %v7172_v28 = vmul.f32 %v15144_v14, %v7152_v46 }
 0x8c8   : > { %v7232_v47 = vmul.f32 1.442695, %v7203_v1  ;;  %8379 = vmatprep.mubr.bf16.mxu0 %v7429_v54 }
 0x8c9   : > { %v7314_v52 = vpop.permute.xlu1 %7313  ;;  %v6816_v55 = vmul.f32 %v6800_v39, %v6800_v39  ;;  %v6864_v22 = vmul.f32 1.442695, %v6833_v38  ;;  %v7188_v61 = vmul.f32 %v7172_v28, %v7172_v28 }
 0x8ca   : > { %10960 = vpow2.f32 %v7232_v47  ;;  %v7338_v31 = vsub.f32 %v7314_v52, %v15236_v62  ;;  %8283 = vmatmul.mubr.bf16.gmra.mrb[196].mxu1 %v6871_v16 }
 0x8cb   : > { %v10951_v5 = vpop.eup %10950  ;;  %8290 = vmatprep.mubr.bf16.mxu1 %v7058_v44  ;;  %v6832_v59 = vsub.f32 0.0, %v6816_v55  ;;  %10962 = vpow2.f32 %v7048_v36  ;;  %v7204_v35 = vsub.f32 0.0, %v7188_v61 }
 0x8cc   : > { %v10953_v24 = vpop.eup %10952  ;;  %v7358_v12 = vmul.f32 %v15255_v48, %v7338_v31 }
 0x8cd   : > { %v10955_v42 = vpop.eup %10954  ;;  %v7430_v26 = vpack.c.bf16 %v10953_v24, %v10951_v5  ;;  %v6862_v56 = vmul.f32 1.442695, %v6832_v59  ;;  %v7234_v50 = vmul.f32 1.442695, %v7204_v35 }
 0x8ce   : > { %v6946_v20 = vpop.permute.xlu1 %6945  ;;  %v10957_v51 = vpop.eup %10956  ;;  %v7374_v9 = vmul.f32 %v7358_v12, %v7358_v12 }
 0x8cf   : > { %v6967_v27 = vsub.f32 %v6946_v20, %v15075_v33  ;;  %8380 = vmatmul.mubr.bf16.gmra.mrb[196].mxu0 %v7243_v13  ;;  %v6872_v40 = vpack.c.bf16 %v10955_v42, %v10957_v51  ;;  %10964 = vpow2.f32 %v6862_v56 }
 0x8d0   : > { %8387 = vmatprep.mubr.bf16.mxu0 %v7430_v26  ;;  %v10959_v63 = vpop.eup %10958  ;;  %v7390_v33 = vsub.f32 0.0, %v7374_v9 }
 0x8d1   : > { %v6987_v25 = vmul.f32 %v15090_v37, %v6967_v27 }
 0x8d2   : > { %8291 = vmatmul.mubr.bf16.gmra.mrb[200].mxu1 %v6872_v40  ;;  %v7420_v2 = vmul.f32 1.442695, %v7390_v33 }
 0x8d3   : > { %v7003_v17 = vmul.f32 %v6987_v25, %v6987_v25  ;;  %v7318_v32 = vpop.permute.xlu1 %7317 }
 0x8d4   : > { %v10961_v30 = vpop.eup %10960  ;;  %v7339_v57 = vsub.f32 %v7318_v32, %v15236_v62 }
 0x8d5   : > { %v7019_v34 = vsub.f32 0.0, %v7003_v17  ;;  %v7244_v49 = vpack.c.bf16 %v10961_v30, %v10959_v63  ;;  %v10963_v8 = vpop.eup %10962 }
 0x8d6   : > { %v7359_v23 = vmul.f32 %v15255_v48, %v7339_v57 }
 0x8d7   : > { %v7050_v37 = vmul.f32 1.442695, %v7019_v34  ;;  %8388 = vmatmul.mubr.bf16.gmra.mrb[200].mxu0 %v7244_v49 }
 0x8d8   : > { %v7375_v41 = vmul.f32 %v7359_v23, %v7359_v23  ;;  %v7132_v6 = vpop.permute.xlu1 %7131 }
 0x8d9   : > { %10966 = vpow2.f32 %v7050_v37  ;;  %v7153_v19 = vsub.f32 %v7132_v6, %v15127_v45  ;;  %v10965_v39 = vpop.eup %10964 }
 0x8da   : > { %10968 = vpow2.f32 %v6864_v22  ;;  %v7391_v62 = vsub.f32 0.0, %v7375_v41 }
 0x8db   : > { %v7173_v1 = vmul.f32 %v15144_v14, %v7153_v19  ;;  %10970 = vpow2.f32 %v7420_v2 }
 0x8dc   : > { %v7422_v54 = vmul.f32 1.442695, %v7391_v62 }
 0x8dd   : > { %v7189_v15 = vmul.f32 %v7173_v1, %v7173_v1 }
 0x8de   : > { %10972 = vpow2.f32 %v7422_v54 }
 0x8df   : > { %v7205_v48 = vsub.f32 0.0, %v7189_v15  ;;  %10974 = vpow2.f32 %v7234_v50 }
 0x8e1   : > { %v7236_v47 = vmul.f32 1.442695, %v7205_v48 }
 0x8e3   : > { %v10967_v16 = vpop.eup %10966  ;;  %10976 = vpow2.f32 %v7236_v47 }
 0x8e4   : > { %v10969_v58 = vpop.eup %10968  ;;  %v7059_v52 = vpack.c.bf16 %v10967_v16, %v10963_v8 }
 0x8e5   : > { %v6873_v45 = vpack.c.bf16 %v10969_v58, %v10965_v39  ;;  %v10971_v7 = vpop.eup %10970 }
 0x8e6   : > { %v9364_v44 = vpop.f32.mrb[156].mxu1  ;;  %8298 = vmatprep.mubr.bf16.mxu1 %v7059_v52 }
 0x8e7   : > { %v9365_v21 = vpop.f32.mrb[157].mxu1  ;;  %8299 = vmatmul.mubr.bf16.gmra.mrb[204].mxu1 %v6873_v45 }
 0x8e8   : > { %v10973_v14 = vpop.eup %10972  ;;  %v9366_v31 = vadd.f32 %v9365_v21, %v9364_v44  ;;  %v9367_v5 = vpop.f32.mrb[158].mxu1 }
 0x8e9   : > { %v9368_v3 = vpop.f32.mrb[159].mxu1  ;;  %v7431_v18 = vpack.c.bf16 %v10973_v14, %v10971_v7  ;;  %v10975_v42 = vpop.eup %10974 }
 0x8ea   : > { %v9369_v24 = vadd.f32 %v9368_v3, %v9367_v5 }
 0x8eb   : > { %v9428_v55 = vpop.f32.mrb[156].mxu0  ;;  %8395 = vmatprep.mubr.bf16.mxu0 %v7431_v18 }
 0x8ec   : > { %v9429_v12 = vpop.f32.mrb[157].mxu0 }
 0x8ed   : > { %v10977_v13 = vpop.eup %10976  ;;  %v9430_v10 = vadd.f32 %v9429_v12, %v9428_v55  ;;  %v9431_v46 = vpop.f32.mrb[158].mxu0 }
 0x8ee   : > { %v9432_v20 = vpop.f32.mrb[159].mxu0  ;;  %v7245_v26 = vpack.c.bf16 %v10977_v13, %v10975_v42 }
 0x8ef   : > { %v15326_v51 = vadd.f32 %v9430_v10, %v9366_v31  ;;  %v9433_v4 = vadd.f32 %v9432_v20, %v9431_v46 }
 0x8f0   : > { %8396 = vmatmul.mubr.bf16.gmra.mrb[204].mxu0 %v7245_v26 }
 0x8f1   : > { %v15328_v27 = vadd.f32 %v9433_v4, %v9369_v24 }
 0x918   : > { %v9370_v59 = vpop.f32.mrb[160].mxu1 }
 0x919   : > { %v9371_v40 = vpop.f32.mrb[161].mxu1 }
 0x91a   : > { %v9372_v9 = vadd.f32 %v9371_v40, %v9370_v59  ;;  %v9373_v25 = vpop.f32.mrb[162].mxu1 }
 0x91b   : > { %v9374_v38 = vpop.f32.mrb[163].mxu1 }
 0x91c   : > { %v9375_v28 = vadd.f32 %v9374_v38, %v9373_v25 }
 0x91d   : > { %v9434_v63 = vpop.f32.mrb[160].mxu0 }
 0x91e   : > { %v9435_v36 = vpop.f32.mrb[161].mxu0 }
 0x91f   : > { %v9436_v17 = vadd.f32 %v9435_v36, %v9434_v63  ;;  %v9437_v32 = vpop.f32.mrb[162].mxu0 }
 0x920   : > { %v9438_v30 = vpop.f32.mrb[163].mxu0 }
 0x921   : > { %v15330_v56 = vadd.f32 %v9436_v17, %v9372_v9  ;;  %v9439_v57 = vadd.f32 %v9438_v30, %v9437_v32 }
 0x923   : > { %v15332_v33 = vadd.f32 %v9439_v57, %v9375_v28 }
 0x93b   : > { %v9376_v34 = vpop.f32.mrb[164].mxu1 }
 0x93c   : > { %v9377_v49 = vpop.f32.mrb[165].mxu1 }
 0x93d   : > { %v9378_v22 = vadd.f32 %v9377_v49, %v9376_v34  ;;  %v9379_v61 = vpop.f32.mrb[166].mxu1 }
 0x93e   : > { %v9380_v23 = vpop.f32.mrb[167].mxu1 }
 0x93f   : > { %v9381_v37 = vadd.f32 %v9380_v23, %v9379_v61 }
 0x940   : > { %v9440_v41 = vpop.f32.mrb[164].mxu0 }
 0x941   : > { %v9441_v6 = vpop.f32.mrb[165].mxu0 }
 0x942   : > { %v9442_v2 = vadd.f32 %v9441_v6, %v9440_v41  ;;  %v9443_v19 = vpop.f32.mrb[166].mxu0 }
 0x943   : > { %v9444_v35 = vpop.f32.mrb[167].mxu0 }
 0x944   : > { %v15334_v62 = vadd.f32 %v9442_v2, %v9378_v22  ;;  %v9445_v1 = vadd.f32 %v9444_v35, %v9443_v19 }
 0x946   : > { %v15336_v54 = vadd.f32 %v9445_v1, %v9381_v37 }
 0x954   : > { %v9382_v15 = vpop.f32.mrb[168].mxu1 }
 0x955   : > { %v9383_v50 = vpop.f32.mrb[169].mxu1 }
 0x956   : > { %v9384_v48 = vadd.f32 %v9383_v50, %v9382_v15  ;;  %v9385_v8 = vpop.f32.mrb[170].mxu1 }
 0x957   : > { %v9386_v47 = vpop.f32.mrb[171].mxu1 }
 0x958   : > { %v9387_v39 = vadd.f32 %v9386_v47, %v9385_v8 }
 0x959   : > { %v9446_v16 = vpop.f32.mrb[168].mxu0 }
 0x95a   : > { %v9447_v58 = vpop.f32.mrb[169].mxu0 }
 0x95b   : > { %v9448_v52 = vadd.f32 %v9447_v58, %v9446_v16  ;;  %v9449_v45 = vpop.f32.mrb[170].mxu0 }
 0x95c   : > { %v9450_v44 = vpop.f32.mrb[171].mxu0 }
 0x95d   : > { %v15338_v7 = vadd.f32 %v9448_v52, %v9384_v48  ;;  %v9451_v21 = vadd.f32 %v9450_v44, %v9449_v45 }
 0x95f   : > { %v15340_v14 = vadd.f32 %v9451_v21, %v9387_v39 }
 0x96d   : > { %v9388_v31 = vpop.f32.mrb[172].mxu1 }
 0x96e   : > { %v9389_v5 = vpop.f32.mrb[173].mxu1 }
 0x96f   : > { %v9390_v3 = vadd.f32 %v9389_v5, %v9388_v31  ;;  %v9391_v18 = vpop.f32.mrb[174].mxu1 }
 0x970   : > { %v9392_v24 = vpop.f32.mrb[175].mxu1 }
 0x971   : > { %v9393_v55 = vadd.f32 %v9392_v24, %v9391_v18 }
 0x972   : > { %v9452_v42 = vpop.f32.mrb[172].mxu0 }
 0x973   : > { %v9453_v12 = vpop.f32.mrb[173].mxu0 }
 0x974   : > { %v9454_v13 = vadd.f32 %v9453_v12, %v9452_v42  ;;  %v9455_v10 = vpop.f32.mrb[174].mxu0 }
 0x975   : > { %v9456_v46 = vpop.f32.mrb[175].mxu0  ;;  %v9474_v20 = vpop.f32.mrb[176].mxu1 }
 0x976   : > { %v15342_v26 = vadd.f32 %v9454_v13, %v9390_v3  ;;  %v9457_v4 = vadd.f32 %v9456_v46, %v9455_v10  ;;  %v9475_v59 = vpop.f32.mrb[177].mxu1 }
 0x977   : > { %v9476_v40 = vadd.f32 %v9475_v59, %v9474_v20  ;;  %v9477_v9 = vpop.f32.mrb[178].mxu1 }
 0x978   : > { %v15344_v25 = vadd.f32 %v9457_v4, %v9393_v55  ;;  %v9478_v38 = vpop.f32.mrb[179].mxu1 }
 0x979   : > { %v8245_v28 = vadd.f32 %v9476_v40, %v15002_v53  ;;  %v9479_v63 = vadd.f32 %v9478_v38, %v9477_v9 }
 0x97a   : > { %v9538_v36 = vpop.f32.mrb[176].mxu0 }
 0x97b   : > { %v8248_v17 = vadd.f32 %v9479_v63, %v15006_v29  ;;  %v9539_v32 = vpop.f32.mrb[177].mxu0 }
 0x97c   : > { %v9540_v30 = vadd.f32 %v9539_v32, %v9538_v36  ;;  %v9541_v57 = vpop.f32.mrb[178].mxu0 }
 0x97d   : > { %v9480_v34 = vpop.f32.mrb[180].mxu1  ;;  %v9542_v49 = vpop.f32.mrb[179].mxu0 }
 0x97e   : > { %v8342_v22 = vadd.f32 %v9540_v30, %v8245_v28  ;;  %v9543_v53 = vadd.f32 %v9542_v49, %v9541_v57  ;;  %v9481_v61 = vpop.f32.mrb[181].mxu1 }
 0x97f   : > { %v9482_v23 = vadd.f32 %v9481_v61, %v9480_v34  ;;  %v9483_v37 = vpop.f32.mrb[182].mxu1 }
 0x980   : > { %8405 = vst.msk [vmem:[%s15353_s6] sm:$0xff] %vm8404_vm0, %v8342_v22  ;;  %v8345_v29 = vadd.f32 %v9543_v53, %v8248_v17  ;;  %v9484_v41 = vpop.f32.mrb[183].mxu1 }
 0x981   : > { %v8253_v6 = vadd.f32 %v9482_v23, %v15139_v11  ;;  %v9485_v2 = vadd.f32 %v9484_v41, %v9483_v37 }
 0x982   : > { %8406 = vst.msk [vmem:[%s15353_s6 + $0x8] sm:$0xff] %vm8404_vm0, %v8345_v29  ;;  %v9544_v19 = vpop.f32.mrb[180].mxu0 }
 0x983   : > { %v8256_v35 = vadd.f32 %v9485_v2, %v15153_v43  ;;  %v9545_v1 = vpop.f32.mrb[181].mxu0 }
 0x984   : > { %v9546_v15 = vadd.f32 %v9545_v1, %v9544_v19  ;;  %v9547_v50 = vpop.f32.mrb[182].mxu0 }
 0x985   : > { %v9486_v48 = vpop.f32.mrb[184].mxu1  ;;  %v9548_v8 = vpop.f32.mrb[183].mxu0 }
 0x986   : > { %v8350_v47 = vadd.f32 %v9546_v15, %v8253_v6  ;;  %v9549_v39 = vadd.f32 %v9548_v8, %v9547_v50  ;;  %v9487_v16 = vpop.f32.mrb[185].mxu1 }
 0x987   : > { %v9488_v58 = vadd.f32 %v9487_v16, %v9486_v48  ;;  %v9489_v52 = vpop.f32.mrb[186].mxu1 }
 0x988   : > { %8407 = vst.msk [vmem:[%s15353_s6 + $0x10] sm:$0xff] %vm8404_vm0, %v8350_v47  ;;  %v8353_v11 = vadd.f32 %v9549_v39, %v8256_v35  ;;  %v9490_v45 = vpop.f32.mrb[187].mxu1 }
 0x989   : > { %v8261_v44 = vadd.f32 %v9488_v58, %v15292_v60  ;;  %v9491_v21 = vadd.f32 %v9490_v45, %v9489_v52 }
 0x98a   : > { %8408 = vst.msk [vmem:[%s15353_s6 + $0x18] sm:$0xff] %vm8404_vm0, %v8353_v11  ;;  %v9550_v43 = vpop.f32.mrb[184].mxu0 }
 0x98b   : > { %v8264_v31 = vadd.f32 %v9491_v21, %v15295_v0  ;;  %v9551_v5 = vpop.f32.mrb[185].mxu0 }
 0x98c   : > { %v9552_v3 = vadd.f32 %v9551_v5, %v9550_v43  ;;  %v9553_v18 = vpop.f32.mrb[186].mxu0 }
 0x98d   : > { %v9492_v24 = vpop.f32.mrb[188].mxu1  ;;  %v9554_v55 = vpop.f32.mrb[187].mxu0 }
 0x98e   : > { %v8358_v42 = vadd.f32 %v9552_v3, %v8261_v44  ;;  %v9555_v12 = vadd.f32 %v9554_v55, %v9553_v18  ;;  %v9493_v13 = vpop.f32.mrb[189].mxu1 }
 0x98f   : > { %v9494_v10 = vadd.f32 %v9493_v13, %v9492_v24  ;;  %v9495_v46 = vpop.f32.mrb[190].mxu1 }
 0x990   : > { %8409 = vst.msk [vmem:[%s15353_s6 + $0x20] sm:$0xff] %vm8404_vm0, %v8358_v42  ;;  %v8361_v60 = vadd.f32 %v9555_v12, %v8264_v31  ;;  %v9496_v20 = vpop.f32.mrb[191].mxu1 }
 0x991   : > { %v8269_v4 = vadd.f32 %v9494_v10, %v15326_v51  ;;  %v9497_v59 = vadd.f32 %v9496_v20, %v9495_v46 }
 0x992   : > { %8410 = vst.msk [vmem:[%s15353_s6 + $0x28] sm:$0xff] %vm8404_vm0, %v8361_v60  ;;  %v9556_v0 = vpop.f32.mrb[188].mxu0 }
 0x993   : > { %v8272_v40 = vadd.f32 %v9497_v59, %v15328_v27  ;;  %v9557_v9 = vpop.f32.mrb[189].mxu0 }
 0x994   : > { %v9558_v38 = vadd.f32 %v9557_v9, %v9556_v0  ;;  %v9559_v28 = vpop.f32.mrb[190].mxu0 }
 0x995   : > { %v9498_v63 = vpop.f32.mrb[192].mxu1  ;;  %v9560_v36 = vpop.f32.mrb[191].mxu0 }
 0x996   : > { %v8366_v17 = vadd.f32 %v9558_v38, %v8269_v4  ;;  %v9561_v32 = vadd.f32 %v9560_v36, %v9559_v28  ;;  %v9499_v30 = vpop.f32.mrb[193].mxu1 }
 0x997   : > { %v9500_v57 = vadd.f32 %v9499_v30, %v9498_v63  ;;  %v9501_v34 = vpop.f32.mrb[194].mxu1 }
 0x998   : > { %8411 = vst.msk [vmem:[%s15353_s6 + $0x30] sm:$0xff] %vm8404_vm0, %v8366_v17  ;;  %v8369_v51 = vadd.f32 %v9561_v32, %v8272_v40  ;;  %v9502_v49 = vpop.f32.mrb[195].mxu1 }
 0x999   : > { %v8277_v22 = vadd.f32 %v9500_v57, %v15330_v56  ;;  %v9503_v53 = vadd.f32 %v9502_v49, %v9501_v34 }
 0x99a   : > { %8412 = vst.msk [vmem:[%s15353_s6 + $0x38] sm:$0xff] %vm8404_vm0, %v8369_v51  ;;  %v9562_v27 = vpop.f32.mrb[192].mxu0 }
 0x99b   : > { %v8280_v61 = vadd.f32 %v9503_v53, %v15332_v33  ;;  %v9563_v23 = vpop.f32.mrb[193].mxu0 }
 0x99c   : > { %v9564_v37 = vadd.f32 %v9563_v23, %v9562_v27  ;;  %v9565_v29 = vpop.f32.mrb[194].mxu0 }
 0x99d   : > { %v9504_v41 = vpop.f32.mrb[196].mxu1  ;;  %v9566_v6 = vpop.f32.mrb[195].mxu0 }
 0x99e   : > { %v8374_v2 = vadd.f32 %v9564_v37, %v8277_v22  ;;  %v9567_v19 = vadd.f32 %v9566_v6, %v9565_v29  ;;  %v9505_v35 = vpop.f32.mrb[197].mxu1 }
 0x99f   : > { %v9506_v1 = vadd.f32 %v9505_v35, %v9504_v41  ;;  %v9507_v15 = vpop.f32.mrb[198].mxu1 }
 0x9a0   : > { %8413 = vst.msk [vmem:[%s15353_s6 + $0x40] sm:$0xff] %vm8404_vm0, %v8374_v2  ;;  %v8377_v56 = vadd.f32 %v9567_v19, %v8280_v61  ;;  %v9508_v50 = vpop.f32.mrb[199].mxu1 }
 0x9a1   : > { %v8285_v48 = vadd.f32 %v9506_v1, %v15334_v62  ;;  %v9509_v8 = vadd.f32 %v9508_v50, %v9507_v15 }
 0x9a2   : > { %8414 = vst.msk [vmem:[%s15353_s6 + $0x48] sm:$0xff] %vm8404_vm0, %v8377_v56  ;;  %v9568_v33 = vpop.f32.mrb[196].mxu0 }
 0x9a3   : > { %v8288_v47 = vadd.f32 %v9509_v8, %v15336_v54  ;;  %v9569_v39 = vpop.f32.mrb[197].mxu0 }
 0x9a4   : > { %v9570_v16 = vadd.f32 %v9569_v39, %v9568_v33  ;;  %v9571_v58 = vpop.f32.mrb[198].mxu0 }
 0x9a5   : > { %v9510_v52 = vpop.f32.mrb[200].mxu1  ;;  %v9572_v11 = vpop.f32.mrb[199].mxu0 }
 0x9a6   : > { %v8382_v45 = vadd.f32 %v9570_v16, %v8285_v48  ;;  %v9573_v44 = vadd.f32 %v9572_v11, %v9571_v58  ;;  %v9511_v21 = vpop.f32.mrb[201].mxu1 }
 0x9a7   : > { %v9512_v43 = vadd.f32 %v9511_v21, %v9510_v52  ;;  %v9513_v31 = vpop.f32.mrb[202].mxu1 }
 0x9a8   : > { %8415 = vst.msk [vmem:[%s15353_s6 + $0x50] sm:$0xff] %vm8404_vm0, %v8382_v45  ;;  %v8385_v62 = vadd.f32 %v9573_v44, %v8288_v47  ;;  %v9514_v5 = vpop.f32.mrb[203].mxu1 }
 0x9a9   : > { %v8293_v3 = vadd.f32 %v9512_v43, %v15338_v7  ;;  %v9515_v54 = vadd.f32 %v9514_v5, %v9513_v31 }
 0x9aa   : > { %8416 = vst.msk [vmem:[%s15353_s6 + $0x58] sm:$0xff] %vm8404_vm0, %v8385_v62  ;;  %v9574_v18 = vpop.f32.mrb[200].mxu0 }
 0x9ab   : > { %v8296_v24 = vadd.f32 %v9515_v54, %v15340_v14  ;;  %v9575_v55 = vpop.f32.mrb[201].mxu0 }
 0x9ac   : > { %v9576_v42 = vadd.f32 %v9575_v55, %v9574_v18  ;;  %v9577_v12 = vpop.f32.mrb[202].mxu0 }
 0x9ad   : > { %v9578_v13 = vpop.f32.mrb[203].mxu0 }
 0x9ae   : > { %v8390_v10 = vadd.f32 %v9576_v42, %v8293_v3  ;;  %v9579_v46 = vadd.f32 %v9578_v13, %v9577_v12 }
 0x9b0   : > { %8417 = vst.msk [vmem:[%s15353_s6 + $0x60] sm:$0xff] %vm8404_vm0, %v8390_v10  ;;  %v8393_v60 = vadd.f32 %v9579_v46, %v8296_v24 }
 0x9b2   : > { %8418 = vst.msk [vmem:[%s15353_s6 + $0x68] sm:$0xff] %vm8404_vm0, %v8393_v60 }
 0x9ba   : > { %v9516_v20 = vpop.f32.mrb[204].mxu1 }
 0x9bb   : > { %v9517_v7 = vpop.f32.mrb[205].mxu1 }
 0x9bc   : > { %v9518_v4 = vadd.f32 %v9517_v7, %v9516_v20  ;;  %v9519_v59 = vpop.f32.mrb[206].mxu1 }
 0x9bd   : > { %v9520_v0 = vpop.f32.mrb[207].mxu1 }
 0x9be   : > { %v8301_v14 = vadd.f32 %v9518_v4, %v15342_v26  ;;  %v9521_v40 = vadd.f32 %v9520_v0, %v9519_v59 }
 0x9c0   : > { %v8304_v9 = vadd.f32 %v9521_v40, %v15344_v25 }
 0x9c3   : > { %v9580_v38 = vpop.f32.mrb[204].mxu0 }
 0x9c4   : > { %v9581_v28 = vpop.f32.mrb[205].mxu0 }
 0x9c5   : > { %v9582_v63 = vadd.f32 %v9581_v28, %v9580_v38  ;;  %v9583_v36 = vpop.f32.mrb[206].mxu0 }
 0x9c6   : > { %v9584_v17 = vpop.f32.mrb[207].mxu0 }
 0x9c7   : > { %v8398_v32 = vadd.f32 %v9582_v63, %v8301_v14  ;;  %v9585_v30 = vadd.f32 %v9584_v17, %v9583_v36 }
 0x9c9   : > { %8419 = vst.msk [vmem:[%s15353_s6 + $0x70] sm:$0xff] %vm8404_vm0, %v8398_v32  ;;  %v8401_v57 = vadd.f32 %v9585_v30, %v8304_v9 }
 0x9cb   : > { %8420 = vst.msk [vmem:[%s15353_s6 + $0x78] sm:$0xff] %vm8404_vm0, %v8401_v57 }
 0x9cc PF: > { %s15_s18 = sadd.s32 1, %s11028_s18  }
 0x9cd   : > { %p12_p4 = scmp.ge.s32.totalorder %s15_s18, 4  }
 0x9cf   :  { %14 = sbr.rel (!%p12_p4) target bundleno = 1 (0x1), region = 70 }

</bundles_post_ra>
